<compile_context>
chip_gen: v7x
topology: tpu7x:2x2x1
jax: 0.10.0
libtpu: 0.0.40
codegen_flags: <defaults>
</compile_context>

<pallas_src>
import math

import jax
import jax.numpy as jnp
from jax.experimental import pallas as pl
from jax.experimental.pallas import tpu as pltpu

N_HIDDEN = 64        # MoleculeMPNN.N_hidden
N_MP_BLOCKS = 4      # MoleculeMPNN.N_message_passing_blocks
N_FEATURES = 5       # (eta, e, x, y, z)
FEAT_LANES = 8       # features padded 5 -> 8; lane 5 = has-message flag
OUT_LANES = 128      # prediction padded to a full lane tile (lane-dense store)


# ----------------------------------------------------------------------------- slab layout
def _round8(x):
    return (x + 7) // 8 * 8


def _fcn_slab_layout(fan_ins):
    """Row offsets for packing an FCN into a single [rows, lanes] slab.
    Per layer: fan_in weight rows followed by one bias row; the next layer
    starts on an 8-aligned sublane row (so every kernel slice is tile-aligned)."""
    offsets, row = [], 0
    for f in fan_ins:
        offsets.append((row, row + f))               # (weight start row, bias row)
        row = _round8(row + f + 1)
    return tuple(offsets), row


ENC_OFFS, ENC_ROWS = _fcn_slab_layout((FEAT_LANES, N_HIDDEN, N_HIDDEN))
MP_OFFS, MP_ROWS = _fcn_slab_layout(
    (2 * N_HIDDEN, 3 * N_HIDDEN, 2 * N_HIDDEN, 2 * N_HIDDEN))
PRED_OFFS, PRED_ROWS = _fcn_slab_layout(
    (N_HIDDEN, 2 * N_HIDDEN, 3 * N_HIDDEN, 2 * N_HIDDEN, N_HIDDEN))
ENC_LANES = N_HIDDEN            # 64
MP_LANES = 3 * N_HIDDEN         # 192 (max layer width in an MP block)
PRED_LANES = 3 * N_HIDDEN       # 192 (max layer width in the pred head)


# ----------------------------------------------------------------------------- helpers
def _relu(x):
    return jnp.maximum(x, 0.0)


def _dot(a, b):
    return jnp.dot(a, b, preferred_element_type=jnp.float32)


def _resident_spec(arr):
    # Full-array block with a constant index_map: DMA'd into VMEM once and kept
    # resident across grid steps (weights / selector never re-fetched).
    zeros = (0,) * arr.ndim
    return pl.BlockSpec(arr.shape, lambda g, _z=zeros: _z)


# ----------------------------------------------------------------------------- kernel
def fused_mpnn_kernel(feat_ref, adj_ref, sel_ref, enc_ref, blk_ref, pred_ref, out_ref):
    H = N_HIDDEN
    feat = feat_ref[...]                                   # [GBN, 8]
    adj_n = adj_ref[...]                                   # [GBN, GBN] row-normalized
    has_msg = feat[:, N_FEATURES:N_FEATURES + 1] > 0.5     # [GBN, 1] (from wrapper flag)

    # --- node_encoding: FCN(5, [64, 64], 64) (fan-in padded 5 -> 8 with zeros) ---
    (e0w, e0b), (e1w, e1b), (e2w, e2b) = ENC_OFFS
    h = _relu(_dot(feat, enc_ref[e0w:e0w + FEAT_LANES, :]) + enc_ref[e0b:e0b + 1, :])
    h = _relu(_dot(h, enc_ref[e1w:e1w + H, :]) + enc_ref[e1b:e1b + 1, :])
    h = _dot(h, enc_ref[e2w:e2w + H, :]) + enc_ref[e2b:e2b + 1, :]        # [GBN, 64]

    # --- 4 message-passing blocks (unrolled; weights sliced from one [4,...] slab) ---
    (m1w, m1b), (m2w, m2b), (m3w, m3b), (m4w, m4b) = MP_OFFS
    for i in range(N_MP_BLOCKS):
        # mean over mailbox == row-normalized adjacency matmul (normalized in wrapper)
        agg = _dot(adj_n, h)                                              # [GBN, 64]
        # cat([h, agg], -1) @ W1  ==  h @ W1[:64] + agg @ W1[64:]  (no lane concat)
        x = _relu(_dot(h, blk_ref[i, m1w:m1w + H, :])
                  + _dot(agg, blk_ref[i, m1w + H:m1w + 2 * H, :])
                  + blk_ref[i, m1b:m1b + 1, :])                           # [GBN, 192]
        x = _relu(_dot(x, blk_ref[i, m2w:m2w + 3 * H, 0:2 * H])
                  + blk_ref[i, m2b:m2b + 1, 0:2 * H])                     # [GBN, 128]
        x = _relu(_dot(x, blk_ref[i, m3w:m3w + 2 * H, 0:2 * H])
                  + blk_ref[i, m3b:m3b + 1, 0:2 * H])                     # [GBN, 128]
        y = (_dot(x, blk_ref[i, m4w:m4w + 2 * H, 0:H])
             + blk_ref[i, m4b:m4b + 1, 0:H])                              # [GBN, 64]
        # DGL update_all semantics: zero in-degree nodes keep their old h.
        h = jnp.where(has_msg, y, h)

    # --- dgl.sum_nodes: per-graph node sum via selector matmul -> [GB, 64] ---
    g_rep = _dot(sel_ref[...], h)

    # --- pred: FCN(64, [128, 192, 128, 64], 1), final layer zero-padded to 128 lanes ---
    (p0w, p0b), (p1w, p1b), (p2w, p2b), (p3w, p3b), (p4w, p4b) = PRED_OFFS
    x = _relu(_dot(g_rep, pred_ref[p0w:p0w + H, 0:2 * H]) + pred_ref[p0b:p0b + 1, 0:2 * H])
    x = _relu(_dot(x, pred_ref[p1w:p1w + 2 * H, :]) + pred_ref[p1b:p1b + 1, :])
    x = _relu(_dot(x, pred_ref[p2w:p2w + 3 * H, 0:2 * H]) + pred_ref[p2b:p2b + 1, 0:2 * H])
    x = _relu(_dot(x, pred_ref[p3w:p3w + 2 * H, 0:H]) + pred_ref[p3b:p3b + 1, 0:H])
    out_ref[...] = (_dot(x, pred_ref[p4w:p4w + H, 0:OUT_LANES])
                    + pred_ref[p4b:p4b + 1, 0:OUT_LANES])       # [GB, 128]; lane 0 = pred


# ----------------------------------------------------------------------------- packing (once, at init)
def _pack_fcn_slab(layers, offsets, rows, lanes, dtype=jnp.float32):
    slab = jnp.zeros((rows, lanes), dtype)
    for (w, b), (w0, b0) in zip(layers, offsets):
        fi, fo = w.shape
        slab = slab.at[w0:w0 + fi, 0:fo].set(w.astype(dtype))
        slab = slab.at[b0, 0:fo].set(b.reshape(-1).astype(dtype))
    return slab


def prepare_params(params, *, n_nodes, graphs_per_step):
    """One-time repacking of the parameter pytree into VMEM-resident slabs.
    Runs at init, NOT per forward call (hoisted out of the hot path)."""
    gb = graphs_per_step
    # Per-group graph-sum selector: sel[b, b*N + i] = 1.
    sel = jnp.repeat(jnp.eye(gb, dtype=jnp.float32), n_nodes, axis=1)     # [GB, GB*N]
    enc = _pack_fcn_slab(params["encode"], ENC_OFFS, ENC_ROWS, ENC_LANES)
    blk = jnp.stack([_pack_fcn_slab(b, MP_OFFS, MP_ROWS, MP_LANES)
                     for b in params["blocks"]])                          # [4, 608, 192]
    pred = _pack_fcn_slab(params["pred"], PRED_OFFS, PRED_ROWS, PRED_LANES)
    return {"sel": sel, "enc": enc, "blk": blk, "pred": pred}


# ----------------------------------------------------------------------------- forward
def molecule_mpnn_forward(features, adj, packed):
    """features: [B, N, 5]; adj[b, dst, src]: [B, N, N]  ->  predictions [B, 1]."""
    B, N, F = features.shape
    GB, GBN = packed["sel"].shape
    assert GBN == GB * N, "packed params were prepared for a different node count"
    assert B % GB == 0, "batch must divide evenly into graph groups"
    G = B // GB

    # In-degree, has-message flag and row-normalized adjacency (mean aggregation
    # folded into the adjacency once, instead of 4 per-block rescales in-kernel).
    deg = jnp.sum(adj, axis=-1, keepdims=True)                            # [B, N, 1]
    has_msg = (deg > 0.0).astype(jnp.float32)
    adj_n = (adj / jnp.maximum(deg, 1.0)).astype(jnp.float32)

    # Features padded to 8 lanes; lane 5 carries the has-message flag (the matching
    # encode-weight rows are zero, so it cannot leak into the node encoding).
    feat = jnp.concatenate(
        [features.astype(jnp.float32), has_msg,
         jnp.zeros((B, N, FEAT_LANES - F - 1), jnp.float32)], axis=-1
    ).reshape(B * N, FEAT_LANES)

    # Vectorized block-diagonal packing over ALL graphs (no Python loop).
    eye = jnp.eye(GB, dtype=jnp.float32)
    adj_bd = jnp.einsum("gbij,bc->gbicj", adj_n.reshape(G, GB, N, N), eye)
    adj_bd = adj_bd.reshape(G * GBN, GBN)                                 # [G*GBN, GBN]

    # VMEM budget guard: adjacency is the only quadratically growing tile
    # (double-buffered data blocks + double-buffered resident weight slabs).
    vmem_bytes = 4 * (2 * (GBN * GBN + GBN * FEAT_LANES + GB * OUT_LANES)
                      + 2 * (packed["sel"].size + packed["enc"].size
                             + packed["blk"].size + packed["pred"].size))
    assert vmem_bytes < 24 * 2**20, f"tile too large for VMEM budget: {vmem_bytes} B"

    out = pl.pallas_call(
        fused_mpnn_kernel,
        out_shape=jax.ShapeDtypeStruct((B, OUT_LANES), jnp.float32),
        grid=(G,),
        in_specs=[
            pl.BlockSpec((GBN, FEAT_LANES), lambda g: (g, 0)),   # node features, per group
            pl.BlockSpec((GBN, GBN), lambda g: (g, 0)),          # block-diag adjacency
            _resident_spec(packed["sel"]),                       # resident selector
            _resident_spec(packed["enc"]),                       # resident encode slab
            _resident_spec(packed["blk"]),                       # resident MP-block slab
            _resident_spec(packed["pred"]),                      # resident pred slab
        ],
        out_specs=pl.BlockSpec((GB, OUT_LANES), lambda g: (g, 0)),
        compiler_params=pltpu.CompilerParams(dimension_semantics=("parallel",)),
    )(feat, adj_bd, packed["sel"], packed["enc"], packed["blk"], packed["pred"])

    return out[:, :1]                                            # [B, 1]


# ----------------------------------------------------------------------------- tiling choice
def _pick_graphs_per_step(n_nodes, batch):
    """GBN = GB*N ~ MXU row width per generation: 256 on v6e/v7x, 128 on v2-v5,
    while keeping >= 2 grid steps so pipelining / megacore sharding have work."""
    kind = ""
    try:
        kind = jax.devices()[0].device_kind.lower()
    except Exception:
        pass
    target_rows = 128 if any(v in kind for v in ("v2", "v3", "v4", "v5")) else 256
    gb = max(1, min(batch, target_rows // max(1, n_nodes)))
    while gb > 1 and (batch % gb != 0 or batch // gb < 2):
        gb -= 1
    return gb


# ----------------------------------------------------------------------------- params
def _linear_params(key, fan_in, fan_out):
    # Deterministic PyTorch-style nn.Linear init: U(-1/sqrt(in), 1/sqrt(in)).
    kw, kb = jax.random.split(key)
    bound = 1.0 / math.sqrt(fan_in)
    w = jax.random.uniform(kw, (fan_in, fan_out), jnp.float32, -bound, bound)
    b = jax.random.uniform(kb, (1, fan_out), jnp.float32, -bound, bound)
    return w, b


def _fcn_params(key, n_in, hidden, n_out):
    dims = [n_in] + list(hidden) + [n_out]
    keys = jax.random.split(key, len(dims) - 1)
    return [_linear_params(k, dims[i], dims[i + 1]) for i, k in enumerate(keys)]


def init_params(key):
    k_enc, k_pred, *k_blocks = jax.random.split(key, 2 + N_MP_BLOCKS)
    return {
        "encode": _fcn_params(k_enc, N_FEATURES, [N_HIDDEN, N_HIDDEN], N_HIDDEN),
        "blocks": [
            _fcn_params(kb, N_HIDDEN * 2,
                        [N_HIDDEN * 3, N_HIDDEN * 2, N_HIDDEN * 2], N_HIDDEN)
            for kb in k_blocks
        ],
        "pred": _fcn_params(k_pred, N_HIDDEN,
                            [N_HIDDEN * 2, N_HIDDEN * 3, N_HIDDEN * 2, N_HIDDEN], 1),
    }


# ----------------------------------------------------------------------------- reference
def _reference_forward(features, adj, params):
    def fcn(x, layers):
        for i, (w, b) in enumerate(layers):
            x = x @ w + b
            if i < len(layers) - 1:
                x = jnp.maximum(x, 0.0)
        return x

    def single(f, A):
        N = f.shape[0]
        deg = jnp.sum(A, axis=1, keepdims=True)
        h = fcn(f, params["encode"])
        for blk in params["blocks"]:
            agg = (A @ h) / jnp.maximum(deg, 1.0)
            y = fcn(jnp.concatenate([h, agg], axis=-1), blk)
            h = jnp.where(deg > 0.0, y, h)
        # dgl.sum_nodes written as a matmul so the reference uses the same MXU
        # accumulation numerics as the kernel's selector-matmul readout.
        g = jnp.ones((1, N), jnp.float32) @ h
        return fcn(g, params["pred"])[0]                 # [1]

    return jax.vmap(single)(features, adj)               # [B, 1]


# ----------------------------------------------------------------------------- main
if __name__ == "__main__":
    key = jax.random.PRNGKey(0)
    k_feat, k_adj, k_params = jax.random.split(key, 3)

    B_GRAPHS = 64      # batched molecules (GB graphs per grid step, G = B/GB steps)
    N_NODES = 16       # cells per molecule

    # Per-node raw attributes (eta, e, x, y, z) stacked -> [B, N, 5] float32.
    features = jax.random.normal(k_feat, (B_GRAPHS, N_NODES, N_FEATURES), jnp.float32)

    # Deterministic random directed graphs, dense adjacency A[b, dst, src].
    adj = jax.random.bernoulli(
        k_adj, 0.35, (B_GRAPHS, N_NODES, N_NODES)).astype(jnp.float32)
    adj = adj * (1.0 - jnp.eye(N_NODES, dtype=jnp.float32))   # drop self-loops

    params = init_params(k_params)
    gb = _pick_graphs_per_step(N_NODES, B_GRAPHS)
    packed = prepare_params(params, n_nodes=N_NODES, graphs_per_step=gb)

    forward = jax.jit(molecule_mpnn_forward)
    pred = jax.block_until_ready(forward(features, adj, packed))

    ref = _reference_forward(features, adj, params)
    assert pred.shape == (B_GRAPHS, 1)
    assert jnp.allclose(pred, ref, atol=1e-4, rtol=1e-4), (pred, ref)

    print("KERNEL_OK")
</pallas_src>

<mosaic_0001>
module attributes {stable_mosaic.version = 11 : i64} {
  func.func @fused_mpnn_kernel(%arg0: i32, %arg1: memref<256x8xf32, #tpu.memory_space<vmem>>, %arg2: memref<256x256xf32, #tpu.memory_space<vmem>>, %arg3: memref<16x256xf32, #tpu.memory_space<vmem>>, %arg4: memref<160x64xf32, #tpu.memory_space<vmem>>, %arg5: memref<4x608x192xf32, #tpu.memory_space<vmem>>, %arg6: memref<616x192xf32, #tpu.memory_space<vmem>>, %arg7: memref<16x128xf32, #tpu.memory_space<vmem>>) attributes {dimension_semantics = [#tpu.dimension_semantics<parallel>], iteration_bounds = array<i64: 4>, scalar_prefetch = 0 : i64, scratch_operands = 0 : i64, tpu.core_type = #tpu.core_type<tc>, window_params = [{transform_indices = @transform_0, window_bounds = array<i64: 256, 8>}, {transform_indices = @transform_1, window_bounds = array<i64: 256, 256>}, {pipeline_mode = #tpu.pipeline_mode<synchronous>, transform_indices = @transform_2, window_bounds = array<i64: 16, 256>}, {pipeline_mode = #tpu.pipeline_mode<synchronous>, transform_indices = @transform_3, window_bounds = array<i64: 160, 64>}, {pipeline_mode = #tpu.pipeline_mode<synchronous>, transform_indices = @transform_4, window_bounds = array<i64: 4, 608, 192>}, {pipeline_mode = #tpu.pipeline_mode<synchronous>, transform_indices = @transform_5, window_bounds = array<i64: 616, 192>}, {transform_indices = @transform_6, window_bounds = array<i64: 16, 128>}]} {
    %c0 = arith.constant 0 : index
    %c0_0 = arith.constant 0 : index
    %0 = vector.load %arg1[%c0, %c0_0] : memref<256x8xf32, #tpu.memory_space<vmem>>, vector<256x8xf32>
    %c0_1 = arith.constant 0 : index
    %c0_2 = arith.constant 0 : index
    %1 = vector.load %arg2[%c0_1, %c0_2] : memref<256x256xf32, #tpu.memory_space<vmem>>, vector<256x256xf32>
    %2 = vector.extract_strided_slice %0 {offsets = [0, 5], sizes = [256, 1], strides = [1, 1]} : vector<256x8xf32> to vector<256x1xf32>
    %cst = arith.constant 5.000000e-01 : f32
    %3 = vector.broadcast %cst : f32 to vector<256x1xf32>
    %4 = arith.cmpf ogt, %2, %3 : vector<256x1xf32>
    %c0_3 = arith.constant 0 : index
    %c0_4 = arith.constant 0 : index
    %5 = vector.load %arg4[%c0_3, %c0_4] : memref<160x64xf32, #tpu.memory_space<vmem>>, vector<8x64xf32>
    %cst_5 = arith.constant dense<0.000000e+00> : vector<256x64xf32>
    %6 = tpu.matmul %0, %5, %cst_5 {dimension_numbers = #tpu.dot_dimension_numbers<[1], [0], [0], [1], [0, 0, 1, 1], [], []>} : vector<256x8xf32>, vector<8x64xf32>, vector<256x64xf32> -> vector<256x64xf32>
    %c8 = arith.constant 8 : index
    %c0_6 = arith.constant 0 : index
    %7 = vector.load %arg4[%c8, %c0_6] : memref<160x64xf32, #tpu.memory_space<vmem>>, vector<1x64xf32>
    %8 = vector.broadcast %7 : vector<1x64xf32> to vector<256x64xf32>
    %9 = arith.addf %6, %8 : vector<256x64xf32>
    %cst_7 = arith.constant 0.000000e+00 : f32
    %10 = vector.broadcast %cst_7 : f32 to vector<256x64xf32>
    %11 = arith.maximumf %9, %10 : vector<256x64xf32>
    %c16 = arith.constant 16 : index
    %c0_8 = arith.constant 0 : index
    %12 = vector.load %arg4[%c16, %c0_8] : memref<160x64xf32, #tpu.memory_space<vmem>>, vector<64x64xf32>
    %cst_9 = arith.constant dense<0.000000e+00> : vector<256x64xf32>
    %13 = tpu.matmul %11, %12, %cst_9 {dimension_numbers = #tpu.dot_dimension_numbers<[1], [0], [0], [1], [0, 0, 1, 1], [], []>} : vector<256x64xf32>, vector<64x64xf32>, vector<256x64xf32> -> vector<256x64xf32>
    %c80 = arith.constant 80 : index
    %c0_10 = arith.constant 0 : index
    %14 = vector.load %arg4[%c80, %c0_10] : memref<160x64xf32, #tpu.memory_space<vmem>>, vector<1x64xf32>
    %15 = vector.broadcast %14 : vector<1x64xf32> to vector<256x64xf32>
    %16 = arith.addf %13, %15 : vector<256x64xf32>
    %cst_11 = arith.constant 0.000000e+00 : f32
    %17 = vector.broadcast %cst_11 : f32 to vector<256x64xf32>
    %18 = arith.maximumf %16, %17 : vector<256x64xf32>
    %c88 = arith.constant 88 : index
    %c0_12 = arith.constant 0 : index
    %19 = vector.load %arg4[%c88, %c0_12] : memref<160x64xf32, #tpu.memory_space<vmem>>, vector<64x64xf32>
    %cst_13 = arith.constant dense<0.000000e+00> : vector<256x64xf32>
    %20 = tpu.matmul %18, %19, %cst_13 {dimension_numbers = #tpu.dot_dimension_numbers<[1], [0], [0], [1], [0, 0, 1, 1], [], []>} : vector<256x64xf32>, vector<64x64xf32>, vector<256x64xf32> -> vector<256x64xf32>
    %c152 = arith.constant 152 : index
    %c0_14 = arith.constant 0 : index
    %21 = vector.load %arg4[%c152, %c0_14] : memref<160x64xf32, #tpu.memory_space<vmem>>, vector<1x64xf32>
    %22 = vector.broadcast %21 : vector<1x64xf32> to vector<256x64xf32>
    %23 = arith.addf %20, %22 : vector<256x64xf32>
    %cst_15 = arith.constant dense<0.000000e+00> : vector<256x64xf32>
    %24 = tpu.matmul %1, %23, %cst_15 {dimension_numbers = #tpu.dot_dimension_numbers<[1], [0], [0], [1], [0, 0, 1, 1], [], []>} : vector<256x256xf32>, vector<256x64xf32>, vector<256x64xf32> -> vector<256x64xf32>
    %c0_16 = arith.constant 0 : index
    %c0_17 = arith.constant 0 : index
    %c0_18 = arith.constant 0 : index
    %25 = vector.load %arg5[%c0_16, %c0_17, %c0_18] : memref<4x608x192xf32, #tpu.memory_space<vmem>>, vector<1x64x192xf32>
    %26 = vector.shape_cast %25 : vector<1x64x192xf32> to vector<64x192xf32>
    %cst_19 = arith.constant dense<0.000000e+00> : vector<256x192xf32>
    %27 = tpu.matmul %23, %26, %cst_19 {dimension_numbers = #tpu.dot_dimension_numbers<[1], [0], [0], [1], [0, 0, 1, 1], [], []>} : vector<256x64xf32>, vector<64x192xf32>, vector<256x192xf32> -> vector<256x192xf32>
    %c0_20 = arith.constant 0 : index
    %c64 = arith.constant 64 : index
    %c0_21 = arith.constant 0 : index
    %28 = vector.load %arg5[%c0_20, %c64, %c0_21] : memref<4x608x192xf32, #tpu.memory_space<vmem>>, vector<1x64x192xf32>
    %29 = vector.shape_cast %28 : vector<1x64x192xf32> to vector<64x192xf32>
    %cst_22 = arith.constant dense<0.000000e+00> : vector<256x192xf32>
    %30 = tpu.matmul %24, %29, %cst_22 {dimension_numbers = #tpu.dot_dimension_numbers<[1], [0], [0], [1], [0, 0, 1, 1], [], []>} : vector<256x64xf32>, vector<64x192xf32>, vector<256x192xf32> -> vector<256x192xf32>
    %31 = arith.addf %27, %30 : vector<256x192xf32>
    %c0_23 = arith.constant 0 : index
    %c128 = arith.constant 128 : index
    %c0_24 = arith.constant 0 : index
    %32 = vector.load %arg5[%c0_23, %c128, %c0_24] : memref<4x608x192xf32, #tpu.memory_space<vmem>>, vector<1x1x192xf32>
    %33 = vector.shape_cast %32 : vector<1x1x192xf32> to vector<1x192xf32>
    %34 = vector.broadcast %33 : vector<1x192xf32> to vector<256x192xf32>
    %35 = arith.addf %31, %34 : vector<256x192xf32>
    %cst_25 = arith.constant 0.000000e+00 : f32
    %36 = vector.broadcast %cst_25 : f32 to vector<256x192xf32>
    %37 = arith.maximumf %35, %36 : vector<256x192xf32>
    %c0_26 = arith.constant 0 : index
    %c136 = arith.constant 136 : index
    %c0_27 = arith.constant 0 : index
    %38 = vector.load %arg5[%c0_26, %c136, %c0_27] : memref<4x608x192xf32, #tpu.memory_space<vmem>>, vector<1x192x128xf32>
    %39 = vector.shape_cast %38 : vector<1x192x128xf32> to vector<192x128xf32>
    %cst_28 = arith.constant dense<0.000000e+00> : vector<256x128xf32>
    %40 = tpu.matmul %37, %39, %cst_28 {dimension_numbers = #tpu.dot_dimension_numbers<[1], [0], [0], [1], [0, 0, 1, 1], [], []>} : vector<256x192xf32>, vector<192x128xf32>, vector<256x128xf32> -> vector<256x128xf32>
    %c0_29 = arith.constant 0 : index
    %c328 = arith.constant 328 : index
    %c0_30 = arith.constant 0 : index
    %41 = vector.load %arg5[%c0_29, %c328, %c0_30] : memref<4x608x192xf32, #tpu.memory_space<vmem>>, vector<1x1x128xf32>
    %42 = vector.shape_cast %41 : vector<1x1x128xf32> to vector<1x128xf32>
    %43 = vector.broadcast %42 : vector<1x128xf32> to vector<256x128xf32>
    %44 = arith.addf %40, %43 : vector<256x128xf32>
    %cst_31 = arith.constant 0.000000e+00 : f32
    %45 = vector.broadcast %cst_31 : f32 to vector<256x128xf32>
    %46 = arith.maximumf %44, %45 : vector<256x128xf32>
    %c0_32 = arith.constant 0 : index
    %c336 = arith.constant 336 : index
    %c0_33 = arith.constant 0 : index
    %47 = vector.load %arg5[%c0_32, %c336, %c0_33] : memref<4x608x192xf32, #tpu.memory_space<vmem>>, vector<1x128x128xf32>
    %48 = vector.shape_cast %47 : vector<1x128x128xf32> to vector<128x128xf32>
    %cst_34 = arith.constant dense<0.000000e+00> : vector<256x128xf32>
    %49 = tpu.matmul %46, %48, %cst_34 {dimension_numbers = #tpu.dot_dimension_numbers<[1], [0], [0], [1], [0, 0, 1, 1], [], []>} : vector<256x128xf32>, vector<128x128xf32>, vector<256x128xf32> -> vector<256x128xf32>
    %c0_35 = arith.constant 0 : index
    %c464 = arith.constant 464 : index
    %c0_36 = arith.constant 0 : index
    %50 = vector.load %arg5[%c0_35, %c464, %c0_36] : memref<4x608x192xf32, #tpu.memory_space<vmem>>, vector<1x1x128xf32>
    %51 = vector.shape_cast %50 : vector<1x1x128xf32> to vector<1x128xf32>
    %52 = vector.broadcast %51 : vector<1x128xf32> to vector<256x128xf32>
    %53 = arith.addf %49, %52 : vector<256x128xf32>
    %cst_37 = arith.constant 0.000000e+00 : f32
    %54 = vector.broadcast %cst_37 : f32 to vector<256x128xf32>
    %55 = arith.maximumf %53, %54 : vector<256x128xf32>
    %c0_38 = arith.constant 0 : index
    %c472 = arith.constant 472 : index
    %c0_39 = arith.constant 0 : index
    %56 = vector.load %arg5[%c0_38, %c472, %c0_39] : memref<4x608x192xf32, #tpu.memory_space<vmem>>, vector<1x128x64xf32>
    %57 = vector.shape_cast %56 : vector<1x128x64xf32> to vector<128x64xf32>
    %cst_40 = arith.constant dense<0.000000e+00> : vector<256x64xf32>
    %58 = tpu.matmul %55, %57, %cst_40 {dimension_numbers = #tpu.dot_dimension_numbers<[1], [0], [0], [1], [0, 0, 1, 1], [], []>} : vector<256x128xf32>, vector<128x64xf32>, vector<256x64xf32> -> vector<256x64xf32>
    %c0_41 = arith.constant 0 : index
    %c600 = arith.constant 600 : index
    %c0_42 = arith.constant 0 : index
    %59 = vector.load %arg5[%c0_41, %c600, %c0_42] : memref<4x608x192xf32, #tpu.memory_space<vmem>>, vector<1x1x64xf32>
    %60 = vector.shape_cast %59 : vector<1x1x64xf32> to vector<1x64xf32>
    %61 = vector.broadcast %60 : vector<1x64xf32> to vector<256x64xf32>
    %62 = arith.addf %58, %61 : vector<256x64xf32>
    %63 = vector.shape_cast %4 : vector<256x1xi1> to vector<256x1xi1>
    %64 = vector.broadcast %63 : vector<256x1xi1> to vector<256x64xi1>
    %65 = arith.select %64, %62, %23 : vector<256x64xi1>, vector<256x64xf32>
    %cst_43 = arith.constant dense<0.000000e+00> : vector<256x64xf32>
    %66 = tpu.matmul %1, %65, %cst_43 {dimension_numbers = #tpu.dot_dimension_numbers<[1], [0], [0], [1], [0, 0, 1, 1], [], []>} : vector<256x256xf32>, vector<256x64xf32>, vector<256x64xf32> -> vector<256x64xf32>
    %c1 = arith.constant 1 : index
    %c0_44 = arith.constant 0 : index
    %c0_45 = arith.constant 0 : index
    %67 = vector.load %arg5[%c1, %c0_44, %c0_45] : memref<4x608x192xf32, #tpu.memory_space<vmem>>, vector<1x64x192xf32>
    %68 = vector.shape_cast %67 : vector<1x64x192xf32> to vector<64x192xf32>
    %cst_46 = arith.constant dense<0.000000e+00> : vector<256x192xf32>
    %69 = tpu.matmul %65, %68, %cst_46 {dimension_numbers = #tpu.dot_dimension_numbers<[1], [0], [0], [1], [0, 0, 1, 1], [], []>} : vector<256x64xf32>, vector<64x192xf32>, vector<256x192xf32> -> vector<256x192xf32>
    %c1_47 = arith.constant 1 : index
    %c64_48 = arith.constant 64 : index
    %c0_49 = arith.constant 0 : index
    %70 = vector.load %arg5[%c1_47, %c64_48, %c0_49] : memref<4x608x192xf32, #tpu.memory_space<vmem>>, vector<1x64x192xf32>
    %71 = vector.shape_cast %70 : vector<1x64x192xf32> to vector<64x192xf32>
    %cst_50 = arith.constant dense<0.000000e+00> : vector<256x192xf32>
    %72 = tpu.matmul %66, %71, %cst_50 {dimension_numbers = #tpu.dot_dimension_numbers<[1], [0], [0], [1], [0, 0, 1, 1], [], []>} : vector<256x64xf32>, vector<64x192xf32>, vector<256x192xf32> -> vector<256x192xf32>
    %73 = arith.addf %69, %72 : vector<256x192xf32>
    %c1_51 = arith.constant 1 : index
    %c128_52 = arith.constant 128 : index
    %c0_53 = arith.constant 0 : index
    %74 = vector.load %arg5[%c1_51, %c128_52, %c0_53] : memref<4x608x192xf32, #tpu.memory_space<vmem>>, vector<1x1x192xf32>
    %75 = vector.shape_cast %74 : vector<1x1x192xf32> to vector<1x192xf32>
    %76 = vector.broadcast %75 : vector<1x192xf32> to vector<256x192xf32>
    %77 = arith.addf %73, %76 : vector<256x192xf32>
    %cst_54 = arith.constant 0.000000e+00 : f32
    %78 = vector.broadcast %cst_54 : f32 to vector<256x192xf32>
    %79 = arith.maximumf %77, %78 : vector<256x192xf32>
    %c1_55 = arith.constant 1 : index
    %c136_56 = arith.constant 136 : index
    %c0_57 = arith.constant 0 : index
    %80 = vector.load %arg5[%c1_55, %c136_56, %c0_57] : memref<4x608x192xf32, #tpu.memory_space<vmem>>, vector<1x192x128xf32>
    %81 = vector.shape_cast %80 : vector<1x192x128xf32> to vector<192x128xf32>
    %cst_58 = arith.constant dense<0.000000e+00> : vector<256x128xf32>
    %82 = tpu.matmul %79, %81, %cst_58 {dimension_numbers = #tpu.dot_dimension_numbers<[1], [0], [0], [1], [0, 0, 1, 1], [], []>} : vector<256x192xf32>, vector<192x128xf32>, vector<256x128xf32> -> vector<256x128xf32>
    %c1_59 = arith.constant 1 : index
    %c328_60 = arith.constant 328 : index
    %c0_61 = arith.constant 0 : index
    %83 = vector.load %arg5[%c1_59, %c328_60, %c0_61] : memref<4x608x192xf32, #tpu.memory_space<vmem>>, vector<1x1x128xf32>
    %84 = vector.shape_cast %83 : vector<1x1x128xf32> to vector<1x128xf32>
    %85 = vector.broadcast %84 : vector<1x128xf32> to vector<256x128xf32>
    %86 = arith.addf %82, %85 : vector<256x128xf32>
    %cst_62 = arith.constant 0.000000e+00 : f32
    %87 = vector.broadcast %cst_62 : f32 to vector<256x128xf32>
    %88 = arith.maximumf %86, %87 : vector<256x128xf32>
    %c1_63 = arith.constant 1 : index
    %c336_64 = arith.constant 336 : index
    %c0_65 = arith.constant 0 : index
    %89 = vector.load %arg5[%c1_63, %c336_64, %c0_65] : memref<4x608x192xf32, #tpu.memory_space<vmem>>, vector<1x128x128xf32>
    %90 = vector.shape_cast %89 : vector<1x128x128xf32> to vector<128x128xf32>
    %cst_66 = arith.constant dense<0.000000e+00> : vector<256x128xf32>
    %91 = tpu.matmul %88, %90, %cst_66 {dimension_numbers = #tpu.dot_dimension_numbers<[1], [0], [0], [1], [0, 0, 1, 1], [], []>} : vector<256x128xf32>, vector<128x128xf32>, vector<256x128xf32> -> vector<256x128xf32>
    %c1_67 = arith.constant 1 : index
    %c464_68 = arith.constant 464 : index
    %c0_69 = arith.constant 0 : index
    %92 = vector.load %arg5[%c1_67, %c464_68, %c0_69] : memref<4x608x192xf32, #tpu.memory_space<vmem>>, vector<1x1x128xf32>
    %93 = vector.shape_cast %92 : vector<1x1x128xf32> to vector<1x128xf32>
    %94 = vector.broadcast %93 : vector<1x128xf32> to vector<256x128xf32>
    %95 = arith.addf %91, %94 : vector<256x128xf32>
    %cst_70 = arith.constant 0.000000e+00 : f32
    %96 = vector.broadcast %cst_70 : f32 to vector<256x128xf32>
    %97 = arith.maximumf %95, %96 : vector<256x128xf32>
    %c1_71 = arith.constant 1 : index
    %c472_72 = arith.constant 472 : index
    %c0_73 = arith.constant 0 : index
    %98 = vector.load %arg5[%c1_71, %c472_72, %c0_73] : memref<4x608x192xf32, #tpu.memory_space<vmem>>, vector<1x128x64xf32>
    %99 = vector.shape_cast %98 : vector<1x128x64xf32> to vector<128x64xf32>
    %cst_74 = arith.constant dense<0.000000e+00> : vector<256x64xf32>
    %100 = tpu.matmul %97, %99, %cst_74 {dimension_numbers = #tpu.dot_dimension_numbers<[1], [0], [0], [1], [0, 0, 1, 1], [], []>} : vector<256x128xf32>, vector<128x64xf32>, vector<256x64xf32> -> vector<256x64xf32>
    %c1_75 = arith.constant 1 : index
    %c600_76 = arith.constant 600 : index
    %c0_77 = arith.constant 0 : index
    %101 = vector.load %arg5[%c1_75, %c600_76, %c0_77] : memref<4x608x192xf32, #tpu.memory_space<vmem>>, vector<1x1x64xf32>
    %102 = vector.shape_cast %101 : vector<1x1x64xf32> to vector<1x64xf32>
    %103 = vector.broadcast %102 : vector<1x64xf32> to vector<256x64xf32>
    %104 = arith.addf %100, %103 : vector<256x64xf32>
    %105 = vector.shape_cast %4 : vector<256x1xi1> to vector<256x1xi1>
    %106 = vector.broadcast %105 : vector<256x1xi1> to vector<256x64xi1>
    %107 = arith.select %106, %104, %65 : vector<256x64xi1>, vector<256x64xf32>
    %cst_78 = arith.constant dense<0.000000e+00> : vector<256x64xf32>
    %108 = tpu.matmul %1, %107, %cst_78 {dimension_numbers = #tpu.dot_dimension_numbers<[1], [0], [0], [1], [0, 0, 1, 1], [], []>} : vector<256x256xf32>, vector<256x64xf32>, vector<256x64xf32> -> vector<256x64xf32>
    %c2 = arith.constant 2 : index
    %c0_79 = arith.constant 0 : index
    %c0_80 = arith.constant 0 : index
    %109 = vector.load %arg5[%c2, %c0_79, %c0_80] : memref<4x608x192xf32, #tpu.memory_space<vmem>>, vector<1x64x192xf32>
    %110 = vector.shape_cast %109 : vector<1x64x192xf32> to vector<64x192xf32>
    %cst_81 = arith.constant dense<0.000000e+00> : vector<256x192xf32>
    %111 = tpu.matmul %107, %110, %cst_81 {dimension_numbers = #tpu.dot_dimension_numbers<[1], [0], [0], [1], [0, 0, 1, 1], [], []>} : vector<256x64xf32>, vector<64x192xf32>, vector<256x192xf32> -> vector<256x192xf32>
    %c2_82 = arith.constant 2 : index
    %c64_83 = arith.constant 64 : index
    %c0_84 = arith.constant 0 : index
    %112 = vector.load %arg5[%c2_82, %c64_83, %c0_84] : memref<4x608x192xf32, #tpu.memory_space<vmem>>, vector<1x64x192xf32>
    %113 = vector.shape_cast %112 : vector<1x64x192xf32> to vector<64x192xf32>
    %cst_85 = arith.constant dense<0.000000e+00> : vector<256x192xf32>
    %114 = tpu.matmul %108, %113, %cst_85 {dimension_numbers = #tpu.dot_dimension_numbers<[1], [0], [0], [1], [0, 0, 1, 1], [], []>} : vector<256x64xf32>, vector<64x192xf32>, vector<256x192xf32> -> vector<256x192xf32>
    %115 = arith.addf %111, %114 : vector<256x192xf32>
    %c2_86 = arith.constant 2 : index
    %c128_87 = arith.constant 128 : index
    %c0_88 = arith.constant 0 : index
    %116 = vector.load %arg5[%c2_86, %c128_87, %c0_88] : memref<4x608x192xf32, #tpu.memory_space<vmem>>, vector<1x1x192xf32>
    %117 = vector.shape_cast %116 : vector<1x1x192xf32> to vector<1x192xf32>
    %118 = vector.broadcast %117 : vector<1x192xf32> to vector<256x192xf32>
    %119 = arith.addf %115, %118 : vector<256x192xf32>
    %cst_89 = arith.constant 0.000000e+00 : f32
    %120 = vector.broadcast %cst_89 : f32 to vector<256x192xf32>
    %121 = arith.maximumf %119, %120 : vector<256x192xf32>
    %c2_90 = arith.constant 2 : index
    %c136_91 = arith.constant 136 : index
    %c0_92 = arith.constant 0 : index
    %122 = vector.load %arg5[%c2_90, %c136_91, %c0_92] : memref<4x608x192xf32, #tpu.memory_space<vmem>>, vector<1x192x128xf32>
    %123 = vector.shape_cast %122 : vector<1x192x128xf32> to vector<192x128xf32>
    %cst_93 = arith.constant dense<0.000000e+00> : vector<256x128xf32>
    %124 = tpu.matmul %121, %123, %cst_93 {dimension_numbers = #tpu.dot_dimension_numbers<[1], [0], [0], [1], [0, 0, 1, 1], [], []>} : vector<256x192xf32>, vector<192x128xf32>, vector<256x128xf32> -> vector<256x128xf32>
    %c2_94 = arith.constant 2 : index
    %c328_95 = arith.constant 328 : index
    %c0_96 = arith.constant 0 : index
    %125 = vector.load %arg5[%c2_94, %c328_95, %c0_96] : memref<4x608x192xf32, #tpu.memory_space<vmem>>, vector<1x1x128xf32>
    %126 = vector.shape_cast %125 : vector<1x1x128xf32> to vector<1x128xf32>
    %127 = vector.broadcast %126 : vector<1x128xf32> to vector<256x128xf32>
    %128 = arith.addf %124, %127 : vector<256x128xf32>
    %cst_97 = arith.constant 0.000000e+00 : f32
    %129 = vector.broadcast %cst_97 : f32 to vector<256x128xf32>
    %130 = arith.maximumf %128, %129 : vector<256x128xf32>
    %c2_98 = arith.constant 2 : index
    %c336_99 = arith.constant 336 : index
    %c0_100 = arith.constant 0 : index
    %131 = vector.load %arg5[%c2_98, %c336_99, %c0_100] : memref<4x608x192xf32, #tpu.memory_space<vmem>>, vector<1x128x128xf32>
    %132 = vector.shape_cast %131 : vector<1x128x128xf32> to vector<128x128xf32>
    %cst_101 = arith.constant dense<0.000000e+00> : vector<256x128xf32>
    %133 = tpu.matmul %130, %132, %cst_101 {dimension_numbers = #tpu.dot_dimension_numbers<[1], [0], [0], [1], [0, 0, 1, 1], [], []>} : vector<256x128xf32>, vector<128x128xf32>, vector<256x128xf32> -> vector<256x128xf32>
    %c2_102 = arith.constant 2 : index
    %c464_103 = arith.constant 464 : index
    %c0_104 = arith.constant 0 : index
    %134 = vector.load %arg5[%c2_102, %c464_103, %c0_104] : memref<4x608x192xf32, #tpu.memory_space<vmem>>, vector<1x1x128xf32>
    %135 = vector.shape_cast %134 : vector<1x1x128xf32> to vector<1x128xf32>
    %136 = vector.broadcast %135 : vector<1x128xf32> to vector<256x128xf32>
    %137 = arith.addf %133, %136 : vector<256x128xf32>
    %cst_105 = arith.constant 0.000000e+00 : f32
    %138 = vector.broadcast %cst_105 : f32 to vector<256x128xf32>
    %139 = arith.maximumf %137, %138 : vector<256x128xf32>
    %c2_106 = arith.constant 2 : index
    %c472_107 = arith.constant 472 : index
    %c0_108 = arith.constant 0 : index
    %140 = vector.load %arg5[%c2_106, %c472_107, %c0_108] : memref<4x608x192xf32, #tpu.memory_space<vmem>>, vector<1x128x64xf32>
    %141 = vector.shape_cast %140 : vector<1x128x64xf32> to vector<128x64xf32>
    %cst_109 = arith.constant dense<0.000000e+00> : vector<256x64xf32>
    %142 = tpu.matmul %139, %141, %cst_109 {dimension_numbers = #tpu.dot_dimension_numbers<[1], [0], [0], [1], [0, 0, 1, 1], [], []>} : vector<256x128xf32>, vector<128x64xf32>, vector<256x64xf32> -> vector<256x64xf32>
    %c2_110 = arith.constant 2 : index
    %c600_111 = arith.constant 600 : index
    %c0_112 = arith.constant 0 : index
    %143 = vector.load %arg5[%c2_110, %c600_111, %c0_112] : memref<4x608x192xf32, #tpu.memory_space<vmem>>, vector<1x1x64xf32>
    %144 = vector.shape_cast %143 : vector<1x1x64xf32> to vector<1x64xf32>
    %145 = vector.broadcast %144 : vector<1x64xf32> to vector<256x64xf32>
    %146 = arith.addf %142, %145 : vector<256x64xf32>
    %147 = vector.shape_cast %4 : vector<256x1xi1> to vector<256x1xi1>
    %148 = vector.broadcast %147 : vector<256x1xi1> to vector<256x64xi1>
    %149 = arith.select %148, %146, %107 : vector<256x64xi1>, vector<256x64xf32>
    %cst_113 = arith.constant dense<0.000000e+00> : vector<256x64xf32>
    %150 = tpu.matmul %1, %149, %cst_113 {dimension_numbers = #tpu.dot_dimension_numbers<[1], [0], [0], [1], [0, 0, 1, 1], [], []>} : vector<256x256xf32>, vector<256x64xf32>, vector<256x64xf32> -> vector<256x64xf32>
    %c3 = arith.constant 3 : index
    %c0_114 = arith.constant 0 : index
    %c0_115 = arith.constant 0 : index
    %151 = vector.load %arg5[%c3, %c0_114, %c0_115] : memref<4x608x192xf32, #tpu.memory_space<vmem>>, vector<1x64x192xf32>
    %152 = vector.shape_cast %151 : vector<1x64x192xf32> to vector<64x192xf32>
    %cst_116 = arith.constant dense<0.000000e+00> : vector<256x192xf32>
    %153 = tpu.matmul %149, %152, %cst_116 {dimension_numbers = #tpu.dot_dimension_numbers<[1], [0], [0], [1], [0, 0, 1, 1], [], []>} : vector<256x64xf32>, vector<64x192xf32>, vector<256x192xf32> -> vector<256x192xf32>
    %c3_117 = arith.constant 3 : index
    %c64_118 = arith.constant 64 : index
    %c0_119 = arith.constant 0 : index
    %154 = vector.load %arg5[%c3_117, %c64_118, %c0_119] : memref<4x608x192xf32, #tpu.memory_space<vmem>>, vector<1x64x192xf32>
    %155 = vector.shape_cast %154 : vector<1x64x192xf32> to vector<64x192xf32>
    %cst_120 = arith.constant dense<0.000000e+00> : vector<256x192xf32>
    %156 = tpu.matmul %150, %155, %cst_120 {dimension_numbers = #tpu.dot_dimension_numbers<[1], [0], [0], [1], [0, 0, 1, 1], [], []>} : vector<256x64xf32>, vector<64x192xf32>, vector<256x192xf32> -> vector<256x192xf32>
    %157 = arith.addf %153, %156 : vector<256x192xf32>
    %c3_121 = arith.constant 3 : index
    %c128_122 = arith.constant 128 : index
    %c0_123 = arith.constant 0 : index
    %158 = vector.load %arg5[%c3_121, %c128_122, %c0_123] : memref<4x608x192xf32, #tpu.memory_space<vmem>>, vector<1x1x192xf32>
    %159 = vector.shape_cast %158 : vector<1x1x192xf32> to vector<1x192xf32>
    %160 = vector.broadcast %159 : vector<1x192xf32> to vector<256x192xf32>
    %161 = arith.addf %157, %160 : vector<256x192xf32>
    %cst_124 = arith.constant 0.000000e+00 : f32
    %162 = vector.broadcast %cst_124 : f32 to vector<256x192xf32>
    %163 = arith.maximumf %161, %162 : vector<256x192xf32>
    %c3_125 = arith.constant 3 : index
    %c136_126 = arith.constant 136 : index
    %c0_127 = arith.constant 0 : index
    %164 = vector.load %arg5[%c3_125, %c136_126, %c0_127] : memref<4x608x192xf32, #tpu.memory_space<vmem>>, vector<1x192x128xf32>
    %165 = vector.shape_cast %164 : vector<1x192x128xf32> to vector<192x128xf32>
    %cst_128 = arith.constant dense<0.000000e+00> : vector<256x128xf32>
    %166 = tpu.matmul %163, %165, %cst_128 {dimension_numbers = #tpu.dot_dimension_numbers<[1], [0], [0], [1], [0, 0, 1, 1], [], []>} : vector<256x192xf32>, vector<192x128xf32>, vector<256x128xf32> -> vector<256x128xf32>
    %c3_129 = arith.constant 3 : index
    %c328_130 = arith.constant 328 : index
    %c0_131 = arith.constant 0 : index
    %167 = vector.load %arg5[%c3_129, %c328_130, %c0_131] : memref<4x608x192xf32, #tpu.memory_space<vmem>>, vector<1x1x128xf32>
    %168 = vector.shape_cast %167 : vector<1x1x128xf32> to vector<1x128xf32>
    %169 = vector.broadcast %168 : vector<1x128xf32> to vector<256x128xf32>
    %170 = arith.addf %166, %169 : vector<256x128xf32>
    %cst_132 = arith.constant 0.000000e+00 : f32
    %171 = vector.broadcast %cst_132 : f32 to vector<256x128xf32>
    %172 = arith.maximumf %170, %171 : vector<256x128xf32>
    %c3_133 = arith.constant 3 : index
    %c336_134 = arith.constant 336 : index
    %c0_135 = arith.constant 0 : index
    %173 = vector.load %arg5[%c3_133, %c336_134, %c0_135] : memref<4x608x192xf32, #tpu.memory_space<vmem>>, vector<1x128x128xf32>
    %174 = vector.shape_cast %173 : vector<1x128x128xf32> to vector<128x128xf32>
    %cst_136 = arith.constant dense<0.000000e+00> : vector<256x128xf32>
    %175 = tpu.matmul %172, %174, %cst_136 {dimension_numbers = #tpu.dot_dimension_numbers<[1], [0], [0], [1], [0, 0, 1, 1], [], []>} : vector<256x128xf32>, vector<128x128xf32>, vector<256x128xf32> -> vector<256x128xf32>
    %c3_137 = arith.constant 3 : index
    %c464_138 = arith.constant 464 : index
    %c0_139 = arith.constant 0 : index
    %176 = vector.load %arg5[%c3_137, %c464_138, %c0_139] : memref<4x608x192xf32, #tpu.memory_space<vmem>>, vector<1x1x128xf32>
    %177 = vector.shape_cast %176 : vector<1x1x128xf32> to vector<1x128xf32>
    %178 = vector.broadcast %177 : vector<1x128xf32> to vector<256x128xf32>
    %179 = arith.addf %175, %178 : vector<256x128xf32>
    %cst_140 = arith.constant 0.000000e+00 : f32
    %180 = vector.broadcast %cst_140 : f32 to vector<256x128xf32>
    %181 = arith.maximumf %179, %180 : vector<256x128xf32>
    %c3_141 = arith.constant 3 : index
    %c472_142 = arith.constant 472 : index
    %c0_143 = arith.constant 0 : index
    %182 = vector.load %arg5[%c3_141, %c472_142, %c0_143] : memref<4x608x192xf32, #tpu.memory_space<vmem>>, vector<1x128x64xf32>
    %183 = vector.shape_cast %182 : vector<1x128x64xf32> to vector<128x64xf32>
    %cst_144 = arith.constant dense<0.000000e+00> : vector<256x64xf32>
    %184 = tpu.matmul %181, %183, %cst_144 {dimension_numbers = #tpu.dot_dimension_numbers<[1], [0], [0], [1], [0, 0, 1, 1], [], []>} : vector<256x128xf32>, vector<128x64xf32>, vector<256x64xf32> -> vector<256x64xf32>
    %c3_145 = arith.constant 3 : index
    %c600_146 = arith.constant 600 : index
    %c0_147 = arith.constant 0 : index
    %185 = vector.load %arg5[%c3_145, %c600_146, %c0_147] : memref<4x608x192xf32, #tpu.memory_space<vmem>>, vector<1x1x64xf32>
    %186 = vector.shape_cast %185 : vector<1x1x64xf32> to vector<1x64xf32>
    %187 = vector.broadcast %186 : vector<1x64xf32> to vector<256x64xf32>
    %188 = arith.addf %184, %187 : vector<256x64xf32>
    %189 = vector.shape_cast %4 : vector<256x1xi1> to vector<256x1xi1>
    %190 = vector.broadcast %189 : vector<256x1xi1> to vector<256x64xi1>
    %191 = arith.select %190, %188, %149 : vector<256x64xi1>, vector<256x64xf32>
    %c0_148 = arith.constant 0 : index
    %c0_149 = arith.constant 0 : index
    %192 = vector.load %arg3[%c0_148, %c0_149] : memref<16x256xf32, #tpu.memory_space<vmem>>, vector<16x256xf32>
    %cst_150 = arith.constant dense<0.000000e+00> : vector<16x64xf32>
    %193 = tpu.matmul %192, %191, %cst_150 {dimension_numbers = #tpu.dot_dimension_numbers<[1], [0], [0], [1], [0, 0, 1, 1], [], []>} : vector<16x256xf32>, vector<256x64xf32>, vector<16x64xf32> -> vector<16x64xf32>
    %c0_151 = arith.constant 0 : index
    %c0_152 = arith.constant 0 : index
    %194 = vector.load %arg6[%c0_151, %c0_152] : memref<616x192xf32, #tpu.memory_space<vmem>>, vector<64x128xf32>
    %cst_153 = arith.constant dense<0.000000e+00> : vector<16x128xf32>
    %195 = tpu.matmul %193, %194, %cst_153 {dimension_numbers = #tpu.dot_dimension_numbers<[1], [0], [0], [1], [0, 0, 1, 1], [], []>} : vector<16x64xf32>, vector<64x128xf32>, vector<16x128xf32> -> vector<16x128xf32>
    %c64_154 = arith.constant 64 : index
    %c0_155 = arith.constant 0 : index
    %196 = vector.load %arg6[%c64_154, %c0_155] : memref<616x192xf32, #tpu.memory_space<vmem>>, vector<1x128xf32>
    %197 = vector.broadcast %196 : vector<1x128xf32> to vector<16x128xf32>
    %198 = arith.addf %195, %197 : vector<16x128xf32>
    %cst_156 = arith.constant 0.000000e+00 : f32
    %199 = vector.broadcast %cst_156 : f32 to vector<16x128xf32>
    %200 = arith.maximumf %198, %199 : vector<16x128xf32>
    %c72 = arith.constant 72 : index
    %c0_157 = arith.constant 0 : index
    %201 = vector.load %arg6[%c72, %c0_157] : memref<616x192xf32, #tpu.memory_space<vmem>>, vector<128x192xf32>
    %cst_158 = arith.constant dense<0.000000e+00> : vector<16x192xf32>
    %202 = tpu.matmul %200, %201, %cst_158 {dimension_numbers = #tpu.dot_dimension_numbers<[1], [0], [0], [1], [0, 0, 1, 1], [], []>} : vector<16x128xf32>, vector<128x192xf32>, vector<16x192xf32> -> vector<16x192xf32>
    %c200 = arith.constant 200 : index
    %c0_159 = arith.constant 0 : index
    %203 = vector.load %arg6[%c200, %c0_159] : memref<616x192xf32, #tpu.memory_space<vmem>>, vector<1x192xf32>
    %204 = vector.broadcast %203 : vector<1x192xf32> to vector<16x192xf32>
    %205 = arith.addf %202, %204 : vector<16x192xf32>
    %cst_160 = arith.constant 0.000000e+00 : f32
    %206 = vector.broadcast %cst_160 : f32 to vector<16x192xf32>
    %207 = arith.maximumf %205, %206 : vector<16x192xf32>
    %c208 = arith.constant 208 : index
    %c0_161 = arith.constant 0 : index
    %208 = vector.load %arg6[%c208, %c0_161] : memref<616x192xf32, #tpu.memory_space<vmem>>, vector<192x128xf32>
    %cst_162 = arith.constant dense<0.000000e+00> : vector<16x128xf32>
    %209 = tpu.matmul %207, %208, %cst_162 {dimension_numbers = #tpu.dot_dimension_numbers<[1], [0], [0], [1], [0, 0, 1, 1], [], []>} : vector<16x192xf32>, vector<192x128xf32>, vector<16x128xf32> -> vector<16x128xf32>
    %c400 = arith.constant 400 : index
    %c0_163 = arith.constant 0 : index
    %210 = vector.load %arg6[%c400, %c0_163] : memref<616x192xf32, #tpu.memory_space<vmem>>, vector<1x128xf32>
    %211 = vector.broadcast %210 : vector<1x128xf32> to vector<16x128xf32>
    %212 = arith.addf %209, %211 : vector<16x128xf32>
    %cst_164 = arith.constant 0.000000e+00 : f32
    %213 = vector.broadcast %cst_164 : f32 to vector<16x128xf32>
    %214 = arith.maximumf %212, %213 : vector<16x128xf32>
    %c408 = arith.constant 408 : index
    %c0_165 = arith.constant 0 : index
    %215 = vector.load %arg6[%c408, %c0_165] : memref<616x192xf32, #tpu.memory_space<vmem>>, vector<128x64xf32>
    %cst_166 = arith.constant dense<0.000000e+00> : vector<16x64xf32>
    %216 = tpu.matmul %214, %215, %cst_166 {dimension_numbers = #tpu.dot_dimension_numbers<[1], [0], [0], [1], [0, 0, 1, 1], [], []>} : vector<16x128xf32>, vector<128x64xf32>, vector<16x64xf32> -> vector<16x64xf32>
    %c536 = arith.constant 536 : index
    %c0_167 = arith.constant 0 : index
    %217 = vector.load %arg6[%c536, %c0_167] : memref<616x192xf32, #tpu.memory_space<vmem>>, vector<1x64xf32>
    %218 = vector.broadcast %217 : vector<1x64xf32> to vector<16x64xf32>
    %219 = arith.addf %216, %218 : vector<16x64xf32>
    %cst_168 = arith.constant 0.000000e+00 : f32
    %220 = vector.broadcast %cst_168 : f32 to vector<16x64xf32>
    %221 = arith.maximumf %219, %220 : vector<16x64xf32>
    %c544 = arith.constant 544 : index
    %c0_169 = arith.constant 0 : index
    %222 = vector.load %arg6[%c544, %c0_169] : memref<616x192xf32, #tpu.memory_space<vmem>>, vector<64x128xf32>
    %cst_170 = arith.constant dense<0.000000e+00> : vector<16x128xf32>
    %223 = tpu.matmul %221, %222, %cst_170 {dimension_numbers = #tpu.dot_dimension_numbers<[1], [0], [0], [1], [0, 0, 1, 1], [], []>} : vector<16x64xf32>, vector<64x128xf32>, vector<16x128xf32> -> vector<16x128xf32>
    %c608 = arith.constant 608 : index
    %c0_171 = arith.constant 0 : index
    %224 = vector.load %arg6[%c608, %c0_171] : memref<616x192xf32, #tpu.memory_space<vmem>>, vector<1x128xf32>
    %225 = vector.broadcast %224 : vector<1x128xf32> to vector<16x128xf32>
    %226 = arith.addf %223, %225 : vector<16x128xf32>
    %c0_172 = arith.constant 0 : index
    %c0_173 = arith.constant 0 : index
    %227 = vector.load %arg7[%c0_172, %c0_173] : memref<16x128xf32, #tpu.memory_space<vmem>>, vector<16x128xf32>
    tpu.vector_store %arg7[%c0_172, %c0_173], %226 {strides = array<i32>} : memref<16x128xf32, #tpu.memory_space<vmem>>, vector<16x128xf32>,
    return
  }
  func.func @transform_0(%arg0: i32) -> (i32, i32) {
    %c0_i32 = arith.constant 0 : i32
    %c0_i32_0 = arith.constant 0 : i32
    return %arg0, %c0_i32 : i32, i32
  }
  func.func @transform_1(%arg0: i32) -> (i32, i32) {
    %c0_i32 = arith.constant 0 : i32
    %c0_i32_0 = arith.constant 0 : i32
    return %arg0, %c0_i32 : i32, i32
  }
  func.func @transform_2(%arg0: i32) -> (i32, i32) {
    %c0_i32 = arith.constant 0 : i32
    %c0_i32_0 = arith.constant 0 : i32
    %c0_i32_1 = arith.constant 0 : i32
    return %c0_i32, %c0_i32_0 : i32, i32
  }
  func.func @transform_3(%arg0: i32) -> (i32, i32) {
    %c0_i32 = arith.constant 0 : i32
    %c0_i32_0 = arith.constant 0 : i32
    %c0_i32_1 = arith.constant 0 : i32
    return %c0_i32, %c0_i32_0 : i32, i32
  }
  func.func @transform_4(%arg0: i32) -> (i32, i32, i32) {
    %c0_i32 = arith.constant 0 : i32
    %c0_i32_0 = arith.constant 0 : i32
    %c0_i32_1 = arith.constant 0 : i32
    %c0_i32_2 = arith.constant 0 : i32
    return %c0_i32, %c0_i32_0, %c0_i32_1 : i32, i32, i32
  }
  func.func @transform_5(%arg0: i32) -> (i32, i32) {
    %c0_i32 = arith.constant 0 : i32
    %c0_i32_0 = arith.constant 0 : i32
    %c0_i32_1 = arith.constant 0 : i32
    return %c0_i32, %c0_i32_0 : i32, i32
  }
  func.func @transform_6(%arg0: i32) -> (i32, i32) {
    %c0_i32 = arith.constant 0 : i32
    %c0_i32_0 = arith.constant 0 : i32
    return %arg0, %c0_i32 : i32, i32
  }
}

</mosaic_0001>

<bundles_post_ra>
// kernel: molecule_mpnn_forward.1
= control target key start
LH: loop header
LB: loop body
LE: loop exit
PB: predicated region body
PF: predicated region fallthrough
CT: control target
= control target key end

     0   :  { %s14117_s21 = smov 0   ;;  %s18666_s0 = inlined_call_operand.vmem [shape: f32[1024,8], index: 0, kind: input, shape index: {}]   ;;  %s18667_s1 = inlined_call_operand.vmem [shape: f32[1024,256], index: 1, kind: input, shape index: {}]   ;;  %s18668_s2 = inlined_call_operand.vmem [shape: f32[16,256], index: 2, kind: input, shape index: {}]   ;;  %s18669_s3 = inlined_call_operand.vmem [shape: f32[160,64], index: 3, kind: input, shape index: {}]   ;;  %s18670_s4 = inlined_call_operand.vmem [shape: f32[4,608,192], index: 4, kind: input, shape index: {}]   ;;  %s18671_s5 = inlined_call_operand.vmem [shape: f32[616,192], index: 5, kind: input, shape index: {}]   ;;  %s18672_s6 = inlined_call_operand.vmem [shape: f32[64,128], index: 6, kind: output, shape index: {}]  }
   0x1 LB: > { %s10414_s22 = sadd.s32 4294967295, %s14076_s21   ;;  %p10418_p0 = scmp.ge.s32.totalorder %s14076_s21, 1  ;;  %s14076_s21 = sphi %s14117_s21, %s16_s21  }
   0x2   : > { %p225_p1 = scmp.lt.s32.totalorder %s14076_s21, 5 }
   0x4   : > { %p226_p2 = pnand %p10418_p0, %p225_p1 }
   0x6   : > { %229 = sbr.rel (%p226_p2) target bundleno = 7394 (0x1ce2), region = 44 }
   0xd   : > { %v408_v0 = vld [vmem:[%s18669_s3] sm:$0xff]  ;;  %s10419_s25 = sshll.u32 %s10414_s22, 5  ;;  %v768_v1 = vld [vmem:[%s18669_s3 + $0x10] sm:$0xff]  ;;  %v769_v2 = vld [vmem:[%s18669_s3 + $0x18] sm:$0xff]  ;;  %vm414_vm0 = vcmask 64512   ;;  %vm781_vm1 = vcmask 523264  }
   0xe   : > { %11769 = vmatprep.subr.mxu0 %v408_v0  ;;  %p262_p3 = scmp.lt.s32.totalorder %s10419_s25, 127  ;;  %v12660_v3 = vpack.c.bf16 %v769_v2, %v768_v1  ;;  %v770_v4 = vld [vmem:[%s18669_s3 + $0x20] sm:$0xff]  ;;  %v771_v5 = vld [vmem:[%s18669_s3 + $0x28] sm:$0xff]  ;;  %v772_v7 = vld [vmem:[%s18669_s3 + $0x30] sm:$0xff]  ;;  %s10424_s27 = sshll.u32 %s10414_s22, 1 }
   0xf   : > { %11770 = vmatpush3.msra.mxu0 %v408_v0  ;;  %v12664_v6 = vpack.c.bf16 %v771_v5, %v770_v4  ;;  %v773_v8 = vld [vmem:[%s18669_s3 + $0x38] sm:$0xff]  ;;  %v774_v42 = vld [vmem:[%s18669_s3 + $0x40] sm:$0xff]  ;;  %v775_v43 = vld [vmem:[%s18669_s3 + $0x48] sm:$0xff]  ;;  %p275_p4 = scmp.lt.s32.totalorder %s10424_s27, 7 }
  0x10   : > { %s19054_s25 = smov (!%p262_p3, %s10419_s25), 127  ;;  %12661 = vmatprep.subr.bf16.mxu1 %v12660_v3  ;;  %v12668_v9 = vpack.c.bf16 %v773_v8, %v772_v7  ;;  %v12672_v44 = vpack.c.bf16 %v775_v43, %v774_v42  ;;  %v1135_v45 = vld [vmem:[%s18669_s3 + $0x58] sm:$0xff]  ;;  %v1136_v46 = vld [vmem:[%s18669_s3 + $0x60] sm:$0xff]  ;;  %v1137_v47 = vld [vmem:[%s18669_s3 + $0x68] sm:$0xff] }
  0x11   : > { %12663 = vmatpush3.bf16.msra.mxu1 %v12660_v3  ;;  %s10420_s14 = sshll.u32 %s19054_s25, 3  ;;  %v12676_v48 = vpack.c.bf16 %v1136_v46, %v1135_v45  ;;  %v1138_v49 = vld [vmem:[%s18669_s3 + $0x70] sm:$0xff]  ;;  %v1139_v51 = vld [vmem:[%s18669_s3 + $0x78] sm:$0xff]  ;;  %v1140_v52 = vld [vmem:[%s18669_s3 + $0x80] sm:$0xff]  ;;  %s11195_s24 = sshll.u32 %s19054_s25, 4 }
  0x12   : > { %12665 = vmatprep.subr.bf16.mxu1 %v12664_v6  ;;  %s14154_s17 = scalar_lea.vmem %s18666_s0, %s10420_s14  ;;  %v12680_v50 = vpack.c.bf16 %v1138_v49, %v1137_v47  ;;  %v12684_v53 = vpack.c.bf16 %v1140_v52, %v1139_v51  ;;  %v1141_v54 = vld [vmem:[%s18669_s3 + $0x88] sm:$0xff]  ;;  %v1142_v55 = vld [vmem:[%s18669_s3 + $0x90] sm:$0xff]  ;;  %s14393_s28 = scalar_lea.vmem %s18667_s1, %s11195_s24 }
  0x13   : > { %v280_v10 = vld [vmem:[%s14154_s17] sm:$0xff]  ;;  %v281_v11 = vld [vmem:[%s14154_s17 + $0x8] sm:$0xff]  ;;  %v282_v12 = vld [vmem:[%s14154_s17 + $0x10] sm:$0xff]  ;;  %12677 = vmatprep.subr.bf16.mxu0 %v12676_v48  ;;  %v12688_v56 = vpack.c.bf16 %v1142_v55, %v1141_v54  ;;  %s19056_s27 = smov (!%p275_p4, %s10424_s27), 7 }
  0x14   : > { %11771 = vmatprep.mubr.msk.f32.mxu0 %vm414_vm0, %v280_v10  ;;  %v283_v13 = vld [vmem:[%s14154_s17 + $0x18] sm:$0xff]  ;;  %v284_v14 = vld [vmem:[%s14154_s17 + $0x20] sm:$0xff]  ;;  %v285_v15 = vld [vmem:[%s14154_s17 + $0x28] sm:$0xff]  ;;  %s10425_s29 = sshll.u32 %s19056_s27, 3 }
  0x15   : > { %12667 = vmatpush3.bf16.msra.mxu1 %v12664_v6  ;;  %11772 = vmatmul.mubr.msk.f32.vlgmr.msra.gmra.mrb[0].mxu0 %vm414_vm0, %v281_v11  ;;  %v286_v16 = vld [vmem:[%s14154_s17 + $0x30] sm:$0xff]  ;;  %v287_v17 = vld [vmem:[%s14154_s17 + $0x38] sm:$0xff]  ;;  %v288_v18 = vld [vmem:[%s14154_s17 + $0x40] sm:$0xff]  ;;  %s278_s8 = scalar_lea.vmem %s18672_s6, %s10425_s29 }
  0x16   : > { %12669 = vmatprep.subr.bf16.mxu1 %v12668_v9  ;;  %11774 = vmatprep.mubr.msk.f32.mxu0 %vm414_vm0, %v282_v12  ;;  %v289_v19 = vld [vmem:[%s14154_s17 + $0x48] sm:$0xff]  ;;  %v290_v20 = vld [vmem:[%s14154_s17 + $0x50] sm:$0xff]  ;;  %v291_v21 = vld [vmem:[%s14154_s17 + $0x58] sm:$0xff] }
  0x17   : > { %v292_v22 = vld [vmem:[%s14154_s17 + $0x60] sm:$0xff]  ;;  %v293_v23 = vld [vmem:[%s14154_s17 + $0x68] sm:$0xff]  ;;  %v294_v24 = vld [vmem:[%s14154_s17 + $0x70] sm:$0xff]  ;;  %12679 = vmatpush3.bf16.msra.mxu0 %v12676_v48 }
  0x18   : > { %v295_v25 = vld [vmem:[%s14154_s17 + $0x78] sm:$0xff]  ;;  %v296_v26 = vld [vmem:[%s14154_s17 + $0x80] sm:$0xff]  ;;  %v297_v27 = vld [vmem:[%s14154_s17 + $0x88] sm:$0xff]  ;;  %12681 = vmatprep.subr.bf16.mxu0 %v12680_v50 }
  0x19   : > { %12671 = vmatpush3.bf16.msra.mxu1 %v12668_v9  ;;  %11775 = vmatmul.mubr.msk.f32.gmra.mrb[2].mxu0 %vm414_vm0, %v283_v13  ;;  %v298_v28 = vld [vmem:[%s14154_s17 + $0x90] sm:$0xff]  ;;  %v299_v29 = vld [vmem:[%s14154_s17 + $0x98] sm:$0xff]  ;;  %v300_v30 = vld [vmem:[%s14154_s17 + $0xa0] sm:$0xff] }
  0x1a   : > { %11777 = vmatprep.mubr.msk.f32.mxu0 %vm414_vm0, %v284_v14  ;;  %v301_v31 = vld [vmem:[%s14154_s17 + $0xa8] sm:$0xff]  ;;  %v302_v32 = vld [vmem:[%s14154_s17 + $0xb0] sm:$0xff]  ;;  %v303_v33 = vld [vmem:[%s14154_s17 + $0xb8] sm:$0xff]  ;;  %12673 = vmatprep.subr.bf16.mxu1 %v12672_v44 }
  0x1b   : > { %v304_v34 = vld [vmem:[%s14154_s17 + $0xc0] sm:$0xff]  ;;  %v305_v35 = vld [vmem:[%s14154_s17 + $0xc8] sm:$0xff]  ;;  %v306_v36 = vld [vmem:[%s14154_s17 + $0xd0] sm:$0xff]  ;;  %12683 = vmatpush3.bf16.msra.mxu0 %v12680_v50 }
  0x1c   : > { %v307_v37 = vld [vmem:[%s14154_s17 + $0xd8] sm:$0xff]  ;;  %v308_v38 = vld [vmem:[%s14154_s17 + $0xe0] sm:$0xff]  ;;  %v309_v39 = vld [vmem:[%s14154_s17 + $0xe8] sm:$0xff]  ;;  %12685 = vmatprep.subr.bf16.mxu0 %v12684_v53 }
  0x1d   : > { %11778 = vmatmul.mubr.msk.f32.gmra.mrb[4].mxu0 %vm414_vm0, %v285_v15  ;;  %v310_v40 = vld [vmem:[%s14154_s17 + $0xf0] sm:$0xff]  ;;  %v311_v41 = vld [vmem:[%s14154_s17 + $0xf8] sm:$0xff]  ;;  %12675 = vmatpush3.bf16.msra.mxu1 %v12672_v44  ;;  %v14253_v57 = vld [vmem:[%s18669_s3 + $0x8] ss:$0 sm:$0xff] }
  0x1e   : > { %11780 = vmatprep.mubr.msk.f32.mxu0 %vm414_vm0, %v286_v16 }
  0x1f   : > { %12687 = vmatpush3.bf16.msra.mxu0 %v12684_v53 }
  0x20   : > { %12689 = vmatprep.subr.bf16.mxu0 %v12688_v56 }
  0x21   : > { %11781 = vmatmul.mubr.msk.f32.gmra.mrb[6].mxu0 %vm414_vm0, %v287_v17 }
  0x22   : > { %11783 = vmatprep.mubr.msk.f32.mxu0 %vm414_vm0, %v288_v18 }
  0x23   : > { %12691 = vmatpush3.bf16.msra.mxu0 %v12688_v56 }
  0x25   : > { %11784 = vmatmul.mubr.msk.f32.gmra.mrb[8].mxu0 %vm414_vm0, %v289_v19 }
  0x26   : > { %11786 = vmatprep.mubr.msk.f32.mxu0 %vm414_vm0, %v290_v20 }
  0x29   : > { %11787 = vmatmul.mubr.msk.f32.gmra.mrb[10].mxu0 %vm414_vm0, %v291_v21 }
  0x2a   : > { %11789 = vmatprep.mubr.msk.f32.mxu0 %vm414_vm0, %v292_v22 }
  0x2d   : > { %11790 = vmatmul.mubr.msk.f32.gmra.mrb[12].mxu0 %vm414_vm0, %v293_v23 }
  0x2e   : > { %11792 = vmatprep.mubr.msk.f32.mxu0 %vm414_vm0, %v294_v24 }
  0x31   : > { %11793 = vmatmul.mubr.msk.f32.gmra.mrb[14].mxu0 %vm414_vm0, %v295_v25 }
  0x32   : > { %11795 = vmatprep.mubr.msk.f32.mxu0 %vm414_vm0, %v296_v26 }
  0x35   : > { %11796 = vmatmul.mubr.msk.f32.gmra.mrb[16].mxu0 %vm414_vm0, %v297_v27 }
  0x36   : > { %11798 = vmatprep.mubr.msk.f32.mxu0 %vm414_vm0, %v298_v28 }
  0x39   : > { %11799 = vmatmul.mubr.msk.f32.gmra.mrb[18].mxu0 %vm414_vm0, %v299_v29 }
  0x3a   : > { %11801 = vmatprep.mubr.msk.f32.mxu0 %vm414_vm0, %v300_v30 }
  0x3d   : > { %11802 = vmatmul.mubr.msk.f32.gmra.mrb[20].mxu0 %vm414_vm0, %v301_v31 }
  0x3e   : > { %11804 = vmatprep.mubr.msk.f32.mxu0 %vm414_vm0, %v302_v32 }
  0x41   : > { %11805 = vmatmul.mubr.msk.f32.gmra.mrb[22].mxu0 %vm414_vm0, %v303_v33 }
  0x42   : > { %11807 = vmatprep.mubr.msk.f32.mxu0 %vm414_vm0, %v304_v34 }
  0x45   : > { %11808 = vmatmul.mubr.msk.f32.gmra.mrb[24].mxu0 %vm414_vm0, %v305_v35 }
  0x46   : > { %11810 = vmatprep.mubr.msk.f32.mxu0 %vm414_vm0, %v306_v36 }
  0x49   : > { %11811 = vmatmul.mubr.msk.f32.gmra.mrb[26].mxu0 %vm414_vm0, %v307_v37 }
  0x4a   : > { %11813 = vmatprep.mubr.msk.f32.mxu0 %vm414_vm0, %v308_v38 }
  0x4d   : > { %11814 = vmatmul.mubr.msk.f32.gmra.mrb[28].mxu0 %vm414_vm0, %v309_v39 }
  0x4e   : > { %11816 = vmatprep.mubr.msk.f32.mxu0 %vm414_vm0, %v310_v40 }
  0x51   : > { %11817 = vmatmul.mubr.msk.f32.gmra.mrb[30].mxu0 %vm414_vm0, %v311_v41 }
  0xe8   : > { %v11773_v58 = vpop.f32.mrb[0].mxu0 }
  0xe9   : > { %v583_v59 = vadd.f32 %v11773_v58, %v14253_v57  ;;  %v577_v60 = vpop.f32.mrb[1].mxu0 }
  0xea   : > { %v578_v61 = vadd.f32 %v14253_v57, %v577_v60 }
  0xeb   : > { %v737_v0 = vmax.f32 %v583_v59, 0.0 }
  0xec   : > { %v11776_v62 = vpop.f32.mrb[2].mxu0  ;;  %v736_v63 = vmax.f32 %v578_v61, 0.0 }
  0xed   : > { %v593_v1 = vadd.f32 %v11776_v62, %v14253_v57  ;;  %v587_v2 = vpop.f32.mrb[3].mxu0 }
  0xee   : > { %v588_v3 = vadd.f32 %v14253_v57, %v587_v2  ;;  %11835 = vmatprep.mubr.msk.f32.mxu1 %vm781_vm1, %v736_v63 }
  0xef   : > { %11836 = vmatmul.mubr.msk.f32.vlgmr.msra.gmra.mrb[0].mxu1 %vm781_vm1, %v737_v0  ;;  %v739_v6 = vmax.f32 %v593_v1, 0.0 }
  0xf0   : > { %v738_v4 = vmax.f32 %v588_v3, 0.0  ;;  %v11779_v5 = vpop.f32.mrb[4].mxu0 }
  0xf1   : > { %v603_v7 = vadd.f32 %v11779_v5, %v14253_v57  ;;  %v597_v8 = vpop.f32.mrb[5].mxu0 }
  0xf2   : > { %v598_v9 = vadd.f32 %v14253_v57, %v597_v8  ;;  %11838 = vmatprep.mubr.msk.f32.mxu1 %vm781_vm1, %v738_v4 }
  0xf3   : > { %11839 = vmatmul.mubr.msk.f32.gmra.mrb[2].mxu1 %vm781_vm1, %v739_v6  ;;  %v741_v12 = vmax.f32 %v603_v7, 0.0 }
  0xf4   : > { %v740_v10 = vmax.f32 %v598_v9, 0.0  ;;  %v11782_v11 = vpop.f32.mrb[6].mxu0 }
  0xf5   : > { %v613_v13 = vadd.f32 %v11782_v11, %v14253_v57  ;;  %v607_v14 = vpop.f32.mrb[7].mxu0 }
  0xf6   : > { %v608_v15 = vadd.f32 %v14253_v57, %v607_v14  ;;  %11841 = vmatprep.mubr.msk.f32.mxu1 %vm781_vm1, %v740_v10 }
  0xf7   : > { %11842 = vmatmul.mubr.msk.f32.gmra.mrb[4].mxu1 %vm781_vm1, %v741_v12  ;;  %v743_v18 = vmax.f32 %v613_v13, 0.0 }
  0xf8   : > { %v742_v16 = vmax.f32 %v608_v15, 0.0  ;;  %v11785_v17 = vpop.f32.mrb[8].mxu0 }
  0xf9   : > { %v623_v19 = vadd.f32 %v11785_v17, %v14253_v57  ;;  %v617_v20 = vpop.f32.mrb[9].mxu0 }
  0xfa   : > { %v618_v21 = vadd.f32 %v14253_v57, %v617_v20  ;;  %11844 = vmatprep.mubr.msk.f32.mxu1 %vm781_vm1, %v742_v16 }
  0xfb   : > { %11845 = vmatmul.mubr.msk.f32.gmra.mrb[6].mxu1 %vm781_vm1, %v743_v18  ;;  %v745_v24 = vmax.f32 %v623_v19, 0.0 }
  0xfc   : > { %v744_v22 = vmax.f32 %v618_v21, 0.0  ;;  %v11788_v23 = vpop.f32.mrb[10].mxu0 }
  0xfd   : > { %v633_v25 = vadd.f32 %v11788_v23, %v14253_v57  ;;  %v627_v26 = vpop.f32.mrb[11].mxu0 }
  0xfe   : > { %v628_v27 = vadd.f32 %v14253_v57, %v627_v26  ;;  %11847 = vmatprep.mubr.msk.f32.mxu1 %vm781_vm1, %v744_v22 }
  0xff   : > { %11848 = vmatmul.mubr.msk.f32.gmra.mrb[8].mxu1 %vm781_vm1, %v745_v24  ;;  %v747_v30 = vmax.f32 %v633_v25, 0.0 }
 0x100   : > { %v746_v28 = vmax.f32 %v628_v27, 0.0  ;;  %v11791_v29 = vpop.f32.mrb[12].mxu0  ;;  %v14322_v27 = vld [vmem:[%s18669_s3 + $0x50] ss:$0 sm:$0xff] }
 0x101   : > { %v643_v31 = vadd.f32 %v11791_v29, %v14253_v57  ;;  %v637_v32 = vpop.f32.mrb[13].mxu0 }
 0x102   : > { %v638_v33 = vadd.f32 %v14253_v57, %v637_v32  ;;  %11850 = vmatprep.mubr.msk.f32.mxu1 %vm781_vm1, %v746_v28 }
 0x103   : > { %11851 = vmatmul.mubr.msk.f32.gmra.mrb[10].mxu1 %vm781_vm1, %v747_v30  ;;  %v749_v36 = vmax.f32 %v643_v31, 0.0 }
 0x104   : > { %v748_v34 = vmax.f32 %v638_v33, 0.0  ;;  %v11794_v35 = vpop.f32.mrb[14].mxu0 }
 0x105   : > { %v653_v37 = vadd.f32 %v11794_v35, %v14253_v57  ;;  %v647_v38 = vpop.f32.mrb[15].mxu0 }
 0x106   : > { %v648_v39 = vadd.f32 %v14253_v57, %v647_v38  ;;  %11853 = vmatprep.mubr.msk.f32.mxu1 %vm781_vm1, %v748_v34 }
 0x107   : > { %11854 = vmatmul.mubr.msk.f32.gmra.mrb[12].mxu1 %vm781_vm1, %v749_v36  ;;  %v751_v42 = vmax.f32 %v653_v37, 0.0 }
 0x108   : > { %v750_v40 = vmax.f32 %v648_v39, 0.0  ;;  %v11797_v41 = vpop.f32.mrb[16].mxu0 }
 0x109   : > { %v663_v43 = vadd.f32 %v11797_v41, %v14253_v57  ;;  %v657_v44 = vpop.f32.mrb[17].mxu0 }
 0x10a   : > { %v658_v45 = vadd.f32 %v14253_v57, %v657_v44  ;;  %11856 = vmatprep.mubr.msk.f32.mxu1 %vm781_vm1, %v750_v40 }
 0x10b   : > { %11857 = vmatmul.mubr.msk.f32.gmra.mrb[14].mxu1 %vm781_vm1, %v751_v42  ;;  %v753_v48 = vmax.f32 %v663_v43, 0.0 }
 0x10c   : > { %v752_v46 = vmax.f32 %v658_v45, 0.0  ;;  %v11800_v47 = vpop.f32.mrb[18].mxu0 }
 0x10d   : > { %v673_v49 = vadd.f32 %v11800_v47, %v14253_v57  ;;  %v667_v50 = vpop.f32.mrb[19].mxu0 }
 0x10e   : > { %v668_v51 = vadd.f32 %v14253_v57, %v667_v50  ;;  %11859 = vmatprep.mubr.msk.f32.mxu1 %vm781_vm1, %v752_v46 }
 0x10f   : > { %11860 = vmatmul.mubr.msk.f32.gmra.mrb[16].mxu1 %vm781_vm1, %v753_v48  ;;  %v755_v54 = vmax.f32 %v673_v49, 0.0 }
 0x110   : > { %v754_v52 = vmax.f32 %v668_v51, 0.0  ;;  %v11803_v53 = vpop.f32.mrb[20].mxu0 }
 0x111   : > { %v683_v55 = vadd.f32 %v11803_v53, %v14253_v57  ;;  %v677_v56 = vpop.f32.mrb[21].mxu0 }
 0x112   : > { %v678_v58 = vadd.f32 %v14253_v57, %v677_v56  ;;  %11862 = vmatprep.mubr.msk.f32.mxu1 %vm781_vm1, %v754_v52 }
 0x113   : > { %11863 = vmatmul.mubr.msk.f32.gmra.mrb[18].mxu1 %vm781_vm1, %v755_v54  ;;  %v757_v61 = vmax.f32 %v683_v55, 0.0 }
 0x114   : > { %v756_v59 = vmax.f32 %v678_v58, 0.0  ;;  %v11806_v60 = vpop.f32.mrb[22].mxu0 }
 0x115   : > { %v693_v62 = vadd.f32 %v11806_v60, %v14253_v57  ;;  %v687_v63 = vpop.f32.mrb[23].mxu0 }
 0x116   : > { %v688_v0 = vadd.f32 %v14253_v57, %v687_v63  ;;  %11865 = vmatprep.mubr.msk.f32.mxu1 %vm781_vm1, %v756_v59 }
 0x117   : > { %11866 = vmatmul.mubr.msk.f32.gmra.mrb[20].mxu1 %vm781_vm1, %v757_v61  ;;  %v759_v3 = vmax.f32 %v693_v62, 0.0 }
 0x118   : > { %v758_v1 = vmax.f32 %v688_v0, 0.0  ;;  %v11809_v2 = vpop.f32.mrb[24].mxu0 }
 0x119   : > { %v703_v4 = vadd.f32 %v11809_v2, %v14253_v57  ;;  %v697_v5 = vpop.f32.mrb[25].mxu0 }
 0x11a   : > { %v698_v6 = vadd.f32 %v14253_v57, %v697_v5  ;;  %11868 = vmatprep.mubr.msk.f32.mxu1 %vm781_vm1, %v758_v1 }
 0x11b   : > { %11869 = vmatmul.mubr.msk.f32.gmra.mrb[22].mxu1 %vm781_vm1, %v759_v3  ;;  %v761_v9 = vmax.f32 %v703_v4, 0.0 }
 0x11c   : > { %v760_v7 = vmax.f32 %v698_v6, 0.0  ;;  %v11812_v8 = vpop.f32.mrb[26].mxu0 }
 0x11d   : > { %v713_v10 = vadd.f32 %v11812_v8, %v14253_v57  ;;  %v707_v11 = vpop.f32.mrb[27].mxu0 }
 0x11e   : > { %v708_v12 = vadd.f32 %v14253_v57, %v707_v11  ;;  %11871 = vmatprep.mubr.msk.f32.mxu1 %vm781_vm1, %v760_v7 }
 0x11f   : > { %11872 = vmatmul.mubr.msk.f32.gmra.mrb[24].mxu1 %vm781_vm1, %v761_v9  ;;  %v763_v15 = vmax.f32 %v713_v10, 0.0 }
 0x120   : > { %v762_v13 = vmax.f32 %v708_v12, 0.0  ;;  %v11815_v14 = vpop.f32.mrb[28].mxu0 }
 0x121   : > { %v723_v16 = vadd.f32 %v11815_v14, %v14253_v57  ;;  %v717_v17 = vpop.f32.mrb[29].mxu0 }
 0x122   : > { %v718_v18 = vadd.f32 %v14253_v57, %v717_v17  ;;  %11874 = vmatprep.mubr.msk.f32.mxu1 %vm781_vm1, %v762_v13 }
 0x123   : > { %11875 = vmatmul.mubr.msk.f32.gmra.mrb[26].mxu1 %vm781_vm1, %v763_v15  ;;  %v765_v21 = vmax.f32 %v723_v16, 0.0 }
 0x124   : > { %v764_v19 = vmax.f32 %v718_v18, 0.0  ;;  %v11818_v20 = vpop.f32.mrb[30].mxu0 }
 0x125   : > { %v733_v22 = vadd.f32 %v11818_v20, %v14253_v57  ;;  %v727_v23 = vpop.f32.mrb[31].mxu0 }
 0x126   : > { %v728_v24 = vadd.f32 %v14253_v57, %v727_v23  ;;  %11877 = vmatprep.mubr.msk.f32.mxu1 %vm781_vm1, %v764_v19 }
 0x127   : > { %11878 = vmatmul.mubr.msk.f32.gmra.mrb[28].mxu1 %vm781_vm1, %v765_v21  ;;  %v767_v26 = vmax.f32 %v733_v22, 0.0 }
 0x128   : > { %v766_v25 = vmax.f32 %v728_v24, 0.0 }
 0x12a   : > { %11880 = vmatprep.mubr.msk.f32.mxu1 %vm781_vm1, %v766_v25 }
 0x12b   : > { %11881 = vmatmul.mubr.msk.f32.gmra.mrb[30].mxu1 %vm781_vm1, %v767_v26 }
 0x1c2   : > { %v11837_v28 = vpop.f32.mrb[0].mxu1 }
 0x1c3   : > { %v950_v29 = vadd.f32 %v11837_v28, %v14322_v27  ;;  %v944_v30 = vpop.f32.mrb[1].mxu1 }
 0x1c4   : > { %v945_v57 = vadd.f32 %v14322_v27, %v944_v30 }
 0x1c5   : > { %v1104_v33 = vmax.f32 %v950_v29, 0.0 }
 0x1c6   : > { %v1103_v31 = vmax.f32 %v945_v57, 0.0  ;;  %v11840_v32 = vpop.f32.mrb[2].mxu1 }
 0x1c7   : > { %v960_v34 = vadd.f32 %v11840_v32, %v14322_v27  ;;  %v954_v35 = vpop.f32.mrb[3].mxu1 }
 0x1c8   : > { %v955_v36 = vadd.f32 %v14322_v27, %v954_v35  ;;  %11899 = vmatprep.mubr.msk.f32.mxu0 %vm781_vm1, %v1103_v31 }
 0x1c9   : > { %11900 = vmatmul.mubr.msk.f32.vlgmr.msra.gmra.mrb[32].mxu0 %vm781_vm1, %v1104_v33  ;;  %v1106_v39 = vmax.f32 %v960_v34, 0.0 }
 0x1ca   : > { %v1105_v37 = vmax.f32 %v955_v36, 0.0  ;;  %v11843_v38 = vpop.f32.mrb[4].mxu1 }
 0x1cb   : > { %v970_v40 = vadd.f32 %v11843_v38, %v14322_v27  ;;  %v964_v41 = vpop.f32.mrb[5].mxu1 }
 0x1cc   : > { %v965_v42 = vadd.f32 %v14322_v27, %v964_v41  ;;  %11902 = vmatprep.mubr.msk.f32.mxu0 %vm781_vm1, %v1105_v37 }
 0x1cd   : > { %11903 = vmatmul.mubr.msk.f32.gmra.mrb[34].mxu0 %vm781_vm1, %v1106_v39  ;;  %v1108_v45 = vmax.f32 %v970_v40, 0.0 }
 0x1ce   : > { %v1107_v43 = vmax.f32 %v965_v42, 0.0  ;;  %v11846_v44 = vpop.f32.mrb[6].mxu1 }
 0x1cf   : > { %v980_v46 = vadd.f32 %v11846_v44, %v14322_v27  ;;  %v974_v47 = vpop.f32.mrb[7].mxu1 }
 0x1d0   : > { %v975_v48 = vadd.f32 %v14322_v27, %v974_v47  ;;  %11905 = vmatprep.mubr.msk.f32.mxu0 %vm781_vm1, %v1107_v43 }
 0x1d1   : > { %11906 = vmatmul.mubr.msk.f32.gmra.mrb[36].mxu0 %vm781_vm1, %v1108_v45  ;;  %v1110_v51 = vmax.f32 %v980_v46, 0.0 }
 0x1d2   : > { %v1109_v49 = vmax.f32 %v975_v48, 0.0  ;;  %v11849_v50 = vpop.f32.mrb[8].mxu1 }
 0x1d3   : > { %v990_v52 = vadd.f32 %v11849_v50, %v14322_v27  ;;  %v984_v53 = vpop.f32.mrb[9].mxu1 }
 0x1d4   : > { %v985_v54 = vadd.f32 %v14322_v27, %v984_v53  ;;  %11908 = vmatprep.mubr.msk.f32.mxu0 %vm781_vm1, %v1109_v49 }
 0x1d5   : > { %11909 = vmatmul.mubr.msk.f32.gmra.mrb[38].mxu0 %vm781_vm1, %v1110_v51  ;;  %v1112_v58 = vmax.f32 %v990_v52, 0.0 }
 0x1d6   : > { %v1111_v55 = vmax.f32 %v985_v54, 0.0  ;;  %v11852_v56 = vpop.f32.mrb[10].mxu1 }
 0x1d7   : > { %v1000_v59 = vadd.f32 %v11852_v56, %v14322_v27  ;;  %v994_v60 = vpop.f32.mrb[11].mxu1 }
 0x1d8   : > { %v995_v61 = vadd.f32 %v14322_v27, %v994_v60  ;;  %11911 = vmatprep.mubr.msk.f32.mxu0 %vm781_vm1, %v1111_v55 }
 0x1d9   : > { %11912 = vmatmul.mubr.msk.f32.gmra.mrb[40].mxu0 %vm781_vm1, %v1112_v58  ;;  %v1114_v0 = vmax.f32 %v1000_v59, 0.0 }
 0x1da   : > { %v1113_v62 = vmax.f32 %v995_v61, 0.0  ;;  %v11855_v63 = vpop.f32.mrb[12].mxu1  ;;  %v18675_v61 = vmov 0.0|0.0  }
 0x1db   : > { %v1010_v1 = vadd.f32 %v11855_v63, %v14322_v27  ;;  %v1004_v2 = vpop.f32.mrb[13].mxu1  ;;  %12692 = vmatprep.subr.bf16.mxu1 %v18675_v61 }
 0x1dc   : > { %v1005_v3 = vadd.f32 %v14322_v27, %v1004_v2  ;;  %11914 = vmatprep.mubr.msk.f32.mxu0 %vm781_vm1, %v1113_v62  ;;  %v14399_v62 = vld [vmem:[%s18669_s3 + $0x98] ss:$0 sm:$0xff] }
 0x1dd   : > { %11915 = vmatmul.mubr.msk.f32.gmra.mrb[42].mxu0 %vm781_vm1, %v1114_v0  ;;  %v1116_v6 = vmax.f32 %v1010_v1, 0.0 }
 0x1de   : > { %v1115_v4 = vmax.f32 %v1005_v3, 0.0  ;;  %v11858_v5 = vpop.f32.mrb[14].mxu1 }
 0x1df   : > { %v1020_v7 = vadd.f32 %v11858_v5, %v14322_v27  ;;  %v1014_v8 = vpop.f32.mrb[15].mxu1 }
 0x1e0   : > { %v1015_v9 = vadd.f32 %v14322_v27, %v1014_v8  ;;  %11917 = vmatprep.mubr.msk.f32.mxu0 %vm781_vm1, %v1115_v4 }
 0x1e1   : > { %11918 = vmatmul.mubr.msk.f32.gmra.mrb[44].mxu0 %vm781_vm1, %v1116_v6  ;;  %v1118_v12 = vmax.f32 %v1020_v7, 0.0 }
 0x1e2   : > { %v1117_v10 = vmax.f32 %v1015_v9, 0.0  ;;  %v11861_v11 = vpop.f32.mrb[16].mxu1 }
 0x1e3   : > { %v1030_v13 = vadd.f32 %v11861_v11, %v14322_v27  ;;  %v1024_v14 = vpop.f32.mrb[17].mxu1 }
 0x1e4   : > { %v1025_v15 = vadd.f32 %v14322_v27, %v1024_v14  ;;  %11920 = vmatprep.mubr.msk.f32.mxu0 %vm781_vm1, %v1117_v10 }
 0x1e5   : > { %11921 = vmatmul.mubr.msk.f32.gmra.mrb[46].mxu0 %vm781_vm1, %v1118_v12  ;;  %v1120_v18 = vmax.f32 %v1030_v13, 0.0 }
 0x1e6   : > { %v1119_v16 = vmax.f32 %v1025_v15, 0.0  ;;  %v11864_v17 = vpop.f32.mrb[18].mxu1 }
 0x1e7   : > { %v1040_v19 = vadd.f32 %v11864_v17, %v14322_v27  ;;  %v1034_v20 = vpop.f32.mrb[19].mxu1 }
 0x1e8   : > { %v1035_v21 = vadd.f32 %v14322_v27, %v1034_v20  ;;  %11923 = vmatprep.mubr.msk.f32.mxu0 %vm781_vm1, %v1119_v16 }
 0x1e9   : > { %11924 = vmatmul.mubr.msk.f32.gmra.mrb[48].mxu0 %vm781_vm1, %v1120_v18  ;;  %v1122_v24 = vmax.f32 %v1040_v19, 0.0 }
 0x1ea   : > { %v1121_v22 = vmax.f32 %v1035_v21, 0.0  ;;  %v11867_v23 = vpop.f32.mrb[20].mxu1 }
 0x1eb   : > { %v1050_v25 = vadd.f32 %v11867_v23, %v14322_v27  ;;  %v1044_v26 = vpop.f32.mrb[21].mxu1 }
 0x1ec   : > { %v1045_v28 = vadd.f32 %v14322_v27, %v1044_v26  ;;  %11926 = vmatprep.mubr.msk.f32.mxu0 %vm781_vm1, %v1121_v22 }
 0x1ed   : > { %11927 = vmatmul.mubr.msk.f32.gmra.mrb[50].mxu0 %vm781_vm1, %v1122_v24  ;;  %v1124_v57 = vmax.f32 %v1050_v25, 0.0 }
 0x1ee   : > { %v1123_v29 = vmax.f32 %v1045_v28, 0.0  ;;  %v11870_v30 = vpop.f32.mrb[22].mxu1 }
 0x1ef   : > { %v1060_v31 = vadd.f32 %v11870_v30, %v14322_v27  ;;  %v1054_v32 = vpop.f32.mrb[23].mxu1 }
 0x1f0   : > { %v1055_v33 = vadd.f32 %v14322_v27, %v1054_v32  ;;  %11929 = vmatprep.mubr.msk.f32.mxu0 %vm781_vm1, %v1123_v29 }
 0x1f1   : > { %11930 = vmatmul.mubr.msk.f32.gmra.mrb[52].mxu0 %vm781_vm1, %v1124_v57  ;;  %v1126_v36 = vmax.f32 %v1060_v31, 0.0 }
 0x1f2   : > { %v1125_v34 = vmax.f32 %v1055_v33, 0.0  ;;  %v11873_v35 = vpop.f32.mrb[24].mxu1 }
 0x1f3   : > { %v1070_v37 = vadd.f32 %v11873_v35, %v14322_v27  ;;  %v1064_v38 = vpop.f32.mrb[25].mxu1 }
 0x1f4   : > { %v1065_v39 = vadd.f32 %v14322_v27, %v1064_v38  ;;  %11932 = vmatprep.mubr.msk.f32.mxu0 %vm781_vm1, %v1125_v34 }
 0x1f5   : > { %11933 = vmatmul.mubr.msk.f32.gmra.mrb[54].mxu0 %vm781_vm1, %v1126_v36  ;;  %v1128_v42 = vmax.f32 %v1070_v37, 0.0 }
 0x1f6   : > { %v1127_v40 = vmax.f32 %v1065_v39, 0.0  ;;  %v11876_v41 = vpop.f32.mrb[26].mxu1 }
 0x1f7   : > { %v1080_v43 = vadd.f32 %v11876_v41, %v14322_v27  ;;  %v1074_v44 = vpop.f32.mrb[27].mxu1 }
 0x1f8   : > { %v1075_v45 = vadd.f32 %v14322_v27, %v1074_v44  ;;  %11935 = vmatprep.mubr.msk.f32.mxu0 %vm781_vm1, %v1127_v40 }
 0x1f9   : > { %11936 = vmatmul.mubr.msk.f32.gmra.mrb[56].mxu0 %vm781_vm1, %v1128_v42  ;;  %v1130_v48 = vmax.f32 %v1080_v43, 0.0 }
 0x1fa   : > { %v1129_v46 = vmax.f32 %v1075_v45, 0.0  ;;  %v11879_v47 = vpop.f32.mrb[28].mxu1 }
 0x1fb   : > { %v1090_v49 = vadd.f32 %v11879_v47, %v14322_v27  ;;  %v1084_v50 = vpop.f32.mrb[29].mxu1 }
 0x1fc   : > { %v1085_v51 = vadd.f32 %v14322_v27, %v1084_v50  ;;  %11938 = vmatprep.mubr.msk.f32.mxu0 %vm781_vm1, %v1129_v46 }
 0x1fd   : > { %11939 = vmatmul.mubr.msk.f32.gmra.mrb[58].mxu0 %vm781_vm1, %v1130_v48  ;;  %v1132_v54 = vmax.f32 %v1090_v49, 0.0 }
 0x1fe   : > { %v1131_v52 = vmax.f32 %v1085_v51, 0.0  ;;  %v11882_v53 = vpop.f32.mrb[30].mxu1 }
 0x1ff   : > { %v1100_v55 = vadd.f32 %v11882_v53, %v14322_v27  ;;  %v1094_v56 = vpop.f32.mrb[31].mxu1 }
 0x200   : > { %v1095_v58 = vadd.f32 %v14322_v27, %v1094_v56  ;;  %11941 = vmatprep.mubr.msk.f32.mxu0 %vm781_vm1, %v1131_v52  ;;  %v313_v27 = vld [vmem:[%s14393_s28 + $0x8] sm:$0xff] }
 0x201   : > { %11942 = vmatmul.mubr.msk.f32.gmra.mrb[60].mxu0 %vm781_vm1, %v1132_v54  ;;  %v1134_v60 = vmax.f32 %v1100_v55, 0.0  ;;  %1533 = vmatprep.mubr.f32.mxu1 %v313_v27 }
 0x202   : > { %v1133_v59 = vmax.f32 %v1095_v58, 0.0 }
 0x204   : > { %11944 = vmatprep.mubr.msk.f32.mxu0 %vm781_vm1, %v1133_v59 }
 0x205   : > { %11945 = vmatmul.mubr.msk.f32.gmra.mrb[62].mxu0 %vm781_vm1, %v1134_v60 }
 0x29c   : > { %v11901_v63 = vpop.f32.mrb[32].mxu0 }
 0x29d   : > { %v14402_v0 = vadd.f32 %v11901_v63, %v14399_v62  ;;  %v1310_v1 = vpop.f32.mrb[33].mxu0 }
 0x29e   : > { %v14405_v2 = vadd.f32 %v14399_v62, %v1310_v1 }
 0x2a0   : > { %v11904_v3 = vpop.f32.mrb[34].mxu0  ;;  %v12693_v4 = vpack.c.bf16 %v14402_v0, %v14405_v2 }
 0x2a1   : > { %v14410_v5 = vadd.f32 %v11904_v3, %v14399_v62  ;;  %v1320_v6 = vpop.f32.mrb[35].mxu0 }
 0x2a2   : > { %v14413_v7 = vadd.f32 %v14399_v62, %v1320_v6  ;;  %12694 = vmatpush1.bf16.msra.mxu1 %v12693_v4 }
 0x2a3   : > { %12695 = vmatprep.subr.bf16.mxu1 %v18675_v61 }
 0x2a4   : > { %v11907_v8 = vpop.f32.mrb[36].mxu0  ;;  %v12696_v9 = vpack.c.bf16 %v14410_v5, %v14413_v7 }
 0x2a5   : > { %v14419_v10 = vadd.f32 %v11907_v8, %v14399_v62  ;;  %v1330_v11 = vpop.f32.mrb[37].mxu0 }
 0x2a6   : > { %v14422_v12 = vadd.f32 %v14399_v62, %v1330_v11  ;;  %12697 = vmatpush1.bf16.msra.mxu1 %v12696_v9 }
 0x2a7   : > { %12698 = vmatprep.subr.bf16.mxu1 %v18675_v61 }
 0x2a8   : > { %v11910_v13 = vpop.f32.mrb[38].mxu0  ;;  %v12699_v14 = vpack.c.bf16 %v14419_v10, %v14422_v12 }
 0x2a9   : > { %v14428_v15 = vadd.f32 %v11910_v13, %v14399_v62  ;;  %v1340_v16 = vpop.f32.mrb[39].mxu0 }
 0x2aa   : > { %v14431_v17 = vadd.f32 %v14399_v62, %v1340_v16  ;;  %12700 = vmatpush1.bf16.msra.mxu1 %v12699_v14 }
 0x2ab   : > { %12701 = vmatprep.subr.bf16.mxu1 %v18675_v61 }
 0x2ac   : > { %18796 = vst [vmem:[#allocation2_spill] sm:$0xff] %v14431_v17  ;;  %v11913_v18 = vpop.f32.mrb[40].mxu0  ;;  %v12702_v19 = vpack.c.bf16 %v14428_v15, %v14431_v17 }
 0x2ad   : > { %v14437_v20 = vadd.f32 %v11913_v18, %v14399_v62  ;;  %v1350_v21 = vpop.f32.mrb[41].mxu0 }
 0x2ae   : > { %v14440_v22 = vadd.f32 %v14399_v62, %v1350_v21  ;;  %12703 = vmatpush1.bf16.msra.mxu1 %v12702_v19 }
 0x2af   : > { %18797 = vst [vmem:[#allocation3_spill] sm:$0xff] %v14437_v20  ;;  %12704 = vmatprep.subr.bf16.mxu1 %v18675_v61 }
 0x2b0   : > { %18798 = vst [vmem:[#allocation4_spill] sm:$0xff] %v14440_v22  ;;  %v11916_v23 = vpop.f32.mrb[42].mxu0  ;;  %v12705_v24 = vpack.c.bf16 %v14437_v20, %v14440_v22 }
 0x2b1   : > { %v14446_v25 = vadd.f32 %v11916_v23, %v14399_v62  ;;  %v1360_v26 = vpop.f32.mrb[43].mxu0 }
 0x2b2   : > { %v14449_v28 = vadd.f32 %v14399_v62, %v1360_v26  ;;  %12706 = vmatpush1.bf16.msra.mxu1 %v12705_v24 }
 0x2b3   : > { %18799 = vst [vmem:[#allocation5_spill] sm:$0xff] %v14446_v25  ;;  %12707 = vmatprep.subr.bf16.mxu1 %v18675_v61 }
 0x2b4   : > { %18800 = vst [vmem:[#allocation6_spill] sm:$0xff] %v14449_v28  ;;  %v11919_v29 = vpop.f32.mrb[44].mxu0  ;;  %v12708_v30 = vpack.c.bf16 %v14446_v25, %v14449_v28 }
 0x2b5   : > { %v14455_v57 = vadd.f32 %v11919_v29, %v14399_v62  ;;  %v1370_v31 = vpop.f32.mrb[45].mxu0 }
 0x2b6   : > { %v14458_v32 = vadd.f32 %v14399_v62, %v1370_v31  ;;  %12709 = vmatpush1.bf16.msra.mxu1 %v12708_v30  ;;  %v312_v30 = vld [vmem:[%s14393_s28] sm:$0xff]  ;;  %v315_v31 = vld [vmem:[%s14393_s28 + $0x18] sm:$0xff] }
 0x2b7   : > { %18801 = vst [vmem:[#allocation7_spill] sm:$0xff] %v14455_v57  ;;  %12710 = vmatprep.subr.bf16.mxu1 %v18675_v61 }
 0x2b8   : > { %18802 = vst [vmem:[#allocation8_spill] sm:$0xff] %v14458_v32  ;;  %v11922_v33 = vpop.f32.mrb[46].mxu0  ;;  %v12711_v34 = vpack.c.bf16 %v14455_v57, %v14458_v32 }
 0x2b9   : > { %v14464_v35 = vadd.f32 %v11922_v33, %v14399_v62  ;;  %v1380_v36 = vpop.f32.mrb[47].mxu0  ;;  %v1711_v33 = vld [vmem:[%s18670_s4 + $0x88] sm:$0xff] }
 0x2ba   : > { %v14467_v37 = vadd.f32 %v14399_v62, %v1380_v36  ;;  %12712 = vmatpush1.bf16.msra.mxu1 %v12711_v34  ;;  %v1713_v34 = vld [vmem:[%s18670_s4 + $0x98] sm:$0xff] }
 0x2bb   : > { %18803 = vst [vmem:[#allocation9_spill] sm:$0xff] %v14464_v35  ;;  %12713 = vmatprep.subr.bf16.mxu1 %v18675_v61  ;;  %v12740_v36 = vpack.c.bf16 %v1713_v34, %v1711_v33  ;;  %v323_v33 = vld [vmem:[%s14393_s28 + $0x58] sm:$0xff]  ;;  %v322_v34 = vld [vmem:[%s14393_s28 + $0x50] sm:$0xff] }
 0x2bc   : > { %18804 = vst [vmem:[#allocation10_spill] sm:$0xff] %v14467_v37  ;;  %v11925_v38 = vpop.f32.mrb[48].mxu0  ;;  %v12714_v39 = vpack.c.bf16 %v14464_v35, %v14467_v37 }
 0x2bd   : > { %v14473_v40 = vadd.f32 %v11925_v38, %v14399_v62  ;;  %v1390_v41 = vpop.f32.mrb[49].mxu0  ;;  %v1712_v38 = vld [vmem:[%s18670_s4 + $0x90] sm:$0xff]  ;;  %12741 = vmatprep.subr.bf16.mxu0 %v12740_v36  ;;  %v324_v36 = vld [vmem:[%s14393_s28 + $0x60] sm:$0xff] }
 0x2be   : > { %v14476_v42 = vadd.f32 %v14399_v62, %v1390_v41  ;;  %12715 = vmatpush1.bf16.msra.mxu1 %v12714_v39  ;;  %v1715_v39 = vld [vmem:[%s18670_s4 + $0xa8] sm:$0xff]  ;;  %v1717_v41 = vld [vmem:[%s18670_s4 + $0xb8] sm:$0xff] }
 0x2bf   : > { %18805 = vst [vmem:[#allocation11_spill] sm:$0xff] %v14473_v40  ;;  %12716 = vmatprep.subr.bf16.mxu1 %v18675_v61 }
 0x2c0   : > { %18806 = vst [vmem:[#allocation12_spill] sm:$0xff] %v14476_v42  ;;  %v11928_v43 = vpop.f32.mrb[50].mxu0  ;;  %v12717_v44 = vpack.c.bf16 %v14473_v40, %v14476_v42 }
 0x2c1   : > { %v14482_v45 = vadd.f32 %v11928_v43, %v14399_v62  ;;  %v1400_v46 = vpop.f32.mrb[51].mxu0 }
 0x2c2   : > { %v14485_v47 = vadd.f32 %v14399_v62, %v1400_v46  ;;  %12718 = vmatpush1.bf16.msra.mxu1 %v12717_v44  ;;  %v12744_v44 = vpack.c.bf16 %v1717_v41, %v1715_v39  ;;  %v1714_v46 = vld [vmem:[%s18670_s4 + $0xa0] sm:$0xff]  ;;  %v326_v39 = vld [vmem:[%s14393_s28 + $0x70] sm:$0xff]  ;;  %v329_v41 = vld [vmem:[%s14393_s28 + $0x88] sm:$0xff] }
 0x2c3   : > { %18807 = vst [vmem:[#allocation13_spill] sm:$0xff] %v14482_v45  ;;  %12719 = vmatprep.subr.bf16.mxu1 %v18675_v61 }
 0x2c4   : > { %18808 = vst [vmem:[#allocation14_spill] sm:$0xff] %v14485_v47  ;;  %v11931_v48 = vpop.f32.mrb[52].mxu0  ;;  %v12720_v49 = vpack.c.bf16 %v14482_v45, %v14485_v47 }
 0x2c5   : > { %v14491_v50 = vadd.f32 %v11931_v48, %v14399_v62  ;;  %v1410_v51 = vpop.f32.mrb[53].mxu0  ;;  %v1716_v48 = vld [vmem:[%s18670_s4 + $0xb0] sm:$0xff] }
 0x2c6   : > { %v14494_v52 = vadd.f32 %v14399_v62, %v1410_v51  ;;  %12721 = vmatpush1.bf16.msra.mxu1 %v12720_v49  ;;  %v1719_v49 = vld [vmem:[%s18670_s4 + $0xc8] sm:$0xff]  ;;  %v1721_v51 = vld [vmem:[%s18670_s4 + $0xd8] sm:$0xff] }
 0x2c7   : > { %18809 = vst [vmem:[#allocation15_spill] sm:$0xff] %v14491_v50  ;;  %12722 = vmatprep.subr.bf16.mxu1 %v18675_v61 }
 0x2c8   : > { %18810 = vst [vmem:[#allocation16_spill] sm:$0xff] %v14494_v52  ;;  %v11934_v53 = vpop.f32.mrb[54].mxu0  ;;  %v12723_v54 = vpack.c.bf16 %v14491_v50, %v14494_v52 }
 0x2c9   : > { %v14500_v55 = vadd.f32 %v11934_v53, %v14399_v62  ;;  %v1420_v56 = vpop.f32.mrb[55].mxu0  ;;  %v12746_v53 = vpack.c.bf16 %v1716_v48, %v1714_v46  ;;  %v330_v46 = vld [vmem:[%s14393_s28 + $0x90] sm:$0xff]  ;;  %v333_v48 = vld [vmem:[%s14393_s28 + $0xa8] sm:$0xff] }
 0x2ca   : > { %v14503_v58 = vadd.f32 %v14399_v62, %v1420_v56  ;;  %12724 = vmatpush1.bf16.msra.mxu1 %v12723_v54  ;;  %v314_v54 = vld [vmem:[%s14393_s28 + $0x10] sm:$0xff]  ;;  %v12748_v56 = vpack.c.bf16 %v1721_v51, %v1719_v49  ;;  %v332_v49 = vld [vmem:[%s14393_s28 + $0xa0] sm:$0xff]  ;;  %v335_v51 = vld [vmem:[%s14393_s28 + $0xb8] sm:$0xff] }
 0x2cb   : > { %18811 = vst [vmem:[#allocation17_spill] sm:$0xff] %v14500_v55  ;;  %12725 = vmatprep.subr.bf16.mxu1 %v18675_v61 }
 0x2cc   : > { %18812 = vst [vmem:[#allocation18_spill] sm:$0xff] %v14503_v58  ;;  %v11937_v59 = vpop.f32.mrb[56].mxu0  ;;  %v12726_v60 = vpack.c.bf16 %v14500_v55, %v14503_v58 }
 0x2cd   : > { %v14509_v27 = vadd.f32 %v11937_v59, %v14399_v62  ;;  %v1430_v63 = vpop.f32.mrb[57].mxu0  ;;  %v1718_v59 = vld [vmem:[%s18670_s4 + $0xc0] sm:$0xff] }
 0x2ce   : > { %v14512_v1 = vadd.f32 %v14399_v62, %v1430_v63  ;;  %12727 = vmatpush1.bf16.msra.mxu1 %v12726_v60  ;;  %v1720_v60 = vld [vmem:[%s18670_s4 + $0xd0] sm:$0xff]  ;;  %v317_v63 = vld [vmem:[%s14393_s28 + $0x28] sm:$0xff] }
 0x2cf   : > { %18813 = vst [vmem:[#allocation19_spill] sm:$0xff] %v14509_v27  ;;  %12728 = vmatprep.subr.bf16.mxu1 %v18675_v61 }
 0x2d0   : > { %18814 = vst [vmem:[#allocation20_spill] sm:$0xff] %v14512_v1  ;;  %v11940_v3 = vpop.f32.mrb[58].mxu0  ;;  %v12729_v4 = vpack.c.bf16 %v14509_v27, %v14512_v1 }
 0x2d1   : > { %v14518_v6 = vadd.f32 %v11940_v3, %v14399_v62  ;;  %v1440_v8 = vpop.f32.mrb[59].mxu0  ;;  %v1723_v3 = vld [vmem:[%s18670_s4 + $0xe8] sm:$0xff] }
 0x2d2   : > { %v14521_v9 = vadd.f32 %v14399_v62, %v1440_v8  ;;  %12730 = vmatpush1.bf16.msra.mxu1 %v12729_v4  ;;  %v1725_v4 = vld [vmem:[%s18670_s4 + $0xf8] sm:$0xff]  ;;  %v12750_v8 = vpack.c.bf16 %v1720_v60, %v1718_v59  ;;  %v338_v60 = vld [vmem:[%s14393_s28 + $0xd0] sm:$0xff] }
 0x2d3   : > { %18815 = vst [vmem:[#allocation21_spill] sm:$0xff] %v14518_v6  ;;  %12731 = vmatprep.subr.bf16.mxu1 %v18675_v61  ;;  %v339_v59 = vld [vmem:[%s14393_s28 + $0xd8] sm:$0xff] }
 0x2d4   : > { %18816 = vst [vmem:[#allocation22_spill] sm:$0xff] %v14521_v9  ;;  %v11943_v11 = vpop.f32.mrb[60].mxu0  ;;  %v12732_v13 = vpack.c.bf16 %v14518_v6, %v14521_v9 }
 0x2d5   : > { %v14527_v14 = vadd.f32 %v11943_v11, %v14399_v62  ;;  %v1450_v16 = vpop.f32.mrb[61].mxu0  ;;  %v316_v11 = vld [vmem:[%s14393_s28 + $0x20] sm:$0xff] }
 0x2d6   : > { %v14530_v18 = vadd.f32 %v14399_v62, %v1450_v16  ;;  %12733 = vmatpush1.bf16.msra.mxu1 %v12732_v13  ;;  %v12752_v13 = vpack.c.bf16 %v1725_v4, %v1723_v3  ;;  %v1722_v16 = vld [vmem:[%s18670_s4 + $0xe0] sm:$0xff]  ;;  %v343_v4 = vld [vmem:[%s14393_s28 + $0xf8] sm:$0xff] }
 0x2d7   : > { %18817 = vst [vmem:[#allocation23_spill] sm:$0xff] %v14527_v14  ;;  %12734 = vmatprep.subr.bf16.mxu1 %v18675_v61  ;;  %v340_v3 = vld [vmem:[%s14393_s28 + $0xe0] sm:$0xff] }
 0x2d8   : > { %18818 = vst [vmem:[#allocation24_spill] sm:$0xff] %v14530_v18  ;;  %v11946_v19 = vpop.f32.mrb[62].mxu0  ;;  %v12735_v21 = vpack.c.bf16 %v14527_v14, %v14530_v18 }
 0x2d9   : > { %v14536_v23 = vadd.f32 %v11946_v19, %v14399_v62  ;;  %v1460_v24 = vpop.f32.mrb[63].mxu0  ;;  %v1724_v19 = vld [vmem:[%s18670_s4 + $0xf0] sm:$0xff] }
 0x2da   : > { %v14539_v26 = vadd.f32 %v14399_v62, %v1460_v24  ;;  %12736 = vmatpush1.bf16.msra.mxu1 %v12735_v21  ;;  %v1710_v62 = vld [vmem:[%s18670_s4 + $0x80] sm:$0xff]  ;;  %v319_v21 = vld [vmem:[%s14393_s28 + $0x38] sm:$0xff]  ;;  %v12754_v24 = vpack.c.bf16 %v1724_v19, %v1722_v16  ;;  %v346_v19 = vld [vmem:[%s14393_s28 + $0x110] sm:$0xff] }
 0x2db   : > { %18819 = vst [vmem:[#allocation25_spill] sm:$0xff] %v14536_v23  ;;  %12737 = vmatprep.subr.bf16.mxu1 %v18675_v61  ;;  %v12742_v43 = vpack.c.bf16 %v1712_v38, %v1710_v62  ;;  %v325_v62 = vld [vmem:[%s14393_s28 + $0x68] sm:$0xff]  ;;  %v327_v38 = vld [vmem:[%s14393_s28 + $0x78] sm:$0xff] }
 0x2dc   : > { %18820 = vst [vmem:[#allocation26_spill] sm:$0xff] %v14539_v26  ;;  %v12738_v29 = vpack.c.bf16 %v14536_v23, %v14539_v26  ;;  %v347_v16 = vld [vmem:[%s14393_s28 + $0x118] sm:$0xff] }
 0x2dd   : > { %12743 = vmatpush1.bf16.msra.mxu0 %v12742_v43  ;;  %v328_v43 = vld [vmem:[%s14393_s28 + $0x80] sm:$0xff] }
 0x2de   : > { %12739 = vmatpush1.bf16.msra.mxu1 %v12738_v29  ;;  %12745 = vmatprep.subr.bf16.mxu0 %v12744_v44  ;;  %v318_v29 = vld [vmem:[%s14393_s28 + $0x30] sm:$0xff]  ;;  %v331_v44 = vld [vmem:[%s14393_s28 + $0x98] sm:$0xff] }
 0x2df   : > { %12772 = vmatprep.subr.bf16.mxu1 %v18675_v61 }
 0x2e1   : > { %1534 = vmatmul.mubr.f32.vlgmr.msra.gmra.mrb[32].mxu1 %v312_v30  ;;  %12747 = vmatpush1.bf16.msra.mxu0 %v12746_v53  ;;  %v321_v30 = vld [vmem:[%s14393_s28 + $0x48] sm:$0xff]  ;;  %v334_v53 = vld [vmem:[%s14393_s28 + $0xb0] sm:$0xff] }
 0x2e2   : > { %1538 = vmatprep.mubr.f32.mxu1 %v315_v31  ;;  %12749 = vmatprep.subr.bf16.mxu0 %v12748_v56  ;;  %v320_v31 = vld [vmem:[%s14393_s28 + $0x40] sm:$0xff] }
 0x2e3   : > { %v336_v56 = vld [vmem:[%s14393_s28 + $0xc0] sm:$0xff] }
 0x2e5   : > { %1539 = vmatmul.mubr.f32.gmra.mrb[34].mxu1 %v314_v54  ;;  %12751 = vmatpush1.bf16.msra.mxu0 %v12750_v8  ;;  %v337_v54 = vld [vmem:[%s14393_s28 + $0xc8] sm:$0xff]  ;;  %v342_v8 = vld [vmem:[%s14393_s28 + $0xf0] sm:$0xff] }
 0x2e6   : > { %1543 = vmatprep.mubr.f32.mxu1 %v317_v63  ;;  %12753 = vmatprep.subr.bf16.mxu0 %v12752_v13  ;;  %v341_v63 = vld [vmem:[%s14393_s28 + $0xe8] sm:$0xff]  ;;  %v344_v13 = vld [vmem:[%s14393_s28 + $0x100] sm:$0xff] }
 0x2e9   : > { %1544 = vmatmul.mubr.f32.gmra.mrb[36].mxu1 %v316_v11  ;;  %12755 = vmatpush1.bf16.msra.mxu0 %v12754_v24  ;;  %v345_v11 = vld [vmem:[%s14393_s28 + $0x108] sm:$0xff]  ;;  %v348_v24 = vld [vmem:[%s14393_s28 + $0x120] sm:$0xff] }
 0x2ea   : > { %1548 = vmatprep.mubr.f32.mxu1 %v319_v21  ;;  %v349_v21 = vld [vmem:[%s14393_s28 + $0x128] sm:$0xff] }
 0x2ed   : > { %1549 = vmatmul.mubr.f32.gmra.mrb[38].mxu1 %v318_v29  ;;  %v351_v29 = vld [vmem:[%s14393_s28 + $0x138] sm:$0xff] }
 0x2ee   : > { %1553 = vmatprep.mubr.f32.mxu1 %v321_v30  ;;  %v350_v30 = vld [vmem:[%s14393_s28 + $0x130] sm:$0xff] }
 0x2f1   : > { %1554 = vmatmul.mubr.f32.gmra.mrb[40].mxu1 %v320_v31  ;;  %v353_v31 = vld [vmem:[%s14393_s28 + $0x148] sm:$0xff] }
 0x2f2   : > { %1558 = vmatprep.mubr.f32.mxu1 %v323_v33  ;;  %v352_v33 = vld [vmem:[%s14393_s28 + $0x140] sm:$0xff] }
 0x2f5   : > { %1559 = vmatmul.mubr.f32.gmra.mrb[42].mxu1 %v322_v34  ;;  %v355_v34 = vld [vmem:[%s14393_s28 + $0x158] sm:$0xff] }
 0x2f6   : > { %1563 = vmatprep.mubr.f32.mxu1 %v325_v62  ;;  %v354_v62 = vld [vmem:[%s14393_s28 + $0x150] sm:$0xff] }
 0x2f9   : > { %1564 = vmatmul.mubr.f32.gmra.mrb[44].mxu1 %v324_v36  ;;  %v357_v36 = vld [vmem:[%s14393_s28 + $0x168] sm:$0xff] }
 0x2fa   : > { %1568 = vmatprep.mubr.f32.mxu1 %v327_v38  ;;  %v18673_v38 = vmov 0.0  }
 0x2fb   : > { %1886 = vmatprep.mubr.f32.mxu0 %v18673_v38 }
 0x2fd   : > { %1569 = vmatmul.mubr.f32.gmra.mrb[46].mxu1 %v326_v39  ;;  %v356_v39 = vld [vmem:[%s14393_s28 + $0x160] sm:$0xff] }
 0x2fe   : > { %1573 = vmatprep.mubr.f32.mxu1 %v329_v41  ;;  %v359_v41 = vld [vmem:[%s14393_s28 + $0x178] sm:$0xff] }
 0x301   : > { %1574 = vmatmul.mubr.f32.gmra.mrb[48].mxu1 %v328_v43  ;;  %v1695_v43 = vld [vmem:[%s18670_s4 + $0x8] sm:$0xff] }
 0x302   : > { %1578 = vmatprep.mubr.f32.mxu1 %v331_v44  ;;  %v1697_v44 = vld [vmem:[%s18670_s4 + $0x18] sm:$0xff] }
 0x305   : > { %1579 = vmatmul.mubr.f32.gmra.mrb[50].mxu1 %v330_v46  ;;  %v358_v46 = vld [vmem:[%s14393_s28 + $0x170] sm:$0xff] }
 0x306   : > { %1583 = vmatprep.mubr.f32.mxu1 %v333_v48  ;;  %v12756_v48 = vpack.c.bf16 %v1697_v44, %v1695_v43  ;;  %v1705_v43 = vld [vmem:[%s18670_s4 + $0x58] sm:$0xff] }
 0x308   : > { %12757 = vmatprep.subr.bf16.mxu0 %v12756_v48 }
 0x309   : > { %1584 = vmatmul.mubr.f32.gmra.mrb[52].mxu1 %v332_v49  ;;  %v361_v49 = vld [vmem:[%s14393_s28 + $0x188] sm:$0xff] }
 0x30a   : > { %1588 = vmatprep.mubr.f32.mxu1 %v335_v51  ;;  %v360_v51 = vld [vmem:[%s14393_s28 + $0x180] sm:$0xff] }
 0x30d   : > { %1589 = vmatmul.mubr.f32.gmra.mrb[54].mxu1 %v334_v53  ;;  %v363_v53 = vld [vmem:[%s14393_s28 + $0x198] sm:$0xff] }
 0x30e   : > { %1593 = vmatprep.mubr.f32.mxu1 %v337_v54  ;;  %v362_v54 = vld [vmem:[%s14393_s28 + $0x190] sm:$0xff] }
 0x311   : > { %1594 = vmatmul.mubr.f32.gmra.mrb[56].mxu1 %v336_v56  ;;  %v365_v56 = vld [vmem:[%s14393_s28 + $0x1a8] sm:$0xff] }
 0x312   : > { %1598 = vmatprep.mubr.f32.mxu1 %v339_v59  ;;  %v364_v59 = vld [vmem:[%s14393_s28 + $0x1a0] sm:$0xff] }
 0x315   : > { %1599 = vmatmul.mubr.f32.gmra.mrb[58].mxu1 %v338_v60  ;;  %v367_v60 = vld [vmem:[%s14393_s28 + $0x1b8] sm:$0xff] }
 0x316   : > { %1603 = vmatprep.mubr.f32.mxu1 %v341_v63  ;;  %v366_v63 = vld [vmem:[%s14393_s28 + $0x1b0] sm:$0xff] }
 0x319   : > { %1604 = vmatmul.mubr.f32.gmra.mrb[60].mxu1 %v340_v3  ;;  %v369_v3 = vld [vmem:[%s14393_s28 + $0x1c8] sm:$0xff] }
 0x31a   : > { %1608 = vmatprep.mubr.f32.mxu1 %v343_v4  ;;  %v368_v4 = vld [vmem:[%s14393_s28 + $0x1c0] sm:$0xff] }
 0x31d   : > { %1609 = vmatmul.mubr.f32.gmra.mrb[62].mxu1 %v342_v8  ;;  %v371_v8 = vld [vmem:[%s14393_s28 + $0x1d8] sm:$0xff] }
 0x31e   : > { %1613 = vmatprep.mubr.f32.mxu1 %v345_v11  ;;  %v370_v11 = vld [vmem:[%s14393_s28 + $0x1d0] sm:$0xff] }
 0x321   : > { %1614 = vmatmul.mubr.f32.gmra.mrb[64].mxu1 %v344_v13  ;;  %v373_v13 = vld [vmem:[%s14393_s28 + $0x1e8] sm:$0xff] }
 0x322   : > { %1618 = vmatprep.mubr.f32.mxu1 %v347_v16  ;;  %v372_v16 = vld [vmem:[%s14393_s28 + $0x1e0] sm:$0xff] }
 0x325   : > { %1619 = vmatmul.mubr.f32.gmra.mrb[66].mxu1 %v346_v19  ;;  %v375_v19 = vld [vmem:[%s14393_s28 + $0x1f8] sm:$0xff] }
 0x326   : > { %1623 = vmatprep.mubr.f32.mxu1 %v349_v21  ;;  %v374_v21 = vld [vmem:[%s14393_s28 + $0x1f0] sm:$0xff] }
 0x329   : > { %1624 = vmatmul.mubr.f32.gmra.mrb[68].mxu1 %v348_v24  ;;  %v1694_v24 = vld [vmem:[%s18670_s4] sm:$0xff] }
 0x32a   : > { %1628 = vmatprep.mubr.f32.mxu1 %v351_v29  ;;  %v1696_v29 = vld [vmem:[%s18670_s4 + $0x10] sm:$0xff] }
 0x32d   : > { %1629 = vmatmul.mubr.f32.gmra.mrb[70].mxu1 %v350_v30  ;;  %v1699_v30 = vld [vmem:[%s18670_s4 + $0x28] sm:$0xff] }
 0x32e   : > { %1633 = vmatprep.mubr.f32.mxu1 %v353_v31  ;;  %v1701_v31 = vld [vmem:[%s18670_s4 + $0x38] sm:$0xff] }
 0x331   : > { %1634 = vmatmul.mubr.f32.gmra.mrb[72].mxu1 %v352_v33  ;;  %v12758_v33 = vpack.c.bf16 %v1696_v29, %v1694_v24 }
 0x332   : > { %1638 = vmatprep.mubr.f32.mxu1 %v355_v34  ;;  %v12760_v34 = vpack.c.bf16 %v1701_v31, %v1699_v30 }
 0x335   : > { %1639 = vmatmul.mubr.f32.gmra.mrb[74].mxu1 %v354_v62  ;;  %v1698_v62 = vld [vmem:[%s18670_s4 + $0x20] sm:$0xff] }
 0x336   : > { %1643 = vmatprep.mubr.f32.mxu1 %v357_v36  ;;  %v1700_v36 = vld [vmem:[%s18670_s4 + $0x30] sm:$0xff] }
 0x339   : > { %1644 = vmatmul.mubr.f32.gmra.mrb[76].mxu1 %v356_v39 }
 0x33a   : > { %1648 = vmatprep.mubr.f32.mxu1 %v359_v41  ;;  %v1703_v41 = vld [vmem:[%s18670_s4 + $0x48] sm:$0xff] }
 0x33b   : > { %v12764_v48 = vpack.c.bf16 %v1705_v43, %v1703_v41 }
 0x33d   : > { %1649 = vmatmul.mubr.f32.gmra.mrb[78].mxu1 %v358_v46  ;;  %v12762_v46 = vpack.c.bf16 %v1700_v36, %v1698_v62 }
 0x33e   : > { %1653 = vmatprep.mubr.f32.mxu1 %v361_v49  ;;  %v1702_v49 = vld [vmem:[%s18670_s4 + $0x40] sm:$0xff] }
 0x341   : > { %1654 = vmatmul.mubr.f32.gmra.mrb[80].mxu1 %v360_v51  ;;  %v1704_v51 = vld [vmem:[%s18670_s4 + $0x50] sm:$0xff] }
 0x342   : > { %1658 = vmatprep.mubr.f32.mxu1 %v363_v53 }
 0x345   : > { %1659 = vmatmul.mubr.f32.gmra.mrb[82].mxu1 %v362_v54  ;;  %v1707_v54 = vld [vmem:[%s18670_s4 + $0x68] sm:$0xff] }
 0x346   : > { %1663 = vmatprep.mubr.f32.mxu1 %v365_v56  ;;  %v1709_v56 = vld [vmem:[%s18670_s4 + $0x78] sm:$0xff] }
 0x349   : > { %1664 = vmatmul.mubr.f32.gmra.mrb[84].mxu1 %v364_v59 }
 0x34a   : > { %1668 = vmatprep.mubr.f32.mxu1 %v367_v60  ;;  %v12766_v60 = vpack.c.bf16 %v1704_v51, %v1702_v49 }
 0x34d   : > { %1669 = vmatmul.mubr.f32.gmra.mrb[86].mxu1 %v366_v63  ;;  %v12768_v63 = vpack.c.bf16 %v1709_v56, %v1707_v54 }
 0x34e   : > { %1673 = vmatprep.mubr.f32.mxu1 %v369_v3  ;;  %v1706_v3 = vld [vmem:[%s18670_s4 + $0x60] sm:$0xff] }
 0x351   : > { %1674 = vmatmul.mubr.f32.gmra.mrb[88].mxu1 %v368_v4  ;;  %v1708_v4 = vld [vmem:[%s18670_s4 + $0x70] sm:$0xff] }
 0x352   : > { %1678 = vmatprep.mubr.f32.mxu1 %v371_v8 }
 0x355   : > { %1679 = vmatmul.mubr.f32.gmra.mrb[90].mxu1 %v370_v11 }
 0x356   : > { %1683 = vmatprep.mubr.f32.mxu1 %v373_v13  ;;  %v12770_v13 = vpack.c.bf16 %v1708_v4, %v1706_v3 }
 0x359   : > { %1684 = vmatmul.mubr.f32.gmra.mrb[92].mxu1 %v372_v16 }
 0x35a   : > { %1688 = vmatprep.mubr.f32.mxu1 %v375_v19 }
 0x35d   : > { %1689 = vmatmul.mubr.f32.gmra.mrb[94].mxu1 %v374_v21 }
 0x3b4   : > { %v1535_v39 = vpop.f32.mrb[32].mxu1 }
 0x3b5   : > { %v1537_v44 = vpop.f32.mrb[33].mxu1  ;;  %10525 = vmatmul.mubr.msk.f32.vlgmr.msra.gmra.mrb[64].mxu0 %vm781_vm1, %v1535_v39 }
 0x3b6   : > { %1892 = vmatprep.mubr.f32.mxu0 %v18673_v38  ;;  %12759 = vmatpush1.bf16.msra.mxu0 %v12758_v33 }
 0x3b7   : > { %12761 = vmatprep.subr.bf16.mxu0 %v12760_v34 }
 0x3b8   : > { %v1540_v53 = vpop.f32.mrb[34].mxu1 }
 0x3b9   : > { %v1542_v59 = vpop.f32.mrb[35].mxu1  ;;  %10526 = vmatmul.mubr.msk.f32.gmra.mrb[66].mxu0 %vm781_vm1, %v1540_v53 }
 0x3ba   : > { %1898 = vmatprep.mubr.f32.mxu0 %v18673_v38  ;;  %12763 = vmatpush1.bf16.msra.mxu0 %v12762_v46 }
 0x3bb   : > { %12765 = vmatprep.subr.bf16.mxu0 %v12764_v48 }
 0x3bc   : > { %v1545_v8 = vpop.f32.mrb[36].mxu1 }
 0x3bd   : > { %v1547_v11 = vpop.f32.mrb[37].mxu1  ;;  %10527 = vmatmul.mubr.msk.f32.gmra.mrb[68].mxu0 %vm781_vm1, %v1545_v8 }
 0x3be   : > { %1904 = vmatprep.mubr.f32.mxu0 %v18673_v38  ;;  %12767 = vmatpush1.bf16.msra.mxu0 %v12766_v60 }
 0x3bf   : > { %12769 = vmatprep.subr.bf16.mxu0 %v12768_v63 }
 0x3c0   : > { %v1550_v16 = vpop.f32.mrb[38].mxu1 }
 0x3c1   : > { %v1552_v19 = vpop.f32.mrb[39].mxu1  ;;  %10528 = vmatmul.mubr.msk.f32.gmra.mrb[70].mxu0 %vm781_vm1, %v1550_v16 }
 0x3c2   : > { %1910 = vmatprep.mubr.f32.mxu0 %v18673_v38  ;;  %12771 = vmatpush1.bf16.msra.mxu0 %v12770_v13 }
 0x3c4   : > { %v1555_v21 = vpop.f32.mrb[40].mxu1 }
 0x3c5   : > { %v1557_v24 = vpop.f32.mrb[41].mxu1  ;;  %10529 = vmatmul.mubr.msk.f32.gmra.mrb[72].mxu0 %vm781_vm1, %v1555_v21 }
 0x3c6   : > { %1916 = vmatprep.mubr.f32.mxu0 %v18673_v38 }
 0x3c8   : > { %v1560_v29 = vpop.f32.mrb[42].mxu1 }
 0x3c9   : > { %v1562_v30 = vpop.f32.mrb[43].mxu1  ;;  %10530 = vmatmul.mubr.msk.f32.gmra.mrb[74].mxu0 %vm781_vm1, %v1560_v29 }
 0x3ca   : > { %1922 = vmatprep.mubr.f32.mxu0 %v18673_v38 }
 0x3cc   : > { %v1565_v31 = vpop.f32.mrb[44].mxu1 }
 0x3cd   : > { %v1567_v33 = vpop.f32.mrb[45].mxu1  ;;  %10531 = vmatmul.mubr.msk.f32.gmra.mrb[76].mxu0 %vm781_vm1, %v1565_v31 }
 0x3ce   : > { %1928 = vmatprep.mubr.f32.mxu0 %v18673_v38 }
 0x3d0   : > { %v1570_v34 = vpop.f32.mrb[46].mxu1 }
 0x3d1   : > { %v1572_v62 = vpop.f32.mrb[47].mxu1  ;;  %10532 = vmatmul.mubr.msk.f32.gmra.mrb[78].mxu0 %vm781_vm1, %v1570_v34 }
 0x3d2   : > { %1934 = vmatprep.mubr.f32.mxu0 %v18673_v38 }
 0x3d4   : > { %v1575_v36 = vpop.f32.mrb[48].mxu1 }
 0x3d5   : > { %v1577_v39 = vpop.f32.mrb[49].mxu1  ;;  %10533 = vmatmul.mubr.msk.f32.gmra.mrb[80].mxu0 %vm781_vm1, %v1575_v36 }
 0x3d6   : > { %1940 = vmatprep.mubr.f32.mxu0 %v18673_v38 }
 0x3d8   : > { %v1580_v41 = vpop.f32.mrb[50].mxu1 }
 0x3d9   : > { %v1582_v43 = vpop.f32.mrb[51].mxu1  ;;  %10534 = vmatmul.mubr.msk.f32.gmra.mrb[82].mxu0 %vm781_vm1, %v1580_v41  ;;  %v2573_v41 = vld [vmem:[%s18670_s4 + $0x110] sm:$0xff] }
 0x3da   : > { %1946 = vmatprep.mubr.f32.mxu0 %v18673_v38  ;;  %v2574_v43 = vld [vmem:[%s18670_s4 + $0x120] sm:$0xff] }
 0x3dc   : > { %v1585_v44 = vpop.f32.mrb[52].mxu1 }
 0x3dd   : > { %v1587_v46 = vpop.f32.mrb[53].mxu1  ;;  %10535 = vmatmul.mubr.msk.f32.gmra.mrb[84].mxu0 %vm781_vm1, %v1585_v44  ;;  %v12773_v44 = vpack.c.bf16 %v2574_v43, %v2573_v41  ;;  %v2583_v43 = vld [vmem:[%s18670_s4 + $0x1b0] sm:$0xff] }
 0x3de   : > { %1952 = vmatprep.mubr.f32.mxu0 %v18673_v38 }
 0x3df   : > { %12774 = vmatpush1.bf16.msra.mxu1 %v12773_v44  ;;  %v2584_v44 = vld [vmem:[%s18670_s4 + $0x1c0] sm:$0xff] }
 0x3e0   : > { %v1590_v48 = vpop.f32.mrb[54].mxu1  ;;  %12775 = vmatprep.subr.bf16.mxu1 %v18675_v61 }
 0x3e1   : > { %v1592_v49 = vpop.f32.mrb[55].mxu1  ;;  %10536 = vmatmul.mubr.msk.f32.gmra.mrb[86].mxu0 %vm781_vm1, %v1590_v48 }
 0x3e2   : > { %1958 = vmatprep.mubr.f32.mxu0 %v18673_v38 }
 0x3e4   : > { %v1595_v51 = vpop.f32.mrb[56].mxu1 }
 0x3e5   : > { %v1597_v53 = vpop.f32.mrb[57].mxu1  ;;  %10537 = vmatmul.mubr.msk.f32.gmra.mrb[88].mxu0 %vm781_vm1, %v1595_v51 }
 0x3e6   : > { %1964 = vmatprep.mubr.f32.mxu0 %v18673_v38 }
 0x3e8   : > { %v1600_v54 = vpop.f32.mrb[58].mxu1 }
 0x3e9   : > { %v1602_v56 = vpop.f32.mrb[59].mxu1  ;;  %10538 = vmatmul.mubr.msk.f32.gmra.mrb[90].mxu0 %vm781_vm1, %v1600_v54 }
 0x3ea   : > { %1970 = vmatprep.mubr.f32.mxu0 %v18673_v38  ;;  %v2575_v56 = vld [vmem:[%s18670_s4 + $0x130] sm:$0xff] }
 0x3ec   : > { %v1605_v59 = vpop.f32.mrb[60].mxu1 }
 0x3ed   : > { %v1607_v60 = vpop.f32.mrb[61].mxu1  ;;  %10539 = vmatmul.mubr.msk.f32.gmra.mrb[92].mxu0 %vm781_vm1, %v1605_v59  ;;  %v2576_v59 = vld [vmem:[%s18670_s4 + $0x140] sm:$0xff] }
 0x3ee   : > { %1976 = vmatprep.mubr.f32.mxu0 %v18673_v38  ;;  %v12776_v60 = vpack.c.bf16 %v2576_v59, %v2575_v56  ;;  %v2589_v59 = vld [vmem:[%s18670_s4 + $0x210] sm:$0xff] }
 0x3f0   : > { %v1610_v63 = vpop.f32.mrb[62].mxu1  ;;  %12777 = vmatpush1.bf16.msra.mxu1 %v12776_v60  ;;  %v2590_v60 = vld [vmem:[%s18670_s4 + $0x220] sm:$0xff] }
 0x3f1   : > { %v1612_v3 = vpop.f32.mrb[63].mxu1  ;;  %10540 = vmatmul.mubr.msk.f32.gmra.mrb[94].mxu0 %vm781_vm1, %v1610_v63  ;;  %12778 = vmatprep.subr.bf16.mxu1 %v18675_v61 }
 0x3f2   : > { %1982 = vmatprep.mubr.f32.mxu0 %v18673_v38 }
 0x3f4   : > { %v1615_v4 = vpop.f32.mrb[64].mxu1 }
 0x3f5   : > { %v1617_v8 = vpop.f32.mrb[65].mxu1  ;;  %10541 = vmatmul.mubr.msk.f32.gmra.mrb[96].mxu0 %vm781_vm1, %v1615_v4 }
 0x3f6   : > { %1988 = vmatprep.mubr.f32.mxu0 %v18673_v38 }
 0x3f8   : > { %v1620_v11 = vpop.f32.mrb[66].mxu1 }
 0x3f9   : > { %v1622_v13 = vpop.f32.mrb[67].mxu1  ;;  %10542 = vmatmul.mubr.msk.f32.gmra.mrb[98].mxu0 %vm781_vm1, %v1620_v11 }
 0x3fa   : > { %1994 = vmatprep.mubr.f32.mxu0 %v18673_v38 }
 0x3fc   : > { %v1625_v16 = vpop.f32.mrb[68].mxu1 }
 0x3fd   : > { %v1627_v19 = vpop.f32.mrb[69].mxu1  ;;  %10543 = vmatmul.mubr.msk.f32.gmra.mrb[100].mxu0 %vm781_vm1, %v1625_v16  ;;  %v2577_v16 = vld [vmem:[%s18670_s4 + $0x150] sm:$0xff] }
 0x3fe   : > { %2000 = vmatprep.mubr.f32.mxu0 %v18673_v38  ;;  %v2578_v19 = vld [vmem:[%s18670_s4 + $0x160] sm:$0xff] }
 0x400   : > { %v1630_v21 = vpop.f32.mrb[70].mxu1 }
 0x401   : > { %v1632_v24 = vpop.f32.mrb[71].mxu1  ;;  %10544 = vmatmul.mubr.msk.f32.gmra.mrb[102].mxu0 %vm781_vm1, %v1630_v21  ;;  %v12779_v21 = vpack.c.bf16 %v2578_v19, %v2577_v16  ;;  %v2595_v19 = vld [vmem:[%s18670_s4 + $0x270] sm:$0xff] }
 0x402   : > { %2006 = vmatprep.mubr.f32.mxu0 %v18673_v38 }
 0x403   : > { %12780 = vmatpush1.bf16.msra.mxu1 %v12779_v21  ;;  %v2596_v21 = vld [vmem:[%s18670_s4 + $0x280] sm:$0xff] }
 0x404   : > { %v1635_v29 = vpop.f32.mrb[72].mxu1  ;;  %12781 = vmatprep.subr.bf16.mxu1 %v18675_v61 }
 0x405   : > { %v1637_v30 = vpop.f32.mrb[73].mxu1  ;;  %10545 = vmatmul.mubr.msk.f32.gmra.mrb[104].mxu0 %vm781_vm1, %v1635_v29 }
 0x406   : > { %2012 = vmatprep.mubr.f32.mxu0 %v18673_v38 }
 0x408   : > { %v1640_v31 = vpop.f32.mrb[74].mxu1 }
 0x409   : > { %v1642_v33 = vpop.f32.mrb[75].mxu1  ;;  %10546 = vmatmul.mubr.msk.f32.gmra.mrb[106].mxu0 %vm781_vm1, %v1640_v31 }
 0x40a   : > { %2018 = vmatprep.mubr.f32.mxu0 %v18673_v38  ;;  %v2579_v33 = vld [vmem:[%s18670_s4 + $0x170] sm:$0xff] }
 0x40c   : > { %v1645_v34 = vpop.f32.mrb[76].mxu1 }
 0x40d   : > { %v1647_v62 = vpop.f32.mrb[77].mxu1  ;;  %10547 = vmatmul.mubr.msk.f32.gmra.mrb[108].mxu0 %vm781_vm1, %v1645_v34  ;;  %v2580_v34 = vld [vmem:[%s18670_s4 + $0x180] sm:$0xff] }
 0x40e   : > { %2024 = vmatprep.mubr.f32.mxu0 %v18673_v38  ;;  %v2581_v62 = vld [vmem:[%s18670_s4 + $0x190] sm:$0xff] }
 0x410   : > { %v1650_v36 = vpop.f32.mrb[78].mxu1 }
 0x411   : > { %v1652_v39 = vpop.f32.mrb[79].mxu1  ;;  %10548 = vmatmul.mubr.msk.f32.gmra.mrb[110].mxu0 %vm781_vm1, %v1650_v36  ;;  %v12782_v36 = vpack.c.bf16 %v2580_v34, %v2579_v33  ;;  %v10589_v33 = vld [vmem:[%s18670_s4 + $0x100] ss:$8 sm:$0x3] }
 0x412   : > { %2030 = vmatprep.mubr.f32.mxu0 %v18673_v38  ;;  %v2582_v39 = vld [vmem:[%s18670_s4 + $0x1a0] sm:$0xff] }
 0x413   : > { %12783 = vmatpush1.bf16.msra.mxu1 %v12782_v36  ;;  %v12785_v41 = vpack.c.bf16 %v2582_v39, %v2581_v62 }
 0x414   : > { %v1655_v46 = vpop.f32.mrb[80].mxu1  ;;  %12784 = vmatprep.subr.bf16.mxu1 %v18675_v61 }
 0x415   : > { %v1657_v48 = vpop.f32.mrb[81].mxu1  ;;  %10549 = vmatmul.mubr.msk.f32.gmra.mrb[112].mxu0 %vm781_vm1, %v1655_v46  ;;  %v12788_v46 = vpack.c.bf16 %v2584_v44, %v2583_v43 }
 0x416   : > { %2036 = vmatprep.mubr.f32.mxu0 %v18673_v38  ;;  %v2585_v48 = vld [vmem:[%s18670_s4 + $0x1d0] sm:$0xff] }
 0x417   : > { %12786 = vmatpush1.bf16.msra.mxu1 %v12785_v41 }
 0x418   : > { %v1660_v49 = vpop.f32.mrb[82].mxu1  ;;  %12787 = vmatprep.subr.bf16.mxu1 %v18675_v61 }
 0x419   : > { %v1662_v51 = vpop.f32.mrb[83].mxu1  ;;  %10550 = vmatmul.mubr.msk.f32.gmra.mrb[114].mxu0 %vm781_vm1, %v1660_v49  ;;  %v2586_v49 = vld [vmem:[%s18670_s4 + $0x1e0] sm:$0xff] }
 0x41a   : > { %2042 = vmatprep.mubr.f32.mxu0 %v18673_v38  ;;  %v12791_v51 = vpack.c.bf16 %v2586_v49, %v2585_v48  ;;  %v2952_v48 = vld [vmem:[%s18670_s4 + $0x2b0] sm:$0xff]  ;;  %v2953_v49 = vld [vmem:[%s18670_s4 + $0x2c0] sm:$0xff] }
 0x41b   : > { %12789 = vmatpush1.bf16.msra.mxu1 %v12788_v46  ;;  %v2951_v46 = vld [vmem:[%s18670_s4 + $0x2a0] sm:$0xff] }
 0x41c   : > { %v1665_v53 = vpop.f32.mrb[84].mxu1  ;;  %12790 = vmatprep.subr.bf16.mxu1 %v18675_v61 }
 0x41d   : > { %v1667_v54 = vpop.f32.mrb[85].mxu1  ;;  %10551 = vmatmul.mubr.msk.f32.gmra.mrb[116].mxu0 %vm781_vm1, %v1665_v53  ;;  %v2587_v53 = vld [vmem:[%s18670_s4 + $0x1f0] sm:$0xff] }
 0x41e   : > { %2048 = vmatprep.mubr.f32.mxu0 %v18673_v38  ;;  %v2588_v54 = vld [vmem:[%s18670_s4 + $0x200] sm:$0xff] }
 0x41f   : > { %12792 = vmatpush1.bf16.msra.mxu1 %v12791_v51  ;;  %v12794_v56 = vpack.c.bf16 %v2588_v54, %v2587_v53  ;;  %v12808_v54 = vpack.c.bf16 %v2952_v48, %v2951_v46 }
 0x420   : > { %v1670_v63 = vpop.f32.mrb[86].mxu1  ;;  %12793 = vmatprep.subr.bf16.mxu1 %v18675_v61 }
 0x421   : > { %v1672_v3 = vpop.f32.mrb[87].mxu1  ;;  %10552 = vmatmul.mubr.msk.f32.gmra.mrb[118].mxu0 %vm781_vm1, %v1670_v63  ;;  %v12797_v63 = vpack.c.bf16 %v2590_v60, %v2589_v59 }
 0x422   : > { %2054 = vmatprep.mubr.f32.mxu0 %v18673_v38  ;;  %v2591_v3 = vld [vmem:[%s18670_s4 + $0x230] sm:$0xff] }
 0x423   : > { %12795 = vmatpush1.bf16.msra.mxu1 %v12794_v56  ;;  %v2954_v56 = vld [vmem:[%s18670_s4 + $0x2d0] sm:$0xff] }
 0x424   : > { %v1675_v4 = vpop.f32.mrb[88].mxu1  ;;  %12796 = vmatprep.subr.bf16.mxu1 %v18675_v61 }
 0x425   : > { %v1677_v8 = vpop.f32.mrb[89].mxu1  ;;  %10553 = vmatmul.mubr.msk.f32.gmra.mrb[120].mxu0 %vm781_vm1, %v1675_v4  ;;  %v2592_v4 = vld [vmem:[%s18670_s4 + $0x240] sm:$0xff] }
 0x426   : > { %2060 = vmatprep.mubr.f32.mxu0 %v18673_v38  ;;  %v12800_v8 = vpack.c.bf16 %v2592_v4, %v2591_v3  ;;  %v12812_v3 = vpack.c.bf16 %v2954_v56, %v2953_v49 }
 0x427   : > { %12798 = vmatpush1.bf16.msra.mxu1 %v12797_v63 }
 0x428   : > { %v1680_v11 = vpop.f32.mrb[90].mxu1  ;;  %12799 = vmatprep.subr.bf16.mxu1 %v18675_v61 }
 0x429   : > { %v1682_v13 = vpop.f32.mrb[91].mxu1  ;;  %10554 = vmatmul.mubr.msk.f32.gmra.mrb[122].mxu0 %vm781_vm1, %v1680_v11  ;;  %v2593_v11 = vld [vmem:[%s18670_s4 + $0x250] sm:$0xff] }
 0x42a   : > { %2066 = vmatprep.mubr.f32.mxu0 %v18673_v38  ;;  %v2594_v13 = vld [vmem:[%s18670_s4 + $0x260] sm:$0xff] }
 0x42b   : > { %12801 = vmatpush1.bf16.msra.mxu1 %v12800_v8  ;;  %v12803_v16 = vpack.c.bf16 %v2594_v13, %v2593_v11  ;;  %v2955_v8 = vld [vmem:[%s18670_s4 + $0x2e0] sm:$0xff]  ;;  %v2956_v11 = vld [vmem:[%s18670_s4 + $0x2f0] sm:$0xff] }
 0x42c   : > { %v1685_v24 = vpop.f32.mrb[92].mxu1  ;;  %12802 = vmatprep.subr.bf16.mxu1 %v18675_v61 }
 0x42d   : > { %v1687_v29 = vpop.f32.mrb[93].mxu1  ;;  %10555 = vmatmul.mubr.msk.f32.gmra.mrb[124].mxu0 %vm781_vm1, %v1685_v24  ;;  %v12806_v24 = vpack.c.bf16 %v2596_v21, %v2595_v19 }
 0x42e   : > { %2072 = vmatprep.mubr.f32.mxu0 %v18673_v38  ;;  %v2435_v29 = vlaneseq }
 0x42f   : > { %12804 = vmatpush1.bf16.msra.mxu1 %v12803_v16 }
 0x430   : > { %v1690_v30 = vpop.f32.mrb[94].mxu1  ;;  %12805 = vmatprep.subr.bf16.mxu1 %v18675_v61 }
 0x431   : > { %v1692_v31 = vpop.f32.mrb[95].mxu1  ;;  %10556 = vmatmul.mubr.msk.f32.gmra.mrb[126].mxu0 %vm781_vm1, %v1690_v30  ;;  %v2436_v30 = vshrl.u32 %v2435_v29, 7  ;;  %v12816_v29 = vpack.c.bf16 %v2956_v11, %v2955_v8  ;;  %v2961_v11 = vld [vmem:[%s18670_s4 + $0x340] sm:$0xff] }
 0x432   : > { %2239 = vmatprep.mubr.f32.mxu0 %v18673_v38 }
 0x433   : > { %12807 = vmatpush1.bf16.msra.mxu1 %v12806_v24  ;;  %v14947_v31 = vsub.s32 0, %v2436_v30  ;;  %v14952_v34 = vsub.s32 1, %v2436_v30 }
 0x434   : > { %12809 = vmatprep.subr.bf16.mxu1 %v12808_v54 }
 0x435   : > { %10557 = vmatmul.mubr.msk.f32.vlgmr.msra.gmra.mrb[64].mxu0 %vm781_vm1, %v14405_v2  ;;  %v14955_v62 = vrot.slane %v10589_v33, %v14947_v31  ;;  %v14958_v36 = vrot.slane %v10589_v33, %v14952_v34  ;;  %v2957_v33 = vld [vmem:[%s18670_s4 + $0x300] sm:$0xff] }
 0x436   : > { %2245 = vmatprep.mubr.f32.mxu0 %v18673_v38 }
 0x439   : > { %10558 = vmatmul.mubr.msk.f32.gmra.mrb[66].mxu0 %vm781_vm1, %v14402_v0 }
 0x43a   : > { %2251 = vmatprep.mubr.f32.mxu0 %v18673_v38 }
 0x43d   : > { %10559 = vmatmul.mubr.msk.f32.gmra.mrb[68].mxu0 %vm781_vm1, %v14413_v7 }
 0x43e   : > { %2257 = vmatprep.mubr.f32.mxu0 %v18673_v38 }
 0x441   : > { %10560 = vmatmul.mubr.msk.f32.gmra.mrb[70].mxu0 %vm781_vm1, %v14410_v5 }
 0x442   : > { %2263 = vmatprep.mubr.f32.mxu0 %v18673_v38 }
 0x445   : > { %10561 = vmatmul.mubr.msk.f32.gmra.mrb[72].mxu0 %vm781_vm1, %v14422_v12 }
 0x446   : > { %2269 = vmatprep.mubr.f32.mxu0 %v18673_v38 }
 0x449   : > { %10562 = vmatmul.mubr.msk.f32.gmra.mrb[74].mxu0 %vm781_vm1, %v14419_v10 }
 0x44a   : > { %2275 = vmatprep.mubr.f32.mxu0 %v18673_v38 }
 0x44d   : > { %10563 = vmatmul.mubr.msk.f32.gmra.mrb[76].mxu0 %vm781_vm1, %v14431_v17 }
 0x44e   : > { %2281 = vmatprep.mubr.f32.mxu0 %v18673_v38 }
 0x451   : > { %10564 = vmatmul.mubr.msk.f32.gmra.mrb[78].mxu0 %vm781_vm1, %v14428_v15 }
 0x452   : > { %2287 = vmatprep.mubr.f32.mxu0 %v18673_v38 }
 0x455   : > { %10565 = vmatmul.mubr.msk.f32.gmra.mrb[80].mxu0 %vm781_vm1, %v14440_v22 }
 0x456   : > { %2293 = vmatprep.mubr.f32.mxu0 %v18673_v38 }
 0x459   : > { %10566 = vmatmul.mubr.msk.f32.gmra.mrb[82].mxu0 %vm781_vm1, %v14437_v20 }
 0x45a   : > { %2299 = vmatprep.mubr.f32.mxu0 %v18673_v38 }
 0x45d   : > { %10567 = vmatmul.mubr.msk.f32.gmra.mrb[84].mxu0 %vm781_vm1, %v14449_v28 }
 0x45e   : > { %2305 = vmatprep.mubr.f32.mxu0 %v18673_v38 }
 0x461   : > { %10568 = vmatmul.mubr.msk.f32.gmra.mrb[86].mxu0 %vm781_vm1, %v14446_v25 }
 0x462   : > { %2311 = vmatprep.mubr.f32.mxu0 %v18673_v38 }
 0x465   : > { %10569 = vmatmul.mubr.msk.f32.gmra.mrb[88].mxu0 %vm781_vm1, %v14458_v32 }
 0x466   : > { %2317 = vmatprep.mubr.f32.mxu0 %v18673_v38 }
 0x469   : > { %10570 = vmatmul.mubr.msk.f32.gmra.mrb[90].mxu0 %vm781_vm1, %v14455_v57 }
 0x46a   : > { %2323 = vmatprep.mubr.f32.mxu0 %v18673_v38 }
 0x46d   : > { %10571 = vmatmul.mubr.msk.f32.gmra.mrb[92].mxu0 %vm781_vm1, %v14467_v37 }
 0x46e   : > { %2329 = vmatprep.mubr.f32.mxu0 %v18673_v38 }
 0x471   : > { %10572 = vmatmul.mubr.msk.f32.gmra.mrb[94].mxu0 %vm781_vm1, %v14464_v35 }
 0x472   : > { %2335 = vmatprep.mubr.f32.mxu0 %v18673_v38 }
 0x475   : > { %10573 = vmatmul.mubr.msk.f32.gmra.mrb[96].mxu0 %vm781_vm1, %v14476_v42 }
 0x476   : > { %2341 = vmatprep.mubr.f32.mxu0 %v18673_v38 }
 0x479   : > { %10574 = vmatmul.mubr.msk.f32.gmra.mrb[98].mxu0 %vm781_vm1, %v14473_v40 }
 0x47a   : > { %2347 = vmatprep.mubr.f32.mxu0 %v18673_v38 }
 0x47d   : > { %10575 = vmatmul.mubr.msk.f32.gmra.mrb[100].mxu0 %vm781_vm1, %v14485_v47 }
 0x47e   : > { %2353 = vmatprep.mubr.f32.mxu0 %v18673_v38 }
 0x481   : > { %10576 = vmatmul.mubr.msk.f32.gmra.mrb[102].mxu0 %vm781_vm1, %v14482_v45 }
 0x482   : > { %2359 = vmatprep.mubr.f32.mxu0 %v18673_v38 }
 0x485   : > { %10577 = vmatmul.mubr.msk.f32.gmra.mrb[104].mxu0 %vm781_vm1, %v14494_v52 }
 0x486   : > { %2365 = vmatprep.mubr.f32.mxu0 %v18673_v38 }
 0x489   : > { %10578 = vmatmul.mubr.msk.f32.gmra.mrb[106].mxu0 %vm781_vm1, %v14491_v50 }
 0x48a   : > { %2371 = vmatprep.mubr.f32.mxu0 %v18673_v38 }
 0x48d   : > { %10579 = vmatmul.mubr.msk.f32.gmra.mrb[108].mxu0 %vm781_vm1, %v14503_v58 }
 0x48e   : > { %2377 = vmatprep.mubr.f32.mxu0 %v18673_v38 }
 0x491   : > { %10580 = vmatmul.mubr.msk.f32.gmra.mrb[110].mxu0 %vm781_vm1, %v14500_v55 }
 0x492   : > { %2383 = vmatprep.mubr.f32.mxu0 %v18673_v38 }
 0x495   : > { %10581 = vmatmul.mubr.msk.f32.gmra.mrb[112].mxu0 %vm781_vm1, %v14512_v1 }
 0x496   : > { %2389 = vmatprep.mubr.f32.mxu0 %v18673_v38 }
 0x499   : > { %10582 = vmatmul.mubr.msk.f32.gmra.mrb[114].mxu0 %vm781_vm1, %v14509_v27 }
 0x49a   : > { %2395 = vmatprep.mubr.f32.mxu0 %v18673_v38 }
 0x49d   : > { %10583 = vmatmul.mubr.msk.f32.gmra.mrb[116].mxu0 %vm781_vm1, %v14521_v9 }
 0x49e   : > { %2401 = vmatprep.mubr.f32.mxu0 %v18673_v38 }
 0x4a1   : > { %10584 = vmatmul.mubr.msk.f32.gmra.mrb[118].mxu0 %vm781_vm1, %v14518_v6 }
 0x4a2   : > { %2407 = vmatprep.mubr.f32.mxu0 %v18673_v38 }
 0x4a5   : > { %10585 = vmatmul.mubr.msk.f32.gmra.mrb[120].mxu0 %vm781_vm1, %v14530_v18 }
 0x4a6   : > { %2413 = vmatprep.mubr.f32.mxu0 %v18673_v38 }
 0x4a9   : > { %10586 = vmatmul.mubr.msk.f32.gmra.mrb[122].mxu0 %vm781_vm1, %v14527_v14 }
 0x4aa   : > { %2419 = vmatprep.mubr.f32.mxu0 %v18673_v38 }
 0x4ad   : > { %10587 = vmatmul.mubr.msk.f32.gmra.mrb[124].mxu0 %vm781_vm1, %v14539_v26 }
 0x4ae   : > { %2425 = vmatprep.mubr.f32.mxu0 %v18673_v38 }
 0x4b1   : > { %10588 = vmatmul.mubr.msk.f32.gmra.mrb[126].mxu0 %vm781_vm1, %v14536_v23 }
 0x508   : > { %v2241_v39 = vpop.f32.mrb[64].mxu0 }
 0x509   : > { %v2445_v41 = vadd.f32 %v14955_v62, %v2241_v39  ;;  %v2243_v43 = vpop.f32.mrb[65].mxu0  ;;  %v2958_v39 = vld [vmem:[%s18670_s4 + $0x310] sm:$0xff] }
 0x50a   : > { %v2446_v44 = vadd.f32 %v14958_v36, %v2243_v43  ;;  %v12820_v49 = vpack.c.bf16 %v2958_v39, %v2957_v33 }
 0x50b   : > { %v2509_v59 = vmax.f32 %v2445_v41, 0.0 }
 0x50c   : > { %v2510_v51 = vmax.f32 %v2446_v44, 0.0  ;;  %v2247_v53 = vpop.f32.mrb[66].mxu0 }
 0x50d   : > { %v2447_v60 = vadd.f32 %v14955_v62, %v2247_v53  ;;  %v2249_v63 = vpop.f32.mrb[67].mxu0  ;;  %v2959_v53 = vld [vmem:[%s18670_s4 + $0x320] sm:$0xff] }
 0x50e   : > { %v2448_v4 = vadd.f32 %v14958_v36, %v2249_v63  ;;  %10590 = vmatprep.mubr.msk.f32.mxu1 %vm781_vm1, %v2510_v51 }
 0x50f   : > { %2759 = vmatmul.mubr.f32.vlgmr.msra.gmra.mrb[96].mxu1 %v2509_v59  ;;  %v2511_v24 = vmax.f32 %v2447_v60, 0.0 }
 0x510   : > { %v2512_v13 = vmax.f32 %v2448_v4, 0.0  ;;  %v2253_v16 = vpop.f32.mrb[68].mxu0  ;;  %12811 = vmatpush3.bf16.msra.mxu1 %v12808_v54  ;;  %v2960_v54 = vld [vmem:[%s18670_s4 + $0x330] sm:$0xff] }
 0x511   : > { %v2449_v19 = vadd.f32 %v14955_v62, %v2253_v16  ;;  %v2255_v21 = vpop.f32.mrb[69].mxu0  ;;  %12813 = vmatprep.subr.bf16.mxu1 %v12812_v3  ;;  %v12824_v4 = vpack.c.bf16 %v2960_v54, %v2959_v53 }
 0x512   : > { %v2450_v30 = vadd.f32 %v14958_v36, %v2255_v21  ;;  %10591 = vmatprep.mubr.msk.f32.mxu1 %vm781_vm1, %v2512_v13  ;;  %v2962_v13 = vld [vmem:[%s18670_s4 + $0x350] sm:$0xff] }
 0x513   : > { %2764 = vmatmul.mubr.f32.gmra.mrb[98].mxu1 %v2511_v24  ;;  %v2513_v48 = vmax.f32 %v2449_v19, 0.0 }
 0x514   : > { %v2514_v41 = vmax.f32 %v2450_v30, 0.0  ;;  %v2259_v43 = vpop.f32.mrb[70].mxu0  ;;  %12815 = vmatpush3.bf16.msra.mxu1 %v12812_v3  ;;  %v12828_v30 = vpack.c.bf16 %v2962_v13, %v2961_v11 }
 0x515   : > { %v2451_v44 = vadd.f32 %v14955_v62, %v2259_v43  ;;  %v2261_v46 = vpop.f32.mrb[71].mxu0  ;;  %12817 = vmatprep.subr.bf16.mxu1 %v12816_v29 }
 0x516   : > { %v2452_v51 = vadd.f32 %v14958_v36, %v2261_v46  ;;  %10592 = vmatprep.mubr.msk.f32.mxu1 %vm781_vm1, %v2514_v41 }
 0x517   : > { %2769 = vmatmul.mubr.f32.gmra.mrb[100].mxu1 %v2513_v48  ;;  %v2515_v3 = vmax.f32 %v2451_v44, 0.0 }
 0x518   : > { %v2516_v56 = vmax.f32 %v2452_v51, 0.0  ;;  %v2265_v59 = vpop.f32.mrb[72].mxu0  ;;  %12819 = vmatpush3.bf16.msra.mxu1 %v12816_v29 }
 0x519   : > { %v2453_v60 = vadd.f32 %v14955_v62, %v2265_v59  ;;  %v2267_v63 = vpop.f32.mrb[73].mxu0  ;;  %12821 = vmatprep.subr.bf16.mxu1 %v12820_v49 }
 0x51a   : > { %v2454_v8 = vadd.f32 %v14958_v36, %v2267_v63  ;;  %10593 = vmatprep.mubr.msk.f32.mxu1 %vm781_vm1, %v2516_v56 }
 0x51b   : > { %2774 = vmatmul.mubr.f32.gmra.mrb[102].mxu1 %v2515_v3  ;;  %v2517_v29 = vmax.f32 %v2453_v60, 0.0 }
 0x51c   : > { %v2518_v16 = vmax.f32 %v2454_v8, 0.0  ;;  %v2271_v19 = vpop.f32.mrb[74].mxu0  ;;  %12823 = vmatpush3.bf16.msra.mxu1 %v12820_v49 }
 0x51d   : > { %v2455_v21 = vadd.f32 %v14955_v62, %v2271_v19  ;;  %v2273_v24 = vpop.f32.mrb[75].mxu0  ;;  %12825 = vmatprep.subr.bf16.mxu1 %v12824_v4 }
 0x51e   : > { %v2456_v33 = vadd.f32 %v14958_v36, %v2273_v24  ;;  %10594 = vmatprep.mubr.msk.f32.mxu1 %vm781_vm1, %v2518_v16 }
 0x51f   : > { %2779 = vmatmul.mubr.f32.gmra.mrb[104].mxu1 %v2517_v29  ;;  %v2519_v46 = vmax.f32 %v2455_v21, 0.0 }
 0x520   : > { %v2520_v39 = vmax.f32 %v2456_v33, 0.0  ;;  %v2277_v41 = vpop.f32.mrb[76].mxu0  ;;  %12827 = vmatpush3.bf16.msra.mxu1 %v12824_v4 }
 0x521   : > { %v2457_v43 = vadd.f32 %v14955_v62, %v2277_v41  ;;  %v2279_v44 = vpop.f32.mrb[77].mxu0  ;;  %12829 = vmatprep.subr.bf16.mxu1 %v12828_v30 }
 0x522   : > { %v2458_v48 = vadd.f32 %v14958_v36, %v2279_v44  ;;  %10595 = vmatprep.mubr.msk.f32.mxu1 %vm781_vm1, %v2520_v39 }
 0x523   : > { %2784 = vmatmul.mubr.f32.gmra.mrb[106].mxu1 %v2519_v46  ;;  %v2521_v56 = vmax.f32 %v2457_v43, 0.0 }
 0x524   : > { %v2522_v49 = vmax.f32 %v2458_v48, 0.0  ;;  %v2283_v51 = vpop.f32.mrb[78].mxu0  ;;  %12831 = vmatpush3.bf16.msra.mxu1 %v12828_v30 }
 0x525   : > { %v2459_v53 = vadd.f32 %v14955_v62, %v2283_v51  ;;  %v2285_v54 = vpop.f32.mrb[79].mxu0 }
 0x526   : > { %v2460_v59 = vadd.f32 %v14958_v36, %v2285_v54  ;;  %10596 = vmatprep.mubr.msk.f32.mxu1 %vm781_vm1, %v2522_v49 }
 0x527   : > { %2789 = vmatmul.mubr.f32.gmra.mrb[108].mxu1 %v2521_v56  ;;  %v2523_v8 = vmax.f32 %v2459_v53, 0.0 }
 0x528   : > { %v2524_v60 = vmax.f32 %v2460_v59, 0.0  ;;  %v2289_v63 = vpop.f32.mrb[80].mxu0 }
 0x529   : > { %v2461_v3 = vadd.f32 %v14955_v62, %v2289_v63  ;;  %v2291_v4 = vpop.f32.mrb[81].mxu0 }
 0x52a   : > { %v2462_v11 = vadd.f32 %v14958_v36, %v2291_v4  ;;  %10597 = vmatprep.mubr.msk.f32.mxu1 %vm781_vm1, %v2524_v60 }
 0x52b   : > { %2794 = vmatmul.mubr.f32.gmra.mrb[110].mxu1 %v2523_v8  ;;  %v2525_v24 = vmax.f32 %v2461_v3, 0.0 }
 0x52c   : > { %v2526_v13 = vmax.f32 %v2462_v11, 0.0  ;;  %v2295_v16 = vpop.f32.mrb[82].mxu0 }
 0x52d   : > { %v2463_v19 = vadd.f32 %v14955_v62, %v2295_v16  ;;  %v2297_v21 = vpop.f32.mrb[83].mxu0 }
 0x52e   : > { %v2464_v29 = vadd.f32 %v14958_v36, %v2297_v21  ;;  %10598 = vmatprep.mubr.msk.f32.mxu1 %vm781_vm1, %v2526_v13 }
 0x52f   : > { %2799 = vmatmul.mubr.f32.gmra.mrb[112].mxu1 %v2525_v24  ;;  %v2527_v43 = vmax.f32 %v2463_v19, 0.0 }
 0x530   : > { %v2528_v30 = vmax.f32 %v2464_v29, 0.0  ;;  %v2301_v33 = vpop.f32.mrb[84].mxu0 }
 0x531   : > { %v2465_v39 = vadd.f32 %v14955_v62, %v2301_v33  ;;  %v2303_v41 = vpop.f32.mrb[85].mxu0 }
 0x532   : > { %v2466_v44 = vadd.f32 %v14958_v36, %v2303_v41  ;;  %10599 = vmatprep.mubr.msk.f32.mxu1 %vm781_vm1, %v2528_v30 }
 0x533   : > { %2804 = vmatmul.mubr.f32.gmra.mrb[114].mxu1 %v2527_v43  ;;  %v2529_v53 = vmax.f32 %v2465_v39, 0.0 }
 0x534   : > { %v2530_v46 = vmax.f32 %v2466_v44, 0.0  ;;  %v2307_v48 = vpop.f32.mrb[86].mxu0 }
 0x535   : > { %v2467_v49 = vadd.f32 %v14955_v62, %v2307_v48  ;;  %v2309_v51 = vpop.f32.mrb[87].mxu0 }
 0x536   : > { %v2468_v54 = vadd.f32 %v14958_v36, %v2309_v51  ;;  %10600 = vmatprep.mubr.msk.f32.mxu1 %vm781_vm1, %v2530_v46 }
 0x537   : > { %2809 = vmatmul.mubr.f32.gmra.mrb[116].mxu1 %v2529_v53  ;;  %v2531_v3 = vmax.f32 %v2467_v49, 0.0 }
 0x538   : > { %v2532_v56 = vmax.f32 %v2468_v54, 0.0  ;;  %v2313_v59 = vpop.f32.mrb[88].mxu0 }
 0x539   : > { %v2469_v60 = vadd.f32 %v14955_v62, %v2313_v59  ;;  %v2315_v63 = vpop.f32.mrb[89].mxu0 }
 0x53a   : > { %v2470_v4 = vadd.f32 %v14958_v36, %v2315_v63  ;;  %10601 = vmatprep.mubr.msk.f32.mxu1 %vm781_vm1, %v2532_v56 }
 0x53b   : > { %2814 = vmatmul.mubr.f32.gmra.mrb[118].mxu1 %v2531_v3  ;;  %v2533_v19 = vmax.f32 %v2469_v60, 0.0 }
 0x53c   : > { %v2534_v8 = vmax.f32 %v2470_v4, 0.0  ;;  %v2319_v11 = vpop.f32.mrb[90].mxu0 }
 0x53d   : > { %v2471_v13 = vadd.f32 %v14955_v62, %v2319_v11  ;;  %v2321_v16 = vpop.f32.mrb[91].mxu0 }
 0x53e   : > { %v2472_v21 = vadd.f32 %v14958_v36, %v2321_v16  ;;  %10602 = vmatprep.mubr.msk.f32.mxu1 %vm781_vm1, %v2534_v8 }
 0x53f   : > { %2819 = vmatmul.mubr.f32.gmra.mrb[120].mxu1 %v2533_v19  ;;  %v2535_v39 = vmax.f32 %v2471_v13, 0.0 }
 0x540   : > { %v2536_v24 = vmax.f32 %v2472_v21, 0.0  ;;  %v2325_v29 = vpop.f32.mrb[92].mxu0 }
 0x541   : > { %v2473_v30 = vadd.f32 %v14955_v62, %v2325_v29  ;;  %v2327_v33 = vpop.f32.mrb[93].mxu0 }
 0x542   : > { %v2474_v41 = vadd.f32 %v14958_v36, %v2327_v33  ;;  %10603 = vmatprep.mubr.msk.f32.mxu1 %vm781_vm1, %v2536_v24 }
 0x543   : > { %2824 = vmatmul.mubr.f32.gmra.mrb[122].mxu1 %v2535_v39  ;;  %v2537_v49 = vmax.f32 %v2473_v30, 0.0 }
 0x544   : > { %v2538_v43 = vmax.f32 %v2474_v41, 0.0  ;;  %v2331_v44 = vpop.f32.mrb[94].mxu0 }
 0x545   : > { %v2475_v46 = vadd.f32 %v14955_v62, %v2331_v44  ;;  %v2333_v48 = vpop.f32.mrb[95].mxu0 }
 0x546   : > { %v2476_v51 = vadd.f32 %v14958_v36, %v2333_v48  ;;  %10604 = vmatprep.mubr.msk.f32.mxu1 %vm781_vm1, %v2538_v43 }
 0x547   : > { %2829 = vmatmul.mubr.f32.gmra.mrb[124].mxu1 %v2537_v49  ;;  %v2539_v59 = vmax.f32 %v2475_v46, 0.0 }
 0x548   : > { %v2540_v53 = vmax.f32 %v2476_v51, 0.0  ;;  %v2337_v54 = vpop.f32.mrb[96].mxu0 }
 0x549   : > { %v2339_v56 = vpop.f32.mrb[97].mxu0  ;;  %v2477_v60 = vadd.f32 %v14955_v62, %v2337_v54 }
 0x54a   : > { %v2478_v63 = vadd.f32 %v14958_v36, %v2339_v56  ;;  %10605 = vmatprep.mubr.msk.f32.mxu1 %vm781_vm1, %v2540_v53 }
 0x54b   : > { %2834 = vmatmul.mubr.f32.gmra.mrb[126].mxu1 %v2539_v59  ;;  %v2541_v11 = vmax.f32 %v2477_v60, 0.0 }
 0x54c   : > { %v2542_v3 = vmax.f32 %v2478_v63, 0.0  ;;  %v2343_v4 = vpop.f32.mrb[98].mxu0 }
 0x54d   : > { %v2345_v8 = vpop.f32.mrb[99].mxu0  ;;  %v2479_v13 = vadd.f32 %v14955_v62, %v2343_v4 }
 0x54e   : > { %v2480_v16 = vadd.f32 %v14958_v36, %v2345_v8  ;;  %10606 = vmatprep.mubr.msk.f32.mxu1 %vm781_vm1, %v2542_v3 }
 0x54f   : > { %2839 = vmatmul.mubr.f32.gmra.mrb[128].mxu1 %v2541_v11  ;;  %v2543_v29 = vmax.f32 %v2479_v13, 0.0 }
 0x550   : > { %v2544_v19 = vmax.f32 %v2480_v16, 0.0  ;;  %v2349_v21 = vpop.f32.mrb[100].mxu0 }
 0x551   : > { %v2351_v24 = vpop.f32.mrb[101].mxu0  ;;  %v2481_v30 = vadd.f32 %v14955_v62, %v2349_v21  ;;  %v2964_v21 = vld [vmem:[%s18670_s4 + $0x370] sm:$0xff] }
 0x552   : > { %v2482_v33 = vadd.f32 %v14958_v36, %v2351_v24  ;;  %10607 = vmatprep.mubr.msk.f32.mxu1 %vm781_vm1, %v2544_v19  ;;  %v2963_v19 = vld [vmem:[%s18670_s4 + $0x360] sm:$0xff] }
 0x553   : > { %2844 = vmatmul.mubr.f32.gmra.mrb[130].mxu1 %v2543_v29  ;;  %v2545_v44 = vmax.f32 %v2481_v30, 0.0 }
 0x554   : > { %v2546_v39 = vmax.f32 %v2482_v33, 0.0  ;;  %v2355_v41 = vpop.f32.mrb[102].mxu0  ;;  %v12832_v33 = vpack.c.bf16 %v2964_v21, %v2963_v19 }
 0x555   : > { %v2357_v43 = vpop.f32.mrb[103].mxu0  ;;  %v2483_v46 = vadd.f32 %v14955_v62, %v2355_v41 }
 0x556   : > { %v2484_v48 = vadd.f32 %v14958_v36, %v2357_v43  ;;  %10608 = vmatprep.mubr.msk.f32.mxu1 %vm781_vm1, %v2546_v39  ;;  %12833 = vmatprep.subr.bf16.mxu1 %v12832_v33 }
 0x557   : > { %2849 = vmatmul.mubr.f32.gmra.mrb[132].mxu1 %v2545_v44  ;;  %v2547_v54 = vmax.f32 %v2483_v46, 0.0  ;;  %v2965_v44 = vld [vmem:[%s18670_s4 + $0x380] sm:$0xff]  ;;  %v2966_v46 = vld [vmem:[%s18670_s4 + $0x390] sm:$0xff] }
 0x558   : > { %v2548_v49 = vmax.f32 %v2484_v48, 0.0  ;;  %v2361_v51 = vpop.f32.mrb[104].mxu0  ;;  %12835 = vmatpush3.bf16.msra.mxu1 %v12832_v33 }
 0x559   : > { %v2363_v53 = vpop.f32.mrb[105].mxu0  ;;  %v2485_v56 = vadd.f32 %v14955_v62, %v2361_v51 }
 0x55a   : > { %v2486_v59 = vadd.f32 %v14958_v36, %v2363_v53  ;;  %10609 = vmatprep.mubr.msk.f32.mxu1 %vm781_vm1, %v2548_v49  ;;  %v12836_v53 = vpack.c.bf16 %v2966_v46, %v2965_v44 }
 0x55b   : > { %2854 = vmatmul.mubr.f32.gmra.mrb[134].mxu1 %v2547_v54  ;;  %v2549_v4 = vmax.f32 %v2485_v56, 0.0 }
 0x55c   : > { %v2550_v60 = vmax.f32 %v2486_v59, 0.0  ;;  %v2367_v63 = vpop.f32.mrb[106].mxu0  ;;  %12837 = vmatprep.subr.bf16.mxu1 %v12836_v53 }
 0x55d   : > { %v2369_v3 = vpop.f32.mrb[107].mxu0  ;;  %v2487_v8 = vadd.f32 %v14955_v62, %v2367_v63  ;;  %12839 = vmatpush3.bf16.msra.mxu1 %v12836_v53 }
 0x55e   : > { %v2488_v11 = vadd.f32 %v14958_v36, %v2369_v3  ;;  %10610 = vmatprep.mubr.msk.f32.mxu1 %vm781_vm1, %v2550_v60  ;;  %12872 = vmatprep.subr.bf16.mxu1 %v18675_v61 }
 0x55f   : > { %2859 = vmatmul.mubr.f32.gmra.mrb[136].mxu1 %v2549_v4  ;;  %v2551_v29 = vmax.f32 %v2487_v8, 0.0 }
 0x560   : > { %v2552_v13 = vmax.f32 %v2488_v11, 0.0  ;;  %v2373_v16 = vpop.f32.mrb[108].mxu0 }
 0x561   : > { %v2375_v24 = vpop.f32.mrb[109].mxu0  ;;  %v2489_v30 = vadd.f32 %v14955_v62, %v2373_v16 }
 0x562   : > { %v2490_v39 = vadd.f32 %v14958_v36, %v2375_v24  ;;  %10611 = vmatprep.mubr.msk.f32.mxu1 %vm781_vm1, %v2552_v13 }
 0x563   : > { %2864 = vmatmul.mubr.f32.gmra.mrb[138].mxu1 %v2551_v29  ;;  %v2553_v49 = vmax.f32 %v2489_v30, 0.0 }
 0x564   : > { %v2554_v41 = vmax.f32 %v2490_v39, 0.0  ;;  %v2379_v43 = vpop.f32.mrb[110].mxu0 }
 0x565   : > { %v2381_v48 = vpop.f32.mrb[111].mxu0  ;;  %v2491_v51 = vadd.f32 %v14955_v62, %v2379_v43 }
 0x566   : > { %v2492_v54 = vadd.f32 %v14958_v36, %v2381_v48  ;;  %10612 = vmatprep.mubr.msk.f32.mxu1 %vm781_vm1, %v2554_v41 }
 0x567   : > { %2869 = vmatmul.mubr.f32.gmra.mrb[140].mxu1 %v2553_v49  ;;  %v2555_v63 = vmax.f32 %v2491_v51, 0.0 }
 0x568   : > { %v2556_v56 = vmax.f32 %v2492_v54, 0.0  ;;  %v2385_v59 = vpop.f32.mrb[112].mxu0 }
 0x569   : > { %v2387_v60 = vpop.f32.mrb[113].mxu0  ;;  %v2493_v3 = vadd.f32 %v14955_v62, %v2385_v59 }
 0x56a   : > { %v2494_v4 = vadd.f32 %v14958_v36, %v2387_v60  ;;  %10613 = vmatprep.mubr.msk.f32.mxu1 %vm781_vm1, %v2556_v56 }
 0x56b   : > { %2874 = vmatmul.mubr.f32.gmra.mrb[142].mxu1 %v2555_v63  ;;  %v2557_v16 = vmax.f32 %v2493_v3, 0.0 }
 0x56c   : > { %v2558_v8 = vmax.f32 %v2494_v4, 0.0  ;;  %v2391_v11 = vpop.f32.mrb[114].mxu0 }
 0x56d   : > { %v2393_v13 = vpop.f32.mrb[115].mxu0  ;;  %v2495_v19 = vadd.f32 %v14955_v62, %v2391_v11 }
 0x56e   : > { %v2496_v21 = vadd.f32 %v14958_v36, %v2393_v13  ;;  %10614 = vmatprep.mubr.msk.f32.mxu1 %vm781_vm1, %v2558_v8 }
 0x56f   : > { %2879 = vmatmul.mubr.f32.gmra.mrb[144].mxu1 %v2557_v16  ;;  %v2559_v33 = vmax.f32 %v2495_v19, 0.0 }
 0x570   : > { %v2560_v24 = vmax.f32 %v2496_v21, 0.0  ;;  %v2397_v29 = vpop.f32.mrb[116].mxu0 }
 0x571   : > { %v2399_v30 = vpop.f32.mrb[117].mxu0  ;;  %v2497_v39 = vadd.f32 %v14955_v62, %v2397_v29 }
 0x572   : > { %v2498_v41 = vadd.f32 %v14958_v36, %v2399_v30  ;;  %10615 = vmatprep.mubr.msk.f32.mxu1 %vm781_vm1, %v2560_v24 }
 0x573   : > { %2884 = vmatmul.mubr.f32.gmra.mrb[146].mxu1 %v2559_v33  ;;  %v2561_v48 = vmax.f32 %v2497_v39, 0.0 }
 0x574   : > { %v2562_v43 = vmax.f32 %v2498_v41, 0.0  ;;  %v2403_v44 = vpop.f32.mrb[118].mxu0 }
 0x575   : > { %v2405_v46 = vpop.f32.mrb[119].mxu0  ;;  %v2499_v49 = vadd.f32 %v14955_v62, %v2403_v44 }
 0x576   : > { %v2500_v51 = vadd.f32 %v14958_v36, %v2405_v46  ;;  %10616 = vmatprep.mubr.msk.f32.mxu1 %vm781_vm1, %v2562_v43 }
 0x577   : > { %2889 = vmatmul.mubr.f32.gmra.mrb[148].mxu1 %v2561_v48  ;;  %v2563_v59 = vmax.f32 %v2499_v49, 0.0 }
 0x578   : > { %v2564_v53 = vmax.f32 %v2500_v51, 0.0  ;;  %v2409_v54 = vpop.f32.mrb[120].mxu0 }
 0x579   : > { %v2411_v56 = vpop.f32.mrb[121].mxu0  ;;  %v2501_v60 = vadd.f32 %v14955_v62, %v2409_v54 }
 0x57a   : > { %v2502_v63 = vadd.f32 %v14958_v36, %v2411_v56  ;;  %10617 = vmatprep.mubr.msk.f32.mxu1 %vm781_vm1, %v2564_v53  ;;  %v15108_v53 = vld [vmem:[%s18670_s4 + $0x290] ss:$0 sm:$0xff] }
 0x57b   : > { %2894 = vmatmul.mubr.f32.gmra.mrb[150].mxu1 %v2563_v59  ;;  %v2565_v11 = vmax.f32 %v2501_v60, 0.0  ;;  %v3227_v60 = vld [vmem:[%s18670_s4 + $0x3d0] sm:$0xff] }
 0x57c   : > { %v2566_v3 = vmax.f32 %v2502_v63, 0.0  ;;  %v2415_v4 = vpop.f32.mrb[122].mxu0 }
 0x57d   : > { %v2417_v8 = vpop.f32.mrb[123].mxu0  ;;  %v2503_v13 = vadd.f32 %v14955_v62, %v2415_v4 }
 0x57e   : > { %v2504_v16 = vadd.f32 %v14958_v36, %v2417_v8  ;;  %10618 = vmatprep.mubr.msk.f32.mxu1 %vm781_vm1, %v2566_v3  ;;  %v3228_v3 = vld [vmem:[%s18670_s4 + $0x3e0] sm:$0xff] }
 0x57f   : > { %2899 = vmatmul.mubr.f32.gmra.mrb[152].mxu1 %v2565_v11  ;;  %v2567_v29 = vmax.f32 %v2503_v13, 0.0  ;;  %v12844_v8 = vpack.c.bf16 %v3228_v3, %v3227_v60  ;;  %v3229_v11 = vld [vmem:[%s18670_s4 + $0x3f0] sm:$0xff]  ;;  %v3230_v13 = vld [vmem:[%s18670_s4 + $0x400] sm:$0xff] }
 0x580   : > { %v2568_v19 = vmax.f32 %v2504_v16, 0.0  ;;  %v2421_v21 = vpop.f32.mrb[124].mxu0  ;;  %v3236_v60 = vld [vmem:[%s18670_s4 + $0x460] sm:$0xff] }
 0x581   : > { %v2423_v24 = vpop.f32.mrb[125].mxu0  ;;  %v2505_v30 = vadd.f32 %v14955_v62, %v2421_v21 }
 0x582   : > { %v2506_v33 = vadd.f32 %v14958_v36, %v2423_v24  ;;  %10619 = vmatprep.mubr.msk.f32.mxu1 %vm781_vm1, %v2568_v19  ;;  %v12848_v24 = vpack.c.bf16 %v3230_v13, %v3229_v11  ;;  %v3237_v13 = vld [vmem:[%s18670_s4 + $0x470] sm:$0xff] }
 0x583   : > { %2904 = vmatmul.mubr.f32.gmra.mrb[154].mxu1 %v2567_v29  ;;  %v2569_v44 = vmax.f32 %v2505_v30, 0.0  ;;  %v3231_v30 = vld [vmem:[%s18670_s4 + $0x410] sm:$0xff] }
 0x584   : > { %v2570_v39 = vmax.f32 %v2506_v33, 0.0  ;;  %v2427_v41 = vpop.f32.mrb[126].mxu0  ;;  %v3232_v33 = vld [vmem:[%s18670_s4 + $0x420] sm:$0xff] }
 0x585   : > { %v2429_v43 = vpop.f32.mrb[127].mxu0  ;;  %v2507_v46 = vadd.f32 %v14955_v62, %v2427_v41  ;;  %v3225_v62 = vld [vmem:[%s18670_s4 + $0x3b0] sm:$0xff] }
 0x586   : > { %v2508_v48 = vadd.f32 %v14958_v36, %v2429_v43  ;;  %10620 = vmatprep.mubr.msk.f32.mxu1 %vm781_vm1, %v2570_v39  ;;  %v3226_v36 = vld [vmem:[%s18670_s4 + $0x3c0] sm:$0xff] }
 0x587   : > { %2909 = vmatmul.mubr.f32.gmra.mrb[156].mxu1 %v2569_v44  ;;  %v2571_v51 = vmax.f32 %v2507_v46, 0.0  ;;  %v12840_v63 = vpack.c.bf16 %v3226_v36, %v3225_v62  ;;  %v12852_v44 = vpack.c.bf16 %v3232_v33, %v3231_v30  ;;  %v3235_v36 = vld [vmem:[%s18670_s4 + $0x450] sm:$0xff] }
 0x588   : > { %v2572_v49 = vmax.f32 %v2508_v48, 0.0  ;;  %v3233_v48 = vld [vmem:[%s18670_s4 + $0x430] sm:$0xff] }
 0x589   : > { %12841 = vmatprep.subr.bf16.mxu0 %v12840_v63 }
 0x58a   : > { %10621 = vmatprep.mubr.msk.f32.mxu1 %vm781_vm1, %v2572_v49  ;;  %12843 = vmatpush3.bf16.msra.mxu0 %v12840_v63  ;;  %v3234_v49 = vld [vmem:[%s18670_s4 + $0x440] sm:$0xff] }
 0x58b   : > { %2914 = vmatmul.mubr.f32.gmra.mrb[158].mxu1 %v2571_v51  ;;  %12845 = vmatprep.subr.bf16.mxu0 %v12844_v8 }
 0x58e   : > { %12847 = vmatpush3.bf16.msra.mxu0 %v12844_v8  ;;  %v12860_v8 = vpack.c.bf16 %v3236_v60, %v3235_v36 }
 0x58f   : > { %12849 = vmatprep.subr.bf16.mxu0 %v12848_v24 }
 0x592   : > { %12851 = vmatpush3.bf16.msra.mxu0 %v12848_v24 }
 0x593   : > { %12853 = vmatprep.subr.bf16.mxu0 %v12852_v44 }
 0x596   : > { %12855 = vmatpush3.bf16.msra.mxu0 %v12852_v44 }
 0x5e2   : > { %v2760_v54 = vpop.f32.mrb[96].mxu1 }
 0x5e3   : > { %v2761_v56 = vadd.f32 %v2760_v54, %v15108_v53  ;;  %v2762_v59 = vpop.f32.mrb[97].mxu1 }
 0x5e4   : > { %v12856_v59 = vpack.c.bf16 %v3234_v49, %v3233_v48 }
 0x5e5   : > { %v2919_v4 = vmax.f32 %v2761_v56, 0.0 }
 0x5e6   : > { %v2765_v16 = vpop.f32.mrb[98].mxu1  ;;  %12857 = vmatprep.subr.bf16.mxu0 %v12856_v59 }
 0x5e7   : > { %v2766_v19 = vadd.f32 %v2765_v16, %v15108_v53  ;;  %v2767_v21 = vpop.f32.mrb[99].mxu1  ;;  %11979 = vmatprep.mubr.f32.mxu1 %v2919_v4  ;;  %v3238_v16 = vld [vmem:[%s18670_s4 + $0x480] sm:$0xff]  ;;  %12859 = vmatpush3.bf16.msra.mxu0 %v12856_v59 }
 0x5e8   : > { %12861 = vmatprep.subr.bf16.mxu0 %v12860_v8 }
 0x5e9   : > { %v2920_v29 = vmax.f32 %v2766_v19, 0.0 }
 0x5ea   : > { %v2770_v39 = vpop.f32.mrb[100].mxu1 }
 0x5eb   : > { %v2771_v41 = vadd.f32 %v2770_v39, %v15108_v53  ;;  %v2772_v43 = vpop.f32.mrb[101].mxu1  ;;  %11980 = vmatmul.mubr.f32.vlgmr.msra.gmra.mrb[160].mxu1 %v2920_v29  ;;  %v12864_v29 = vpack.c.bf16 %v3238_v16, %v3237_v13  ;;  %12863 = vmatpush3.bf16.msra.mxu0 %v12860_v8 }
 0x5ed   : > { %v2921_v46 = vmax.f32 %v2771_v41, 0.0  ;;  %12865 = vmatprep.subr.bf16.mxu0 %v12864_v29 }
 0x5ee   : > { %v2775_v51 = vpop.f32.mrb[102].mxu1 }
 0x5ef   : > { %v2776_v54 = vadd.f32 %v2775_v51, %v15108_v53  ;;  %v2777_v56 = vpop.f32.mrb[103].mxu1  ;;  %11982 = vmatprep.mubr.f32.mxu1 %v2921_v46  ;;  %12867 = vmatpush3.bf16.msra.mxu0 %v12864_v29 }
 0x5f1   : > { %v2922_v62 = vmax.f32 %v2776_v54, 0.0 }
 0x5f2   : > { %v2780_v63 = vpop.f32.mrb[104].mxu1 }
 0x5f3   : > { %v2781_v3 = vadd.f32 %v2780_v63, %v15108_v53  ;;  %v2782_v4 = vpop.f32.mrb[105].mxu1  ;;  %11983 = vmatmul.mubr.f32.gmra.mrb[162].mxu1 %v2922_v62 }
 0x5f5   : > { %v2923_v11 = vmax.f32 %v2781_v3, 0.0 }
 0x5f6   : > { %v2785_v19 = vpop.f32.mrb[106].mxu1 }
 0x5f7   : > { %v2786_v21 = vadd.f32 %v2785_v19, %v15108_v53  ;;  %v2787_v24 = vpop.f32.mrb[107].mxu1  ;;  %11985 = vmatprep.mubr.f32.mxu1 %v2923_v11 }
 0x5f9   : > { %v2924_v30 = vmax.f32 %v2786_v21, 0.0 }
 0x5fa   : > { %v2790_v33 = vpop.f32.mrb[108].mxu1 }
 0x5fb   : > { %v2791_v39 = vadd.f32 %v2790_v33, %v15108_v53  ;;  %v2792_v41 = vpop.f32.mrb[109].mxu1  ;;  %11986 = vmatmul.mubr.f32.gmra.mrb[164].mxu1 %v2924_v30 }
 0x5fd   : > { %v2925_v43 = vmax.f32 %v2791_v39, 0.0 }
 0x5fe   : > { %v2795_v44 = vpop.f32.mrb[110].mxu1 }
 0x5ff   : > { %v2796_v46 = vadd.f32 %v2795_v44, %v15108_v53  ;;  %v2797_v48 = vpop.f32.mrb[111].mxu1  ;;  %11988 = vmatprep.mubr.f32.mxu1 %v2925_v43 }
 0x601   : > { %v2926_v49 = vmax.f32 %v2796_v46, 0.0 }
 0x602   : > { %v2800_v51 = vpop.f32.mrb[112].mxu1 }
 0x603   : > { %v2801_v54 = vadd.f32 %v2800_v51, %v15108_v53  ;;  %v2802_v56 = vpop.f32.mrb[113].mxu1  ;;  %11989 = vmatmul.mubr.f32.gmra.mrb[166].mxu1 %v2926_v49 }
 0x605   : > { %v2927_v59 = vmax.f32 %v2801_v54, 0.0 }
 0x606   : > { %v2805_v62 = vpop.f32.mrb[114].mxu1 }
 0x607   : > { %v2806_v36 = vadd.f32 %v2805_v62, %v15108_v53  ;;  %v2807_v60 = vpop.f32.mrb[115].mxu1  ;;  %11991 = vmatprep.mubr.f32.mxu1 %v2927_v59 }
 0x609   : > { %v2928_v63 = vmax.f32 %v2806_v36, 0.0 }
 0x60a   : > { %v2810_v3 = vpop.f32.mrb[116].mxu1 }
 0x60b   : > { %v2811_v4 = vadd.f32 %v2810_v3, %v15108_v53  ;;  %v2812_v8 = vpop.f32.mrb[117].mxu1  ;;  %11992 = vmatmul.mubr.f32.gmra.mrb[168].mxu1 %v2928_v63 }
 0x60d   : > { %v2929_v11 = vmax.f32 %v2811_v4, 0.0 }
 0x60e   : > { %v2815_v13 = vpop.f32.mrb[118].mxu1 }
 0x60f   : > { %v2816_v16 = vadd.f32 %v2815_v13, %v15108_v53  ;;  %v2817_v19 = vpop.f32.mrb[119].mxu1  ;;  %11994 = vmatprep.mubr.f32.mxu1 %v2929_v11 }
 0x611   : > { %v2930_v21 = vmax.f32 %v2816_v16, 0.0 }
 0x612   : > { %v2820_v24 = vpop.f32.mrb[120].mxu1 }
 0x613   : > { %v2821_v29 = vadd.f32 %v2820_v24, %v15108_v53  ;;  %v2822_v30 = vpop.f32.mrb[121].mxu1  ;;  %11995 = vmatmul.mubr.f32.gmra.mrb[170].mxu1 %v2930_v21 }
 0x615   : > { %v2931_v33 = vmax.f32 %v2821_v29, 0.0 }
 0x616   : > { %v2825_v39 = vpop.f32.mrb[122].mxu1 }
 0x617   : > { %v2826_v41 = vadd.f32 %v2825_v39, %v15108_v53  ;;  %v2827_v43 = vpop.f32.mrb[123].mxu1  ;;  %11997 = vmatprep.mubr.f32.mxu1 %v2931_v33 }
 0x619   : > { %v2932_v44 = vmax.f32 %v2826_v41, 0.0 }
 0x61a   : > { %v2830_v46 = vpop.f32.mrb[124].mxu1 }
 0x61b   : > { %v2831_v48 = vadd.f32 %v2830_v46, %v15108_v53  ;;  %v2832_v49 = vpop.f32.mrb[125].mxu1  ;;  %11998 = vmatmul.mubr.f32.gmra.mrb[172].mxu1 %v2932_v44 }
 0x61d   : > { %v2933_v51 = vmax.f32 %v2831_v48, 0.0 }
 0x61e   : > { %v2835_v54 = vpop.f32.mrb[126].mxu1 }
 0x61f   : > { %v2836_v56 = vadd.f32 %v2835_v54, %v15108_v53  ;;  %v2837_v59 = vpop.f32.mrb[127].mxu1  ;;  %12000 = vmatprep.mubr.f32.mxu1 %v2933_v51 }
 0x621   : > { %v2934_v62 = vmax.f32 %v2836_v56, 0.0 }
 0x622   : > { %v2840_v36 = vpop.f32.mrb[128].mxu1 }
 0x623   : > { %v2841_v60 = vadd.f32 %v2840_v36, %v15108_v53  ;;  %v2842_v63 = vpop.f32.mrb[129].mxu1  ;;  %12001 = vmatmul.mubr.f32.gmra.mrb[174].mxu1 %v2934_v62 }
 0x624   : > { %v3239_v63 = vld [vmem:[%s18670_s4 + $0x490] sm:$0xff] }
 0x625   : > { %v2935_v3 = vmax.f32 %v2841_v60, 0.0 }
 0x626   : > { %v2845_v4 = vpop.f32.mrb[130].mxu1 }
 0x627   : > { %v2846_v8 = vadd.f32 %v2845_v4, %v15108_v53  ;;  %v2847_v11 = vpop.f32.mrb[131].mxu1  ;;  %12003 = vmatprep.mubr.f32.mxu1 %v2935_v3  ;;  %v3240_v3 = vld [vmem:[%s18670_s4 + $0x4a0] sm:$0xff] }
 0x628   : > { %v12868_v11 = vpack.c.bf16 %v3240_v3, %v3239_v63 }
 0x629   : > { %v2936_v13 = vmax.f32 %v2846_v8, 0.0 }
 0x62a   : > { %v2850_v16 = vpop.f32.mrb[132].mxu1  ;;  %12869 = vmatprep.subr.bf16.mxu0 %v12868_v11 }
 0x62b   : > { %v2851_v19 = vadd.f32 %v2850_v16, %v15108_v53  ;;  %v2852_v21 = vpop.f32.mrb[133].mxu1  ;;  %12004 = vmatmul.mubr.f32.gmra.mrb[176].mxu1 %v2936_v13  ;;  %12871 = vmatpush3.bf16.msra.mxu0 %v12868_v11 }
 0x62d   : > { %v2937_v24 = vmax.f32 %v2851_v19, 0.0 }
 0x62e   : > { %v2855_v29 = vpop.f32.mrb[134].mxu1 }
 0x62f   : > { %v2856_v30 = vadd.f32 %v2855_v29, %v15108_v53  ;;  %v2857_v33 = vpop.f32.mrb[135].mxu1  ;;  %12006 = vmatprep.mubr.f32.mxu1 %v2937_v24 }
 0x631   : > { %v2938_v39 = vmax.f32 %v2856_v30, 0.0 }
 0x632   : > { %v2860_v41 = vpop.f32.mrb[136].mxu1 }
 0x633   : > { %v2861_v43 = vadd.f32 %v2860_v41, %v15108_v53  ;;  %v2862_v44 = vpop.f32.mrb[137].mxu1  ;;  %12007 = vmatmul.mubr.f32.gmra.mrb[178].mxu1 %v2938_v39 }
 0x635   : > { %v2939_v46 = vmax.f32 %v2861_v43, 0.0 }
 0x636   : > { %v2865_v48 = vpop.f32.mrb[138].mxu1 }
 0x637   : > { %v2866_v49 = vadd.f32 %v2865_v48, %v15108_v53  ;;  %v2867_v51 = vpop.f32.mrb[139].mxu1  ;;  %12009 = vmatprep.mubr.f32.mxu1 %v2939_v46 }
 0x639   : > { %v2940_v54 = vmax.f32 %v2866_v49, 0.0 }
 0x63a   : > { %v2870_v56 = vpop.f32.mrb[140].mxu1 }
 0x63b   : > { %v2871_v59 = vadd.f32 %v2870_v56, %v15108_v53  ;;  %v2872_v62 = vpop.f32.mrb[141].mxu1  ;;  %12010 = vmatmul.mubr.f32.gmra.mrb[180].mxu1 %v2940_v54 }
 0x63d   : > { %v2941_v36 = vmax.f32 %v2871_v59, 0.0 }
 0x63e   : > { %v2875_v60 = vpop.f32.mrb[142].mxu1 }
 0x63f   : > { %v2876_v4 = vadd.f32 %v2875_v60, %v15108_v53  ;;  %v2877_v8 = vpop.f32.mrb[143].mxu1  ;;  %12012 = vmatprep.mubr.f32.mxu1 %v2941_v36 }
 0x641   : > { %v2942_v13 = vmax.f32 %v2876_v4, 0.0 }
 0x642   : > { %v2880_v16 = vpop.f32.mrb[144].mxu1 }
 0x643   : > { %v2881_v19 = vadd.f32 %v2880_v16, %v15108_v53  ;;  %v2882_v21 = vpop.f32.mrb[145].mxu1  ;;  %12013 = vmatmul.mubr.f32.gmra.mrb[182].mxu1 %v2942_v13 }
 0x645   : > { %v2943_v24 = vmax.f32 %v2881_v19, 0.0 }
 0x646   : > { %v2885_v29 = vpop.f32.mrb[146].mxu1 }
 0x647   : > { %v2886_v30 = vadd.f32 %v2885_v29, %v15108_v53  ;;  %v2887_v33 = vpop.f32.mrb[147].mxu1  ;;  %12015 = vmatprep.mubr.f32.mxu1 %v2943_v24 }
 0x648   : > { %v13847_v33 = vld [vmem:[%s14154_s17] sm:$0xff] }
 0x649   : > { %v2944_v39 = vmax.f32 %v2886_v30, 0.0  ;;  %v13846_v30 = vld [vmem:[%s14393_s28 + $0x8] sm:$0xff]  ;;  %vm376_vm2 = vcmp.gt.f32.partialorder %v13847_v33, 0.5 }
 0x64a   : > { %v2890_v41 = vpop.f32.mrb[148].mxu1  ;;  %v13860_v33 = vld [vmem:[%s14154_s17 + $0x68] sm:$0xff] }
 0x64b   : > { %v2891_v43 = vadd.f32 %v2890_v41, %v15108_v53  ;;  %v2892_v44 = vpop.f32.mrb[149].mxu1  ;;  %12016 = vmatmul.mubr.f32.gmra.mrb[184].mxu1 %v2944_v39  ;;  %v14080_v39 = vmov 5   ;;  %v14081_v41 = vmov 0   ;;  %vm389_vm15 = vcmp.gt.f32.partialorder %v13860_v33, 0.5 }
 0x64c   : > { %13844 = vset.pattern.permute.xlu0 %v14080_v39  ;;  %13845 = vset.pattern.permute.xlu1 %v14080_v39  ;;  %v13848_v44 = vld [vmem:[%s14154_s17 + $0x8] sm:$0xff]  ;;  %v13861_v39 = vld [vmem:[%s14154_s17 + $0x70] sm:$0xff] }
 0x64d   : > { %v2945_v46 = vmax.f32 %v2891_v43, 0.0  ;;  %v3467_v43 = vsel %vm376_vm2, 1, %v14081_v41  ;;  %vm377_vm3 = vcmp.gt.f32.partialorder %v13848_v44, 0.5  ;;  %vm390_vm0 = vcmp.gt.f32.partialorder %v13861_v39, 0.5 }
 0x64e   : > { %v2895_v48 = vpop.f32.mrb[150].mxu1  ;;  %3500 = vperm.xlu0 %13844, %v3467_v43   ;;  %v3480_v43 = vsel %vm389_vm15, 1, %v14081_v41  ;;  %v3481_v44 = vsel %vm390_vm0, 1, %v14081_v41 }
 0x64f   : > { %v2896_v49 = vadd.f32 %v2895_v48, %v15108_v53  ;;  %v2897_v51 = vpop.f32.mrb[151].mxu1  ;;  %12018 = vmatprep.mubr.f32.mxu1 %v2945_v46  ;;  %v3468_v46 = vsel %vm377_vm3, 1, %v14081_v41 }
 0x650   : > { %v13851_v51 = vld [vmem:[%s14154_s17 + $0x20] sm:$0xff] }
 0x651   : > { %v2946_v54 = vmax.f32 %v2896_v49, 0.0  ;;  %v13850_v49 = vld [vmem:[%s14154_s17 + $0x18] sm:$0xff]  ;;  %vm380_vm6 = vcmp.gt.f32.partialorder %v13851_v51, 0.5  ;;  %v13864_v51 = vld [vmem:[%s14154_s17 + $0x88] sm:$0xff] }
 0x652   : > { %v2900_v56 = vpop.f32.mrb[152].mxu1  ;;  %3503 = vperm.xlu0 %13844, %v3468_v46   ;;  %vm379_vm5 = vcmp.gt.f32.partialorder %v13850_v49, 0.5  ;;  %v13863_v46 = vld [vmem:[%s14154_s17 + $0x80] sm:$0xff] }
 0x653   : > { %v2901_v59 = vadd.f32 %v2900_v56, %v15108_v53  ;;  %v2902_v62 = vpop.f32.mrb[153].mxu1  ;;  %12019 = vmatmul.mubr.f32.gmra.mrb[186].mxu1 %v2946_v54  ;;  %v3470_v54 = vsel %vm379_vm5, 1, %v14081_v41  ;;  %v3471_v56 = vsel %vm380_vm6, 1, %v14081_v41  ;;  %vm392_vm3 = vcmp.gt.f32.partialorder %v13863_v46, 0.5  ;;  %v13873_v46 = vld [vmem:[%s14154_s17 + $0xd0] sm:$0xff] }
 0x654   : > { %v13853_v62 = vld [vmem:[%s14154_s17 + $0x30] sm:$0xff]  ;;  %v3483_v49 = vsel %vm392_vm3, 1, %v14081_v41 }
 0x655   : > { %v2947_v36 = vmax.f32 %v2901_v59, 0.0  ;;  %v13852_v59 = vld [vmem:[%s14154_s17 + $0x28] sm:$0xff]  ;;  %vm382_vm8 = vcmp.gt.f32.partialorder %v13853_v62, 0.5  ;;  %v15232_v62 = vld [vmem:[%s18670_s4 + $0x3a0] ss:$0 sm:$0xff] }
 0x656   : > { %v2905_v60 = vpop.f32.mrb[154].mxu1  ;;  %3512 = vperm.xlu0 %13844, %v3471_v56   ;;  %vm381_vm7 = vcmp.gt.f32.partialorder %v13852_v59, 0.5 }
 0x657   : > { %v2906_v63 = vadd.f32 %v2905_v60, %v15108_v53  ;;  %v2907_v3 = vpop.f32.mrb[155].mxu1  ;;  %12021 = vmatprep.mubr.f32.mxu1 %v2947_v36  ;;  %v3472_v36 = vsel %vm381_vm7, 1, %v14081_v41  ;;  %v3473_v60 = vsel %vm382_vm8, 1, %v14081_v41 }
 0x658   : > { %v13855_v3 = vld [vmem:[%s14154_s17 + $0x40] sm:$0xff] }
 0x659   : > { %v2948_v4 = vmax.f32 %v2906_v63, 0.0  ;;  %v13854_v63 = vld [vmem:[%s14154_s17 + $0x38] sm:$0xff]  ;;  %vm384_vm10 = vcmp.gt.f32.partialorder %v13855_v3, 0.5  ;;  %v13869_v3 = vld [vmem:[%s14154_s17 + $0xb0] sm:$0xff] }
 0x65a   : > { %v2910_v8 = vpop.f32.mrb[156].mxu1  ;;  %3518 = vperm.xlu0 %13844, %v3473_v60   ;;  %vm383_vm9 = vcmp.gt.f32.partialorder %v13854_v63, 0.5  ;;  %v13867_v60 = vld [vmem:[%s14154_s17 + $0xa0] sm:$0xff]  ;;  %v13868_v63 = vld [vmem:[%s14154_s17 + $0xa8] sm:$0xff] }
 0x65b   : > { %v2911_v11 = vadd.f32 %v2910_v8, %v15108_v53  ;;  %v2912_v13 = vpop.f32.mrb[157].mxu1  ;;  %12022 = vmatmul.mubr.f32.gmra.mrb[188].mxu1 %v2948_v4  ;;  %v3474_v4 = vsel %vm383_vm9, 1, %v14081_v41  ;;  %v3475_v8 = vsel %vm384_vm10, 1, %v14081_v41  ;;  %vm396_vm7 = vcmp.gt.f32.partialorder %v13867_v60, 0.5  ;;  %v13875_v60 = vld [vmem:[%s14154_s17 + $0xe0] sm:$0xff] }
 0x65c   : > { %v13857_v13 = vld [vmem:[%s14154_s17 + $0x50] sm:$0xff]  ;;  %vm397_vm8 = vcmp.gt.f32.partialorder %v13868_v63, 0.5  ;;  %vm398_vm9 = vcmp.gt.f32.partialorder %v13869_v3, 0.5  ;;  %vm404_vm15 = vcmp.gt.f32.partialorder %v13875_v60, 0.5 }
 0x65d   : > { %v2949_v16 = vmax.f32 %v2911_v11, 0.0  ;;  %v13856_v11 = vld [vmem:[%s14154_s17 + $0x48] sm:$0xff]  ;;  %vm386_vm12 = vcmp.gt.f32.partialorder %v13857_v13, 0.5 }
 0x65e   : > { %v2915_v19 = vpop.f32.mrb[158].mxu1  ;;  %3524 = vperm.xlu0 %13844, %v3475_v8   ;;  %vm385_vm11 = vcmp.gt.f32.partialorder %v13856_v11, 0.5  ;;  %v3487_v11 = vsel %vm396_vm7, 1, %v14081_v41 }
 0x65f   : > { %v2916_v21 = vadd.f32 %v2915_v19, %v15108_v53  ;;  %v2917_v24 = vpop.f32.mrb[159].mxu1  ;;  %12024 = vmatprep.mubr.f32.mxu1 %v2949_v16  ;;  %v13849_v53 = vld [vmem:[%s14154_s17 + $0x10] sm:$0xff]  ;;  %v3476_v16 = vsel %vm385_vm11, 1, %v14081_v41  ;;  %v3477_v19 = vsel %vm386_vm12, 1, %v14081_v41 }
 0x660   : > { %vm378_vm4 = vcmp.gt.f32.partialorder %v13849_v53, 0.5  ;;  %v13859_v24 = vld [vmem:[%s14154_s17 + $0x60] sm:$0xff]  ;;  %v13862_v53 = vld [vmem:[%s14154_s17 + $0x78] sm:$0xff] }
 0x661   : > { %v2950_v29 = vmax.f32 %v2916_v21, 0.0  ;;  %v3469_v48 = vsel %vm378_vm4, 1, %v14081_v41  ;;  %v13858_v21 = vld [vmem:[%s14154_s17 + $0x58] sm:$0xff]  ;;  %vm388_vm14 = vcmp.gt.f32.partialorder %v13859_v24, 0.5  ;;  %vm391_vm2 = vcmp.gt.f32.partialorder %v13862_v53, 0.5  ;;  %v13872_v53 = vld [vmem:[%s14154_s17 + $0xc8] sm:$0xff] }
 0x662   : > { %3506 = vperm.xlu1 %13845, %v3469_v48   ;;  %3530 = vperm.xlu0 %13844, %v3477_v19   ;;  %vm387_vm13 = vcmp.gt.f32.partialorder %v13858_v21, 0.5  ;;  %v3482_v48 = vsel %vm391_vm2, 1, %v14081_v41  ;;  %vm393_vm4 = vcmp.gt.f32.partialorder %v13864_v51, 0.5  ;;  %v3488_v21 = vsel %vm397_vm8, 1, %v14081_v41 }
 0x663   : > { %12025 = vmatmul.mubr.f32.gmra.mrb[190].mxu1 %v2950_v29  ;;  %v3478_v29 = vsel %vm387_vm13, 1, %v14081_v41  ;;  %v3484_v56 = vsel %vm393_vm4, 1, %v14081_v41  ;;  %v3489_v24 = vsel %vm398_vm9, 1, %v14081_v41  ;;  %vm401_vm12 = vcmp.gt.f32.partialorder %v13872_v53, 0.5 }
 0x664   : > { %3723 = vmatprep.mubr.f32.mxu1 %v13846_v30  ;;  %v3479_v30 = vsel %vm388_vm14, 1, %v14081_v41  ;;  %vm402_vm13 = vcmp.gt.f32.partialorder %v13873_v46, 0.5 }
 0x666   : > { %3509 = vperm.xlu1 %13845, %v3470_v54   ;;  %3536 = vperm.xlu0 %13844, %v3479_v30   ;;  %v13865_v54 = vld [vmem:[%s14154_s17 + $0x90] sm:$0xff]  ;;  %v13871_v30 = vld [vmem:[%s14154_s17 + $0xc0] sm:$0xff] }
 0x667   : > { %vm394_vm5 = vcmp.gt.f32.partialorder %v13865_v54, 0.5  ;;  %vm400_vm11 = vcmp.gt.f32.partialorder %v13871_v30, 0.5 }
 0x668   : > { %v3485_v59 = vsel %vm394_vm5, 1, %v14081_v41 }
 0x66a   : > { %3515 = vperm.xlu1 %13845, %v3472_v36   ;;  %3542 = vperm.xlu0 %13844, %v3481_v44   ;;  %v13866_v36 = vld [vmem:[%s14154_s17 + $0x98] sm:$0xff]  ;;  %v3491_v44 = vsel %vm400_vm11, 1, %v14081_v41 }
 0x66b   : > { %vm395_vm6 = vcmp.gt.f32.partialorder %v13866_v36, 0.5  ;;  %v13874_v36 = vld [vmem:[%s14154_s17 + $0xd8] sm:$0xff] }
 0x66c   : > { %v3486_v8 = vsel %vm395_vm6, 1, %v14081_v41  ;;  %vm403_vm14 = vcmp.gt.f32.partialorder %v13874_v36, 0.5 }
 0x66e   : > { %3521 = vperm.xlu1 %13845, %v3474_v4   ;;  %3548 = vperm.xlu0 %13844, %v3483_v49  }
 0x672   : > { %3527 = vperm.xlu1 %13845, %v3476_v16   ;;  %3554 = vperm.xlu0 %13844, %v3485_v59   ;;  %v3493_v59 = vsel %vm402_vm13, 1, %v14081_v41 }
 0x676   : > { %3533 = vperm.xlu1 %13845, %v3478_v29   ;;  %3560 = vperm.xlu0 %13844, %v3487_v11   ;;  %v13870_v29 = vld [vmem:[%s14154_s17 + $0xb8] sm:$0xff]  ;;  %v13876_v11 = vld [vmem:[%s14154_s17 + $0xe8] sm:$0xff] }
 0x677   : > { %vm399_vm10 = vcmp.gt.f32.partialorder %v13870_v29, 0.5  ;;  %vm405_vm0 = vcmp.gt.f32.partialorder %v13876_v11, 0.5 }
 0x678   : > { %v3496_v29 = vsel %vm405_vm0, 1, %v14081_v41 }
 0x67a   : > { %3539 = vperm.xlu1 %13845, %v3480_v43   ;;  %3566 = vperm.xlu0 %13844, %v3489_v24   ;;  %v3490_v43 = vsel %vm399_vm10, 1, %v14081_v41 }
 0x67e   : > { %3545 = vperm.xlu1 %13845, %v3482_v48   ;;  %3572 = vperm.xlu0 %13844, %v3491_v44  }
 0x682   : > { %3551 = vperm.xlu1 %13845, %v3484_v56   ;;  %v3492_v56 = vsel %vm401_vm12, 1, %v14081_v41  ;;  %3578 = vperm.xlu0 %13844, %v3493_v59  }
 0x686   : > { %3557 = vperm.xlu1 %13845, %v3486_v8   ;;  %v3495_v8 = vsel %vm404_vm15, 1, %v14081_v41 }
 0x687   : > { %3584 = vperm.xlu0 %13844, %v3495_v8  }
 0x68a   : > { %3563 = vperm.xlu1 %13845, %v3488_v21  }
 0x68e   : > { %3569 = vperm.xlu1 %13845, %v3490_v43  }
 0x692   : > { %3575 = vperm.xlu1 %13845, %v3492_v56  }
 0x6be   : > { %v11981_v4 = vpop.f32.mrb[160].mxu1 }
 0x6bf   : > { %v3040_v13 = vadd.f32 %v11981_v4, %v15232_v62  ;;  %v3034_v16 = vpop.f32.mrb[161].mxu1  ;;  %v3494_v4 = vsel %vm403_vm14, 1, %v14081_v41 }
 0x6c0   : > { %v3035_v19 = vadd.f32 %v3034_v16, %v15232_v62  ;;  %3581 = vperm.xlu1 %13845, %v3494_v4  }
 0x6c1   : > { %v3194_v39 = vmax.f32 %v3040_v13, 0.0  ;;  %v13877_v13 = vld [vmem:[%s14154_s17 + $0xf0] sm:$0xff] }
 0x6c2   : > { %v3193_v33 = vmax.f32 %v3035_v19, 0.0  ;;  %vm406_vm2 = vcmp.gt.f32.partialorder %v13877_v13, 0.5 }
 0x6c3   : > { %v3497_v30 = vsel %vm406_vm2, 1, %v14081_v41 }
 0x6c4   : > { %12059 = vmatprep.mubr.f32.mxu0 %v3193_v33  ;;  %v13878_v33 = vld [vmem:[%s14154_s17 + $0xf8] sm:$0xff]  ;;  %3587 = vperm.xlu1 %13845, %v3496_v29  }
 0x6c5   : > { %12060 = vmatmul.mubr.f32.vlgmr.msra.gmra.mrb[128].mxu0 %v3194_v39  ;;  %vm407_vm3 = vcmp.gt.f32.partialorder %v13878_v33, 0.5  ;;  %3590 = vperm.xlu0 %13844, %v3497_v30  }
 0x6c6   : > { %v11984_v48 = vpop.f32.mrb[162].mxu1  ;;  %v3498_v44 = vsel %vm407_vm3, 1, %v14081_v41 }
 0x6c7   : > { %v3050_v49 = vadd.f32 %v11984_v48, %v15232_v62  ;;  %v3044_v51 = vpop.f32.mrb[163].mxu1 }
 0x6c8   : > { %v3045_v54 = vadd.f32 %v3044_v51, %v15232_v62  ;;  %3593 = vperm.xlu1 %13845, %v3498_v44  }
 0x6c9   : > { %v3196_v3 = vmax.f32 %v3050_v49, 0.0 }
 0x6ca   : > { %v3195_v63 = vmax.f32 %v3045_v54, 0.0 }
 0x6cc   : > { %12062 = vmatprep.mubr.f32.mxu0 %v3195_v63 }
 0x6cd   : > { %12063 = vmatmul.mubr.f32.gmra.mrb[130].mxu0 %v3196_v3 }
 0x6ce   : > { %v11987_v16 = vpop.f32.mrb[164].mxu1 }
 0x6cf   : > { %v3060_v19 = vadd.f32 %v11987_v16, %v15232_v62  ;;  %v3054_v21 = vpop.f32.mrb[165].mxu1 }
 0x6d0   : > { %v3055_v24 = vadd.f32 %v3054_v21, %v15232_v62 }
 0x6d1   : > { %v3198_v43 = vmax.f32 %v3060_v19, 0.0 }
 0x6d2   : > { %v3197_v39 = vmax.f32 %v3055_v24, 0.0 }
 0x6d4   : > { %12065 = vmatprep.mubr.f32.mxu0 %v3197_v39 }
 0x6d5   : > { %12066 = vmatmul.mubr.f32.gmra.mrb[132].mxu0 %v3198_v43 }
 0x6d6   : > { %v11990_v53 = vpop.f32.mrb[166].mxu1 }
 0x6d7   : > { %v3070_v46 = vadd.f32 %v11990_v53, %v15232_v62  ;;  %v3064_v48 = vpop.f32.mrb[167].mxu1 }
 0x6d8   : > { %v3065_v49 = vadd.f32 %v3064_v48, %v15232_v62 }
 0x6d9   : > { %v3200_v54 = vmax.f32 %v3070_v46, 0.0 }
 0x6da   : > { %v3199_v51 = vmax.f32 %v3065_v49, 0.0 }
 0x6dc   : > { %12068 = vmatprep.mubr.f32.mxu0 %v3199_v51 }
 0x6dd   : > { %12069 = vmatmul.mubr.f32.gmra.mrb[134].mxu0 %v3200_v54 }
 0x6de   : > { %v11993_v56 = vpop.f32.mrb[168].mxu1 }
 0x6df   : > { %v3080_v59 = vadd.f32 %v11993_v56, %v15232_v62  ;;  %v3074_v36 = vpop.f32.mrb[169].mxu1 }
 0x6e0   : > { %v3075_v60 = vadd.f32 %v3074_v36, %v15232_v62 }
 0x6e1   : > { %v3202_v41 = vmax.f32 %v3080_v59, 0.0 }
 0x6e2   : > { %v3201_v63 = vmax.f32 %v3075_v60, 0.0 }
 0x6e4   : > { %12071 = vmatprep.mubr.f32.mxu0 %v3201_v63 }
 0x6e5   : > { %12072 = vmatmul.mubr.f32.gmra.mrb[136].mxu0 %v3202_v41 }
 0x6e6   : > { %v11996_v3 = vpop.f32.mrb[170].mxu1 }
 0x6e7   : > { %v3090_v4 = vadd.f32 %v11996_v3, %v15232_v62  ;;  %v3084_v8 = vpop.f32.mrb[171].mxu1 }
 0x6e8   : > { %v3085_v11 = vadd.f32 %v3084_v8, %v15232_v62 }
 0x6e9   : > { %v3204_v16 = vmax.f32 %v3090_v4, 0.0 }
 0x6ea   : > { %v3203_v13 = vmax.f32 %v3085_v11, 0.0 }
 0x6ec   : > { %12074 = vmatprep.mubr.f32.mxu0 %v3203_v13 }
 0x6ed   : > { %12075 = vmatmul.mubr.f32.gmra.mrb[138].mxu0 %v3204_v16 }
 0x6ee   : > { %v11999_v19 = vpop.f32.mrb[172].mxu1 }
 0x6ef   : > { %v3100_v21 = vadd.f32 %v11999_v19, %v15232_v62  ;;  %v3094_v24 = vpop.f32.mrb[173].mxu1 }
 0x6f0   : > { %v3095_v29 = vadd.f32 %v3094_v24, %v15232_v62 }
 0x6f1   : > { %v3206_v33 = vmax.f32 %v3100_v21, 0.0 }
 0x6f2   : > { %v3205_v30 = vmax.f32 %v3095_v29, 0.0 }
 0x6f4   : > { %12077 = vmatprep.mubr.f32.mxu0 %v3205_v30 }
 0x6f5   : > { %12078 = vmatmul.mubr.f32.gmra.mrb[140].mxu0 %v3206_v33 }
 0x6f6   : > { %v12002_v39 = vpop.f32.mrb[174].mxu1 }
 0x6f7   : > { %v3110_v43 = vadd.f32 %v12002_v39, %v15232_v62  ;;  %v3104_v44 = vpop.f32.mrb[175].mxu1 }
 0x6f8   : > { %v3105_v53 = vadd.f32 %v3104_v44, %v15232_v62 }
 0x6f9   : > { %v3208_v48 = vmax.f32 %v3110_v43, 0.0 }
 0x6fa   : > { %v3207_v46 = vmax.f32 %v3105_v53, 0.0 }
 0x6fc   : > { %12080 = vmatprep.mubr.f32.mxu0 %v3207_v46 }
 0x6fd   : > { %12081 = vmatmul.mubr.f32.gmra.mrb[142].mxu0 %v3208_v48 }
 0x6fe   : > { %v12005_v49 = vpop.f32.mrb[176].mxu1 }
 0x6ff   : > { %v3120_v51 = vadd.f32 %v12005_v49, %v15232_v62  ;;  %v3114_v54 = vpop.f32.mrb[177].mxu1 }
 0x700   : > { %v3115_v56 = vadd.f32 %v3114_v54, %v15232_v62 }
 0x701   : > { %v3210_v36 = vmax.f32 %v3120_v51, 0.0 }
 0x702   : > { %v3209_v59 = vmax.f32 %v3115_v56, 0.0 }
 0x704   : > { %12083 = vmatprep.mubr.f32.mxu0 %v3209_v59 }
 0x705   : > { %12084 = vmatmul.mubr.f32.gmra.mrb[144].mxu0 %v3210_v36 }
 0x706   : > { %v12008_v60 = vpop.f32.mrb[178].mxu1 }
 0x707   : > { %v3130_v63 = vadd.f32 %v12008_v60, %v15232_v62  ;;  %v3124_v41 = vpop.f32.mrb[179].mxu1 }
 0x708   : > { %v3125_v3 = vadd.f32 %v3124_v41, %v15232_v62 }
 0x709   : > { %v3212_v8 = vmax.f32 %v3130_v63, 0.0 }
 0x70a   : > { %v3211_v4 = vmax.f32 %v3125_v3, 0.0 }
 0x70c   : > { %12086 = vmatprep.mubr.f32.mxu0 %v3211_v4 }
 0x70d   : > { %12087 = vmatmul.mubr.f32.gmra.mrb[146].mxu0 %v3212_v8 }
 0x70e   : > { %v12011_v11 = vpop.f32.mrb[180].mxu1 }
 0x70f   : > { %v3140_v13 = vadd.f32 %v12011_v11, %v15232_v62  ;;  %v3134_v16 = vpop.f32.mrb[181].mxu1 }
 0x710   : > { %v3135_v19 = vadd.f32 %v3134_v16, %v15232_v62 }
 0x711   : > { %v3214_v24 = vmax.f32 %v3140_v13, 0.0 }
 0x712   : > { %v3213_v21 = vmax.f32 %v3135_v19, 0.0 }
 0x714   : > { %12089 = vmatprep.mubr.f32.mxu0 %v3213_v21 }
 0x715   : > { %12090 = vmatmul.mubr.f32.gmra.mrb[148].mxu0 %v3214_v24 }
 0x716   : > { %v12014_v29 = vpop.f32.mrb[182].mxu1 }
 0x717   : > { %v3150_v30 = vadd.f32 %v12014_v29, %v15232_v62  ;;  %v3144_v33 = vpop.f32.mrb[183].mxu1 }
 0x718   : > { %v3145_v39 = vadd.f32 %v3144_v33, %v15232_v62 }
 0x719   : > { %v3216_v44 = vmax.f32 %v3150_v30, 0.0 }
 0x71a   : > { %v3215_v43 = vmax.f32 %v3145_v39, 0.0  ;;  %v15293_v39 = vpop.permute.xlu0 %3500 }
 0x71b   : > { %vm3595_vm5 = vcmp.eq.s32.totalorder %v15293_v39, 1 }
 0x71c   : > { %12092 = vmatprep.mubr.f32.mxu0 %v3215_v43 }
 0x71d   : > { %12093 = vmatmul.mubr.f32.gmra.mrb[150].mxu0 %v3216_v44  ;;  %v15300_v44 = vld [vmem:[%s18670_s4 + $0x4b0] ss:$0 sm:$0xff] }
 0x71e   : > { %v12017_v53 = vpop.f32.mrb[184].mxu1  ;;  %v15295_v43 = vpop.permute.xlu0 %3503 }
 0x71f   : > { %v3160_v46 = vadd.f32 %v12017_v53, %v15232_v62  ;;  %v3154_v48 = vpop.f32.mrb[185].mxu1  ;;  %vm3596_vm4 = vcmp.eq.s32.totalorder %v15295_v43, 1 }
 0x720   : > { %v3155_v49 = vadd.f32 %v3154_v48, %v15232_v62  ;;  %v15305_v48 = vpop.permute.xlu1 %3506 }
 0x721   : > { %v3218_v54 = vmax.f32 %v3160_v46, 0.0  ;;  %vm3597_vm7 = vcmp.eq.s32.totalorder %v15305_v48, 1 }
 0x722   : > { %v3217_v51 = vmax.f32 %v3155_v49, 0.0 }
 0x724   : > { %12095 = vmatprep.mubr.f32.mxu0 %v3217_v51 }
 0x725   : > { %12096 = vmatmul.mubr.f32.gmra.mrb[152].mxu0 %v3218_v54 }
 0x726   : > { %v12020_v56 = vpop.f32.mrb[186].mxu1 }
 0x727   : > { %v3170_v59 = vadd.f32 %v12020_v56, %v15232_v62  ;;  %v3164_v36 = vpop.f32.mrb[187].mxu1 }
 0x728   : > { %v3165_v60 = vadd.f32 %v3164_v36, %v15232_v62 }
 0x729   : > { %v3220_v41 = vmax.f32 %v3170_v59, 0.0  ;;  %v15320_v59 = vpop.permute.xlu1 %3509 }
 0x72a   : > { %v3219_v63 = vmax.f32 %v3165_v60, 0.0  ;;  %vm3598_vm6 = vcmp.eq.s32.totalorder %v15320_v59, 1 }
 0x72c   : > { %12098 = vmatprep.mubr.f32.mxu0 %v3219_v63 }
 0x72d   : > { %12099 = vmatmul.mubr.f32.gmra.mrb[154].mxu0 %v3220_v41 }
 0x72e   : > { %v12023_v3 = vpop.f32.mrb[188].mxu1 }
 0x72f   : > { %v3180_v4 = vadd.f32 %v12023_v3, %v15232_v62  ;;  %v3174_v8 = vpop.f32.mrb[189].mxu1 }
 0x730   : > { %v3175_v11 = vadd.f32 %v3174_v8, %v15232_v62 }
 0x731   : > { %v3222_v16 = vmax.f32 %v3180_v4, 0.0 }
 0x732   : > { %v3221_v13 = vmax.f32 %v3175_v11, 0.0  ;;  %v15339_v11 = vpop.permute.xlu1 %3515 }
 0x733   : > { %vm3600_vm8 = vcmp.eq.s32.totalorder %v15339_v11, 1 }
 0x734   : > { %12101 = vmatprep.mubr.f32.mxu0 %v3221_v13  ;;  %v15341_v13 = vpop.permute.xlu0 %3512 }
 0x735   : > { %12102 = vmatmul.mubr.f32.gmra.mrb[156].mxu0 %v3222_v16  ;;  %vm3599_vm9 = vcmp.eq.s32.totalorder %v15341_v13, 1 }
 0x736   : > { %v12026_v19 = vpop.f32.mrb[190].mxu1 }
 0x737   : > { %v3190_v21 = vadd.f32 %v12026_v19, %v15232_v62  ;;  %v3184_v24 = vpop.f32.mrb[191].mxu1 }
 0x738   : > { %v3185_v29 = vadd.f32 %v3184_v24, %v15232_v62 }
 0x739   : > { %v3224_v33 = vmax.f32 %v3190_v21, 0.0 }
 0x73a   : > { %v3223_v30 = vmax.f32 %v3185_v29, 0.0 }
 0x73c   : > { %12104 = vmatprep.mubr.f32.mxu0 %v3223_v30 }
 0x73d   : > { %12105 = vmatmul.mubr.f32.gmra.mrb[158].mxu0 %v3224_v33 }
 0x73e   : > { %4077 = vmatprep.mubr.f32.mxu0 %v18673_v38 }
 0x798   : > { %v12061_v53 = vpop.f32.mrb[128].mxu0 }
 0x799   : > { %v3314_v62 = vadd.f32 %v12061_v53, %v15300_v44  ;;  %v3308_v46 = vpop.f32.mrb[129].mxu0  ;;  %v15360_v53 = vpop.permute.xlu1 %3521 }
 0x79a   : > { %v3309_v49 = vadd.f32 %v3308_v46, %v15300_v44  ;;  %vm3602_vm10 = vcmp.eq.s32.totalorder %v15360_v53, 1 }
 0x79b   : > { %v15311_v51 = vsel %vm3596_vm4, %v3314_v62, %v14402_v0  ;;  %v15362_v62 = vpop.permute.xlu0 %3518 }
 0x79c   : > { %v15316_v54 = vsel %vm3595_vm5, %v3309_v49, %v14405_v2  ;;  %18821 = vst [vmem:[#allocation27_spill] sm:$0xff] %v15362_v62  ;;  %vm3601_vm11 = vcmp.eq.s32.totalorder %v15362_v62, 1 }
 0x79d   : > { %v12873_v56 = vpack.c.bf16 %v15311_v51, %v15316_v54 }
 0x79f   : > { %12874 = vmatpush1.bf16.msra.mxu1 %v12873_v56 }
 0x7a0   : > { %v12064_v36 = vpop.f32.mrb[130].mxu0  ;;  %12875 = vmatprep.subr.bf16.mxu1 %v18675_v61 }
 0x7a1   : > { %v3324_v60 = vadd.f32 %v12064_v36, %v15300_v44  ;;  %v3318_v63 = vpop.f32.mrb[131].mxu0 }
 0x7a2   : > { %v3319_v41 = vadd.f32 %v3318_v63, %v15300_v44 }
 0x7a3   : > { %v15330_v3 = vsel %vm3598_vm6, %v3324_v60, %v14410_v5 }
 0x7a4   : > { %v15335_v4 = vsel %vm3597_vm7, %v3319_v41, %v14413_v7 }
 0x7a5   : > { %v12876_v8 = vpack.c.bf16 %v15330_v3, %v15335_v4 }
 0x7a7   : > { %12877 = vmatpush1.bf16.msra.mxu1 %v12876_v8  ;;  %v15381_v8 = vpop.permute.xlu1 %3527 }
 0x7a8   : > { %v12067_v16 = vpop.f32.mrb[132].mxu0  ;;  %12878 = vmatprep.subr.bf16.mxu1 %v18675_v61  ;;  %18822 = vst [vmem:[#allocation28_spill] sm:$0xff] %v15381_v8  ;;  %vm3604_vm12 = vcmp.eq.s32.totalorder %v15381_v8, 1 }
 0x7a9   : > { %v3334_v19 = vadd.f32 %v12067_v16, %v15300_v44  ;;  %v3328_v21 = vpop.f32.mrb[133].mxu0  ;;  %v15383_v16 = vpop.permute.xlu0 %3524 }
 0x7aa   : > { %v3329_v24 = vadd.f32 %v3328_v21, %v15300_v44  ;;  %18823 = vst [vmem:[#allocation29_spill] sm:$0xff] %v15383_v16  ;;  %vm3603_vm13 = vcmp.eq.s32.totalorder %v15383_v16, 1 }
 0x7ab   : > { %v15351_v29 = vsel %vm3600_vm8, %v3334_v19, %v14419_v10 }
 0x7ac   : > { %v15356_v30 = vsel %vm3599_vm9, %v3329_v24, %v14422_v12 }
 0x7ad   : > { %v12879_v33 = vpack.c.bf16 %v15351_v29, %v15356_v30 }
 0x7af   : > { %12880 = vmatpush1.bf16.msra.mxu1 %v12879_v33 }
 0x7b0   : > { %v12070_v46 = vpop.f32.mrb[134].mxu0  ;;  %12881 = vmatprep.subr.bf16.mxu1 %v18675_v61 }
 0x7b1   : > { %v3344_v49 = vadd.f32 %v12070_v46, %v15300_v44  ;;  %v3338_v56 = vpop.f32.mrb[135].mxu0 }
 0x7b2   : > { %v3339_v36 = vadd.f32 %v3338_v56, %v15300_v44 }
 0x7b3   : > { %v15372_v60 = vsel %vm3602_vm10, %v3344_v49, %v14428_v15 }
 0x7b4   : > { %v15377_v63 = vsel %vm3601_vm11, %v3339_v36, %v14431_v17  ;;  %v15402_v36 = vpop.permute.xlu1 %3533 }
 0x7b5   : > { %v12882_v41 = vpack.c.bf16 %v15372_v60, %v15377_v63  ;;  %18824 = vst [vmem:[#allocation30_spill] sm:$0xff] %v15402_v36  ;;  %vm18794_vm14 = vcmp.eq.s32.totalorder %v15402_v36, 1 }
 0x7b7   : > { %12883 = vmatpush1.bf16.msra.mxu1 %v12882_v41  ;;  %v15404_v41 = vpop.permute.xlu0 %3530 }
 0x7b8   : > { %v12073_v19 = vpop.f32.mrb[136].mxu0  ;;  %12884 = vmatprep.subr.bf16.mxu1 %v18675_v61  ;;  %18825 = vst [vmem:[#allocation31_spill] sm:$0xff] %v15404_v41  ;;  %vm3605_vm15 = vcmp.eq.s32.totalorder %v15404_v41, 1  ;;  %v15423_v16 = vpop.permute.xlu1 %3539 }
 0x7b9   : > { %v3354_v21 = vadd.f32 %v12073_v19, %v15300_v44  ;;  %v3348_v24 = vpop.f32.mrb[137].mxu0  ;;  %18826 = vst [vmem:[#allocation32_spill] sm:$0xff] %v15423_v16  ;;  %vm18689_vm0 = vcmp.eq.s32.totalorder %v15423_v16, 1 }
 0x7ba   : > { %v3349_v33 = vadd.f32 %v3348_v24, %v15300_v44 }
 0x7bb   : > { %v15393_v46 = vsel %vm3604_vm12, %v3354_v21, %v14437_v20  ;;  %v10651_v20 = vld [vmem:[%s18670_s4 + $0x5a8] sm:$0xff] }
 0x7bc   : > { %v15398_v49 = vsel %vm3603_vm13, %v3349_v33, %v14440_v22  ;;  %v18828_v22 = vmov 0.0|0.0  }
 0x7bd   : > { %v12885_v56 = vpack.c.bf16 %v15393_v46, %v15398_v49 }
 0x7bf   : > { %12886 = vmatpush1.bf16.msra.mxu1 %v12885_v56 }
 0x7c0   : > { %v12076_v19 = vpop.f32.mrb[138].mxu0  ;;  %12887 = vmatprep.subr.bf16.mxu1 %v18675_v61 }
 0x7c1   : > { %v3364_v21 = vadd.f32 %v12076_v19, %v15300_v44  ;;  %v3358_v24 = vpop.f32.mrb[139].mxu0  ;;  %v15425_v19 = vpop.permute.xlu0 %3536 }
 0x7c2   : > { %v3359_v33 = vadd.f32 %v3358_v24, %v15300_v44  ;;  %18827 = vst [vmem:[#allocation33_spill] sm:$0xff] %v15425_v19  ;;  %vm18795_vm2 = vcmp.eq.s32.totalorder %v15425_v19, 1 }
 0x7c3   : > { %v15414_v38 = vsel %vm18794_vm14, %v3364_v21, %v14446_v25  ;;  %v15444_v25 = vpop.permute.xlu1 %3545 }
 0x7c4   : > { %v15419_v56 = vsel %vm3605_vm15, %v3359_v33, %v14449_v28  ;;  %18829 = vst [vmem:[#allocation34_spill] sm:$0xff] %v15444_v25  ;;  %vm18702_vm3 = vcmp.eq.s32.totalorder %v15444_v25, 1 }
 0x7c5   : > { %v12888_v61 = vpack.c.bf16 %v15414_v38, %v15419_v56 }
 0x7c7   : > { %12889 = vmatpush1.bf16.msra.mxu1 %v12888_v61 }
 0x7c8   : > { %v12079_v24 = vpop.f32.mrb[140].mxu0  ;;  %12890 = vmatprep.subr.bf16.mxu1 %v18828_v22 }
 0x7c9   : > { %v3374_v21 = vadd.f32 %v12079_v24, %v15300_v44  ;;  %v3368_v41 = vpop.f32.mrb[141].mxu0  ;;  %v15446_v24 = vpop.permute.xlu0 %3542 }
 0x7ca   : > { %v3369_v33 = vadd.f32 %v3368_v41, %v15300_v44  ;;  %18830 = vst [vmem:[#allocation35_spill] sm:$0xff] %v15446_v24 }
 0x7cb   : > { %v15435_v28 = vsel %vm18689_vm0, %v3374_v21, %v14455_v57  ;;  %vm18703_vm0 = vcmp.eq.s32.totalorder %v15446_v24, 1 }
 0x7cc   : > { %v15440_v61 = vsel %vm18795_vm2, %v3369_v33, %v14458_v32 }
 0x7cd   : > { %v12891_v36 = vpack.c.bf16 %v15435_v28, %v15440_v61  ;;  %v15469_v25 = vpop.permute.xlu0 %3548 }
 0x7ce   : > { %18832 = vst [vmem:[#allocation37_spill] sm:$0xff] %v15469_v25 }
 0x7cf   : > { %12892 = vmatpush1.bf16.msra.mxu1 %v12891_v36 }
 0x7d0   : > { %v12082_v41 = vpop.f32.mrb[142].mxu0  ;;  %12893 = vmatprep.subr.bf16.mxu1 %v18828_v22 }
 0x7d1   : > { %v3384_v21 = vadd.f32 %v12082_v41, %v15300_v44  ;;  %v3378_v19 = vpop.f32.mrb[143].mxu0  ;;  %v15466_v41 = vpop.permute.xlu1 %3551 }
 0x7d2   : > { %v3379_v33 = vadd.f32 %v3378_v19, %v15300_v44  ;;  %18831 = vst [vmem:[#allocation36_spill] sm:$0xff] %v15466_v41 }
 0x7d3   : > { %v15456_v32 = vsel %vm18702_vm3, %v3384_v21, %v14464_v35  ;;  %vm18712_vm3 = vcmp.eq.s32.totalorder %v15466_v41, 1  ;;  %v15490_v41 = vpop.permute.xlu0 %3554 }
 0x7d4   : > { %v15461_v36 = vsel %vm18703_vm0, %v3379_v33, %v14467_v37  ;;  %vm18713_vm0 = vcmp.eq.s32.totalorder %v15469_v25, 1  ;;  %18834 = vst [vmem:[#allocation39_spill] sm:$0xff] %v15490_v41 }
 0x7d5   : > { %v12894_v16 = vpack.c.bf16 %v15456_v32, %v15461_v36 }
 0x7d7   : > { %12895 = vmatpush1.bf16.msra.mxu1 %v12894_v16 }
 0x7d8   : > { %v12085_v57 = vpop.f32.mrb[144].mxu0  ;;  %12896 = vmatprep.subr.bf16.mxu1 %v18828_v22 }
 0x7d9   : > { %v3394_v19 = vadd.f32 %v12085_v57, %v15300_v44  ;;  %v3388_v8 = vpop.f32.mrb[145].mxu0 }
 0x7da   : > { %v3389_v21 = vadd.f32 %v3388_v8, %v15300_v44  ;;  %v15487_v8 = vpop.permute.xlu1 %3557 }
 0x7db   : > { %v15477_v16 = vsel %vm18712_vm3, %v3394_v19, %v14473_v40  ;;  %18833 = vst [vmem:[#allocation38_spill] sm:$0xff] %v15487_v8  ;;  %vm18722_vm3 = vcmp.eq.s32.totalorder %v15487_v8, 1  ;;  %v15511_v8 = vpop.permute.xlu0 %3560 }
 0x7dc   : > { %v15482_v33 = vsel %vm18713_vm0, %v3389_v21, %v14476_v42  ;;  %vm18723_vm0 = vcmp.eq.s32.totalorder %v15490_v41, 1  ;;  %18836 = vst [vmem:[#allocation41_spill] sm:$0xff] %v15511_v8 }
 0x7dd   : > { %v12897_v57 = vpack.c.bf16 %v15477_v16, %v15482_v33 }
 0x7df   : > { %12898 = vmatpush1.bf16.msra.mxu1 %v12897_v57 }
 0x7e0   : > { %v12088_v24 = vpop.f32.mrb[146].mxu0  ;;  %12899 = vmatprep.subr.bf16.mxu1 %v18828_v22 }
 0x7e1   : > { %v3404_v37 = vadd.f32 %v12088_v24, %v15300_v44  ;;  %v3398_v35 = vpop.f32.mrb[147].mxu0 }
 0x7e2   : > { %v3399_v19 = vadd.f32 %v3398_v35, %v15300_v44  ;;  %v15508_v35 = vpop.permute.xlu1 %3563 }
 0x7e3   : > { %v15498_v21 = vsel %vm18722_vm3, %v3404_v37, %v14482_v45  ;;  %18835 = vst [vmem:[#allocation40_spill] sm:$0xff] %v15508_v35  ;;  %vm18732_vm3 = vcmp.eq.s32.totalorder %v15508_v35, 1  ;;  %v15532_v35 = vpop.permute.xlu0 %3566 }
 0x7e4   : > { %v15503_v57 = vsel %vm18723_vm0, %v3399_v19, %v14485_v47  ;;  %vm18733_vm0 = vcmp.eq.s32.totalorder %v15511_v8, 1  ;;  %18838 = vst [vmem:[#allocation43_spill] sm:$0xff] %v15532_v35 }
 0x7e5   : > { %v12900_v24 = vpack.c.bf16 %v15498_v21, %v15503_v57 }
 0x7e7   : > { %12901 = vmatpush1.bf16.msra.mxu1 %v12900_v24 }
 0x7e8   : > { %v12091_v25 = vpop.f32.mrb[148].mxu0  ;;  %12902 = vmatprep.subr.bf16.mxu1 %v18828_v22 }
 0x7e9   : > { %v3414_v42 = vadd.f32 %v12091_v25, %v15300_v44  ;;  %v3408_v40 = vpop.f32.mrb[149].mxu0 }
 0x7ea   : > { %v3409_v37 = vadd.f32 %v3408_v40, %v15300_v44  ;;  %v15529_v40 = vpop.permute.xlu1 %3569 }
 0x7eb   : > { %v15519_v19 = vsel %vm18732_vm3, %v3414_v42, %v14491_v50  ;;  %18837 = vst [vmem:[#allocation42_spill] sm:$0xff] %v15529_v40  ;;  %vm18742_vm3 = vcmp.eq.s32.totalorder %v15529_v40, 1  ;;  %v15553_v40 = vpop.permute.xlu0 %3572 }
 0x7ec   : > { %v15524_v24 = vsel %vm18733_vm0, %v3409_v37, %v14494_v52  ;;  %vm18743_vm0 = vcmp.eq.s32.totalorder %v15532_v35, 1  ;;  %18840 = vst [vmem:[#allocation45_spill] sm:$0xff] %v15553_v40 }
 0x7ed   : > { %v12903_v25 = vpack.c.bf16 %v15519_v19, %v15524_v24 }
 0x7ef   : > { %12904 = vmatpush1.bf16.msra.mxu1 %v12903_v25 }
 0x7f0   : > { %v12094_v41 = vpop.f32.mrb[150].mxu0  ;;  %12905 = vmatprep.subr.bf16.mxu1 %v18828_v22 }
 0x7f1   : > { %v3424_v47 = vadd.f32 %v12094_v41, %v15300_v44  ;;  %v3418_v45 = vpop.f32.mrb[151].mxu0 }
 0x7f2   : > { %v3419_v42 = vadd.f32 %v3418_v45, %v15300_v44  ;;  %v15550_v45 = vpop.permute.xlu1 %3575 }
 0x7f3   : > { %v15540_v37 = vsel %vm18742_vm3, %v3424_v47, %v14500_v55  ;;  %18839 = vst [vmem:[#allocation44_spill] sm:$0xff] %v15550_v45  ;;  %vm18752_vm3 = vcmp.eq.s32.totalorder %v15550_v45, 1  ;;  %v15574_v45 = vpop.permute.xlu0 %3578 }
 0x7f4   : > { %v15545_v25 = vsel %vm18743_vm0, %v3419_v42, %v14503_v58  ;;  %vm18753_vm0 = vcmp.eq.s32.totalorder %v15553_v40, 1  ;;  %18842 = vst [vmem:[#allocation47_spill] sm:$0xff] %v15574_v45 }
 0x7f5   : > { %v12906_v41 = vpack.c.bf16 %v15540_v37, %v15545_v25 }
 0x7f7   : > { %12907 = vmatpush1.bf16.msra.mxu1 %v12906_v41 }
 0x7f8   : > { %v12097_v8 = vpop.f32.mrb[152].mxu0  ;;  %12908 = vmatprep.subr.bf16.mxu1 %v18828_v22 }
 0x7f9   : > { %v3434_v52 = vadd.f32 %v12097_v8, %v15300_v44  ;;  %v3428_v50 = vpop.f32.mrb[153].mxu0 }
 0x7fa   : > { %v3429_v47 = vadd.f32 %v3428_v50, %v15300_v44  ;;  %v15571_v50 = vpop.permute.xlu1 %3581 }
 0x7fb   : > { %v15561_v42 = vsel %vm18752_vm3, %v3434_v52, %v14509_v27  ;;  %18841 = vst [vmem:[#allocation46_spill] sm:$0xff] %v15571_v50  ;;  %vm18762_vm3 = vcmp.eq.s32.totalorder %v15571_v50, 1  ;;  %v15595_v50 = vpop.permute.xlu0 %3584 }
 0x7fc   : > { %v15566_v41 = vsel %vm18753_vm0, %v3429_v47, %v14512_v1  ;;  %vm18763_vm0 = vcmp.eq.s32.totalorder %v15574_v45, 1  ;;  %18844 = vst [vmem:[#allocation49_spill] sm:$0xff] %v15595_v50 }
 0x7fd   : > { %v12909_v8 = vpack.c.bf16 %v15561_v42, %v15566_v41 }
 0x7ff   : > { %12910 = vmatpush1.bf16.msra.mxu1 %v12909_v8 }
 0x800   : > { %v12100_v35 = vpop.f32.mrb[154].mxu0  ;;  %12911 = vmatprep.subr.bf16.mxu1 %v18828_v22 }
 0x801   : > { %v3444_v58 = vadd.f32 %v12100_v35, %v15300_v44  ;;  %v3438_v55 = vpop.f32.mrb[155].mxu0 }
 0x802   : > { %v3439_v52 = vadd.f32 %v3438_v55, %v15300_v44  ;;  %v15592_v55 = vpop.permute.xlu1 %3587 }
 0x803   : > { %v15582_v47 = vsel %vm18762_vm3, %v3444_v58, %v14518_v6  ;;  %18843 = vst [vmem:[#allocation48_spill] sm:$0xff] %v15592_v55  ;;  %vm18770_vm3 = vcmp.eq.s32.totalorder %v15592_v55, 1  ;;  %v10646_v6 = vld [vmem:[%s18670_s4 + $0x580] sm:$0xff] }
 0x804   : > { %v15587_v8 = vsel %vm18763_vm0, %v3439_v52, %v14521_v9  ;;  %vm18773_vm0 = vcmp.eq.s32.totalorder %v15595_v50, 1  ;;  %v15614_v9 = vpop.permute.xlu0 %3590 }
 0x805   : > { %v12912_v35 = vpack.c.bf16 %v15582_v47, %v15587_v8  ;;  %18846 = vst [vmem:[#allocation51_spill] sm:$0xff] %v15614_v9 }
 0x806   : > { %v15612_v45 = vpop.permute.xlu1 %3593 }
 0x807   : > { %12913 = vmatpush1.bf16.msra.mxu1 %v12912_v35  ;;  %18845 = vst [vmem:[#allocation50_spill] sm:$0xff] %v15612_v45 }
 0x808   : > { %v12103_v40 = vpop.f32.mrb[156].mxu0  ;;  %12914 = vmatprep.subr.bf16.mxu1 %v18828_v22 }
 0x809   : > { %v3454_v1 = vadd.f32 %v12103_v40, %v15300_v44  ;;  %v3448_v27 = vpop.f32.mrb[157].mxu0 }
 0x80a   : > { %v3449_v58 = vadd.f32 %v3448_v27, %v15300_v44 }
 0x80b   : > { %v15603_v52 = vsel %vm18770_vm3, %v3454_v1, %v14527_v14  ;;  %vm3626_vm3 = vcmp.eq.s32.totalorder %v15612_v45, 1 }
 0x80c   : > { %v15608_v35 = vsel %vm18773_vm0, %v3449_v58, %v14530_v18  ;;  %vm3625_vm0 = vcmp.eq.s32.totalorder %v15614_v9, 1  ;;  %v10639_v18 = vld [vmem:[%s18670_s4 + $0x548] sm:$0xff] }
 0x80d   : > { %v12915_v40 = vpack.c.bf16 %v15603_v52, %v15608_v35  ;;  %v10643_v9 = vld [vmem:[%s18670_s4 + $0x568] sm:$0xff] }
 0x80f   : > { %12916 = vmatpush1.bf16.msra.mxu1 %v12915_v40 }
 0x810   : > { %v12106_v27 = vpop.f32.mrb[158].mxu0  ;;  %12917 = vmatprep.subr.bf16.mxu1 %v18828_v22 }
 0x811   : > { %v3464_v55 = vadd.f32 %v12106_v27, %v15300_v44  ;;  %v3458_v1 = vpop.f32.mrb[159].mxu0 }
 0x812   : > { %v3459_v50 = vadd.f32 %v3458_v1, %v15300_v44  ;;  %v10641_v44 = vld [vmem:[%s18670_s4 + $0x558] sm:$0xff] }
 0x813   : > { %v15624_v58 = vsel %vm3626_vm3, %v3464_v55, %v14536_v23  ;;  %v10638_v55 = vld [vmem:[%s18670_s4 + $0x540] sm:$0xff]  ;;  %v12920_v1 = vpack.c.bf16 %v10641_v44, %v10639_v18  ;;  %v10644_v18 = vld [vmem:[%s18670_s4 + $0x570] sm:$0xff]  ;;  %v10647_v44 = vld [vmem:[%s18670_s4 + $0x588] sm:$0xff] }
 0x814   : > { %v15629_v40 = vsel %vm3625_vm0, %v3459_v50, %v14539_v26  ;;  %v10640_v50 = vld [vmem:[%s18670_s4 + $0x550] sm:$0xff]  ;;  %v10645_v26 = vld [vmem:[%s18670_s4 + $0x578] sm:$0xff] }
 0x815   : > { %v12918_v27 = vpack.c.bf16 %v15624_v58, %v15629_v40  ;;  %v12922_v45 = vpack.c.bf16 %v10640_v50, %v10638_v55  ;;  %v12924_v23 = vpack.c.bf16 %v10645_v26, %v10643_v9  ;;  %12921 = vmatprep.subr.bf16.mxu0 %v12920_v1  ;;  %v10649_v9 = vld [vmem:[%s18670_s4 + $0x598] sm:$0xff]  ;;  %v13879_v26 = vld [vmem:[%s14393_s28] sm:$0xff]  ;;  %v10648_v1 = vld [vmem:[%s18670_s4 + $0x590] sm:$0xff] }
 0x816   : > { %v13880_v50 = vld [vmem:[%s14393_s28 + $0x18] sm:$0xff]  ;;  %v12928_v14 = vpack.c.bf16 %v10649_v9, %v10647_v44  ;;  %v10650_v9 = vld [vmem:[%s18670_s4 + $0x5a0] sm:$0xff] }
 0x817   : > { %12919 = vmatpush1.bf16.msra.mxu1 %v12918_v27  ;;  %v10642_v27 = vld [vmem:[%s18670_s4 + $0x560] sm:$0xff]  ;;  %12923 = vmatpush1.bf16.msra.mxu0 %v12922_v45  ;;  %v10653_v45 = vld [vmem:[%s18670_s4 + $0x5b8] sm:$0xff] }
 0x818   : > { %12952 = vmatprep.subr.bf16.mxu1 %v18828_v22  ;;  %v12926_v55 = vpack.c.bf16 %v10644_v18, %v10642_v27  ;;  %12925 = vmatprep.subr.bf16.mxu0 %v12924_v23  ;;  %v13881_v23 = vld [vmem:[%s14393_s28 + $0x10] sm:$0xff]  ;;  %v12930_v27 = vpack.c.bf16 %v10648_v1, %v10646_v6  ;;  %v13882_v18 = vld [vmem:[%s14393_s28 + $0x28] sm:$0xff]  ;;  %v12932_v44 = vpack.c.bf16 %v10653_v45, %v10651_v20  ;;  %v13887_v1 = vld [vmem:[%s14393_s28 + $0x40] sm:$0xff] }
 0x819   : > { %v13885_v20 = vld [vmem:[%s14393_s28 + $0x30] sm:$0xff]  ;;  %v13888_v45 = vld [vmem:[%s14393_s28 + $0x58] sm:$0xff] }
 0x81a   : > { %3724 = vmatmul.mubr.f32.vlgmr.msra.gmra.mrb[192].mxu1 %v13879_v26  ;;  %v10652_v26 = vld [vmem:[%s18670_s4 + $0x5b0] sm:$0xff] }
 0x81b   : > { %3728 = vmatprep.mubr.f32.mxu1 %v13880_v50  ;;  %12927 = vmatpush1.bf16.msra.mxu0 %v12926_v55  ;;  %v13883_v50 = vld [vmem:[%s14393_s28 + $0x20] sm:$0xff]  ;;  %v12934_v6 = vpack.c.bf16 %v10652_v26, %v10650_v9  ;;  %v13884_v55 = vld [vmem:[%s14393_s28 + $0x38] sm:$0xff]  ;;  %v13893_v9 = vld [vmem:[%s14393_s28 + $0x70] sm:$0xff] }
 0x81c   : > { %12929 = vmatprep.subr.bf16.mxu0 %v12928_v14  ;;  %v13886_v14 = vld [vmem:[%s14393_s28 + $0x48] sm:$0xff] }
 0x81d   : > { %v13894_v26 = vld [vmem:[%s14393_s28 + $0x88] sm:$0xff] }
 0x81e   : > { %3729 = vmatmul.mubr.f32.gmra.mrb[194].mxu1 %v13881_v23  ;;  %v13889_v23 = vld [vmem:[%s14393_s28 + $0x50] sm:$0xff] }
 0x81f   : > { %3733 = vmatprep.mubr.f32.mxu1 %v13882_v18  ;;  %12931 = vmatpush1.bf16.msra.mxu0 %v12930_v27  ;;  %v13890_v27 = vld [vmem:[%s14393_s28 + $0x68] sm:$0xff]  ;;  %v13891_v18 = vld [vmem:[%s14393_s28 + $0x60] sm:$0xff] }
 0x820   : > { %12933 = vmatprep.subr.bf16.mxu0 %v12932_v44  ;;  %v13892_v44 = vld [vmem:[%s14393_s28 + $0x78] sm:$0xff] }
 0x822   : > { %3734 = vmatmul.mubr.f32.gmra.mrb[196].mxu1 %v13883_v50  ;;  %v13895_v50 = vld [vmem:[%s14393_s28 + $0x80] sm:$0xff] }
 0x823   : > { %3738 = vmatprep.mubr.f32.mxu1 %v13884_v55  ;;  %12935 = vmatpush1.bf16.msra.mxu0 %v12934_v6  ;;  %v13896_v6 = vld [vmem:[%s14393_s28 + $0x98] sm:$0xff]  ;;  %v13897_v55 = vld [vmem:[%s14393_s28 + $0x90] sm:$0xff] }
 0x826   : > { %3739 = vmatmul.mubr.f32.gmra.mrb[198].mxu1 %v13885_v20  ;;  %v13898_v20 = vld [vmem:[%s14393_s28 + $0xa8] sm:$0xff] }
 0x827   : > { %3743 = vmatprep.mubr.f32.mxu1 %v13886_v14  ;;  %v13899_v14 = vld [vmem:[%s14393_s28 + $0xa0] sm:$0xff] }
 0x82a   : > { %3744 = vmatmul.mubr.f32.gmra.mrb[200].mxu1 %v13887_v1  ;;  %v13900_v1 = vld [vmem:[%s14393_s28 + $0xb8] sm:$0xff] }
 0x82b   : > { %3748 = vmatprep.mubr.f32.mxu1 %v13888_v45  ;;  %v13901_v45 = vld [vmem:[%s14393_s28 + $0xb0] sm:$0xff] }
 0x82e   : > { %3749 = vmatmul.mubr.f32.gmra.mrb[202].mxu1 %v13889_v23  ;;  %v13902_v23 = vld [vmem:[%s14393_s28 + $0xc8] sm:$0xff] }
 0x82f   : > { %3753 = vmatprep.mubr.f32.mxu1 %v13890_v27  ;;  %v13903_v27 = vld [vmem:[%s14393_s28 + $0xc0] sm:$0xff] }
 0x832   : > { %3754 = vmatmul.mubr.f32.gmra.mrb[204].mxu1 %v13891_v18  ;;  %v13904_v18 = vld [vmem:[%s14393_s28 + $0xd8] sm:$0xff] }
 0x833   : > { %3758 = vmatprep.mubr.f32.mxu1 %v13892_v44  ;;  %v13905_v44 = vld [vmem:[%s14393_s28 + $0xd0] sm:$0xff] }
 0x836   : > { %3759 = vmatmul.mubr.f32.gmra.mrb[206].mxu1 %v13893_v9  ;;  %v13906_v9 = vld [vmem:[%s14393_s28 + $0xe8] sm:$0xff] }
 0x837   : > { %3763 = vmatprep.mubr.f32.mxu1 %v13894_v26  ;;  %v13907_v26 = vld [vmem:[%s14393_s28 + $0xe0] sm:$0xff] }
 0x83a   : > { %3764 = vmatmul.mubr.f32.gmra.mrb[208].mxu1 %v13895_v50  ;;  %v13908_v50 = vld [vmem:[%s14393_s28 + $0xf8] sm:$0xff] }
 0x83b   : > { %3768 = vmatprep.mubr.f32.mxu1 %v13896_v6  ;;  %v13909_v6 = vld [vmem:[%s14393_s28 + $0xf0] sm:$0xff] }
 0x83e   : > { %3769 = vmatmul.mubr.f32.gmra.mrb[210].mxu1 %v13897_v55  ;;  %v13910_v55 = vld [vmem:[%s14393_s28 + $0x108] sm:$0xff] }
 0x83f   : > { %3773 = vmatprep.mubr.f32.mxu1 %v13898_v20  ;;  %v13911_v20 = vld [vmem:[%s14393_s28 + $0x100] sm:$0xff] }
 0x842   : > { %3774 = vmatmul.mubr.f32.gmra.mrb[212].mxu1 %v13899_v14  ;;  %v13912_v14 = vld [vmem:[%s14393_s28 + $0x118] sm:$0xff] }
 0x843   : > { %3778 = vmatprep.mubr.f32.mxu1 %v13900_v1  ;;  %v13913_v1 = vld [vmem:[%s14393_s28 + $0x110] sm:$0xff] }
 0x846   : > { %3779 = vmatmul.mubr.f32.gmra.mrb[214].mxu1 %v13901_v45  ;;  %v13914_v45 = vld [vmem:[%s14393_s28 + $0x128] sm:$0xff] }
 0x847   : > { %3783 = vmatprep.mubr.f32.mxu1 %v13902_v23  ;;  %v13915_v23 = vld [vmem:[%s14393_s28 + $0x120] sm:$0xff] }
 0x84a   : > { %3784 = vmatmul.mubr.f32.gmra.mrb[216].mxu1 %v13903_v27  ;;  %v13916_v27 = vld [vmem:[%s14393_s28 + $0x138] sm:$0xff] }
 0x84b   : > { %3788 = vmatprep.mubr.f32.mxu1 %v13904_v18  ;;  %v13917_v18 = vld [vmem:[%s14393_s28 + $0x130] sm:$0xff] }
 0x84e   : > { %3789 = vmatmul.mubr.f32.gmra.mrb[218].mxu1 %v13905_v44  ;;  %v13918_v44 = vld [vmem:[%s14393_s28 + $0x148] sm:$0xff] }
 0x84f   : > { %3793 = vmatprep.mubr.f32.mxu1 %v13906_v9  ;;  %v13919_v9 = vld [vmem:[%s14393_s28 + $0x140] sm:$0xff] }
 0x852   : > { %3794 = vmatmul.mubr.f32.gmra.mrb[220].mxu1 %v13907_v26  ;;  %v13920_v26 = vld [vmem:[%s14393_s28 + $0x158] sm:$0xff] }
 0x853   : > { %3798 = vmatprep.mubr.f32.mxu1 %v13908_v50  ;;  %v13921_v50 = vld [vmem:[%s14393_s28 + $0x150] sm:$0xff] }
 0x856   : > { %3799 = vmatmul.mubr.f32.gmra.mrb[222].mxu1 %v13909_v6  ;;  %v13922_v6 = vld [vmem:[%s14393_s28 + $0x168] sm:$0xff] }
 0x857   : > { %3803 = vmatprep.mubr.f32.mxu1 %v13910_v55  ;;  %v13923_v55 = vld [vmem:[%s14393_s28 + $0x160] sm:$0xff] }
 0x85a   : > { %3804 = vmatmul.mubr.f32.gmra.mrb[224].mxu1 %v13911_v20  ;;  %v10623_v20 = vld [vmem:[%s18670_s4 + $0x4c8] sm:$0xff] }
 0x85b   : > { %3808 = vmatprep.mubr.f32.mxu1 %v13912_v14  ;;  %v10625_v14 = vld [vmem:[%s18670_s4 + $0x4d8] sm:$0xff] }
 0x85e   : > { %3809 = vmatmul.mubr.f32.gmra.mrb[226].mxu1 %v13913_v1  ;;  %v13924_v1 = vld [vmem:[%s14393_s28 + $0x178] sm:$0xff] }
 0x85f   : > { %3813 = vmatprep.mubr.f32.mxu1 %v13914_v45  ;;  %v12936_v45 = vpack.c.bf16 %v10625_v14, %v10623_v20  ;;  %v13934_v20 = vld [vmem:[%s14393_s28 + $0x1c8] sm:$0xff]  ;;  %v13935_v14 = vld [vmem:[%s14393_s28 + $0x1c0] sm:$0xff] }
 0x861   : > { %12937 = vmatprep.subr.bf16.mxu0 %v12936_v45  ;;  %v13937_v45 = vld [vmem:[%s14393_s28 + $0x1d0] sm:$0xff] }
 0x862   : > { %3814 = vmatmul.mubr.f32.gmra.mrb[228].mxu1 %v13915_v23  ;;  %v13925_v23 = vld [vmem:[%s14393_s28 + $0x170] sm:$0xff] }
 0x863   : > { %3818 = vmatprep.mubr.f32.mxu1 %v13916_v27  ;;  %v13926_v27 = vld [vmem:[%s14393_s28 + $0x188] sm:$0xff] }
 0x866   : > { %3819 = vmatmul.mubr.f32.gmra.mrb[230].mxu1 %v13917_v18  ;;  %v13927_v18 = vld [vmem:[%s14393_s28 + $0x180] sm:$0xff] }
 0x867   : > { %3823 = vmatprep.mubr.f32.mxu1 %v13918_v44  ;;  %v13928_v44 = vld [vmem:[%s14393_s28 + $0x198] sm:$0xff] }
 0x86a   : > { %3824 = vmatmul.mubr.f32.gmra.mrb[232].mxu1 %v13919_v9  ;;  %v13929_v9 = vld [vmem:[%s14393_s28 + $0x190] sm:$0xff] }
 0x86b   : > { %3828 = vmatprep.mubr.f32.mxu1 %v13920_v26  ;;  %v13930_v26 = vld [vmem:[%s14393_s28 + $0x1a8] sm:$0xff] }
 0x86e   : > { %3829 = vmatmul.mubr.f32.gmra.mrb[234].mxu1 %v13921_v50  ;;  %v13931_v50 = vld [vmem:[%s14393_s28 + $0x1a0] sm:$0xff] }
 0x86f   : > { %3833 = vmatprep.mubr.f32.mxu1 %v13922_v6  ;;  %v13932_v6 = vld [vmem:[%s14393_s28 + $0x1b8] sm:$0xff] }
 0x872   : > { %3834 = vmatmul.mubr.f32.gmra.mrb[236].mxu1 %v13923_v55  ;;  %v13933_v55 = vld [vmem:[%s14393_s28 + $0x1b0] sm:$0xff] }
 0x873   : > { %3838 = vmatprep.mubr.f32.mxu1 %v13924_v1  ;;  %v13936_v1 = vld [vmem:[%s14393_s28 + $0x1d8] sm:$0xff] }
 0x876   : > { %3839 = vmatmul.mubr.f32.gmra.mrb[238].mxu1 %v13925_v23  ;;  %v13938_v23 = vld [vmem:[%s14393_s28 + $0x1e8] sm:$0xff] }
 0x877   : > { %3843 = vmatprep.mubr.f32.mxu1 %v13926_v27  ;;  %v13939_v27 = vld [vmem:[%s14393_s28 + $0x1e0] sm:$0xff] }
 0x87a   : > { %3844 = vmatmul.mubr.f32.gmra.mrb[240].mxu1 %v13927_v18  ;;  %v13940_v18 = vld [vmem:[%s14393_s28 + $0x1f8] sm:$0xff] }
 0x87b   : > { %3848 = vmatprep.mubr.f32.mxu1 %v13928_v44  ;;  %v13941_v44 = vld [vmem:[%s14393_s28 + $0x1f0] sm:$0xff] }
 0x87e   : > { %3849 = vmatmul.mubr.f32.gmra.mrb[242].mxu1 %v13929_v9  ;;  %v10622_v9 = vld [vmem:[%s18670_s4 + $0x4c0] sm:$0xff] }
 0x87f   : > { %3853 = vmatprep.mubr.f32.mxu1 %v13930_v26  ;;  %v10624_v26 = vld [vmem:[%s18670_s4 + $0x4d0] sm:$0xff] }
 0x882   : > { %3854 = vmatmul.mubr.f32.gmra.mrb[244].mxu1 %v13931_v50  ;;  %v10627_v50 = vld [vmem:[%s18670_s4 + $0x4e8] sm:$0xff] }
 0x883   : > { %3858 = vmatprep.mubr.f32.mxu1 %v13932_v6  ;;  %v10629_v6 = vld [vmem:[%s18670_s4 + $0x4f8] sm:$0xff] }
 0x886   : > { %3859 = vmatmul.mubr.f32.gmra.mrb[246].mxu1 %v13933_v55  ;;  %v12938_v55 = vpack.c.bf16 %v10624_v26, %v10622_v9 }
 0x887   : > { %3863 = vmatprep.mubr.f32.mxu1 %v13934_v20  ;;  %v12940_v20 = vpack.c.bf16 %v10629_v6, %v10627_v50  ;;  %v10630_v50 = vld [vmem:[%s18670_s4 + $0x500] sm:$0xff]  ;;  %v10632_v6 = vld [vmem:[%s18670_s4 + $0x510] sm:$0xff] }
 0x88a   : > { %3864 = vmatmul.mubr.f32.gmra.mrb[248].mxu1 %v13935_v14  ;;  %v10626_v14 = vld [vmem:[%s18670_s4 + $0x4e0] sm:$0xff] }
 0x88b   : > { %3868 = vmatprep.mubr.f32.mxu1 %v13936_v1  ;;  %v10628_v1 = vld [vmem:[%s18670_s4 + $0x4f0] sm:$0xff] }
 0x88c   : > { %v12942_v9 = vpack.c.bf16 %v10628_v1, %v10626_v14 }
 0x88e   : > { %3869 = vmatmul.mubr.f32.gmra.mrb[250].mxu1 %v13937_v45 }
 0x88f   : > { %3873 = vmatprep.mubr.f32.mxu1 %v13938_v23  ;;  %v10631_v23 = vld [vmem:[%s18670_s4 + $0x508] sm:$0xff] }
 0x892   : > { %3874 = vmatmul.mubr.f32.gmra.mrb[252].mxu1 %v13939_v27  ;;  %v10633_v27 = vld [vmem:[%s18670_s4 + $0x518] sm:$0xff] }
 0x893   : > { %3878 = vmatprep.mubr.f32.mxu1 %v13940_v18  ;;  %v12944_v26 = vpack.c.bf16 %v10633_v27, %v10631_v23  ;;  %v10636_v23 = vld [vmem:[%s18670_s4 + $0x530] sm:$0xff] }
 0x896   : > { %3879 = vmatmul.mubr.f32.gmra.mrb[254].mxu1 %v13941_v44  ;;  %v18847_v44 = vmov 0.0  }
 0x8ed   : > { %v3725_v45 = vpop.f32.mrb[192].mxu1 }
 0x8ee   : > { %v3727_v18 = vpop.f32.mrb[193].mxu1  ;;  %10654 = vmatmul.mubr.msk.f32.vlgmr.msra.gmra.mrb[160].mxu0 %vm781_vm1, %v3725_v45  ;;  %v10634_v45 = vld [vmem:[%s18670_s4 + $0x520] sm:$0xff] }
 0x8ef   : > { %4083 = vmatprep.mubr.f32.mxu0 %v18847_v44  ;;  %12939 = vmatpush1.bf16.msra.mxu0 %v12938_v55  ;;  %v10635_v18 = vld [vmem:[%s18670_s4 + $0x528] sm:$0xff]  ;;  %v10637_v55 = vld [vmem:[%s18670_s4 + $0x538] sm:$0xff] }
 0x8f0   : > { %12941 = vmatprep.subr.bf16.mxu0 %v12940_v20  ;;  %v12946_v20 = vpack.c.bf16 %v10632_v6, %v10630_v50  ;;  %v12948_v1 = vpack.c.bf16 %v10637_v55, %v10635_v18 }
 0x8f1   : > { %v3730_v62 = vpop.f32.mrb[194].mxu1 }
 0x8f2   : > { %v3732_v14 = vpop.f32.mrb[195].mxu1  ;;  %10655 = vmatmul.mubr.msk.f32.gmra.mrb[162].mxu0 %vm781_vm1, %v3730_v62  ;;  %v12950_v62 = vpack.c.bf16 %v10636_v23, %v10634_v45 }
 0x8f3   : > { %4089 = vmatprep.mubr.f32.mxu0 %v18847_v44  ;;  %12943 = vmatpush1.bf16.msra.mxu0 %v12942_v9 }
 0x8f4   : > { %12945 = vmatprep.subr.bf16.mxu0 %v12944_v26 }
 0x8f5   : > { %v3735_v27 = vpop.f32.mrb[196].mxu1 }
 0x8f6   : > { %v3737_v17 = vpop.f32.mrb[197].mxu1  ;;  %10656 = vmatmul.mubr.msk.f32.gmra.mrb[164].mxu0 %vm781_vm1, %v3735_v27 }
 0x8f7   : > { %4095 = vmatprep.mubr.f32.mxu0 %v18847_v44  ;;  %12947 = vmatpush1.bf16.msra.mxu0 %v12946_v20 }
 0x8f8   : > { %12949 = vmatprep.subr.bf16.mxu0 %v12948_v1 }
 0x8f9   : > { %v3740_v9 = vpop.f32.mrb[198].mxu1 }
 0x8fa   : > { %v3742_v26 = vpop.f32.mrb[199].mxu1  ;;  %10657 = vmatmul.mubr.msk.f32.gmra.mrb[166].mxu0 %vm781_vm1, %v3740_v9 }
 0x8fb   : > { %4101 = vmatprep.mubr.f32.mxu0 %v18847_v44  ;;  %12951 = vmatpush1.bf16.msra.mxu0 %v12950_v62 }
 0x8fd   : > { %v3745_v50 = vpop.f32.mrb[200].mxu1 }
 0x8fe   : > { %v3747_v6 = vpop.f32.mrb[201].mxu1  ;;  %10658 = vmatmul.mubr.msk.f32.gmra.mrb[168].mxu0 %vm781_vm1, %v3745_v50 }
 0x8ff   : > { %4107 = vmatprep.mubr.f32.mxu0 %v18847_v44 }
 0x901   : > { %v3750_v17 = vpop.f32.mrb[202].mxu1 }
 0x902   : > { %v3752_v18 = vpop.f32.mrb[203].mxu1  ;;  %10659 = vmatmul.mubr.msk.f32.gmra.mrb[170].mxu0 %vm781_vm1, %v3750_v17 }
 0x903   : > { %4113 = vmatprep.mubr.f32.mxu0 %v18847_v44 }
 0x905   : > { %v3755_v55 = vpop.f32.mrb[204].mxu1 }
 0x906   : > { %v3757_v14 = vpop.f32.mrb[205].mxu1  ;;  %10660 = vmatmul.mubr.msk.f32.gmra.mrb[172].mxu0 %vm781_vm1, %v3755_v55 }
 0x907   : > { %4119 = vmatprep.mubr.f32.mxu0 %v18847_v44 }
 0x909   : > { %v3760_v20 = vpop.f32.mrb[206].mxu1 }
 0x90a   : > { %v3762_v1 = vpop.f32.mrb[207].mxu1  ;;  %10661 = vmatmul.mubr.msk.f32.gmra.mrb[174].mxu0 %vm781_vm1, %v3760_v20 }
 0x90b   : > { %4125 = vmatprep.mubr.f32.mxu0 %v18847_v44 }
 0x90d   : > { %v3765_v45 = vpop.f32.mrb[208].mxu1 }
 0x90e   : > { %v3767_v23 = vpop.f32.mrb[209].mxu1  ;;  %10662 = vmatmul.mubr.msk.f32.gmra.mrb[176].mxu0 %vm781_vm1, %v3765_v45 }
 0x90f   : > { %4131 = vmatprep.mubr.f32.mxu0 %v18847_v44 }
 0x911   : > { %v3770_v27 = vpop.f32.mrb[210].mxu1 }
 0x912   : > { %v3772_v62 = vpop.f32.mrb[211].mxu1  ;;  %10663 = vmatmul.mubr.msk.f32.gmra.mrb[178].mxu0 %vm781_vm1, %v3770_v27 }
 0x913   : > { %4137 = vmatprep.mubr.f32.mxu0 %v18847_v44 }
 0x915   : > { %v3775_v9 = vpop.f32.mrb[212].mxu1 }
 0x916   : > { %v3777_v26 = vpop.f32.mrb[213].mxu1  ;;  %10664 = vmatmul.mubr.msk.f32.gmra.mrb[180].mxu0 %vm781_vm1, %v3775_v9 }
 0x917   : > { %4143 = vmatprep.mubr.f32.mxu0 %v18847_v44 }
 0x919   : > { %v3780_v50 = vpop.f32.mrb[214].mxu1 }
 0x91a   : > { %v3782_v6 = vpop.f32.mrb[215].mxu1  ;;  %10665 = vmatmul.mubr.msk.f32.gmra.mrb[182].mxu0 %vm781_vm1, %v3780_v50 }
 0x91b   : > { %4149 = vmatprep.mubr.f32.mxu0 %v18847_v44 }
 0x91d   : > { %v3785_v17 = vpop.f32.mrb[216].mxu1 }
 0x91e   : > { %v3787_v18 = vpop.f32.mrb[217].mxu1  ;;  %10666 = vmatmul.mubr.msk.f32.gmra.mrb[184].mxu0 %vm781_vm1, %v3785_v17 }
 0x91f   : > { %4155 = vmatprep.mubr.f32.mxu0 %v18847_v44 }
 0x921   : > { %v3790_v55 = vpop.f32.mrb[218].mxu1 }
 0x922   : > { %v3792_v14 = vpop.f32.mrb[219].mxu1  ;;  %10667 = vmatmul.mubr.msk.f32.gmra.mrb[186].mxu0 %vm781_vm1, %v3790_v55 }
 0x923   : > { %4161 = vmatprep.mubr.f32.mxu0 %v18847_v44 }
 0x925   : > { %v3795_v20 = vpop.f32.mrb[220].mxu1 }
 0x926   : > { %v3797_v1 = vpop.f32.mrb[221].mxu1  ;;  %10668 = vmatmul.mubr.msk.f32.gmra.mrb[188].mxu0 %vm781_vm1, %v3795_v20 }
 0x927   : > { %4167 = vmatprep.mubr.f32.mxu0 %v18847_v44 }
 0x929   : > { %v3800_v45 = vpop.f32.mrb[222].mxu1 }
 0x92a   : > { %v3802_v23 = vpop.f32.mrb[223].mxu1  ;;  %10669 = vmatmul.mubr.msk.f32.gmra.mrb[190].mxu0 %vm781_vm1, %v3800_v45 }
 0x92b   : > { %4173 = vmatprep.mubr.f32.mxu0 %v18847_v44 }
 0x92d   : > { %v3805_v27 = vpop.f32.mrb[224].mxu1 }
 0x92e   : > { %v3807_v62 = vpop.f32.mrb[225].mxu1  ;;  %10670 = vmatmul.mubr.msk.f32.gmra.mrb[192].mxu0 %vm781_vm1, %v3805_v27 }
 0x92f   : > { %4179 = vmatprep.mubr.f32.mxu0 %v18847_v44 }
 0x931   : > { %v3810_v9 = vpop.f32.mrb[226].mxu1 }
 0x932   : > { %v3812_v26 = vpop.f32.mrb[227].mxu1  ;;  %10671 = vmatmul.mubr.msk.f32.gmra.mrb[194].mxu0 %vm781_vm1, %v3810_v9  ;;  %v10719_v9 = vld [vmem:[%s18670_s4 + $0x5d0] sm:$0xff] }
 0x933   : > { %4185 = vmatprep.mubr.f32.mxu0 %v18847_v44  ;;  %v10720_v26 = vld [vmem:[%s18670_s4 + $0x5e0] sm:$0xff] }
 0x935   : > { %v3815_v50 = vpop.f32.mrb[228].mxu1 }
 0x936   : > { %v3817_v6 = vpop.f32.mrb[229].mxu1  ;;  %10672 = vmatmul.mubr.msk.f32.gmra.mrb[196].mxu0 %vm781_vm1, %v3815_v50  ;;  %v12953_v50 = vpack.c.bf16 %v10720_v26, %v10719_v9 }
 0x937   : > { %4191 = vmatprep.mubr.f32.mxu0 %v18847_v44 }
 0x938   : > { %12954 = vmatpush1.bf16.msra.mxu1 %v12953_v50 }
 0x939   : > { %v3820_v17 = vpop.f32.mrb[230].mxu1  ;;  %12955 = vmatprep.subr.bf16.mxu1 %v18828_v22 }
 0x93a   : > { %v3822_v18 = vpop.f32.mrb[231].mxu1  ;;  %10673 = vmatmul.mubr.msk.f32.gmra.mrb[198].mxu0 %vm781_vm1, %v3820_v17 }
 0x93b   : > { %4197 = vmatprep.mubr.f32.mxu0 %v18847_v44 }
 0x93d   : > { %v3825_v55 = vpop.f32.mrb[232].mxu1 }
 0x93e   : > { %v3827_v14 = vpop.f32.mrb[233].mxu1  ;;  %10674 = vmatmul.mubr.msk.f32.gmra.mrb[200].mxu0 %vm781_vm1, %v3825_v55 }
 0x93f   : > { %4203 = vmatprep.mubr.f32.mxu0 %v18847_v44 }
 0x941   : > { %v3830_v20 = vpop.f32.mrb[234].mxu1 }
 0x942   : > { %v3832_v1 = vpop.f32.mrb[235].mxu1  ;;  %10675 = vmatmul.mubr.msk.f32.gmra.mrb[202].mxu0 %vm781_vm1, %v3830_v20 }
 0x943   : > { %4209 = vmatprep.mubr.f32.mxu0 %v18847_v44  ;;  %v10721_v1 = vld [vmem:[%s18670_s4 + $0x5f0] sm:$0xff] }
 0x945   : > { %v3835_v45 = vpop.f32.mrb[236].mxu1 }
 0x946   : > { %v3837_v23 = vpop.f32.mrb[237].mxu1  ;;  %10676 = vmatmul.mubr.msk.f32.gmra.mrb[204].mxu0 %vm781_vm1, %v3835_v45  ;;  %v10722_v45 = vld [vmem:[%s18670_s4 + $0x600] sm:$0xff] }
 0x947   : > { %4215 = vmatprep.mubr.f32.mxu0 %v18847_v44  ;;  %v12956_v23 = vpack.c.bf16 %v10722_v45, %v10721_v1 }
 0x949   : > { %v3840_v27 = vpop.f32.mrb[238].mxu1  ;;  %12957 = vmatpush1.bf16.msra.mxu1 %v12956_v23  ;;  %v10725_v23 = vld [vmem:[%s18670_s4 + $0x630] sm:$0xff] }
 0x94a   : > { %v3842_v62 = vpop.f32.mrb[239].mxu1  ;;  %10677 = vmatmul.mubr.msk.f32.gmra.mrb[206].mxu0 %vm781_vm1, %v3840_v27  ;;  %12958 = vmatprep.subr.bf16.mxu1 %v18828_v22 }
 0x94b   : > { %4221 = vmatprep.mubr.f32.mxu0 %v18847_v44 }
 0x94d   : > { %v3845_v6 = vpop.f32.mrb[240].mxu1 }
 0x94e   : > { %v3847_v17 = vpop.f32.mrb[241].mxu1  ;;  %10678 = vmatmul.mubr.msk.f32.gmra.mrb[208].mxu0 %vm781_vm1, %v3845_v6 }
 0x94f   : > { %4227 = vmatprep.mubr.f32.mxu0 %v18847_v44  ;;  %v10723_v17 = vld [vmem:[%s18670_s4 + $0x610] sm:$0xff] }
 0x951   : > { %v3850_v18 = vpop.f32.mrb[242].mxu1 }
 0x952   : > { %v3852_v55 = vpop.f32.mrb[243].mxu1  ;;  %10679 = vmatmul.mubr.msk.f32.gmra.mrb[210].mxu0 %vm781_vm1, %v3850_v18  ;;  %v10724_v18 = vld [vmem:[%s18670_s4 + $0x620] sm:$0xff] }
 0x953   : > { %4233 = vmatprep.mubr.f32.mxu0 %v18847_v44  ;;  %v12959_v55 = vpack.c.bf16 %v10724_v18, %v10723_v17  ;;  %v10730_v17 = vld [vmem:[%s18670_s4 + $0x680] sm:$0xff] }
 0x955   : > { %v3855_v14 = vpop.f32.mrb[244].mxu1  ;;  %12960 = vmatpush1.bf16.msra.mxu1 %v12959_v55  ;;  %v10732_v55 = vld [vmem:[%s18670_s4 + $0x6a0] sm:$0xff] }
 0x956   : > { %v3857_v20 = vpop.f32.mrb[245].mxu1  ;;  %10680 = vmatmul.mubr.msk.f32.gmra.mrb[212].mxu0 %vm781_vm1, %v3855_v14  ;;  %12961 = vmatprep.subr.bf16.mxu1 %v18828_v22 }
 0x957   : > { %4239 = vmatprep.mubr.f32.mxu0 %v18847_v44 }
 0x959   : > { %v3860_v27 = vpop.f32.mrb[246].mxu1 }
 0x95a   : > { %v3862_v62 = vpop.f32.mrb[247].mxu1  ;;  %10681 = vmatmul.mubr.msk.f32.gmra.mrb[214].mxu0 %vm781_vm1, %v3860_v27  ;;  %v10726_v27 = vld [vmem:[%s18670_s4 + $0x640] sm:$0xff] }
 0x95b   : > { %4245 = vmatprep.mubr.f32.mxu0 %v18847_v44  ;;  %v10727_v62 = vld [vmem:[%s18670_s4 + $0x650] sm:$0xff] }
 0x95d   : > { %v3865_v9 = vpop.f32.mrb[248].mxu1 }
 0x95e   : > { %v3867_v26 = vpop.f32.mrb[249].mxu1  ;;  %10682 = vmatmul.mubr.msk.f32.gmra.mrb[216].mxu0 %vm781_vm1, %v3865_v9  ;;  %v12962_v9 = vpack.c.bf16 %v10726_v27, %v10725_v23  ;;  %v10738_v27 = vld [vmem:[%s18670_s4 + $0x700] sm:$0xff] }
 0x95f   : > { %4251 = vmatprep.mubr.f32.mxu0 %v18847_v44  ;;  %v10728_v26 = vld [vmem:[%s18670_s4 + $0x660] sm:$0xff] }
 0x960   : > { %12963 = vmatpush1.bf16.msra.mxu1 %v12962_v9  ;;  %v10740_v9 = vld [vmem:[%s18670_s4 + $0x720] sm:$0xff] }
 0x961   : > { %v3870_v50 = vpop.f32.mrb[250].mxu1  ;;  %12964 = vmatprep.subr.bf16.mxu1 %v18828_v22 }
 0x962   : > { %v3872_v6 = vpop.f32.mrb[251].mxu1  ;;  %10683 = vmatmul.mubr.msk.f32.gmra.mrb[218].mxu0 %vm781_vm1, %v3870_v50  ;;  %v12965_v50 = vpack.c.bf16 %v10728_v26, %v10727_v62 }
 0x963   : > { %4257 = vmatprep.mubr.f32.mxu0 %v18847_v44  ;;  %v10729_v6 = vld [vmem:[%s18670_s4 + $0x670] sm:$0xff] }
 0x964   : > { %12966 = vmatpush1.bf16.msra.mxu1 %v12965_v50  ;;  %v12968_v18 = vpack.c.bf16 %v10730_v17, %v10729_v6 }
 0x965   : > { %v3875_v14 = vpop.f32.mrb[252].mxu1  ;;  %12967 = vmatprep.subr.bf16.mxu1 %v18828_v22 }
 0x966   : > { %v3877_v20 = vpop.f32.mrb[253].mxu1  ;;  %10684 = vmatmul.mubr.msk.f32.gmra.mrb[220].mxu0 %vm781_vm1, %v3875_v14 }
 0x967   : > { %4263 = vmatprep.mubr.f32.mxu0 %v18847_v44  ;;  %v10734_v20 = vld [vmem:[%s18670_s4 + $0x6c0] sm:$0xff] }
 0x968   : > { %12969 = vmatpush1.bf16.msra.mxu1 %v12968_v18 }
 0x969   : > { %v3880_v1 = vpop.f32.mrb[254].mxu1  ;;  %12970 = vmatprep.subr.bf16.mxu1 %v18828_v22 }
 0x96a   : > { %v3882_v45 = vpop.f32.mrb[255].mxu1  ;;  %10685 = vmatmul.mubr.msk.f32.gmra.mrb[222].mxu0 %vm781_vm1, %v3880_v1 }
 0x96b   : > { %4430 = vmatprep.mubr.f32.mxu0 %v18847_v44  ;;  %v10736_v45 = vld [vmem:[%s18670_s4 + $0x6e0] sm:$0xff] }
 0x96e   : > { %10686 = vmatmul.mubr.msk.f32.vlgmr.msra.gmra.mrb[160].mxu0 %vm781_vm1, %v15316_v54  ;;  %v10731_v54 = vld [vmem:[%s18670_s4 + $0x690] sm:$0xff] }
 0x96f   : > { %4436 = vmatprep.mubr.f32.mxu0 %v18847_v44  ;;  %v12971_v14 = vpack.c.bf16 %v10732_v55, %v10731_v54  ;;  %v10782_v54 = vld [vmem:[%s18670_s4 + $0x7c0] sm:$0xff]  ;;  %v10783_v55 = vld [vmem:[%s18670_s4 + $0x7d0] sm:$0xff] }
 0x971   : > { %12972 = vmatpush1.bf16.msra.mxu1 %v12971_v14 }
 0x972   : > { %10687 = vmatmul.mubr.msk.f32.gmra.mrb[162].mxu0 %vm781_vm1, %v15311_v51  ;;  %v10733_v51 = vld [vmem:[%s18670_s4 + $0x6b0] sm:$0xff]  ;;  %12973 = vmatprep.subr.bf16.mxu1 %v18828_v22 }
 0x973   : > { %4442 = vmatprep.mubr.f32.mxu0 %v18847_v44  ;;  %v12974_v1 = vpack.c.bf16 %v10734_v20, %v10733_v51 }
 0x975   : > { %12975 = vmatpush1.bf16.msra.mxu1 %v12974_v1 }
 0x976   : > { %10688 = vmatmul.mubr.msk.f32.gmra.mrb[164].mxu0 %vm781_vm1, %v15335_v4  ;;  %v10735_v4 = vld [vmem:[%s18670_s4 + $0x6d0] sm:$0xff]  ;;  %12976 = vmatprep.subr.bf16.mxu1 %v18828_v22 }
 0x977   : > { %4448 = vmatprep.mubr.f32.mxu0 %v18847_v44  ;;  %v12977_v23 = vpack.c.bf16 %v10736_v45, %v10735_v4  ;;  %v13000_v45 = vpack.c.bf16 %v10783_v55, %v10782_v54 }
 0x979   : > { %12978 = vmatpush1.bf16.msra.mxu1 %v12977_v23 }
 0x97a   : > { %10689 = vmatmul.mubr.msk.f32.gmra.mrb[166].mxu0 %vm781_vm1, %v15330_v3  ;;  %v10737_v3 = vld [vmem:[%s18670_s4 + $0x6f0] sm:$0xff]  ;;  %12979 = vmatprep.subr.bf16.mxu1 %v18828_v22 }
 0x97b   : > { %4454 = vmatprep.mubr.f32.mxu0 %v18847_v44  ;;  %v12980_v62 = vpack.c.bf16 %v10738_v27, %v10737_v3  ;;  %v10784_v3 = vld [vmem:[%s18670_s4 + $0x7e0] sm:$0xff]  ;;  %v10785_v27 = vld [vmem:[%s18670_s4 + $0x7f0] sm:$0xff] }
 0x97d   : > { %12981 = vmatpush1.bf16.msra.mxu1 %v12980_v62 }
 0x97e   : > { %10690 = vmatmul.mubr.msk.f32.gmra.mrb[168].mxu0 %vm781_vm1, %v15356_v30  ;;  %v10739_v30 = vld [vmem:[%s18670_s4 + $0x710] sm:$0xff]  ;;  %12982 = vmatprep.subr.bf16.mxu1 %v18828_v22 }
 0x97f   : > { %4460 = vmatprep.mubr.f32.mxu0 %v18847_v44  ;;  %v12983_v26 = vpack.c.bf16 %v10740_v9, %v10739_v30 }
 0x981   : > { %12984 = vmatpush1.bf16.msra.mxu1 %v12983_v26 }
 0x982   : > { %10691 = vmatmul.mubr.msk.f32.gmra.mrb[170].mxu0 %vm781_vm1, %v15351_v29  ;;  %12985 = vmatprep.subr.bf16.mxu1 %v18828_v22  ;;  %v10718_v29 = vld [vmem:[%s18670_s4 + $0x5c0] ss:$8 sm:$0x3] }
 0x983   : > { %4466 = vmatprep.mubr.f32.mxu0 %v18847_v44 }
 0x986   : > { %10692 = vmatmul.mubr.msk.f32.gmra.mrb[172].mxu0 %vm781_vm1, %v15377_v63  ;;  %v16042_v63 = vrot.slane %v10718_v29, %v14952_v34 }
 0x987   : > { %4472 = vmatprep.mubr.f32.mxu0 %v18847_v44 }
 0x98a   : > { %10693 = vmatmul.mubr.msk.f32.gmra.mrb[174].mxu0 %vm781_vm1, %v15372_v60  ;;  %v16039_v60 = vrot.slane %v10718_v29, %v14947_v31  ;;  %v10786_v29 = vld [vmem:[%s18670_s4 + $0x800] sm:$0xff] }
 0x98b   : > { %4478 = vmatprep.mubr.f32.mxu0 %v18847_v44 }
 0x98e   : > { %10694 = vmatmul.mubr.msk.f32.gmra.mrb[176].mxu0 %vm781_vm1, %v15398_v49 }
 0x98f   : > { %4484 = vmatprep.mubr.f32.mxu0 %v18847_v44 }
 0x992   : > { %10695 = vmatmul.mubr.msk.f32.gmra.mrb[178].mxu0 %vm781_vm1, %v15393_v46 }
 0x993   : > { %4490 = vmatprep.mubr.f32.mxu0 %v18847_v44 }
 0x996   : > { %10696 = vmatmul.mubr.msk.f32.gmra.mrb[180].mxu0 %vm781_vm1, %v15419_v56 }
 0x997   : > { %4496 = vmatprep.mubr.f32.mxu0 %v18847_v44 }
 0x99a   : > { %10697 = vmatmul.mubr.msk.f32.gmra.mrb[182].mxu0 %vm781_vm1, %v15414_v38 }
 0x99b   : > { %4502 = vmatprep.mubr.f32.mxu0 %v18847_v44 }
 0x99e   : > { %10698 = vmatmul.mubr.msk.f32.gmra.mrb[184].mxu0 %vm781_vm1, %v15440_v61 }
 0x99f   : > { %4508 = vmatprep.mubr.f32.mxu0 %v18847_v44 }
 0x9a2   : > { %10699 = vmatmul.mubr.msk.f32.gmra.mrb[186].mxu0 %vm781_vm1, %v15435_v28  ;;  %v10741_v28 = vld [vmem:[%s18670_s4 + $0x730] sm:$0xff] }
 0x9a3   : > { %4514 = vmatprep.mubr.f32.mxu0 %v18847_v44 }
 0x9a6   : > { %10700 = vmatmul.mubr.msk.f32.gmra.mrb[188].mxu0 %vm781_vm1, %v15461_v36  ;;  %v10776_v36 = vld [vmem:[%s18670_s4 + $0x760] sm:$0xff] }
 0x9a7   : > { %4520 = vmatprep.mubr.f32.mxu0 %v18847_v44 }
 0x9aa   : > { %10701 = vmatmul.mubr.msk.f32.gmra.mrb[190].mxu0 %vm781_vm1, %v15456_v32  ;;  %v10742_v32 = vld [vmem:[%s18670_s4 + $0x740] sm:$0xff] }
 0x9ab   : > { %4526 = vmatprep.mubr.f32.mxu0 %v18847_v44  ;;  %v12986_v38 = vpack.c.bf16 %v10742_v32, %v10741_v28  ;;  %v13004_v32 = vpack.c.bf16 %v10785_v27, %v10784_v3 }
 0x9ad   : > { %12987 = vmatpush1.bf16.msra.mxu1 %v12986_v38 }
 0x9ae   : > { %10702 = vmatmul.mubr.msk.f32.gmra.mrb[192].mxu0 %vm781_vm1, %v15482_v33  ;;  %v10778_v33 = vld [vmem:[%s18670_s4 + $0x780] sm:$0xff] }
 0x9af   : > { %4532 = vmatprep.mubr.f32.mxu0 %v18847_v44 }
 0x9b2   : > { %10703 = vmatmul.mubr.msk.f32.gmra.mrb[194].mxu0 %vm781_vm1, %v15477_v16  ;;  %v10777_v16 = vld [vmem:[%s18670_s4 + $0x770] sm:$0xff] }
 0x9b3   : > { %4538 = vmatprep.mubr.f32.mxu0 %v18847_v44 }
 0x9b6   : > { %10704 = vmatmul.mubr.msk.f32.gmra.mrb[196].mxu0 %vm781_vm1, %v15503_v57 }
 0x9b7   : > { %4544 = vmatprep.mubr.f32.mxu0 %v18847_v44 }
 0x9ba   : > { %10705 = vmatmul.mubr.msk.f32.gmra.mrb[198].mxu0 %vm781_vm1, %v15498_v21 }
 0x9bb   : > { %4550 = vmatprep.mubr.f32.mxu0 %v18847_v44 }
 0x9be   : > { %10706 = vmatmul.mubr.msk.f32.gmra.mrb[200].mxu0 %vm781_vm1, %v15524_v24  ;;  %v10779_v24 = vld [vmem:[%s18670_s4 + $0x790] sm:$0xff] }
 0x9bf   : > { %4556 = vmatprep.mubr.f32.mxu0 %v18847_v44 }
 0x9c2   : > { %10707 = vmatmul.mubr.msk.f32.gmra.mrb[202].mxu0 %vm781_vm1, %v15519_v19  ;;  %v12988_v19 = vpack.c.bf16 %v10777_v16, %v10776_v36 }
 0x9c3   : > { %4562 = vmatprep.mubr.f32.mxu0 %v18847_v44 }
 0x9c4   : > { %12989 = vmatprep.subr.bf16.mxu1 %v12988_v19 }
 0x9c6   : > { %10708 = vmatmul.mubr.msk.f32.gmra.mrb[204].mxu0 %vm781_vm1, %v15545_v25 }
 0x9c7   : > { %4568 = vmatprep.mubr.f32.mxu0 %v18847_v44 }
 0x9ca   : > { %10709 = vmatmul.mubr.msk.f32.gmra.mrb[206].mxu0 %vm781_vm1, %v15540_v37 }
 0x9cb   : > { %4574 = vmatprep.mubr.f32.mxu0 %v18847_v44 }
 0x9ce   : > { %10710 = vmatmul.mubr.msk.f32.gmra.mrb[208].mxu0 %vm781_vm1, %v15566_v41  ;;  %v12992_v41 = vpack.c.bf16 %v10779_v24, %v10778_v33 }
 0x9cf   : > { %4580 = vmatprep.mubr.f32.mxu0 %v18847_v44 }
 0x9d2   : > { %10711 = vmatmul.mubr.msk.f32.gmra.mrb[210].mxu0 %vm781_vm1, %v15561_v42 }
 0x9d3   : > { %4586 = vmatprep.mubr.f32.mxu0 %v18847_v44 }
 0x9d6   : > { %10712 = vmatmul.mubr.msk.f32.gmra.mrb[212].mxu0 %vm781_vm1, %v15587_v8  ;;  %v10780_v8 = vld [vmem:[%s18670_s4 + $0x7a0] sm:$0xff] }
 0x9d7   : > { %4592 = vmatprep.mubr.f32.mxu0 %v18847_v44 }
 0x9da   : > { %10713 = vmatmul.mubr.msk.f32.gmra.mrb[214].mxu0 %vm781_vm1, %v15582_v47 }
 0x9db   : > { %4598 = vmatprep.mubr.f32.mxu0 %v18847_v44 }
 0x9de   : > { %10714 = vmatmul.mubr.msk.f32.gmra.mrb[216].mxu0 %vm781_vm1, %v15608_v35 }
 0x9df   : > { %4604 = vmatprep.mubr.f32.mxu0 %v18847_v44 }
 0x9e2   : > { %10715 = vmatmul.mubr.msk.f32.gmra.mrb[218].mxu0 %vm781_vm1, %v15603_v52  ;;  %v10781_v52 = vld [vmem:[%s18670_s4 + $0x7b0] sm:$0xff] }
 0x9e3   : > { %4610 = vmatprep.mubr.f32.mxu0 %v18847_v44  ;;  %v12996_v17 = vpack.c.bf16 %v10781_v52, %v10780_v8 }
 0x9e6   : > { %10716 = vmatmul.mubr.msk.f32.gmra.mrb[220].mxu0 %vm781_vm1, %v15629_v40 }
 0x9e7   : > { %4616 = vmatprep.mubr.f32.mxu0 %v18847_v44 }
 0x9ea   : > { %10717 = vmatmul.mubr.msk.f32.gmra.mrb[222].mxu0 %vm781_vm1, %v15624_v58 }
 0xa41   : > { %v4432_v46 = vpop.f32.mrb[160].mxu0 }
 0xa42   : > { %v4636_v49 = vadd.f32 %v16039_v60, %v4432_v46  ;;  %v4434_v56 = vpop.f32.mrb[161].mxu0  ;;  %v10787_v46 = vld [vmem:[%s18670_s4 + $0x810] sm:$0xff] }
 0xa43   : > { %v4637_v61 = vadd.f32 %v16042_v63, %v4434_v56  ;;  %v13008_v33 = vpack.c.bf16 %v10787_v46, %v10786_v29 }
 0xa44   : > { %v4700_v37 = vmax.f32 %v4636_v49, 0.0 }
 0xa45   : > { %v4701_v21 = vmax.f32 %v4637_v61, 0.0  ;;  %v4438_v57 = vpop.f32.mrb[162].mxu0 }
 0xa46   : > { %v4638_v25 = vadd.f32 %v16039_v60, %v4438_v57  ;;  %v4440_v42 = vpop.f32.mrb[163].mxu0 }
 0xa47   : > { %v4639_v47 = vadd.f32 %v16042_v63, %v4440_v42  ;;  %10744 = vmatprep.mubr.msk.f32.mxu1 %vm781_vm1, %v4701_v21 }
 0xa48   : > { %4950 = vmatmul.mubr.f32.vlgmr.msra.gmra.mrb[0].mxu1 %v4700_v37  ;;  %v4702_v40 = vmax.f32 %v4638_v25, 0.0 }
 0xa49   : > { %v4703_v35 = vmax.f32 %v4639_v47, 0.0  ;;  %v4444_v58 = vpop.f32.mrb[164].mxu0  ;;  %12991 = vmatpush3.bf16.msra.mxu1 %v12988_v19 }
 0xa4a   : > { %v4640_v50 = vadd.f32 %v16039_v60, %v4444_v58  ;;  %v4446_v6 = vpop.f32.mrb[165].mxu0  ;;  %12993 = vmatprep.subr.bf16.mxu1 %v12992_v41 }
 0xa4b   : > { %v4641_v18 = vadd.f32 %v16042_v63, %v4446_v6  ;;  %10745 = vmatprep.mubr.msk.f32.mxu1 %vm781_vm1, %v4703_v35 }
 0xa4c   : > { %4955 = vmatmul.mubr.f32.gmra.mrb[2].mxu1 %v4702_v40  ;;  %v4704_v20 = vmax.f32 %v4640_v50, 0.0 }
 0xa4d   : > { %v4705_v14 = vmax.f32 %v4641_v18, 0.0  ;;  %v4450_v51 = vpop.f32.mrb[166].mxu0  ;;  %12995 = vmatpush3.bf16.msra.mxu1 %v12992_v41 }
 0xa4e   : > { %v4642_v1 = vadd.f32 %v16039_v60, %v4450_v51  ;;  %v4452_v4 = vpop.f32.mrb[167].mxu0  ;;  %12997 = vmatprep.subr.bf16.mxu1 %v12996_v17 }
 0xa4f   : > { %v4643_v23 = vadd.f32 %v16042_v63, %v4452_v4  ;;  %10746 = vmatprep.mubr.msk.f32.mxu1 %vm781_vm1, %v4705_v14 }
 0xa50   : > { %4960 = vmatmul.mubr.f32.gmra.mrb[4].mxu1 %v4704_v20  ;;  %v4706_v9 = vmax.f32 %v4642_v1, 0.0 }
 0xa51   : > { %v4707_v62 = vmax.f32 %v4643_v23, 0.0  ;;  %v4456_v30 = vpop.f32.mrb[168].mxu0  ;;  %12999 = vmatpush3.bf16.msra.mxu1 %v12996_v17 }
 0xa52   : > { %v4644_v26 = vadd.f32 %v16039_v60, %v4456_v30  ;;  %v4458_v28 = vpop.f32.mrb[169].mxu0  ;;  %13001 = vmatprep.subr.bf16.mxu1 %v13000_v45 }
 0xa53   : > { %v4645_v38 = vadd.f32 %v16042_v63, %v4458_v28  ;;  %10747 = vmatprep.mubr.msk.f32.mxu1 %vm781_vm1, %v4707_v62 }
 0xa54   : > { %4965 = vmatmul.mubr.f32.gmra.mrb[6].mxu1 %v4706_v9  ;;  %v4708_v61 = vmax.f32 %v4644_v26, 0.0 }
 0xa55   : > { %v4709_v49 = vmax.f32 %v4645_v38, 0.0  ;;  %v4462_v56 = vpop.f32.mrb[170].mxu0  ;;  %13003 = vmatpush3.bf16.msra.mxu1 %v13000_v45 }
 0xa56   : > { %v4646_v36 = vadd.f32 %v16039_v60, %v4462_v56  ;;  %v4464_v16 = vpop.f32.mrb[171].mxu0  ;;  %13005 = vmatprep.subr.bf16.mxu1 %v13004_v32 }
 0xa57   : > { %v4647_v21 = vadd.f32 %v16042_v63, %v4464_v16  ;;  %10748 = vmatprep.mubr.msk.f32.mxu1 %vm781_vm1, %v4709_v49 }
 0xa58   : > { %4970 = vmatmul.mubr.f32.gmra.mrb[8].mxu1 %v4708_v61  ;;  %v4710_v24 = vmax.f32 %v4646_v36, 0.0 }
 0xa59   : > { %v4711_v57 = vmax.f32 %v4647_v21, 0.0  ;;  %v4468_v19 = vpop.f32.mrb[172].mxu0  ;;  %13007 = vmatpush3.bf16.msra.mxu1 %v13004_v32 }
 0xa5a   : > { %v4648_v37 = vadd.f32 %v16039_v60, %v4468_v19  ;;  %v4470_v25 = vpop.f32.mrb[173].mxu0  ;;  %13009 = vmatprep.subr.bf16.mxu1 %v13008_v33 }
 0xa5b   : > { %v4649_v42 = vadd.f32 %v16042_v63, %v4470_v25  ;;  %10749 = vmatprep.mubr.msk.f32.mxu1 %vm781_vm1, %v4711_v57 }
 0xa5c   : > { %4975 = vmatmul.mubr.f32.gmra.mrb[10].mxu1 %v4710_v24  ;;  %v4712_v8 = vmax.f32 %v4648_v37, 0.0 }
 0xa5d   : > { %v4713_v41 = vmax.f32 %v4649_v42, 0.0  ;;  %v4474_v47 = vpop.f32.mrb[174].mxu0  ;;  %13011 = vmatpush3.bf16.msra.mxu1 %v13008_v33 }
 0xa5e   : > { %v4650_v52 = vadd.f32 %v16039_v60, %v4474_v47  ;;  %v4476_v35 = vpop.f32.mrb[175].mxu0 }
 0xa5f   : > { %v4651_v58 = vadd.f32 %v16042_v63, %v4476_v35  ;;  %10750 = vmatprep.mubr.msk.f32.mxu1 %vm781_vm1, %v4713_v41 }
 0xa60   : > { %4980 = vmatmul.mubr.f32.gmra.mrb[12].mxu1 %v4712_v8  ;;  %v4714_v6 = vmax.f32 %v4650_v52, 0.0 }
 0xa61   : > { %v4715_v40 = vmax.f32 %v4651_v58, 0.0  ;;  %v4480_v50 = vpop.f32.mrb[176].mxu0 }
 0xa62   : > { %v4652_v17 = vadd.f32 %v16039_v60, %v4480_v50  ;;  %v4482_v18 = vpop.f32.mrb[177].mxu0 }
 0xa63   : > { %v4653_v54 = vadd.f32 %v16042_v63, %v4482_v18  ;;  %10751 = vmatprep.mubr.msk.f32.mxu1 %vm781_vm1, %v4715_v40 }
 0xa64   : > { %4985 = vmatmul.mubr.f32.gmra.mrb[14].mxu1 %v4714_v6  ;;  %v4716_v51 = vmax.f32 %v4652_v17, 0.0 }
 0xa65   : > { %v4717_v55 = vmax.f32 %v4653_v54, 0.0  ;;  %v4486_v14 = vpop.f32.mrb[178].mxu0 }
 0xa66   : > { %v4654_v20 = vadd.f32 %v16039_v60, %v4486_v14  ;;  %v4488_v1 = vpop.f32.mrb[179].mxu0 }
 0xa67   : > { %v4655_v4 = vadd.f32 %v16042_v63, %v4488_v1  ;;  %10752 = vmatprep.mubr.msk.f32.mxu1 %vm781_vm1, %v4717_v55 }
 0xa68   : > { %4990 = vmatmul.mubr.f32.gmra.mrb[16].mxu1 %v4716_v51  ;;  %v4718_v3 = vmax.f32 %v4654_v20, 0.0 }
 0xa69   : > { %v4719_v45 = vmax.f32 %v4655_v4, 0.0  ;;  %v4492_v23 = vpop.f32.mrb[180].mxu0 }
 0xa6a   : > { %v4656_v27 = vadd.f32 %v16039_v60, %v4492_v23  ;;  %v4494_v62 = vpop.f32.mrb[181].mxu0 }
 0xa6b   : > { %v4657_v30 = vadd.f32 %v16042_v63, %v4494_v62  ;;  %10753 = vmatprep.mubr.msk.f32.mxu1 %vm781_vm1, %v4719_v45 }
 0xa6c   : > { %4995 = vmatmul.mubr.f32.gmra.mrb[18].mxu1 %v4718_v3  ;;  %v4720_v28 = vmax.f32 %v4656_v27, 0.0 }
 0xa6d   : > { %v4721_v9 = vmax.f32 %v4657_v30, 0.0  ;;  %v4498_v26 = vpop.f32.mrb[182].mxu0 }
 0xa6e   : > { %v4658_v32 = vadd.f32 %v16039_v60, %v4498_v26  ;;  %v4500_v38 = vpop.f32.mrb[183].mxu0 }
 0xa6f   : > { %v4659_v29 = vadd.f32 %v16042_v63, %v4500_v38  ;;  %10754 = vmatprep.mubr.msk.f32.mxu1 %vm781_vm1, %v4721_v9 }
 0xa70   : > { %5000 = vmatmul.mubr.f32.gmra.mrb[20].mxu1 %v4720_v28  ;;  %v4722_v56 = vmax.f32 %v4658_v32, 0.0 }
 0xa71   : > { %v4723_v46 = vmax.f32 %v4659_v29, 0.0  ;;  %v4504_v49 = vpop.f32.mrb[184].mxu0 }
 0xa72   : > { %v4660_v61 = vadd.f32 %v16039_v60, %v4504_v49  ;;  %v4506_v36 = vpop.f32.mrb[185].mxu0 }
 0xa73   : > { %v4661_v16 = vadd.f32 %v16042_v63, %v4506_v36  ;;  %10755 = vmatprep.mubr.msk.f32.mxu1 %vm781_vm1, %v4723_v46 }
 0xa74   : > { %5005 = vmatmul.mubr.f32.gmra.mrb[22].mxu1 %v4722_v56  ;;  %v4724_v57 = vmax.f32 %v4660_v61, 0.0 }
 0xa75   : > { %v4725_v33 = vmax.f32 %v4661_v16, 0.0  ;;  %v4510_v21 = vpop.f32.mrb[186].mxu0 }
 0xa76   : > { %v4662_v19 = vadd.f32 %v16039_v60, %v4510_v21  ;;  %v4512_v24 = vpop.f32.mrb[187].mxu0 }
 0xa77   : > { %v4663_v37 = vadd.f32 %v16042_v63, %v4512_v24  ;;  %10756 = vmatprep.mubr.msk.f32.mxu1 %vm781_vm1, %v4725_v33 }
 0xa78   : > { %5010 = vmatmul.mubr.f32.gmra.mrb[24].mxu1 %v4724_v57  ;;  %v4726_v41 = vmax.f32 %v4662_v19, 0.0 }
 0xa79   : > { %v4727_v25 = vmax.f32 %v4663_v37, 0.0  ;;  %v4516_v42 = vpop.f32.mrb[188].mxu0 }
 0xa7a   : > { %v4664_v47 = vadd.f32 %v16039_v60, %v4516_v42  ;;  %v4518_v8 = vpop.f32.mrb[189].mxu0 }
 0xa7b   : > { %v4665_v52 = vadd.f32 %v16042_v63, %v4518_v8  ;;  %10757 = vmatprep.mubr.msk.f32.mxu1 %vm781_vm1, %v4727_v25 }
 0xa7c   : > { %5015 = vmatmul.mubr.f32.gmra.mrb[26].mxu1 %v4726_v41  ;;  %v4728_v40 = vmax.f32 %v4664_v47, 0.0 }
 0xa7d   : > { %v4729_v35 = vmax.f32 %v4665_v52, 0.0  ;;  %v4522_v58 = vpop.f32.mrb[190].mxu0 }
 0xa7e   : > { %v4666_v50 = vadd.f32 %v16039_v60, %v4522_v58  ;;  %v4524_v6 = vpop.f32.mrb[191].mxu0  ;;  %v10789_v58 = vld [vmem:[%s18670_s4 + $0x830] sm:$0xff] }
 0xa7f   : > { %v4667_v17 = vadd.f32 %v16042_v63, %v4524_v6  ;;  %10758 = vmatprep.mubr.msk.f32.mxu1 %vm781_vm1, %v4729_v35  ;;  %v10788_v35 = vld [vmem:[%s18670_s4 + $0x820] sm:$0xff] }
 0xa80   : > { %5020 = vmatmul.mubr.f32.gmra.mrb[28].mxu1 %v4728_v40  ;;  %v4730_v55 = vmax.f32 %v4666_v50, 0.0 }
 0xa81   : > { %v4731_v18 = vmax.f32 %v4667_v17, 0.0  ;;  %v4528_v54 = vpop.f32.mrb[192].mxu0  ;;  %v13012_v17 = vpack.c.bf16 %v10789_v58, %v10788_v35 }
 0xa82   : > { %v4668_v14 = vadd.f32 %v16039_v60, %v4528_v54  ;;  %v4530_v51 = vpop.f32.mrb[193].mxu0 }
 0xa83   : > { %v4669_v20 = vadd.f32 %v16042_v63, %v4530_v51  ;;  %10759 = vmatprep.mubr.msk.f32.mxu1 %vm781_vm1, %v4731_v18  ;;  %13013 = vmatprep.subr.bf16.mxu1 %v13012_v17  ;;  %v10791_v51 = vld [vmem:[%s18670_s4 + $0x850] sm:$0xff] }
 0xa84   : > { %5025 = vmatmul.mubr.f32.gmra.mrb[30].mxu1 %v4730_v55  ;;  %v4732_v45 = vmax.f32 %v4668_v14, 0.0  ;;  %v10790_v14 = vld [vmem:[%s18670_s4 + $0x840] sm:$0xff] }
 0xa85   : > { %v4733_v1 = vmax.f32 %v4669_v20, 0.0  ;;  %v4534_v4 = vpop.f32.mrb[194].mxu0  ;;  %13015 = vmatpush3.bf16.msra.mxu1 %v13012_v17 }
 0xa86   : > { %v4670_v23 = vadd.f32 %v16039_v60, %v4534_v4  ;;  %v4536_v3 = vpop.f32.mrb[195].mxu0 }
 0xa87   : > { %v4671_v27 = vadd.f32 %v16042_v63, %v4536_v3  ;;  %10760 = vmatprep.mubr.msk.f32.mxu1 %vm781_vm1, %v4733_v1 }
 0xa88   : > { %5030 = vmatmul.mubr.f32.gmra.mrb[32].mxu1 %v4732_v45  ;;  %v4734_v9 = vmax.f32 %v4670_v23, 0.0  ;;  %v13016_v45 = vpack.c.bf16 %v10791_v51, %v10790_v14 }
 0xa89   : > { %v4735_v62 = vmax.f32 %v4671_v27, 0.0  ;;  %v4540_v30 = vpop.f32.mrb[196].mxu0 }
 0xa8a   : > { %v4672_v26 = vadd.f32 %v16039_v60, %v4540_v30  ;;  %v4542_v28 = vpop.f32.mrb[197].mxu0  ;;  %13017 = vmatprep.subr.bf16.mxu1 %v13016_v45 }
 0xa8b   : > { %v4673_v32 = vadd.f32 %v16042_v63, %v4542_v28  ;;  %10761 = vmatprep.mubr.msk.f32.mxu1 %vm781_vm1, %v4735_v62  ;;  %13019 = vmatpush3.bf16.msra.mxu1 %v13016_v45 }
 0xa8c   : > { %5035 = vmatmul.mubr.f32.gmra.mrb[34].mxu1 %v4734_v9  ;;  %v4736_v46 = vmax.f32 %v4672_v26, 0.0  ;;  %13052 = vmatprep.subr.bf16.mxu1 %v18828_v22 }
 0xa8d   : > { %v4737_v38 = vmax.f32 %v4673_v32, 0.0  ;;  %v4546_v29 = vpop.f32.mrb[198].mxu0 }
 0xa8e   : > { %v4674_v49 = vadd.f32 %v16039_v60, %v4546_v29  ;;  %v4548_v56 = vpop.f32.mrb[199].mxu0 }
 0xa8f   : > { %v4675_v61 = vadd.f32 %v16042_v63, %v4548_v56  ;;  %10762 = vmatprep.mubr.msk.f32.mxu1 %vm781_vm1, %v4737_v38 }
 0xa90   : > { %5040 = vmatmul.mubr.f32.gmra.mrb[36].mxu1 %v4736_v46  ;;  %v4738_v33 = vmax.f32 %v4674_v49, 0.0 }
 0xa91   : > { %v4739_v36 = vmax.f32 %v4675_v61, 0.0  ;;  %v4552_v16 = vpop.f32.mrb[200].mxu0 }
 0xa92   : > { %v4676_v21 = vadd.f32 %v16039_v60, %v4552_v16  ;;  %v4554_v57 = vpop.f32.mrb[201].mxu0 }
 0xa93   : > { %v4677_v19 = vadd.f32 %v16042_v63, %v4554_v57  ;;  %10763 = vmatprep.mubr.msk.f32.mxu1 %vm781_vm1, %v4739_v36 }
 0xa94   : > { %5045 = vmatmul.mubr.f32.gmra.mrb[38].mxu1 %v4738_v33  ;;  %v4740_v25 = vmax.f32 %v4676_v21, 0.0 }
 0xa95   : > { %v4741_v24 = vmax.f32 %v4677_v19, 0.0  ;;  %v4558_v37 = vpop.f32.mrb[202].mxu0 }
 0xa96   : > { %v4678_v42 = vadd.f32 %v16039_v60, %v4558_v37  ;;  %v4560_v41 = vpop.f32.mrb[203].mxu0 }
 0xa97   : > { %v4679_v47 = vadd.f32 %v16042_v63, %v4560_v41  ;;  %10764 = vmatprep.mubr.msk.f32.mxu1 %vm781_vm1, %v4741_v24 }
 0xa98   : > { %5050 = vmatmul.mubr.f32.gmra.mrb[40].mxu1 %v4740_v25  ;;  %v4742_v40 = vmax.f32 %v4678_v42, 0.0 }
 0xa99   : > { %v4743_v8 = vmax.f32 %v4679_v47, 0.0  ;;  %v4564_v52 = vpop.f32.mrb[204].mxu0 }
 0xa9a   : > { %v4680_v50 = vadd.f32 %v16039_v60, %v4564_v52  ;;  %v4566_v6 = vpop.f32.mrb[205].mxu0 }
 0xa9b   : > { %v4681_v18 = vadd.f32 %v16042_v63, %v4566_v6  ;;  %10765 = vmatprep.mubr.msk.f32.mxu1 %vm781_vm1, %v4743_v8 }
 0xa9c   : > { %5055 = vmatmul.mubr.f32.gmra.mrb[42].mxu1 %v4742_v40  ;;  %v4744_v20 = vmax.f32 %v4680_v50, 0.0 }
 0xa9d   : > { %v4745_v54 = vmax.f32 %v4681_v18, 0.0  ;;  %v4570_v55 = vpop.f32.mrb[206].mxu0 }
 0xa9e   : > { %v4682_v1 = vadd.f32 %v16039_v60, %v4570_v55  ;;  %v4572_v4 = vpop.f32.mrb[207].mxu0 }
 0xa9f   : > { %v4683_v23 = vadd.f32 %v16042_v63, %v4572_v4  ;;  %10766 = vmatprep.mubr.msk.f32.mxu1 %vm781_vm1, %v4745_v54 }
 0xaa0   : > { %5060 = vmatmul.mubr.f32.gmra.mrb[44].mxu1 %v4744_v20  ;;  %v4746_v62 = vmax.f32 %v4682_v1, 0.0 }
 0xaa1   : > { %v4747_v3 = vmax.f32 %v4683_v23, 0.0  ;;  %v4576_v27 = vpop.f32.mrb[208].mxu0 }
 0xaa2   : > { %v4684_v30 = vadd.f32 %v16039_v60, %v4576_v27  ;;  %v4578_v9 = vpop.f32.mrb[209].mxu0 }
 0xaa3   : > { %v4685_v26 = vadd.f32 %v16042_v63, %v4578_v9  ;;  %10767 = vmatprep.mubr.msk.f32.mxu1 %vm781_vm1, %v4747_v3 }
 0xaa4   : > { %5065 = vmatmul.mubr.f32.gmra.mrb[46].mxu1 %v4746_v62  ;;  %v4748_v38 = vmax.f32 %v4684_v30, 0.0 }
 0xaa5   : > { %v4749_v28 = vmax.f32 %v4685_v26, 0.0  ;;  %v4582_v32 = vpop.f32.mrb[210].mxu0 }
 0xaa6   : > { %v4686_v29 = vadd.f32 %v16039_v60, %v4582_v32  ;;  %v4584_v46 = vpop.f32.mrb[211].mxu0 }
 0xaa7   : > { %v4687_v49 = vadd.f32 %v16042_v63, %v4584_v46  ;;  %10768 = vmatprep.mubr.msk.f32.mxu1 %vm781_vm1, %v4749_v28  ;;  %v16192_v28 = vld [vmem:[%s18670_s4 + $0x750] ss:$0 sm:$0xff] }
 0xaa8   : > { %5070 = vmatmul.mubr.f32.gmra.mrb[48].mxu1 %v4748_v38  ;;  %v4750_v36 = vmax.f32 %v4686_v29, 0.0  ;;  %v10794_v29 = vld [vmem:[%s18670_s4 + $0x880] sm:$0xff]  ;;  %v10795_v46 = vld [vmem:[%s18670_s4 + $0x890] sm:$0xff] }
 0xaa9   : > { %v4751_v56 = vmax.f32 %v4687_v49, 0.0  ;;  %v4588_v61 = vpop.f32.mrb[212].mxu0 }
 0xaaa   : > { %v4688_v16 = vadd.f32 %v16039_v60, %v4588_v61  ;;  %v4590_v33 = vpop.f32.mrb[213].mxu0 }
 0xaab   : > { %v4689_v21 = vadd.f32 %v16042_v63, %v4590_v33  ;;  %10769 = vmatprep.mubr.msk.f32.mxu1 %vm781_vm1, %v4751_v56  ;;  %v10796_v56 = vld [vmem:[%s18670_s4 + $0x8a0] sm:$0xff] }
 0xaac   : > { %5075 = vmatmul.mubr.f32.gmra.mrb[50].mxu1 %v4750_v36  ;;  %v4752_v24 = vmax.f32 %v4688_v16, 0.0  ;;  %v13024_v36 = vpack.c.bf16 %v10796_v56, %v10795_v46  ;;  %v10797_v16 = vld [vmem:[%s18670_s4 + $0x8b0] sm:$0xff]  ;;  %v10798_v33 = vld [vmem:[%s18670_s4 + $0x8c0] sm:$0xff] }
 0xaad   : > { %v4753_v57 = vmax.f32 %v4689_v21, 0.0  ;;  %v4594_v19 = vpop.f32.mrb[214].mxu0 }
 0xaae   : > { %v4690_v37 = vadd.f32 %v16039_v60, %v4594_v19  ;;  %v4596_v25 = vpop.f32.mrb[215].mxu0 }
 0xaaf   : > { %v4691_v42 = vadd.f32 %v16042_v63, %v4596_v25  ;;  %10770 = vmatprep.mubr.msk.f32.mxu1 %vm781_vm1, %v4753_v57  ;;  %v10799_v25 = vld [vmem:[%s18670_s4 + $0x8d0] sm:$0xff] }
 0xab0   : > { %5080 = vmatmul.mubr.f32.gmra.mrb[52].mxu1 %v4752_v24  ;;  %v4754_v8 = vmax.f32 %v4690_v37, 0.0  ;;  %v13028_v24 = vpack.c.bf16 %v10798_v33, %v10797_v16 }
 0xab1   : > { %v4755_v41 = vmax.f32 %v4691_v42, 0.0  ;;  %v4600_v47 = vpop.f32.mrb[216].mxu0  ;;  %v10800_v42 = vld [vmem:[%s18670_s4 + $0x8e0] sm:$0xff] }
 0xab2   : > { %v4692_v52 = vadd.f32 %v16039_v60, %v4600_v47  ;;  %v4602_v35 = vpop.f32.mrb[217].mxu0 }
 0xab3   : > { %v4693_v58 = vadd.f32 %v16042_v63, %v4602_v35  ;;  %10771 = vmatprep.mubr.msk.f32.mxu1 %vm781_vm1, %v4755_v41 }
 0xab4   : > { %5085 = vmatmul.mubr.f32.gmra.mrb[54].mxu1 %v4754_v8  ;;  %v4756_v6 = vmax.f32 %v4692_v52, 0.0  ;;  %v13032_v52 = vpack.c.bf16 %v10800_v42, %v10799_v25 }
 0xab5   : > { %v4757_v40 = vmax.f32 %v4693_v58, 0.0  ;;  %v4606_v50 = vpop.f32.mrb[218].mxu0  ;;  %v10801_v58 = vld [vmem:[%s18670_s4 + $0x8f0] sm:$0xff] }
 0xab6   : > { %v4694_v17 = vadd.f32 %v16039_v60, %v4606_v50  ;;  %v4608_v18 = vpop.f32.mrb[219].mxu0 }
 0xab7   : > { %v4695_v54 = vadd.f32 %v16042_v63, %v4608_v18  ;;  %10772 = vmatprep.mubr.msk.f32.mxu1 %vm781_vm1, %v4757_v40  ;;  %v10802_v40 = vld [vmem:[%s18670_s4 + $0x900] sm:$0xff] }
 0xab8   : > { %5090 = vmatmul.mubr.f32.gmra.mrb[56].mxu1 %v4756_v6  ;;  %v4758_v51 = vmax.f32 %v4694_v17, 0.0  ;;  %v13036_v18 = vpack.c.bf16 %v10802_v40, %v10801_v58 }
 0xab9   : > { %v4759_v55 = vmax.f32 %v4695_v54, 0.0  ;;  %v4612_v14 = vpop.f32.mrb[220].mxu0 }
 0xaba   : > { %v4696_v20 = vadd.f32 %v16039_v60, %v4612_v14  ;;  %v4614_v1 = vpop.f32.mrb[221].mxu0  ;;  %v10804_v14 = vld [vmem:[%s18670_s4 + $0x920] sm:$0xff] }
 0xabb   : > { %v4697_v4 = vadd.f32 %v16042_v63, %v4614_v1  ;;  %10773 = vmatprep.mubr.msk.f32.mxu1 %vm781_vm1, %v4759_v55  ;;  %v10803_v55 = vld [vmem:[%s18670_s4 + $0x910] sm:$0xff] }
 0xabc   : > { %5095 = vmatmul.mubr.f32.gmra.mrb[58].mxu1 %v4758_v51  ;;  %v4760_v3 = vmax.f32 %v4696_v20, 0.0 }
 0xabd   : > { %v4761_v45 = vmax.f32 %v4697_v4, 0.0  ;;  %v4618_v23 = vpop.f32.mrb[222].mxu0  ;;  %v13040_v4 = vpack.c.bf16 %v10804_v14, %v10803_v55 }
 0xabe   : > { %v4698_v27 = vadd.f32 %v16039_v60, %v4618_v23  ;;  %v4620_v62 = vpop.f32.mrb[223].mxu0  ;;  %v10805_v23 = vld [vmem:[%s18670_s4 + $0x930] sm:$0xff] }
 0xabf   : > { %v4699_v30 = vadd.f32 %v16042_v63, %v4620_v62  ;;  %10774 = vmatprep.mubr.msk.f32.mxu1 %vm781_vm1, %v4761_v45  ;;  %v10793_v63 = vld [vmem:[%s18670_s4 + $0x870] sm:$0xff] }
 0xac0   : > { %5100 = vmatmul.mubr.f32.gmra.mrb[60].mxu1 %v4760_v3  ;;  %v4762_v26 = vmax.f32 %v4698_v27, 0.0  ;;  %v13020_v49 = vpack.c.bf16 %v10794_v29, %v10793_v63  ;;  %v10806_v3 = vld [vmem:[%s18670_s4 + $0x940] sm:$0xff] }
 0xac1   : > { %v4763_v9 = vmax.f32 %v4699_v30, 0.0 }
 0xac2   : > { %13021 = vmatprep.subr.bf16.mxu0 %v13020_v49 }
 0xac3   : > { %10775 = vmatprep.mubr.msk.f32.mxu1 %vm781_vm1, %v4763_v9  ;;  %13023 = vmatpush3.bf16.msra.mxu0 %v13020_v49  ;;  %v13044_v9 = vpack.c.bf16 %v10806_v3, %v10805_v23 }
 0xac4   : > { %5105 = vmatmul.mubr.f32.gmra.mrb[62].mxu1 %v4762_v26  ;;  %13025 = vmatprep.subr.bf16.mxu0 %v13024_v36 }
 0xac7   : > { %13027 = vmatpush3.bf16.msra.mxu0 %v13024_v36 }
 0xac8   : > { %13029 = vmatprep.subr.bf16.mxu0 %v13028_v24 }
 0xacb   : > { %13031 = vmatpush3.bf16.msra.mxu0 %v13028_v24 }
 0xacc   : > { %13033 = vmatprep.subr.bf16.mxu0 %v13032_v52 }
 0xacf   : > { %13035 = vmatpush3.bf16.msra.mxu0 %v13032_v52 }
 0xad0   : > { %13037 = vmatprep.subr.bf16.mxu0 %v13036_v18 }
 0xad3   : > { %13039 = vmatpush3.bf16.msra.mxu0 %v13036_v18 }
 0xad4   : > { %13041 = vmatprep.subr.bf16.mxu0 %v13040_v4 }
 0xad7   : > { %13043 = vmatpush3.bf16.msra.mxu0 %v13040_v4 }
 0xad8   : > { %13045 = vmatprep.subr.bf16.mxu0 %v13044_v9 }
 0xadb   : > { %13047 = vmatpush3.bf16.msra.mxu0 %v13044_v9 }
 0xb1b   : > { %v4951_v32 = vpop.f32.mrb[0].mxu1 }
 0xb1c   : > { %v4952_v38 = vadd.f32 %v16192_v28, %v4951_v32  ;;  %v4953_v60 = vpop.f32.mrb[1].mxu1 }
 0xb1e   : > { %v5110_v61 = vmax.f32 %v4952_v38, 0.0 }
 0xb1f   : > { %v4956_v21 = vpop.f32.mrb[2].mxu1 }
 0xb20   : > { %v4957_v57 = vadd.f32 %v16192_v28, %v4956_v21  ;;  %v4958_v19 = vpop.f32.mrb[3].mxu1  ;;  %12139 = vmatprep.mubr.f32.mxu1 %v5110_v61 }
 0xb22   : > { %v5111_v37 = vmax.f32 %v4957_v57, 0.0 }
 0xb23   : > { %v4961_v41 = vpop.f32.mrb[4].mxu1 }
 0xb24   : > { %v4962_v47 = vadd.f32 %v16192_v28, %v4961_v41  ;;  %v4963_v8 = vpop.f32.mrb[5].mxu1  ;;  %12140 = vmatmul.mubr.f32.vlgmr.msra.gmra.mrb[64].mxu1 %v5111_v37 }
 0xb26   : > { %v5112_v35 = vmax.f32 %v4962_v47, 0.0 }
 0xb27   : > { %v4966_v50 = vpop.f32.mrb[6].mxu1 }
 0xb28   : > { %v4967_v6 = vadd.f32 %v16192_v28, %v4966_v50  ;;  %v4968_v17 = vpop.f32.mrb[7].mxu1  ;;  %12142 = vmatprep.mubr.f32.mxu1 %v5112_v35 }
 0xb2a   : > { %v5113_v54 = vmax.f32 %v4967_v6, 0.0 }
 0xb2b   : > { %v4971_v51 = vpop.f32.mrb[8].mxu1 }
 0xb2c   : > { %v4972_v20 = vadd.f32 %v16192_v28, %v4971_v51  ;;  %v4973_v1 = vpop.f32.mrb[9].mxu1  ;;  %12143 = vmatmul.mubr.f32.gmra.mrb[66].mxu1 %v5113_v54 }
 0xb2e   : > { %v5114_v45 = vmax.f32 %v4972_v20, 0.0 }
 0xb2f   : > { %v4976_v27 = vpop.f32.mrb[10].mxu1 }
 0xb30   : > { %v4977_v62 = vadd.f32 %v16192_v28, %v4976_v27  ;;  %v4978_v30 = vpop.f32.mrb[11].mxu1  ;;  %12145 = vmatprep.mubr.f32.mxu1 %v5114_v45 }
 0xb32   : > { %v5115_v26 = vmax.f32 %v4977_v62, 0.0 }
 0xb33   : > { %v4981_v32 = vpop.f32.mrb[12].mxu1 }
 0xb34   : > { %v4982_v38 = vadd.f32 %v16192_v28, %v4981_v32  ;;  %v4983_v60 = vpop.f32.mrb[13].mxu1  ;;  %12146 = vmatmul.mubr.f32.gmra.mrb[68].mxu1 %v5115_v26 }
 0xb36   : > { %v5116_v63 = vmax.f32 %v4982_v38, 0.0 }
 0xb37   : > { %v4986_v29 = vpop.f32.mrb[14].mxu1 }
 0xb38   : > { %v4987_v46 = vadd.f32 %v16192_v28, %v4986_v29  ;;  %v4988_v49 = vpop.f32.mrb[15].mxu1  ;;  %12148 = vmatprep.mubr.f32.mxu1 %v5116_v63 }
 0xb3a   : > { %v5117_v56 = vmax.f32 %v4987_v46, 0.0 }
 0xb3b   : > { %v4991_v61 = vpop.f32.mrb[16].mxu1 }
 0xb3c   : > { %v4992_v36 = vadd.f32 %v16192_v28, %v4991_v61  ;;  %v4993_v16 = vpop.f32.mrb[17].mxu1  ;;  %12149 = vmatmul.mubr.f32.gmra.mrb[70].mxu1 %v5117_v56 }
 0xb3e   : > { %v5118_v33 = vmax.f32 %v4992_v36, 0.0 }
 0xb3f   : > { %v4996_v21 = vpop.f32.mrb[18].mxu1 }
 0xb40   : > { %v4997_v57 = vadd.f32 %v16192_v28, %v4996_v21  ;;  %v4998_v19 = vpop.f32.mrb[19].mxu1  ;;  %12151 = vmatprep.mubr.f32.mxu1 %v5118_v33 }
 0xb42   : > { %v5119_v24 = vmax.f32 %v4997_v57, 0.0 }
 0xb43   : > { %v5001_v37 = vpop.f32.mrb[20].mxu1 }
 0xb44   : > { %v5002_v25 = vadd.f32 %v16192_v28, %v5001_v37  ;;  %v5003_v42 = vpop.f32.mrb[21].mxu1  ;;  %12152 = vmatmul.mubr.f32.gmra.mrb[72].mxu1 %v5119_v24 }
 0xb46   : > { %v5120_v41 = vmax.f32 %v5002_v25, 0.0 }
 0xb47   : > { %v5006_v47 = vpop.f32.mrb[22].mxu1 }
 0xb48   : > { %v5007_v8 = vadd.f32 %v16192_v28, %v5006_v47  ;;  %v5008_v52 = vpop.f32.mrb[23].mxu1  ;;  %12154 = vmatprep.mubr.f32.mxu1 %v5120_v41 }
 0xb4a   : > { %v5121_v35 = vmax.f32 %v5007_v8, 0.0 }
 0xb4b   : > { %v5011_v58 = vpop.f32.mrb[24].mxu1 }
 0xb4c   : > { %v5012_v40 = vadd.f32 %v16192_v28, %v5011_v58  ;;  %v5013_v50 = vpop.f32.mrb[25].mxu1  ;;  %12155 = vmatmul.mubr.f32.gmra.mrb[74].mxu1 %v5121_v35  ;;  %v10807_v58 = vld [vmem:[%s18670_s4 + $0x950] sm:$0xff] }
 0xb4e   : > { %v5122_v6 = vmax.f32 %v5012_v40, 0.0  ;;  %v10808_v40 = vld [vmem:[%s18670_s4 + $0x960] sm:$0xff] }
 0xb4f   : > { %v5016_v17 = vpop.f32.mrb[26].mxu1 }
 0xb50   : > { %v5017_v18 = vadd.f32 %v16192_v28, %v5016_v17  ;;  %v5018_v54 = vpop.f32.mrb[27].mxu1  ;;  %12157 = vmatprep.mubr.f32.mxu1 %v5122_v6  ;;  %v13048_v17 = vpack.c.bf16 %v10808_v40, %v10807_v58 }
 0xb52   : > { %v5123_v55 = vmax.f32 %v5017_v18, 0.0  ;;  %13049 = vmatprep.subr.bf16.mxu0 %v13048_v17 }
 0xb53   : > { %v5021_v14 = vpop.f32.mrb[28].mxu1  ;;  %13051 = vmatpush3.bf16.msra.mxu0 %v13048_v17 }
 0xb54   : > { %v5022_v51 = vadd.f32 %v16192_v28, %v5021_v14  ;;  %v5023_v20 = vpop.f32.mrb[29].mxu1  ;;  %12158 = vmatmul.mubr.f32.gmra.mrb[76].mxu1 %v5123_v55 }
 0xb56   : > { %v5124_v1 = vmax.f32 %v5022_v51, 0.0 }
 0xb57   : > { %v5026_v4 = vpop.f32.mrb[30].mxu1 }
 0xb58   : > { %v5027_v45 = vadd.f32 %v16192_v28, %v5026_v4  ;;  %v5028_v23 = vpop.f32.mrb[31].mxu1  ;;  %12160 = vmatprep.mubr.f32.mxu1 %v5124_v1 }
 0xb5a   : > { %v5125_v3 = vmax.f32 %v5027_v45, 0.0 }
 0xb5b   : > { %v5031_v27 = vpop.f32.mrb[32].mxu1 }
 0xb5c   : > { %v5032_v62 = vadd.f32 %v16192_v28, %v5031_v27  ;;  %v5033_v30 = vpop.f32.mrb[33].mxu1  ;;  %12161 = vmatmul.mubr.f32.gmra.mrb[78].mxu1 %v5125_v3 }
 0xb5e   : > { %v5126_v9 = vmax.f32 %v5032_v62, 0.0 }
 0xb5f   : > { %v5036_v26 = vpop.f32.mrb[34].mxu1 }
 0xb60   : > { %v5037_v32 = vadd.f32 %v16192_v28, %v5036_v26  ;;  %v5038_v38 = vpop.f32.mrb[35].mxu1  ;;  %12163 = vmatprep.mubr.f32.mxu1 %v5126_v9 }
 0xb62   : > { %v5127_v60 = vmax.f32 %v5037_v32, 0.0 }
 0xb63   : > { %v5041_v63 = vpop.f32.mrb[36].mxu1 }
 0xb64   : > { %v5042_v29 = vadd.f32 %v16192_v28, %v5041_v63  ;;  %v5043_v46 = vpop.f32.mrb[37].mxu1  ;;  %12164 = vmatmul.mubr.f32.gmra.mrb[80].mxu1 %v5127_v60 }
 0xb66   : > { %v5128_v49 = vmax.f32 %v5042_v29, 0.0 }
 0xb67   : > { %v5046_v56 = vpop.f32.mrb[38].mxu1 }
 0xb68   : > { %v5047_v61 = vadd.f32 %v16192_v28, %v5046_v56  ;;  %v5048_v36 = vpop.f32.mrb[39].mxu1  ;;  %12166 = vmatprep.mubr.f32.mxu1 %v5128_v49 }
 0xb6a   : > { %v5129_v16 = vmax.f32 %v5047_v61, 0.0 }
 0xb6b   : > { %v5051_v33 = vpop.f32.mrb[40].mxu1 }
 0xb6c   : > { %v5052_v21 = vadd.f32 %v16192_v28, %v5051_v33  ;;  %v5053_v57 = vpop.f32.mrb[41].mxu1  ;;  %12167 = vmatmul.mubr.f32.gmra.mrb[82].mxu1 %v5129_v16 }
 0xb6e   : > { %v5130_v19 = vmax.f32 %v5052_v21, 0.0 }
 0xb6f   : > { %v5056_v24 = vpop.f32.mrb[42].mxu1 }
 0xb70   : > { %v5057_v37 = vadd.f32 %v16192_v28, %v5056_v24  ;;  %v5058_v25 = vpop.f32.mrb[43].mxu1  ;;  %12169 = vmatprep.mubr.f32.mxu1 %v5130_v19 }
 0xb71   : > { %v13942_v25 = vld [vmem:[%s14393_s28 + $0x8] sm:$0xff] }
 0xb72   : > { %v5131_v42 = vmax.f32 %v5057_v37, 0.0 }
 0xb73   : > { %v5061_v41 = vpop.f32.mrb[44].mxu1 }
 0xb74   : > { %v5062_v47 = vadd.f32 %v16192_v28, %v5061_v41  ;;  %v5063_v8 = vpop.f32.mrb[45].mxu1  ;;  %12170 = vmatmul.mubr.f32.gmra.mrb[84].mxu1 %v5131_v42  ;;  %v16278_v42 = vld [vmem:[%s18670_s4 + $0x860] ss:$0 sm:$0xff] }
 0xb76   : > { %v5132_v52 = vmax.f32 %v5062_v47, 0.0 }
 0xb77   : > { %v5066_v35 = vpop.f32.mrb[46].mxu1 }
 0xb78   : > { %v5067_v50 = vadd.f32 %v16192_v28, %v5066_v35  ;;  %v5068_v6 = vpop.f32.mrb[47].mxu1  ;;  %12172 = vmatprep.mubr.f32.mxu1 %v5132_v52 }
 0xb7a   : > { %v5133_v18 = vmax.f32 %v5067_v50, 0.0 }
 0xb7b   : > { %v5071_v54 = vpop.f32.mrb[48].mxu1 }
 0xb7c   : > { %v5072_v55 = vadd.f32 %v16192_v28, %v5071_v54  ;;  %v5073_v14 = vpop.f32.mrb[49].mxu1  ;;  %12173 = vmatmul.mubr.f32.gmra.mrb[86].mxu1 %v5133_v18 }
 0xb7e   : > { %v5134_v51 = vmax.f32 %v5072_v55, 0.0 }
 0xb7f   : > { %v5076_v20 = vpop.f32.mrb[50].mxu1 }
 0xb80   : > { %v5077_v1 = vadd.f32 %v16192_v28, %v5076_v20  ;;  %v5078_v4 = vpop.f32.mrb[51].mxu1  ;;  %12175 = vmatprep.mubr.f32.mxu1 %v5134_v51 }
 0xb82   : > { %v5135_v45 = vmax.f32 %v5077_v1, 0.0 }
 0xb83   : > { %v5081_v23 = vpop.f32.mrb[52].mxu1 }
 0xb84   : > { %v5082_v3 = vadd.f32 %v16192_v28, %v5081_v23  ;;  %v5083_v27 = vpop.f32.mrb[53].mxu1  ;;  %12176 = vmatmul.mubr.f32.gmra.mrb[88].mxu1 %v5135_v45 }
 0xb86   : > { %v5136_v62 = vmax.f32 %v5082_v3, 0.0 }
 0xb87   : > { %v5086_v30 = vpop.f32.mrb[54].mxu1 }
 0xb88   : > { %v5087_v9 = vadd.f32 %v16192_v28, %v5086_v30  ;;  %v5088_v26 = vpop.f32.mrb[55].mxu1  ;;  %12178 = vmatprep.mubr.f32.mxu1 %v5136_v62 }
 0xb8a   : > { %v5137_v32 = vmax.f32 %v5087_v9, 0.0 }
 0xb8b   : > { %v5091_v38 = vpop.f32.mrb[56].mxu1 }
 0xb8c   : > { %v5092_v60 = vadd.f32 %v16192_v28, %v5091_v38  ;;  %v5093_v63 = vpop.f32.mrb[57].mxu1  ;;  %12179 = vmatmul.mubr.f32.gmra.mrb[90].mxu1 %v5137_v32 }
 0xb8e   : > { %v5138_v29 = vmax.f32 %v5092_v60, 0.0 }
 0xb8f   : > { %v5096_v46 = vpop.f32.mrb[58].mxu1 }
 0xb90   : > { %v5097_v49 = vadd.f32 %v16192_v28, %v5096_v46  ;;  %v5098_v56 = vpop.f32.mrb[59].mxu1  ;;  %12181 = vmatprep.mubr.f32.mxu1 %v5138_v29 }
 0xb92   : > { %v5139_v61 = vmax.f32 %v5097_v49, 0.0 }
 0xb93   : > { %v5101_v36 = vpop.f32.mrb[60].mxu1 }
 0xb94   : > { %v5102_v16 = vadd.f32 %v16192_v28, %v5101_v36  ;;  %v5103_v33 = vpop.f32.mrb[61].mxu1  ;;  %12182 = vmatmul.mubr.f32.gmra.mrb[92].mxu1 %v5139_v61 }
 0xb96   : > { %v5140_v21 = vmax.f32 %v5102_v16, 0.0 }
 0xb97   : > { %v5106_v57 = vpop.f32.mrb[62].mxu1 }
 0xb98   : > { %v5107_v19 = vadd.f32 %v16192_v28, %v5106_v57  ;;  %v5108_v24 = vpop.f32.mrb[63].mxu1  ;;  %12184 = vmatprep.mubr.f32.mxu1 %v5140_v21 }
 0xb9a   : > { %v5141_v37 = vmax.f32 %v5107_v19, 0.0 }
 0xb9c   : > { %12185 = vmatmul.mubr.f32.gmra.mrb[94].mxu1 %v5141_v37 }
 0xb9d   : > { %5754 = vmatprep.mubr.f32.mxu1 %v13942_v25 }
 0xbf7   : > { %v12141_v41 = vpop.f32.mrb[64].mxu1 }
 0xbf8   : > { %v5231_v47 = vadd.f32 %v12141_v41, %v16278_v42  ;;  %v5225_v8 = vpop.f32.mrb[65].mxu1 }
 0xbf9   : > { %v5226_v52 = vadd.f32 %v16278_v42, %v5225_v8 }
 0xbfa   : > { %v5385_v58 = vmax.f32 %v5231_v47, 0.0 }
 0xbfb   : > { %v5384_v35 = vmax.f32 %v5226_v52, 0.0 }
 0xbfd   : > { %12219 = vmatprep.mubr.f32.mxu0 %v5384_v35 }
 0xbfe   : > { %12220 = vmatmul.mubr.f32.vlgmr.msra.gmra.mrb[224].mxu0 %v5385_v58 }
 0xbff   : > { %v12144_v28 = vpop.f32.mrb[66].mxu1 }
 0xc00   : > { %v5241_v40 = vadd.f32 %v12144_v28, %v16278_v42  ;;  %v5235_v50 = vpop.f32.mrb[67].mxu1 }
 0xc01   : > { %v5236_v6 = vadd.f32 %v16278_v42, %v5235_v50 }
 0xc02   : > { %v5387_v18 = vmax.f32 %v5241_v40, 0.0 }
 0xc03   : > { %v5386_v17 = vmax.f32 %v5236_v6, 0.0 }
 0xc05   : > { %12222 = vmatprep.mubr.f32.mxu0 %v5386_v17 }
 0xc06   : > { %12223 = vmatmul.mubr.f32.gmra.mrb[226].mxu0 %v5387_v18 }
 0xc07   : > { %v12147_v54 = vpop.f32.mrb[68].mxu1 }
 0xc08   : > { %v5251_v55 = vadd.f32 %v12147_v54, %v16278_v42  ;;  %v5245_v14 = vpop.f32.mrb[69].mxu1 }
 0xc09   : > { %v5246_v51 = vadd.f32 %v16278_v42, %v5245_v14 }
 0xc0a   : > { %v5389_v1 = vmax.f32 %v5251_v55, 0.0 }
 0xc0b   : > { %v5388_v20 = vmax.f32 %v5246_v51, 0.0 }
 0xc0d   : > { %12225 = vmatprep.mubr.f32.mxu0 %v5388_v20 }
 0xc0e   : > { %12226 = vmatmul.mubr.f32.gmra.mrb[228].mxu0 %v5389_v1 }
 0xc0f   : > { %v12150_v4 = vpop.f32.mrb[70].mxu1 }
 0xc10   : > { %v5261_v45 = vadd.f32 %v12150_v4, %v16278_v42  ;;  %v5255_v23 = vpop.f32.mrb[71].mxu1 }
 0xc11   : > { %v5256_v3 = vadd.f32 %v16278_v42, %v5255_v23 }
 0xc12   : > { %v5391_v62 = vmax.f32 %v5261_v45, 0.0 }
 0xc13   : > { %v5390_v27 = vmax.f32 %v5256_v3, 0.0 }
 0xc15   : > { %12228 = vmatprep.mubr.f32.mxu0 %v5390_v27 }
 0xc16   : > { %12229 = vmatmul.mubr.f32.gmra.mrb[230].mxu0 %v5391_v62 }
 0xc17   : > { %v12153_v30 = vpop.f32.mrb[72].mxu1 }
 0xc18   : > { %v5271_v9 = vadd.f32 %v12153_v30, %v16278_v42  ;;  %v5265_v26 = vpop.f32.mrb[73].mxu1 }
 0xc19   : > { %v5266_v32 = vadd.f32 %v16278_v42, %v5265_v26 }
 0xc1a   : > { %v5393_v60 = vmax.f32 %v5271_v9, 0.0 }
 0xc1b   : > { %v5392_v38 = vmax.f32 %v5266_v32, 0.0 }
 0xc1d   : > { %12231 = vmatprep.mubr.f32.mxu0 %v5392_v38 }
 0xc1e   : > { %12232 = vmatmul.mubr.f32.gmra.mrb[232].mxu0 %v5393_v60 }
 0xc1f   : > { %v12156_v63 = vpop.f32.mrb[74].mxu1 }
 0xc20   : > { %v5281_v29 = vadd.f32 %v12156_v63, %v16278_v42  ;;  %v5275_v46 = vpop.f32.mrb[75].mxu1 }
 0xc21   : > { %v5276_v49 = vadd.f32 %v16278_v42, %v5275_v46 }
 0xc22   : > { %v5395_v61 = vmax.f32 %v5281_v29, 0.0 }
 0xc23   : > { %v5394_v56 = vmax.f32 %v5276_v49, 0.0 }
 0xc25   : > { %12234 = vmatprep.mubr.f32.mxu0 %v5394_v56 }
 0xc26   : > { %12235 = vmatmul.mubr.f32.gmra.mrb[234].mxu0 %v5395_v61 }
 0xc27   : > { %v12159_v36 = vpop.f32.mrb[76].mxu1 }
 0xc28   : > { %v5291_v16 = vadd.f32 %v12159_v36, %v16278_v42  ;;  %v5285_v33 = vpop.f32.mrb[77].mxu1 }
 0xc29   : > { %v5286_v21 = vadd.f32 %v16278_v42, %v5285_v33 }
 0xc2a   : > { %v5397_v19 = vmax.f32 %v5291_v16, 0.0 }
 0xc2b   : > { %v5396_v57 = vmax.f32 %v5286_v21, 0.0 }
 0xc2d   : > { %12237 = vmatprep.mubr.f32.mxu0 %v5396_v57 }
 0xc2e   : > { %12238 = vmatmul.mubr.f32.gmra.mrb[236].mxu0 %v5397_v19 }
 0xc2f   : > { %v12162_v24 = vpop.f32.mrb[78].mxu1 }
 0xc30   : > { %v5301_v37 = vadd.f32 %v12162_v24, %v16278_v42  ;;  %v5295_v25 = vpop.f32.mrb[79].mxu1 }
 0xc31   : > { %v5296_v41 = vadd.f32 %v16278_v42, %v5295_v25 }
 0xc32   : > { %v5399_v8 = vmax.f32 %v5301_v37, 0.0 }
 0xc33   : > { %v5398_v47 = vmax.f32 %v5296_v41, 0.0 }
 0xc35   : > { %12240 = vmatprep.mubr.f32.mxu0 %v5398_v47 }
 0xc36   : > { %12241 = vmatmul.mubr.f32.gmra.mrb[238].mxu0 %v5399_v8 }
 0xc37   : > { %v12165_v52 = vpop.f32.mrb[80].mxu1 }
 0xc38   : > { %v5311_v35 = vadd.f32 %v12165_v52, %v16278_v42  ;;  %v5305_v58 = vpop.f32.mrb[81].mxu1 }
 0xc39   : > { %v5306_v28 = vadd.f32 %v16278_v42, %v5305_v58 }
 0xc3a   : > { %v5401_v50 = vmax.f32 %v5311_v35, 0.0 }
 0xc3b   : > { %v5400_v40 = vmax.f32 %v5306_v28, 0.0  ;;  %v16316_v28 = vld [vmem:[%s18670_s4 + $0x970] ss:$0 sm:$0xff] }
 0xc3d   : > { %12243 = vmatprep.mubr.f32.mxu0 %v5400_v40 }
 0xc3e   : > { %12244 = vmatmul.mubr.f32.gmra.mrb[240].mxu0 %v5401_v50 }
 0xc3f   : > { %v12168_v6 = vpop.f32.mrb[82].mxu1 }
 0xc40   : > { %v5321_v17 = vadd.f32 %v12168_v6, %v16278_v42  ;;  %v5315_v18 = vpop.f32.mrb[83].mxu1 }
 0xc41   : > { %v5316_v54 = vadd.f32 %v16278_v42, %v5315_v18 }
 0xc42   : > { %v5403_v14 = vmax.f32 %v5321_v17, 0.0 }
 0xc43   : > { %v5402_v55 = vmax.f32 %v5316_v54, 0.0 }
 0xc45   : > { %12246 = vmatprep.mubr.f32.mxu0 %v5402_v55 }
 0xc46   : > { %12247 = vmatmul.mubr.f32.gmra.mrb[242].mxu0 %v5403_v14 }
 0xc47   : > { %v12171_v51 = vpop.f32.mrb[84].mxu1 }
 0xc48   : > { %v5331_v20 = vadd.f32 %v12171_v51, %v16278_v42  ;;  %v5325_v1 = vpop.f32.mrb[85].mxu1 }
 0xc49   : > { %v5326_v4 = vadd.f32 %v16278_v42, %v5325_v1 }
 0xc4a   : > { %v5405_v23 = vmax.f32 %v5331_v20, 0.0 }
 0xc4b   : > { %v5404_v45 = vmax.f32 %v5326_v4, 0.0 }
 0xc4d   : > { %12249 = vmatprep.mubr.f32.mxu0 %v5404_v45 }
 0xc4e   : > { %12250 = vmatmul.mubr.f32.gmra.mrb[244].mxu0 %v5405_v23 }
 0xc4f   : > { %v12174_v3 = vpop.f32.mrb[86].mxu1 }
 0xc50   : > { %v5341_v27 = vadd.f32 %v12174_v3, %v16278_v42  ;;  %v5335_v62 = vpop.f32.mrb[87].mxu1 }
 0xc51   : > { %v5336_v30 = vadd.f32 %v16278_v42, %v5335_v62 }
 0xc52   : > { %v5407_v26 = vmax.f32 %v5341_v27, 0.0 }
 0xc53   : > { %v5406_v9 = vmax.f32 %v5336_v30, 0.0 }
 0xc55   : > { %12252 = vmatprep.mubr.f32.mxu0 %v5406_v9 }
 0xc56   : > { %12253 = vmatmul.mubr.f32.gmra.mrb[246].mxu0 %v5407_v26 }
 0xc57   : > { %v12177_v32 = vpop.f32.mrb[88].mxu1 }
 0xc58   : > { %v5351_v38 = vadd.f32 %v12177_v32, %v16278_v42  ;;  %v5345_v60 = vpop.f32.mrb[89].mxu1 }
 0xc59   : > { %v5346_v63 = vadd.f32 %v16278_v42, %v5345_v60 }
 0xc5a   : > { %v5409_v46 = vmax.f32 %v5351_v38, 0.0 }
 0xc5b   : > { %v5408_v29 = vmax.f32 %v5346_v63, 0.0 }
 0xc5d   : > { %12255 = vmatprep.mubr.f32.mxu0 %v5408_v29 }
 0xc5e   : > { %12256 = vmatmul.mubr.f32.gmra.mrb[248].mxu0 %v5409_v46  ;;  %v18848_v46 = vld [vmem:[#allocation2_spill] sm:$0xff] }
 0xc5f   : > { %v12180_v49 = vpop.f32.mrb[90].mxu1 }
 0xc60   : > { %v5361_v56 = vadd.f32 %v12180_v49, %v16278_v42  ;;  %v5355_v61 = vpop.f32.mrb[91].mxu1  ;;  %v10839_v49 = vld [vmem:[%s18670_s4 + $0xa68] sm:$0xff] }
 0xc61   : > { %v5356_v36 = vadd.f32 %v16278_v42, %v5355_v61 }
 0xc62   : > { %v5411_v33 = vmax.f32 %v5361_v56, 0.0 }
 0xc63   : > { %v5410_v16 = vmax.f32 %v5356_v36, 0.0 }
 0xc65   : > { %12258 = vmatprep.mubr.f32.mxu0 %v5410_v16 }
 0xc66   : > { %12259 = vmatmul.mubr.f32.gmra.mrb[250].mxu0 %v5411_v33 }
 0xc67   : > { %v12183_v21 = vpop.f32.mrb[92].mxu1 }
 0xc68   : > { %v5371_v57 = vadd.f32 %v12183_v21, %v16278_v42  ;;  %v5365_v19 = vpop.f32.mrb[93].mxu1 }
 0xc69   : > { %v5366_v24 = vadd.f32 %v16278_v42, %v5365_v19 }
 0xc6a   : > { %v5413_v25 = vmax.f32 %v5371_v57, 0.0  ;;  %v18850_v57 = vld [vmem:[#allocation3_spill] sm:$0xff] }
 0xc6b   : > { %v5412_v37 = vmax.f32 %v5366_v24, 0.0 }
 0xc6d   : > { %12261 = vmatprep.mubr.f32.mxu0 %v5412_v37  ;;  %v18852_v37 = vld [vmem:[#allocation4_spill] sm:$0xff] }
 0xc6e   : > { %12262 = vmatmul.mubr.f32.gmra.mrb[252].mxu0 %v5413_v25 }
 0xc6f   : > { %v12186_v41 = vpop.f32.mrb[94].mxu1 }
 0xc70   : > { %v5381_v47 = vadd.f32 %v12186_v41, %v16278_v42  ;;  %v5375_v8 = vpop.f32.mrb[95].mxu1 }
 0xc71   : > { %v5376_v52 = vadd.f32 %v16278_v42, %v5375_v8 }
 0xc72   : > { %v5415_v58 = vmax.f32 %v5381_v47, 0.0 }
 0xc73   : > { %v5414_v35 = vmax.f32 %v5376_v52, 0.0 }
 0xc75   : > { %12264 = vmatprep.mubr.f32.mxu0 %v5414_v35 }
 0xc76   : > { %12265 = vmatmul.mubr.f32.gmra.mrb[254].mxu0 %v5415_v58 }
 0xc77   : > { %6108 = vmatprep.mubr.f32.mxu0 %v18847_v44 }
 0xcd1   : > { %v12221_v40 = vpop.f32.mrb[224].mxu0 }
 0xcd2   : > { %v5505_v50 = vadd.f32 %v12221_v40, %v16316_v28  ;;  %v5499_v6 = vpop.f32.mrb[225].mxu0  ;;  %v18854_v40 = vld [vmem:[#allocation5_spill] sm:$0xff] }
 0xcd3   : > { %v5500_v17 = vadd.f32 %v16316_v28, %v5499_v6 }
 0xcd4   : > { %v16323_v42 = vsel %vm3596_vm4, %v5505_v50, %v14402_v0 }
 0xcd5   : > { %v16328_v18 = vsel %vm3595_vm5, %v5500_v17, %v14405_v2  ;;  %v18856_v17 = vld [vmem:[#allocation6_spill] sm:$0xff] }
 0xcd6   : > { %v13053_v54 = vpack.c.bf16 %v16323_v42, %v16328_v18 }
 0xcd8   : > { %13054 = vmatpush1.bf16.msra.mxu1 %v13053_v54 }
 0xcd9   : > { %v12224_v55 = vpop.f32.mrb[226].mxu0  ;;  %13055 = vmatprep.subr.bf16.mxu1 %v18828_v22 }
 0xcda   : > { %v5515_v14 = vadd.f32 %v12224_v55, %v16316_v28  ;;  %v5509_v51 = vpop.f32.mrb[227].mxu0 }
 0xcdb   : > { %v5510_v20 = vadd.f32 %v16316_v28, %v5509_v51 }
 0xcdc   : > { %v16338_v1 = vsel %vm3598_vm6, %v5515_v14, %v14410_v5 }
 0xcdd   : > { %v16343_v4 = vsel %vm3597_vm7, %v5510_v20, %v14413_v7 }
 0xcde   : > { %v13056_v45 = vpack.c.bf16 %v16338_v1, %v16343_v4 }
 0xce0   : > { %13057 = vmatpush1.bf16.msra.mxu1 %v13056_v45 }
 0xce1   : > { %v12227_v23 = vpop.f32.mrb[228].mxu0  ;;  %13058 = vmatprep.subr.bf16.mxu1 %v18828_v22 }
 0xce2   : > { %v5525_v3 = vadd.f32 %v12227_v23, %v16316_v28  ;;  %v5519_v27 = vpop.f32.mrb[229].mxu0 }
 0xce3   : > { %v5520_v62 = vadd.f32 %v16316_v28, %v5519_v27  ;;  %v18859_v27 = vld [vmem:[#allocation32_spill] sm:$0xff] }
 0xce4   : > { %v16353_v30 = vsel %vm3600_vm8, %v5525_v3, %v14419_v10  ;;  %v18858_v3 = vld [vmem:[#allocation7_spill] sm:$0xff] }
 0xce5   : > { %v16358_v9 = vsel %vm3599_vm9, %v5520_v62, %v14422_v12 }
 0xce6   : > { %v13059_v26 = vpack.c.bf16 %v16353_v30, %v16358_v9 }
 0xce8   : > { %13060 = vmatpush1.bf16.msra.mxu1 %v13059_v26  ;;  %v18861_v26 = vld [vmem:[#allocation8_spill] sm:$0xff] }
 0xce9   : > { %v12230_v32 = vpop.f32.mrb[230].mxu0  ;;  %13061 = vmatprep.subr.bf16.mxu1 %v18828_v22 }
 0xcea   : > { %v5535_v38 = vadd.f32 %v12230_v32, %v16316_v28  ;;  %v5529_v60 = vpop.f32.mrb[231].mxu0 }
 0xceb   : > { %v5530_v63 = vadd.f32 %v16316_v28, %v5529_v60 }
 0xcec   : > { %v16368_v29 = vsel %vm3602_vm10, %v5535_v38, %v14428_v15 }
 0xced   : > { %v16373_v56 = vsel %vm3601_vm11, %v5530_v63, %v18848_v46 }
 0xcee   : > { %v13062_v61 = vpack.c.bf16 %v16368_v29, %v16373_v56 }
 0xcf0   : > { %13063 = vmatpush1.bf16.msra.mxu1 %v13062_v61 }
 0xcf1   : > { %v12233_v36 = vpop.f32.mrb[232].mxu0  ;;  %13064 = vmatprep.subr.bf16.mxu1 %v18828_v22 }
 0xcf2   : > { %v5545_v16 = vadd.f32 %v12233_v36, %v16316_v28  ;;  %v5539_v33 = vpop.f32.mrb[233].mxu0 }
 0xcf3   : > { %v5540_v21 = vadd.f32 %v16316_v28, %v5539_v33  ;;  %v18863_v33 = vld [vmem:[#allocation9_spill] sm:$0xff] }
 0xcf4   : > { %v16383_v24 = vsel %vm3604_vm12, %v5545_v16, %v18850_v57  ;;  %v10834_v57 = vld [vmem:[%s18670_s4 + $0xa40] sm:$0xff] }
 0xcf5   : > { %v16388_v41 = vsel %vm3603_vm13, %v5540_v21, %v18852_v37  ;;  %v18864_v21 = vld [vmem:[#allocation34_spill] sm:$0xff] }
 0xcf6   : > { %v13065_v47 = vpack.c.bf16 %v16383_v24, %v16388_v41 }
 0xcf8   : > { %13066 = vmatpush1.bf16.msra.mxu1 %v13065_v47 }
 0xcf9   : > { %v12236_v8 = vpop.f32.mrb[234].mxu0  ;;  %13067 = vmatprep.subr.bf16.mxu1 %v18828_v22 }
 0xcfa   : > { %v5555_v52 = vadd.f32 %v12236_v8, %v16316_v28  ;;  %v5549_v35 = vpop.f32.mrb[235].mxu0  ;;  %v18866_v8 = vld [vmem:[#allocation10_spill] sm:$0xff] }
 0xcfb   : > { %v5550_v58 = vadd.f32 %v16316_v28, %v5549_v35 }
 0xcfc   : > { %v16398_v6 = vsel %vm18794_vm14, %v5555_v52, %v18854_v40  ;;  %vm18860_vm14 = vcmp.eq.s32.totalorder %v18859_v27, 1  ;;  %v18867_v52 = vld [vmem:[#allocation35_spill] sm:$0xff] }
 0xcfd   : > { %v16403_v55 = vsel %vm3605_vm15, %v5550_v58, %v18856_v17 }
 0xcfe   : > { %v13068_v14 = vpack.c.bf16 %v16398_v6, %v16403_v55 }
 0xd00   : > { %13069 = vmatpush1.bf16.msra.mxu1 %v13068_v14 }
 0xd01   : > { %v12239_v51 = vpop.f32.mrb[236].mxu0  ;;  %13070 = vmatprep.subr.bf16.mxu1 %v18828_v22 }
 0xd02   : > { %v5565_v20 = vadd.f32 %v12239_v51, %v16316_v28  ;;  %v5559_v45 = vpop.f32.mrb[237].mxu0 }
 0xd03   : > { %v5560_v23 = vadd.f32 %v16316_v28, %v5559_v45 }
 0xd04   : > { %v16413_v62 = vsel %vm18860_vm14, %v5565_v20, %v18858_v3  ;;  %vm18865_vm14 = vcmp.eq.s32.totalorder %v18864_v21, 1 }
 0xd05   : > { %v16418_v38 = vsel %vm18795_vm2, %v5560_v23, %v18861_v26  ;;  %vm18868_vm2 = vcmp.eq.s32.totalorder %v18867_v52, 1  ;;  %v18869_v23 = vld [vmem:[#allocation11_spill] sm:$0xff] }
 0xd06   : > { %v13071_v60 = vpack.c.bf16 %v16413_v62, %v16418_v38 }
 0xd08   : > { %13072 = vmatpush1.bf16.msra.mxu1 %v13071_v60  ;;  %v18870_v60 = vld [vmem:[#allocation36_spill] sm:$0xff] }
 0xd09   : > { %v12242_v63 = vpop.f32.mrb[238].mxu0  ;;  %13073 = vmatprep.subr.bf16.mxu1 %v18828_v22 }
 0xd0a   : > { %v5575_v61 = vadd.f32 %v12242_v63, %v16316_v28  ;;  %v5569_v36 = vpop.f32.mrb[239].mxu0 }
 0xd0b   : > { %v5570_v16 = vadd.f32 %v16316_v28, %v5569_v36  ;;  %v18873_v36 = vld [vmem:[#allocation37_spill] sm:$0xff] }
 0xd0c   : > { %v16428_v47 = vsel %vm18865_vm14, %v5575_v61, %v18863_v33  ;;  %vm18871_vm14 = vcmp.eq.s32.totalorder %v18870_v60, 1  ;;  %v18872_v61 = vld [vmem:[#allocation12_spill] sm:$0xff]  ;;  %v18875_v60 = vld [vmem:[#allocation13_spill] sm:$0xff] }
 0xd0d   : > { %v16433_v35 = vsel %vm18868_vm2, %v5570_v16, %v18866_v8  ;;  %vm18874_vm2 = vcmp.eq.s32.totalorder %v18873_v36, 1  ;;  %v18878_v36 = vld [vmem:[#allocation14_spill] sm:$0xff] }
 0xd0e   : > { %v13074_v58 = vpack.c.bf16 %v16428_v47, %v16433_v35 }
 0xd10   : > { %13075 = vmatpush1.bf16.msra.mxu1 %v13074_v58 }
 0xd11   : > { %v12245_v14 = vpop.f32.mrb[240].mxu0  ;;  %13076 = vmatprep.subr.bf16.mxu1 %v18828_v22 }
 0xd12   : > { %v5585_v51 = vadd.f32 %v12245_v14, %v16316_v28  ;;  %v5579_v20 = vpop.f32.mrb[241].mxu0 }
 0xd13   : > { %v5580_v45 = vadd.f32 %v16316_v28, %v5579_v20 }
 0xd14   : > { %v16443_v63 = vsel %vm18871_vm14, %v5585_v51, %v18869_v23  ;;  %v18876_v51 = vld [vmem:[#allocation38_spill] sm:$0xff] }
 0xd15   : > { %v16448_v16 = vsel %vm18874_vm2, %v5580_v45, %v18872_v61  ;;  %vm18877_vm14 = vcmp.eq.s32.totalorder %v18876_v51, 1  ;;  %v18879_v45 = vld [vmem:[#allocation39_spill] sm:$0xff] }
 0xd16   : > { %v13077_v58 = vpack.c.bf16 %v16443_v63, %v16448_v16  ;;  %vm18880_vm2 = vcmp.eq.s32.totalorder %v18879_v45, 1  ;;  %v18881_v51 = vld [vmem:[#allocation15_spill] sm:$0xff]  ;;  %v18884_v45 = vld [vmem:[#allocation16_spill] sm:$0xff] }
 0xd18   : > { %13078 = vmatpush1.bf16.msra.mxu1 %v13077_v58 }
 0xd19   : > { %v12248_v52 = vpop.f32.mrb[242].mxu0  ;;  %13079 = vmatprep.subr.bf16.mxu1 %v18828_v22 }
 0xd1a   : > { %v5595_v14 = vadd.f32 %v12248_v52, %v16316_v28  ;;  %v5589_v20 = vpop.f32.mrb[243].mxu0 }
 0xd1b   : > { %v5590_v8 = vadd.f32 %v16316_v28, %v5589_v20 }
 0xd1c   : > { %v16458_v23 = vsel %vm18877_vm14, %v5595_v14, %v18875_v60  ;;  %v18882_v14 = vld [vmem:[#allocation40_spill] sm:$0xff] }
 0xd1d   : > { %v16463_v61 = vsel %vm18880_vm2, %v5590_v8, %v18878_v36  ;;  %vm18883_vm14 = vcmp.eq.s32.totalorder %v18882_v14, 1  ;;  %v18885_v8 = vld [vmem:[#allocation41_spill] sm:$0xff] }
 0xd1e   : > { %v13080_v58 = vpack.c.bf16 %v16458_v23, %v16463_v61  ;;  %vm18886_vm2 = vcmp.eq.s32.totalorder %v18885_v8, 1  ;;  %v18887_v14 = vld [vmem:[#allocation17_spill] sm:$0xff]  ;;  %v18890_v8 = vld [vmem:[#allocation18_spill] sm:$0xff] }
 0xd20   : > { %13081 = vmatpush1.bf16.msra.mxu1 %v13080_v58 }
 0xd21   : > { %v12251_v21 = vpop.f32.mrb[244].mxu0  ;;  %13082 = vmatprep.subr.bf16.mxu1 %v18828_v22 }
 0xd22   : > { %v5605_v52 = vadd.f32 %v12251_v21, %v16316_v28  ;;  %v5599_v20 = vpop.f32.mrb[245].mxu0 }
 0xd23   : > { %v5600_v33 = vadd.f32 %v16316_v28, %v5599_v20 }
 0xd24   : > { %v16473_v60 = vsel %vm18883_vm14, %v5605_v52, %v18881_v51  ;;  %v18888_v52 = vld [vmem:[#allocation42_spill] sm:$0xff] }
 0xd25   : > { %v16478_v36 = vsel %vm18886_vm2, %v5600_v33, %v18884_v45  ;;  %vm18889_vm14 = vcmp.eq.s32.totalorder %v18888_v52, 1  ;;  %v18891_v33 = vld [vmem:[#allocation43_spill] sm:$0xff] }
 0xd26   : > { %v13083_v58 = vpack.c.bf16 %v16473_v60, %v16478_v36  ;;  %vm18892_vm2 = vcmp.eq.s32.totalorder %v18891_v33, 1  ;;  %v18893_v52 = vld [vmem:[#allocation19_spill] sm:$0xff]  ;;  %v18896_v33 = vld [vmem:[#allocation20_spill] sm:$0xff] }
 0xd28   : > { %13084 = vmatpush1.bf16.msra.mxu1 %v13083_v58 }
 0xd29   : > { %v12254_v32 = vpop.f32.mrb[246].mxu0  ;;  %13085 = vmatprep.subr.bf16.mxu1 %v18828_v22 }
 0xd2a   : > { %v5615_v21 = vadd.f32 %v12254_v32, %v16316_v28  ;;  %v5609_v20 = vpop.f32.mrb[247].mxu0 }
 0xd2b   : > { %v5610_v26 = vadd.f32 %v16316_v28, %v5609_v20 }
 0xd2c   : > { %v16488_v51 = vsel %vm18889_vm14, %v5615_v21, %v18887_v14  ;;  %v18894_v21 = vld [vmem:[#allocation44_spill] sm:$0xff] }
 0xd2d   : > { %v16493_v45 = vsel %vm18892_vm2, %v5610_v26, %v18890_v8  ;;  %vm18895_vm14 = vcmp.eq.s32.totalorder %v18894_v21, 1  ;;  %v18897_v26 = vld [vmem:[#allocation45_spill] sm:$0xff] }
 0xd2e   : > { %v13086_v58 = vpack.c.bf16 %v16488_v51, %v16493_v45  ;;  %vm18898_vm2 = vcmp.eq.s32.totalorder %v18897_v26, 1  ;;  %v18899_v21 = vld [vmem:[#allocation21_spill] sm:$0xff]  ;;  %v18902_v26 = vld [vmem:[#allocation22_spill] sm:$0xff] }
 0xd30   : > { %13087 = vmatpush1.bf16.msra.mxu1 %v13086_v58 }
 0xd31   : > { %v12257_v27 = vpop.f32.mrb[248].mxu0  ;;  %13088 = vmatprep.subr.bf16.mxu1 %v18828_v22 }
 0xd32   : > { %v5625_v32 = vadd.f32 %v12257_v27, %v16316_v28  ;;  %v5619_v20 = vpop.f32.mrb[249].mxu0 }
 0xd33   : > { %v5620_v3 = vadd.f32 %v16316_v28, %v5619_v20 }
 0xd34   : > { %v16503_v14 = vsel %vm18895_vm14, %v5625_v32, %v18893_v52  ;;  %v18900_v32 = vld [vmem:[#allocation46_spill] sm:$0xff] }
 0xd35   : > { %v16508_v8 = vsel %vm18898_vm2, %v5620_v3, %v18896_v33  ;;  %vm18901_vm14 = vcmp.eq.s32.totalorder %v18900_v32, 1  ;;  %v18903_v3 = vld [vmem:[#allocation47_spill] sm:$0xff] }
 0xd36   : > { %v13089_v58 = vpack.c.bf16 %v16503_v14, %v16508_v8  ;;  %vm18904_vm2 = vcmp.eq.s32.totalorder %v18903_v3, 1  ;;  %v18905_v32 = vld [vmem:[#allocation23_spill] sm:$0xff]  ;;  %v18908_v3 = vld [vmem:[#allocation24_spill] sm:$0xff] }
 0xd38   : > { %13090 = vmatpush1.bf16.msra.mxu1 %v13089_v58 }
 0xd39   : > { %v12260_v54 = vpop.f32.mrb[250].mxu0  ;;  %13091 = vmatprep.subr.bf16.mxu1 %v18828_v22 }
 0xd3a   : > { %v5635_v27 = vadd.f32 %v12260_v54, %v16316_v28  ;;  %v5629_v20 = vpop.f32.mrb[251].mxu0 }
 0xd3b   : > { %v5630_v17 = vadd.f32 %v16316_v28, %v5629_v20 }
 0xd3c   : > { %v16518_v52 = vsel %vm18901_vm14, %v5635_v27, %v18899_v21  ;;  %v18906_v27 = vld [vmem:[#allocation48_spill] sm:$0xff] }
 0xd3d   : > { %v16523_v33 = vsel %vm18904_vm2, %v5630_v17, %v18902_v26  ;;  %vm18907_vm14 = vcmp.eq.s32.totalorder %v18906_v27, 1  ;;  %v18909_v17 = vld [vmem:[#allocation49_spill] sm:$0xff] }
 0xd3e   : > { %v13092_v58 = vpack.c.bf16 %v16518_v52, %v16523_v33  ;;  %vm18910_vm2 = vcmp.eq.s32.totalorder %v18909_v17, 1  ;;  %v18911_v27 = vld [vmem:[#allocation25_spill] sm:$0xff]  ;;  %v18913_v17 = vld [vmem:[#allocation26_spill] sm:$0xff] }
 0xd40   : > { %13093 = vmatpush1.bf16.msra.mxu1 %v13092_v58 }
 0xd41   : > { %v12263_v50 = vpop.f32.mrb[252].mxu0  ;;  %13094 = vmatprep.subr.bf16.mxu1 %v18828_v22 }
 0xd42   : > { %v5645_v54 = vadd.f32 %v12263_v50, %v16316_v28  ;;  %v5639_v20 = vpop.f32.mrb[253].mxu0 }
 0xd43   : > { %v5640_v40 = vadd.f32 %v16316_v28, %v5639_v20 }
 0xd44   : > { %v16533_v21 = vsel %vm18907_vm14, %v5645_v54, %v18905_v32 }
 0xd45   : > { %v16538_v26 = vsel %vm18910_vm2, %v5640_v40, %v18908_v3  ;;  %v10831_v40 = vld [vmem:[%s18670_s4 + $0xa28] sm:$0xff] }
 0xd46   : > { %v13095_v58 = vpack.c.bf16 %v16533_v21, %v16538_v26 }
 0xd48   : > { %13096 = vmatpush1.bf16.msra.mxu1 %v13095_v58 }
 0xd49   : > { %v12266_v25 = vpop.f32.mrb[254].mxu0  ;;  %13097 = vmatprep.subr.bf16.mxu1 %v18828_v22 }
 0xd4a   : > { %v5655_v50 = vadd.f32 %v12266_v25, %v16316_v28  ;;  %v5649_v20 = vpop.f32.mrb[255].mxu0  ;;  %v10827_v25 = vld [vmem:[%s18670_s4 + $0xa08] sm:$0xff] }
 0xd4b   : > { %v5650_v37 = vadd.f32 %v16316_v28, %v5649_v20  ;;  %v10829_v28 = vld [vmem:[%s18670_s4 + $0xa18] sm:$0xff] }
 0xd4c   : > { %v16548_v32 = vsel %vm3626_vm3, %v5655_v50, %v18911_v27  ;;  %v10826_v50 = vld [vmem:[%s18670_s4 + $0xa00] sm:$0xff]  ;;  %v13100_v20 = vpack.c.bf16 %v10829_v28, %v10827_v25  ;;  %v10832_v25 = vld [vmem:[%s18670_s4 + $0xa30] sm:$0xff]  ;;  %v10835_v28 = vld [vmem:[%s18670_s4 + $0xa48] sm:$0xff] }
 0xd4d   : > { %v16553_v3 = vsel %vm3625_vm0, %v5650_v37, %v18913_v17  ;;  %v10828_v37 = vld [vmem:[%s18670_s4 + $0xa10] sm:$0xff]  ;;  %v10833_v17 = vld [vmem:[%s18670_s4 + $0xa38] sm:$0xff] }
 0xd4e   : > { %v13098_v58 = vpack.c.bf16 %v16548_v32, %v16553_v3  ;;  %v13102_v54 = vpack.c.bf16 %v10828_v37, %v10826_v50  ;;  %v13104_v27 = vpack.c.bf16 %v10833_v17, %v10831_v40  ;;  %13101 = vmatprep.subr.bf16.mxu0 %v13100_v20  ;;  %v10837_v17 = vld [vmem:[%s18670_s4 + $0xa58] sm:$0xff]  ;;  %v13943_v40 = vld [vmem:[%s14393_s28] sm:$0xff]  ;;  %v10836_v20 = vld [vmem:[%s18670_s4 + $0xa50] sm:$0xff] }
 0xd4f   : > { %v13944_v37 = vld [vmem:[%s14393_s28 + $0x18] sm:$0xff]  ;;  %v13108_v19 = vpack.c.bf16 %v10837_v17, %v10835_v28  ;;  %v10838_v17 = vld [vmem:[%s18670_s4 + $0xa60] sm:$0xff] }
 0xd50   : > { %13099 = vmatpush1.bf16.msra.mxu1 %v13098_v58  ;;  %v10830_v58 = vld [vmem:[%s18670_s4 + $0xa20] sm:$0xff]  ;;  %13103 = vmatpush1.bf16.msra.mxu0 %v13102_v54  ;;  %v10841_v54 = vld [vmem:[%s18670_s4 + $0xa78] sm:$0xff] }
 0xd51   : > { %13132 = vmatprep.subr.bf16.mxu1 %v18828_v22  ;;  %v13106_v50 = vpack.c.bf16 %v10832_v25, %v10830_v58  ;;  %13105 = vmatprep.subr.bf16.mxu0 %v13104_v27  ;;  %v13945_v27 = vld [vmem:[%s14393_s28 + $0x10] sm:$0xff]  ;;  %v13110_v58 = vpack.c.bf16 %v10836_v20, %v10834_v57  ;;  %v13946_v25 = vld [vmem:[%s14393_s28 + $0x28] sm:$0xff]  ;;  %v13112_v28 = vpack.c.bf16 %v10841_v54, %v10839_v49  ;;  %v13951_v20 = vld [vmem:[%s14393_s28 + $0x40] sm:$0xff] }
 0xd52   : > { %v13949_v49 = vld [vmem:[%s14393_s28 + $0x30] sm:$0xff]  ;;  %v13952_v54 = vld [vmem:[%s14393_s28 + $0x58] sm:$0xff] }
 0xd53   : > { %5755 = vmatmul.mubr.f32.vlgmr.msra.gmra.mrb[96].mxu1 %v13943_v40  ;;  %v10840_v40 = vld [vmem:[%s18670_s4 + $0xa70] sm:$0xff] }
 0xd54   : > { %5759 = vmatprep.mubr.f32.mxu1 %v13944_v37  ;;  %13107 = vmatpush1.bf16.msra.mxu0 %v13106_v50  ;;  %v13947_v37 = vld [vmem:[%s14393_s28 + $0x20] sm:$0xff]  ;;  %v13114_v57 = vpack.c.bf16 %v10840_v40, %v10838_v17  ;;  %v13948_v50 = vld [vmem:[%s14393_s28 + $0x38] sm:$0xff]  ;;  %v13957_v17 = vld [vmem:[%s14393_s28 + $0x70] sm:$0xff] }
 0xd55   : > { %13109 = vmatprep.subr.bf16.mxu0 %v13108_v19  ;;  %v13950_v19 = vld [vmem:[%s14393_s28 + $0x48] sm:$0xff] }
 0xd56   : > { %v13958_v40 = vld [vmem:[%s14393_s28 + $0x88] sm:$0xff] }
 0xd57   : > { %5760 = vmatmul.mubr.f32.gmra.mrb[98].mxu1 %v13945_v27  ;;  %v13953_v27 = vld [vmem:[%s14393_s28 + $0x50] sm:$0xff] }
 0xd58   : > { %5764 = vmatprep.mubr.f32.mxu1 %v13946_v25  ;;  %13111 = vmatpush1.bf16.msra.mxu0 %v13110_v58  ;;  %v13954_v58 = vld [vmem:[%s14393_s28 + $0x68] sm:$0xff]  ;;  %v13955_v25 = vld [vmem:[%s14393_s28 + $0x60] sm:$0xff] }
 0xd59   : > { %13113 = vmatprep.subr.bf16.mxu0 %v13112_v28  ;;  %v13956_v28 = vld [vmem:[%s14393_s28 + $0x78] sm:$0xff] }
 0xd5b   : > { %5765 = vmatmul.mubr.f32.gmra.mrb[100].mxu1 %v13947_v37  ;;  %v13959_v37 = vld [vmem:[%s14393_s28 + $0x80] sm:$0xff] }
 0xd5c   : > { %5769 = vmatprep.mubr.f32.mxu1 %v13948_v50  ;;  %13115 = vmatpush1.bf16.msra.mxu0 %v13114_v57  ;;  %v13960_v57 = vld [vmem:[%s14393_s28 + $0x98] sm:$0xff]  ;;  %v13961_v50 = vld [vmem:[%s14393_s28 + $0x90] sm:$0xff] }
 0xd5f   : > { %5770 = vmatmul.mubr.f32.gmra.mrb[102].mxu1 %v13949_v49  ;;  %v13962_v49 = vld [vmem:[%s14393_s28 + $0xa8] sm:$0xff] }
 0xd60   : > { %5774 = vmatprep.mubr.f32.mxu1 %v13950_v19  ;;  %v13963_v19 = vld [vmem:[%s14393_s28 + $0xa0] sm:$0xff] }
 0xd63   : > { %5775 = vmatmul.mubr.f32.gmra.mrb[104].mxu1 %v13951_v20  ;;  %v13964_v20 = vld [vmem:[%s14393_s28 + $0xb8] sm:$0xff] }
 0xd64   : > { %5779 = vmatprep.mubr.f32.mxu1 %v13952_v54  ;;  %v13965_v54 = vld [vmem:[%s14393_s28 + $0xb0] sm:$0xff] }
 0xd67   : > { %5780 = vmatmul.mubr.f32.gmra.mrb[106].mxu1 %v13953_v27  ;;  %v13966_v27 = vld [vmem:[%s14393_s28 + $0xc8] sm:$0xff] }
 0xd68   : > { %5784 = vmatprep.mubr.f32.mxu1 %v13954_v58  ;;  %v13967_v58 = vld [vmem:[%s14393_s28 + $0xc0] sm:$0xff] }
 0xd6b   : > { %5785 = vmatmul.mubr.f32.gmra.mrb[108].mxu1 %v13955_v25  ;;  %v13968_v25 = vld [vmem:[%s14393_s28 + $0xd8] sm:$0xff] }
 0xd6c   : > { %5789 = vmatprep.mubr.f32.mxu1 %v13956_v28  ;;  %v13969_v28 = vld [vmem:[%s14393_s28 + $0xd0] sm:$0xff] }
 0xd6f   : > { %5790 = vmatmul.mubr.f32.gmra.mrb[110].mxu1 %v13957_v17  ;;  %v13970_v17 = vld [vmem:[%s14393_s28 + $0xe8] sm:$0xff] }
 0xd70   : > { %5794 = vmatprep.mubr.f32.mxu1 %v13958_v40  ;;  %v13971_v40 = vld [vmem:[%s14393_s28 + $0xe0] sm:$0xff] }
 0xd73   : > { %5795 = vmatmul.mubr.f32.gmra.mrb[112].mxu1 %v13959_v37  ;;  %v13972_v37 = vld [vmem:[%s14393_s28 + $0xf8] sm:$0xff] }
 0xd74   : > { %5799 = vmatprep.mubr.f32.mxu1 %v13960_v57  ;;  %v13973_v57 = vld [vmem:[%s14393_s28 + $0xf0] sm:$0xff] }
 0xd77   : > { %5800 = vmatmul.mubr.f32.gmra.mrb[114].mxu1 %v13961_v50  ;;  %v13974_v50 = vld [vmem:[%s14393_s28 + $0x108] sm:$0xff] }
 0xd78   : > { %5804 = vmatprep.mubr.f32.mxu1 %v13962_v49  ;;  %v13975_v49 = vld [vmem:[%s14393_s28 + $0x100] sm:$0xff] }
 0xd7b   : > { %5805 = vmatmul.mubr.f32.gmra.mrb[116].mxu1 %v13963_v19  ;;  %v13976_v19 = vld [vmem:[%s14393_s28 + $0x118] sm:$0xff] }
 0xd7c   : > { %5809 = vmatprep.mubr.f32.mxu1 %v13964_v20  ;;  %v13977_v20 = vld [vmem:[%s14393_s28 + $0x110] sm:$0xff] }
 0xd7f   : > { %5810 = vmatmul.mubr.f32.gmra.mrb[118].mxu1 %v13965_v54  ;;  %v13978_v54 = vld [vmem:[%s14393_s28 + $0x128] sm:$0xff] }
 0xd80   : > { %5814 = vmatprep.mubr.f32.mxu1 %v13966_v27  ;;  %v13979_v27 = vld [vmem:[%s14393_s28 + $0x120] sm:$0xff] }
 0xd83   : > { %5815 = vmatmul.mubr.f32.gmra.mrb[120].mxu1 %v13967_v58  ;;  %v13980_v58 = vld [vmem:[%s14393_s28 + $0x138] sm:$0xff] }
 0xd84   : > { %5819 = vmatprep.mubr.f32.mxu1 %v13968_v25  ;;  %v13981_v25 = vld [vmem:[%s14393_s28 + $0x130] sm:$0xff] }
 0xd87   : > { %5820 = vmatmul.mubr.f32.gmra.mrb[122].mxu1 %v13969_v28  ;;  %v13982_v28 = vld [vmem:[%s14393_s28 + $0x148] sm:$0xff] }
 0xd88   : > { %5824 = vmatprep.mubr.f32.mxu1 %v13970_v17  ;;  %v13983_v17 = vld [vmem:[%s14393_s28 + $0x140] sm:$0xff] }
 0xd8b   : > { %5825 = vmatmul.mubr.f32.gmra.mrb[124].mxu1 %v13971_v40  ;;  %v13984_v40 = vld [vmem:[%s14393_s28 + $0x158] sm:$0xff] }
 0xd8c   : > { %5829 = vmatprep.mubr.f32.mxu1 %v13972_v37  ;;  %v13985_v37 = vld [vmem:[%s14393_s28 + $0x150] sm:$0xff] }
 0xd8f   : > { %5830 = vmatmul.mubr.f32.gmra.mrb[126].mxu1 %v13973_v57  ;;  %v13986_v57 = vld [vmem:[%s14393_s28 + $0x168] sm:$0xff] }
 0xd90   : > { %5834 = vmatprep.mubr.f32.mxu1 %v13974_v50  ;;  %v13987_v50 = vld [vmem:[%s14393_s28 + $0x160] sm:$0xff] }
 0xd93   : > { %5835 = vmatmul.mubr.f32.gmra.mrb[128].mxu1 %v13975_v49  ;;  %v10811_v49 = vld [vmem:[%s18670_s4 + $0x988] sm:$0xff] }
 0xd94   : > { %5839 = vmatprep.mubr.f32.mxu1 %v13976_v19  ;;  %v10813_v19 = vld [vmem:[%s18670_s4 + $0x998] sm:$0xff] }
 0xd97   : > { %5840 = vmatmul.mubr.f32.gmra.mrb[130].mxu1 %v13977_v20  ;;  %v13988_v20 = vld [vmem:[%s14393_s28 + $0x178] sm:$0xff] }
 0xd98   : > { %5844 = vmatprep.mubr.f32.mxu1 %v13978_v54  ;;  %v13116_v54 = vpack.c.bf16 %v10813_v19, %v10811_v49  ;;  %v13998_v49 = vld [vmem:[%s14393_s28 + $0x1c8] sm:$0xff]  ;;  %v13999_v19 = vld [vmem:[%s14393_s28 + $0x1c0] sm:$0xff] }
 0xd9a   : > { %13117 = vmatprep.subr.bf16.mxu0 %v13116_v54  ;;  %v14001_v54 = vld [vmem:[%s14393_s28 + $0x1d0] sm:$0xff] }
 0xd9b   : > { %5845 = vmatmul.mubr.f32.gmra.mrb[132].mxu1 %v13979_v27  ;;  %v13989_v27 = vld [vmem:[%s14393_s28 + $0x170] sm:$0xff] }
 0xd9c   : > { %5849 = vmatprep.mubr.f32.mxu1 %v13980_v58  ;;  %v13990_v58 = vld [vmem:[%s14393_s28 + $0x188] sm:$0xff] }
 0xd9f   : > { %5850 = vmatmul.mubr.f32.gmra.mrb[134].mxu1 %v13981_v25  ;;  %v13991_v25 = vld [vmem:[%s14393_s28 + $0x180] sm:$0xff] }
 0xda0   : > { %5854 = vmatprep.mubr.f32.mxu1 %v13982_v28  ;;  %v13992_v28 = vld [vmem:[%s14393_s28 + $0x198] sm:$0xff] }
 0xda3   : > { %5855 = vmatmul.mubr.f32.gmra.mrb[136].mxu1 %v13983_v17  ;;  %v13993_v17 = vld [vmem:[%s14393_s28 + $0x190] sm:$0xff] }
 0xda4   : > { %5859 = vmatprep.mubr.f32.mxu1 %v13984_v40  ;;  %v13994_v40 = vld [vmem:[%s14393_s28 + $0x1a8] sm:$0xff] }
 0xda7   : > { %5860 = vmatmul.mubr.f32.gmra.mrb[138].mxu1 %v13985_v37  ;;  %v13995_v37 = vld [vmem:[%s14393_s28 + $0x1a0] sm:$0xff] }
 0xda8   : > { %5864 = vmatprep.mubr.f32.mxu1 %v13986_v57  ;;  %v13996_v57 = vld [vmem:[%s14393_s28 + $0x1b8] sm:$0xff] }
 0xdab   : > { %5865 = vmatmul.mubr.f32.gmra.mrb[140].mxu1 %v13987_v50  ;;  %v13997_v50 = vld [vmem:[%s14393_s28 + $0x1b0] sm:$0xff] }
 0xdac   : > { %5869 = vmatprep.mubr.f32.mxu1 %v13988_v20  ;;  %v14000_v20 = vld [vmem:[%s14393_s28 + $0x1d8] sm:$0xff] }
 0xdaf   : > { %5870 = vmatmul.mubr.f32.gmra.mrb[142].mxu1 %v13989_v27  ;;  %v14002_v27 = vld [vmem:[%s14393_s28 + $0x1e8] sm:$0xff] }
 0xdb0   : > { %5874 = vmatprep.mubr.f32.mxu1 %v13990_v58  ;;  %v14003_v58 = vld [vmem:[%s14393_s28 + $0x1e0] sm:$0xff] }
 0xdb3   : > { %5875 = vmatmul.mubr.f32.gmra.mrb[144].mxu1 %v13991_v25  ;;  %v14004_v25 = vld [vmem:[%s14393_s28 + $0x1f8] sm:$0xff] }
 0xdb4   : > { %5879 = vmatprep.mubr.f32.mxu1 %v13992_v28  ;;  %v14005_v28 = vld [vmem:[%s14393_s28 + $0x1f0] sm:$0xff] }
 0xdb7   : > { %5880 = vmatmul.mubr.f32.gmra.mrb[146].mxu1 %v13993_v17  ;;  %v10810_v17 = vld [vmem:[%s18670_s4 + $0x980] sm:$0xff] }
 0xdb8   : > { %5884 = vmatprep.mubr.f32.mxu1 %v13994_v40  ;;  %v10812_v40 = vld [vmem:[%s18670_s4 + $0x990] sm:$0xff] }
 0xdbb   : > { %5885 = vmatmul.mubr.f32.gmra.mrb[148].mxu1 %v13995_v37  ;;  %v10815_v37 = vld [vmem:[%s18670_s4 + $0x9a8] sm:$0xff] }
 0xdbc   : > { %5889 = vmatprep.mubr.f32.mxu1 %v13996_v57  ;;  %v10817_v57 = vld [vmem:[%s18670_s4 + $0x9b8] sm:$0xff] }
 0xdbf   : > { %5890 = vmatmul.mubr.f32.gmra.mrb[150].mxu1 %v13997_v50  ;;  %v13118_v50 = vpack.c.bf16 %v10812_v40, %v10810_v17  ;;  %v10818_v40 = vld [vmem:[%s18670_s4 + $0x9c0] sm:$0xff] }
 0xdc0   : > { %5894 = vmatprep.mubr.f32.mxu1 %v13998_v49  ;;  %v13120_v49 = vpack.c.bf16 %v10817_v57, %v10815_v37  ;;  %v10820_v37 = vld [vmem:[%s18670_s4 + $0x9d0] sm:$0xff] }
 0xdc3   : > { %5895 = vmatmul.mubr.f32.gmra.mrb[152].mxu1 %v13999_v19  ;;  %v10814_v19 = vld [vmem:[%s18670_s4 + $0x9a0] sm:$0xff] }
 0xdc4   : > { %5899 = vmatprep.mubr.f32.mxu1 %v14000_v20  ;;  %v10816_v20 = vld [vmem:[%s18670_s4 + $0x9b0] sm:$0xff] }
 0xdc7   : > { %5900 = vmatmul.mubr.f32.gmra.mrb[154].mxu1 %v14001_v54 }
 0xdc8   : > { %5904 = vmatprep.mubr.f32.mxu1 %v14002_v27  ;;  %v10819_v27 = vld [vmem:[%s18670_s4 + $0x9c8] sm:$0xff] }
 0xdcb   : > { %5905 = vmatmul.mubr.f32.gmra.mrb[156].mxu1 %v14003_v58  ;;  %v10821_v58 = vld [vmem:[%s18670_s4 + $0x9d8] sm:$0xff] }
 0xdcc   : > { %5909 = vmatprep.mubr.f32.mxu1 %v14004_v25  ;;  %v13124_v17 = vpack.c.bf16 %v10821_v58, %v10819_v27  ;;  %v10824_v27 = vld [vmem:[%s18670_s4 + $0x9f0] sm:$0xff] }
 0xdcf   : > { %5910 = vmatmul.mubr.f32.gmra.mrb[158].mxu1 %v14005_v28  ;;  %v13122_v28 = vpack.c.bf16 %v10816_v20, %v10814_v19 }
 0xe26   : > { %v5756_v54 = vpop.f32.mrb[96].mxu1 }
 0xe27   : > { %v5758_v25 = vpop.f32.mrb[97].mxu1  ;;  %10842 = vmatmul.mubr.msk.f32.vlgmr.msra.gmra.mrb[0].mxu0 %vm781_vm1, %v5756_v54  ;;  %v10822_v54 = vld [vmem:[%s18670_s4 + $0x9e0] sm:$0xff] }
 0xe28   : > { %6114 = vmatprep.mubr.f32.mxu0 %v18847_v44  ;;  %13119 = vmatpush1.bf16.msra.mxu0 %v13118_v50  ;;  %v10823_v25 = vld [vmem:[%s18670_s4 + $0x9e8] sm:$0xff]  ;;  %v10825_v50 = vld [vmem:[%s18670_s4 + $0x9f8] sm:$0xff] }
 0xe29   : > { %13121 = vmatprep.subr.bf16.mxu0 %v13120_v49  ;;  %v13126_v49 = vpack.c.bf16 %v10820_v37, %v10818_v40  ;;  %v13128_v20 = vpack.c.bf16 %v10825_v50, %v10823_v25 }
 0xe2a   : > { %v5761_v57 = vpop.f32.mrb[98].mxu1 }
 0xe2b   : > { %v5763_v19 = vpop.f32.mrb[99].mxu1  ;;  %10843 = vmatmul.mubr.msk.f32.gmra.mrb[2].mxu0 %vm781_vm1, %v5761_v57  ;;  %v13130_v57 = vpack.c.bf16 %v10824_v27, %v10822_v54 }
 0xe2c   : > { %6120 = vmatprep.mubr.f32.mxu0 %v18847_v44  ;;  %13123 = vmatpush1.bf16.msra.mxu0 %v13122_v28 }
 0xe2d   : > { %13125 = vmatprep.subr.bf16.mxu0 %v13124_v17 }
 0xe2e   : > { %v5766_v58 = vpop.f32.mrb[100].mxu1 }
 0xe2f   : > { %v5768_v46 = vpop.f32.mrb[101].mxu1  ;;  %10844 = vmatmul.mubr.msk.f32.gmra.mrb[4].mxu0 %vm781_vm1, %v5766_v58 }
 0xe30   : > { %6126 = vmatprep.mubr.f32.mxu0 %v18847_v44  ;;  %13127 = vmatpush1.bf16.msra.mxu0 %v13126_v49 }
 0xe31   : > { %13129 = vmatprep.subr.bf16.mxu0 %v13128_v20 }
 0xe32   : > { %v5771_v28 = vpop.f32.mrb[102].mxu1 }
 0xe33   : > { %v5773_v17 = vpop.f32.mrb[103].mxu1  ;;  %10845 = vmatmul.mubr.msk.f32.gmra.mrb[6].mxu0 %vm781_vm1, %v5771_v28 }
 0xe34   : > { %6132 = vmatprep.mubr.f32.mxu0 %v18847_v44  ;;  %13131 = vmatpush1.bf16.msra.mxu0 %v13130_v57 }
 0xe36   : > { %v5776_v40 = vpop.f32.mrb[104].mxu1 }
 0xe37   : > { %v5778_v37 = vpop.f32.mrb[105].mxu1  ;;  %10846 = vmatmul.mubr.msk.f32.gmra.mrb[8].mxu0 %vm781_vm1, %v5776_v40 }
 0xe38   : > { %6138 = vmatprep.mubr.f32.mxu0 %v18847_v44 }
 0xe3a   : > { %v5781_v46 = vpop.f32.mrb[106].mxu1 }
 0xe3b   : > { %v5783_v25 = vpop.f32.mrb[107].mxu1  ;;  %10847 = vmatmul.mubr.msk.f32.gmra.mrb[10].mxu0 %vm781_vm1, %v5781_v46 }
 0xe3c   : > { %6144 = vmatprep.mubr.f32.mxu0 %v18847_v44 }
 0xe3e   : > { %v5786_v50 = vpop.f32.mrb[108].mxu1 }
 0xe3f   : > { %v5788_v19 = vpop.f32.mrb[109].mxu1  ;;  %10848 = vmatmul.mubr.msk.f32.gmra.mrb[12].mxu0 %vm781_vm1, %v5786_v50 }
 0xe40   : > { %6150 = vmatprep.mubr.f32.mxu0 %v18847_v44 }
 0xe42   : > { %v5791_v49 = vpop.f32.mrb[110].mxu1 }
 0xe43   : > { %v5793_v20 = vpop.f32.mrb[111].mxu1  ;;  %10849 = vmatmul.mubr.msk.f32.gmra.mrb[14].mxu0 %vm781_vm1, %v5791_v49 }
 0xe44   : > { %6156 = vmatprep.mubr.f32.mxu0 %v18847_v44 }
 0xe46   : > { %v5796_v54 = vpop.f32.mrb[112].mxu1 }
 0xe47   : > { %v5798_v27 = vpop.f32.mrb[113].mxu1  ;;  %10850 = vmatmul.mubr.msk.f32.gmra.mrb[16].mxu0 %vm781_vm1, %v5796_v54 }
 0xe48   : > { %6162 = vmatprep.mubr.f32.mxu0 %v18847_v44 }
 0xe4a   : > { %v5801_v58 = vpop.f32.mrb[114].mxu1 }
 0xe4b   : > { %v5803_v57 = vpop.f32.mrb[115].mxu1  ;;  %10851 = vmatmul.mubr.msk.f32.gmra.mrb[18].mxu0 %vm781_vm1, %v5801_v58 }
 0xe4c   : > { %6168 = vmatprep.mubr.f32.mxu0 %v18847_v44 }
 0xe4e   : > { %v5806_v28 = vpop.f32.mrb[116].mxu1 }
 0xe4f   : > { %v5808_v17 = vpop.f32.mrb[117].mxu1  ;;  %10852 = vmatmul.mubr.msk.f32.gmra.mrb[20].mxu0 %vm781_vm1, %v5806_v28 }
 0xe50   : > { %6174 = vmatprep.mubr.f32.mxu0 %v18847_v44 }
 0xe52   : > { %v5811_v40 = vpop.f32.mrb[118].mxu1 }
 0xe53   : > { %v5813_v37 = vpop.f32.mrb[119].mxu1  ;;  %10853 = vmatmul.mubr.msk.f32.gmra.mrb[22].mxu0 %vm781_vm1, %v5811_v40 }
 0xe54   : > { %6180 = vmatprep.mubr.f32.mxu0 %v18847_v44 }
 0xe56   : > { %v5816_v46 = vpop.f32.mrb[120].mxu1 }
 0xe57   : > { %v5818_v25 = vpop.f32.mrb[121].mxu1  ;;  %10854 = vmatmul.mubr.msk.f32.gmra.mrb[24].mxu0 %vm781_vm1, %v5816_v46 }
 0xe58   : > { %6186 = vmatprep.mubr.f32.mxu0 %v18847_v44 }
 0xe5a   : > { %v5821_v50 = vpop.f32.mrb[122].mxu1 }
 0xe5b   : > { %v5823_v19 = vpop.f32.mrb[123].mxu1  ;;  %10855 = vmatmul.mubr.msk.f32.gmra.mrb[26].mxu0 %vm781_vm1, %v5821_v50 }
 0xe5c   : > { %6192 = vmatprep.mubr.f32.mxu0 %v18847_v44 }
 0xe5e   : > { %v5826_v49 = vpop.f32.mrb[124].mxu1 }
 0xe5f   : > { %v5828_v20 = vpop.f32.mrb[125].mxu1  ;;  %10856 = vmatmul.mubr.msk.f32.gmra.mrb[28].mxu0 %vm781_vm1, %v5826_v49 }
 0xe60   : > { %6198 = vmatprep.mubr.f32.mxu0 %v18847_v44 }
 0xe62   : > { %v5831_v54 = vpop.f32.mrb[126].mxu1 }
 0xe63   : > { %v5833_v27 = vpop.f32.mrb[127].mxu1  ;;  %10857 = vmatmul.mubr.msk.f32.gmra.mrb[30].mxu0 %vm781_vm1, %v5831_v54 }
 0xe64   : > { %6204 = vmatprep.mubr.f32.mxu0 %v18847_v44 }
 0xe66   : > { %v5836_v58 = vpop.f32.mrb[128].mxu1 }
 0xe67   : > { %v5838_v57 = vpop.f32.mrb[129].mxu1  ;;  %10858 = vmatmul.mubr.msk.f32.gmra.mrb[32].mxu0 %vm781_vm1, %v5836_v58 }
 0xe68   : > { %6210 = vmatprep.mubr.f32.mxu0 %v18847_v44 }
 0xe6a   : > { %v5841_v28 = vpop.f32.mrb[130].mxu1 }
 0xe6b   : > { %v5843_v17 = vpop.f32.mrb[131].mxu1  ;;  %10859 = vmatmul.mubr.msk.f32.gmra.mrb[34].mxu0 %vm781_vm1, %v5841_v28  ;;  %v10907_v28 = vld [vmem:[%s18670_s4 + $0xa90] sm:$0xff] }
 0xe6c   : > { %6216 = vmatprep.mubr.f32.mxu0 %v18847_v44  ;;  %v10908_v17 = vld [vmem:[%s18670_s4 + $0xaa0] sm:$0xff] }
 0xe6e   : > { %v5846_v40 = vpop.f32.mrb[132].mxu1 }
 0xe6f   : > { %v5848_v37 = vpop.f32.mrb[133].mxu1  ;;  %10860 = vmatmul.mubr.msk.f32.gmra.mrb[36].mxu0 %vm781_vm1, %v5846_v40  ;;  %v13133_v40 = vpack.c.bf16 %v10908_v17, %v10907_v28 }
 0xe70   : > { %6222 = vmatprep.mubr.f32.mxu0 %v18847_v44 }
 0xe71   : > { %13134 = vmatpush1.bf16.msra.mxu1 %v13133_v40 }
 0xe72   : > { %v5851_v46 = vpop.f32.mrb[134].mxu1  ;;  %13135 = vmatprep.subr.bf16.mxu1 %v18828_v22 }
 0xe73   : > { %v5853_v25 = vpop.f32.mrb[135].mxu1  ;;  %10861 = vmatmul.mubr.msk.f32.gmra.mrb[38].mxu0 %vm781_vm1, %v5851_v46 }
 0xe74   : > { %6228 = vmatprep.mubr.f32.mxu0 %v18847_v44 }
 0xe76   : > { %v5856_v50 = vpop.f32.mrb[136].mxu1 }
 0xe77   : > { %v5858_v19 = vpop.f32.mrb[137].mxu1  ;;  %10862 = vmatmul.mubr.msk.f32.gmra.mrb[40].mxu0 %vm781_vm1, %v5856_v50 }
 0xe78   : > { %6234 = vmatprep.mubr.f32.mxu0 %v18847_v44 }
 0xe7a   : > { %v5861_v49 = vpop.f32.mrb[138].mxu1 }
 0xe7b   : > { %v5863_v20 = vpop.f32.mrb[139].mxu1  ;;  %10863 = vmatmul.mubr.msk.f32.gmra.mrb[42].mxu0 %vm781_vm1, %v5861_v49 }
 0xe7c   : > { %6240 = vmatprep.mubr.f32.mxu0 %v18847_v44  ;;  %v10909_v20 = vld [vmem:[%s18670_s4 + $0xab0] sm:$0xff] }
 0xe7e   : > { %v5866_v54 = vpop.f32.mrb[140].mxu1 }
 0xe7f   : > { %v5868_v27 = vpop.f32.mrb[141].mxu1  ;;  %10864 = vmatmul.mubr.msk.f32.gmra.mrb[44].mxu0 %vm781_vm1, %v5866_v54  ;;  %v10910_v54 = vld [vmem:[%s18670_s4 + $0xac0] sm:$0xff] }
 0xe80   : > { %6246 = vmatprep.mubr.f32.mxu0 %v18847_v44  ;;  %v13136_v27 = vpack.c.bf16 %v10910_v54, %v10909_v20 }
 0xe82   : > { %v5871_v58 = vpop.f32.mrb[142].mxu1  ;;  %13137 = vmatpush1.bf16.msra.mxu1 %v13136_v27  ;;  %v10913_v27 = vld [vmem:[%s18670_s4 + $0xaf0] sm:$0xff] }
 0xe83   : > { %v5873_v57 = vpop.f32.mrb[143].mxu1  ;;  %10865 = vmatmul.mubr.msk.f32.gmra.mrb[46].mxu0 %vm781_vm1, %v5871_v58  ;;  %13138 = vmatprep.subr.bf16.mxu1 %v18828_v22 }
 0xe84   : > { %6252 = vmatprep.mubr.f32.mxu0 %v18847_v44 }
 0xe86   : > { %v5876_v37 = vpop.f32.mrb[144].mxu1 }
 0xe87   : > { %v5878_v46 = vpop.f32.mrb[145].mxu1  ;;  %10866 = vmatmul.mubr.msk.f32.gmra.mrb[48].mxu0 %vm781_vm1, %v5876_v37 }
 0xe88   : > { %6258 = vmatprep.mubr.f32.mxu0 %v18847_v44  ;;  %v10911_v46 = vld [vmem:[%s18670_s4 + $0xad0] sm:$0xff] }
 0xe8a   : > { %v5881_v25 = vpop.f32.mrb[146].mxu1 }
 0xe8b   : > { %v5883_v50 = vpop.f32.mrb[147].mxu1  ;;  %10867 = vmatmul.mubr.msk.f32.gmra.mrb[50].mxu0 %vm781_vm1, %v5881_v25  ;;  %v10912_v25 = vld [vmem:[%s18670_s4 + $0xae0] sm:$0xff] }
 0xe8c   : > { %6264 = vmatprep.mubr.f32.mxu0 %v18847_v44  ;;  %v13139_v50 = vpack.c.bf16 %v10912_v25, %v10911_v46  ;;  %v10918_v46 = vld [vmem:[%s18670_s4 + $0xb40] sm:$0xff] }
 0xe8e   : > { %v5886_v19 = vpop.f32.mrb[148].mxu1  ;;  %13140 = vmatpush1.bf16.msra.mxu1 %v13139_v50  ;;  %v10920_v50 = vld [vmem:[%s18670_s4 + $0xb60] sm:$0xff] }
 0xe8f   : > { %v5888_v49 = vpop.f32.mrb[149].mxu1  ;;  %10868 = vmatmul.mubr.msk.f32.gmra.mrb[52].mxu0 %vm781_vm1, %v5886_v19  ;;  %13141 = vmatprep.subr.bf16.mxu1 %v18828_v22 }
 0xe90   : > { %6270 = vmatprep.mubr.f32.mxu0 %v18847_v44 }
 0xe92   : > { %v5891_v58 = vpop.f32.mrb[150].mxu1 }
 0xe93   : > { %v5893_v57 = vpop.f32.mrb[151].mxu1  ;;  %10869 = vmatmul.mubr.msk.f32.gmra.mrb[54].mxu0 %vm781_vm1, %v5891_v58  ;;  %v10914_v58 = vld [vmem:[%s18670_s4 + $0xb00] sm:$0xff] }
 0xe94   : > { %6276 = vmatprep.mubr.f32.mxu0 %v18847_v44  ;;  %v10915_v57 = vld [vmem:[%s18670_s4 + $0xb10] sm:$0xff] }
 0xe96   : > { %v5896_v28 = vpop.f32.mrb[152].mxu1 }
 0xe97   : > { %v5898_v17 = vpop.f32.mrb[153].mxu1  ;;  %10870 = vmatmul.mubr.msk.f32.gmra.mrb[56].mxu0 %vm781_vm1, %v5896_v28  ;;  %v13142_v28 = vpack.c.bf16 %v10914_v58, %v10913_v27  ;;  %v10926_v58 = vld [vmem:[%s18670_s4 + $0xbc0] sm:$0xff] }
 0xe98   : > { %6282 = vmatprep.mubr.f32.mxu0 %v18847_v44  ;;  %v10916_v17 = vld [vmem:[%s18670_s4 + $0xb20] sm:$0xff] }
 0xe99   : > { %13143 = vmatpush1.bf16.msra.mxu1 %v13142_v28  ;;  %v10928_v28 = vld [vmem:[%s18670_s4 + $0xbe0] sm:$0xff] }
 0xe9a   : > { %v5901_v40 = vpop.f32.mrb[154].mxu1  ;;  %13144 = vmatprep.subr.bf16.mxu1 %v18828_v22 }
 0xe9b   : > { %v5903_v37 = vpop.f32.mrb[155].mxu1  ;;  %10871 = vmatmul.mubr.msk.f32.gmra.mrb[58].mxu0 %vm781_vm1, %v5901_v40  ;;  %v13145_v40 = vpack.c.bf16 %v10916_v17, %v10915_v57 }
 0xe9c   : > { %6288 = vmatprep.mubr.f32.mxu0 %v18847_v44  ;;  %v10917_v37 = vld [vmem:[%s18670_s4 + $0xb30] sm:$0xff] }
 0xe9d   : > { %13146 = vmatpush1.bf16.msra.mxu1 %v13145_v40  ;;  %v13148_v25 = vpack.c.bf16 %v10918_v46, %v10917_v37 }
 0xe9e   : > { %v5906_v19 = vpop.f32.mrb[156].mxu1  ;;  %13147 = vmatprep.subr.bf16.mxu1 %v18828_v22 }
 0xe9f   : > { %v5908_v49 = vpop.f32.mrb[157].mxu1  ;;  %10872 = vmatmul.mubr.msk.f32.gmra.mrb[60].mxu0 %vm781_vm1, %v5906_v19 }
 0xea0   : > { %6294 = vmatprep.mubr.f32.mxu0 %v18847_v44  ;;  %v10922_v49 = vld [vmem:[%s18670_s4 + $0xb80] sm:$0xff] }
 0xea1   : > { %13149 = vmatpush1.bf16.msra.mxu1 %v13148_v25 }
 0xea2   : > { %v5911_v20 = vpop.f32.mrb[158].mxu1  ;;  %13150 = vmatprep.subr.bf16.mxu1 %v18828_v22 }
 0xea3   : > { %v5913_v54 = vpop.f32.mrb[159].mxu1  ;;  %10873 = vmatmul.mubr.msk.f32.gmra.mrb[62].mxu0 %vm781_vm1, %v5911_v20 }
 0xea4   : > { %6461 = vmatprep.mubr.f32.mxu0 %v18847_v44  ;;  %v10924_v54 = vld [vmem:[%s18670_s4 + $0xba0] sm:$0xff] }
 0xea7   : > { %10874 = vmatmul.mubr.msk.f32.vlgmr.msra.gmra.mrb[0].mxu0 %vm781_vm1, %v16328_v18  ;;  %v10919_v18 = vld [vmem:[%s18670_s4 + $0xb50] sm:$0xff] }
 0xea8   : > { %6467 = vmatprep.mubr.f32.mxu0 %v18847_v44  ;;  %v13151_v19 = vpack.c.bf16 %v10920_v50, %v10919_v18  ;;  %v10970_v18 = vld [vmem:[%s18670_s4 + $0xc80] sm:$0xff]  ;;  %v10971_v50 = vld [vmem:[%s18670_s4 + $0xc90] sm:$0xff] }
 0xeaa   : > { %13152 = vmatpush1.bf16.msra.mxu1 %v13151_v19 }
 0xeab   : > { %10875 = vmatmul.mubr.msk.f32.gmra.mrb[2].mxu0 %vm781_vm1, %v16323_v42  ;;  %v10921_v42 = vld [vmem:[%s18670_s4 + $0xb70] sm:$0xff]  ;;  %13153 = vmatprep.subr.bf16.mxu1 %v18828_v22 }
 0xeac   : > { %6473 = vmatprep.mubr.f32.mxu0 %v18847_v44  ;;  %v13154_v20 = vpack.c.bf16 %v10922_v49, %v10921_v42 }
 0xeae   : > { %13155 = vmatpush1.bf16.msra.mxu1 %v13154_v20 }
 0xeaf   : > { %10876 = vmatmul.mubr.msk.f32.gmra.mrb[4].mxu0 %vm781_vm1, %v16343_v4  ;;  %v10923_v4 = vld [vmem:[%s18670_s4 + $0xb90] sm:$0xff]  ;;  %13156 = vmatprep.subr.bf16.mxu1 %v18828_v22 }
 0xeb0   : > { %6479 = vmatprep.mubr.f32.mxu0 %v18847_v44  ;;  %v13157_v27 = vpack.c.bf16 %v10924_v54, %v10923_v4  ;;  %v13180_v54 = vpack.c.bf16 %v10971_v50, %v10970_v18 }
 0xeb2   : > { %13158 = vmatpush1.bf16.msra.mxu1 %v13157_v27 }
 0xeb3   : > { %10877 = vmatmul.mubr.msk.f32.gmra.mrb[6].mxu0 %vm781_vm1, %v16338_v1  ;;  %v10925_v1 = vld [vmem:[%s18670_s4 + $0xbb0] sm:$0xff]  ;;  %13159 = vmatprep.subr.bf16.mxu1 %v18828_v22 }
 0xeb4   : > { %6485 = vmatprep.mubr.f32.mxu0 %v18847_v44  ;;  %v13160_v57 = vpack.c.bf16 %v10926_v58, %v10925_v1  ;;  %v10972_v1 = vld [vmem:[%s18670_s4 + $0xca0] sm:$0xff]  ;;  %v10973_v58 = vld [vmem:[%s18670_s4 + $0xcb0] sm:$0xff] }
 0xeb6   : > { %13161 = vmatpush1.bf16.msra.mxu1 %v13160_v57 }
 0xeb7   : > { %10878 = vmatmul.mubr.msk.f32.gmra.mrb[8].mxu0 %vm781_vm1, %v16358_v9  ;;  %v10927_v9 = vld [vmem:[%s18670_s4 + $0xbd0] sm:$0xff]  ;;  %13162 = vmatprep.subr.bf16.mxu1 %v18828_v22 }
 0xeb8   : > { %6491 = vmatprep.mubr.f32.mxu0 %v18847_v44  ;;  %v13163_v17 = vpack.c.bf16 %v10928_v28, %v10927_v9 }
 0xeba   : > { %13164 = vmatpush1.bf16.msra.mxu1 %v13163_v17 }
 0xebb   : > { %10879 = vmatmul.mubr.msk.f32.gmra.mrb[10].mxu0 %vm781_vm1, %v16353_v30  ;;  %13165 = vmatprep.subr.bf16.mxu1 %v18828_v22  ;;  %v10929_v30 = vld [vmem:[%s18670_s4 + $0xbf0] sm:$0xff] }
 0xebc   : > { %6497 = vmatprep.mubr.f32.mxu0 %v18847_v44 }
 0xebf   : > { %10880 = vmatmul.mubr.msk.f32.gmra.mrb[12].mxu0 %vm781_vm1, %v16373_v56 }
 0xec0   : > { %6503 = vmatprep.mubr.f32.mxu0 %v18847_v44 }
 0xec3   : > { %10881 = vmatmul.mubr.msk.f32.gmra.mrb[14].mxu0 %vm781_vm1, %v16368_v29  ;;  %v10930_v29 = vld [vmem:[%s18670_s4 + $0xc00] sm:$0xff] }
 0xec4   : > { %6509 = vmatprep.mubr.f32.mxu0 %v18847_v44  ;;  %v13166_v56 = vpack.c.bf16 %v10930_v29, %v10929_v30  ;;  %v13184_v29 = vpack.c.bf16 %v10973_v58, %v10972_v1 }
 0xec6   : > { %13167 = vmatpush1.bf16.msra.mxu1 %v13166_v56 }
 0xec7   : > { %10882 = vmatmul.mubr.msk.f32.gmra.mrb[16].mxu0 %vm781_vm1, %v16388_v41 }
 0xec8   : > { %6515 = vmatprep.mubr.f32.mxu0 %v18847_v44 }
 0xecb   : > { %10883 = vmatmul.mubr.msk.f32.gmra.mrb[18].mxu0 %vm781_vm1, %v16383_v24  ;;  %v10906_v24 = vld [vmem:[%s18670_s4 + $0xa80] ss:$8 sm:$0x3] }
 0xecc   : > { %6521 = vmatprep.mubr.f32.mxu0 %v18847_v44  ;;  %v16963_v41 = vrot.slane %v10906_v24, %v14947_v31 }
 0xecf   : > { %10884 = vmatmul.mubr.msk.f32.gmra.mrb[20].mxu0 %vm781_vm1, %v16403_v55 }
 0xed0   : > { %6527 = vmatprep.mubr.f32.mxu0 %v18847_v44 }
 0xed3   : > { %10885 = vmatmul.mubr.msk.f32.gmra.mrb[22].mxu0 %vm781_vm1, %v16398_v6  ;;  %v16966_v6 = vrot.slane %v10906_v24, %v14952_v34  ;;  %v10974_v24 = vld [vmem:[%s18670_s4 + $0xcc0] sm:$0xff] }
 0xed4   : > { %6533 = vmatprep.mubr.f32.mxu0 %v18847_v44 }
 0xed7   : > { %10886 = vmatmul.mubr.msk.f32.gmra.mrb[24].mxu0 %vm781_vm1, %v16418_v38 }
 0xed8   : > { %6539 = vmatprep.mubr.f32.mxu0 %v18847_v44 }
 0xedb   : > { %10887 = vmatmul.mubr.msk.f32.gmra.mrb[26].mxu0 %vm781_vm1, %v16413_v62 }
 0xedc   : > { %6545 = vmatprep.mubr.f32.mxu0 %v18847_v44 }
 0xedf   : > { %10888 = vmatmul.mubr.msk.f32.gmra.mrb[28].mxu0 %vm781_vm1, %v16433_v35  ;;  %v10964_v35 = vld [vmem:[%s18670_s4 + $0xc20] sm:$0xff] }
 0xee0   : > { %6551 = vmatprep.mubr.f32.mxu0 %v18847_v44 }
 0xee3   : > { %10889 = vmatmul.mubr.msk.f32.gmra.mrb[30].mxu0 %vm781_vm1, %v16428_v47 }
 0xee4   : > { %6557 = vmatprep.mubr.f32.mxu0 %v18847_v44 }
 0xee7   : > { %10890 = vmatmul.mubr.msk.f32.gmra.mrb[32].mxu0 %vm781_vm1, %v16448_v16  ;;  %v10967_v16 = vld [vmem:[%s18670_s4 + $0xc50] sm:$0xff] }
 0xee8   : > { %6563 = vmatprep.mubr.f32.mxu0 %v18847_v44 }
 0xeeb   : > { %10891 = vmatmul.mubr.msk.f32.gmra.mrb[34].mxu0 %vm781_vm1, %v16443_v63 }
 0xeec   : > { %6569 = vmatprep.mubr.f32.mxu0 %v18847_v44 }
 0xeef   : > { %10892 = vmatmul.mubr.msk.f32.gmra.mrb[36].mxu0 %vm781_vm1, %v16463_v61 }
 0xef0   : > { %6575 = vmatprep.mubr.f32.mxu0 %v18847_v44 }
 0xef3   : > { %10893 = vmatmul.mubr.msk.f32.gmra.mrb[38].mxu0 %vm781_vm1, %v16458_v23  ;;  %v10965_v23 = vld [vmem:[%s18670_s4 + $0xc30] sm:$0xff] }
 0xef4   : > { %6581 = vmatprep.mubr.f32.mxu0 %v18847_v44 }
 0xef7   : > { %10894 = vmatmul.mubr.msk.f32.gmra.mrb[40].mxu0 %vm781_vm1, %v16478_v36  ;;  %v13168_v36 = vpack.c.bf16 %v10965_v23, %v10964_v35 }
 0xef8   : > { %6587 = vmatprep.mubr.f32.mxu0 %v18847_v44 }
 0xef9   : > { %13169 = vmatprep.subr.bf16.mxu1 %v13168_v36 }
 0xefb   : > { %10895 = vmatmul.mubr.msk.f32.gmra.mrb[42].mxu0 %vm781_vm1, %v16473_v60  ;;  %v10966_v60 = vld [vmem:[%s18670_s4 + $0xc40] sm:$0xff] }
 0xefc   : > { %6593 = vmatprep.mubr.f32.mxu0 %v18847_v44 }
 0xeff   : > { %10896 = vmatmul.mubr.msk.f32.gmra.mrb[44].mxu0 %vm781_vm1, %v16493_v45 }
 0xf00   : > { %6599 = vmatprep.mubr.f32.mxu0 %v18847_v44 }
 0xf03   : > { %10897 = vmatmul.mubr.msk.f32.gmra.mrb[46].mxu0 %vm781_vm1, %v16488_v51 }
 0xf04   : > { %6605 = vmatprep.mubr.f32.mxu0 %v18847_v44 }
 0xf07   : > { %10898 = vmatmul.mubr.msk.f32.gmra.mrb[48].mxu0 %vm781_vm1, %v16508_v8  ;;  %v13172_v8 = vpack.c.bf16 %v10967_v16, %v10966_v60 }
 0xf08   : > { %6611 = vmatprep.mubr.f32.mxu0 %v18847_v44 }
 0xf0b   : > { %10899 = vmatmul.mubr.msk.f32.gmra.mrb[50].mxu0 %vm781_vm1, %v16503_v14 }
 0xf0c   : > { %6617 = vmatprep.mubr.f32.mxu0 %v18847_v44 }
 0xf0f   : > { %10900 = vmatmul.mubr.msk.f32.gmra.mrb[52].mxu0 %vm781_vm1, %v16523_v33  ;;  %v10968_v33 = vld [vmem:[%s18670_s4 + $0xc60] sm:$0xff] }
 0xf10   : > { %6623 = vmatprep.mubr.f32.mxu0 %v18847_v44 }
 0xf13   : > { %10901 = vmatmul.mubr.msk.f32.gmra.mrb[54].mxu0 %vm781_vm1, %v16518_v52 }
 0xf14   : > { %6629 = vmatprep.mubr.f32.mxu0 %v18847_v44 }
 0xf17   : > { %10902 = vmatmul.mubr.msk.f32.gmra.mrb[56].mxu0 %vm781_vm1, %v16538_v26 }
 0xf18   : > { %6635 = vmatprep.mubr.f32.mxu0 %v18847_v44 }
 0xf1b   : > { %10903 = vmatmul.mubr.msk.f32.gmra.mrb[58].mxu0 %vm781_vm1, %v16533_v21  ;;  %v10969_v21 = vld [vmem:[%s18670_s4 + $0xc70] sm:$0xff] }
 0xf1c   : > { %6641 = vmatprep.mubr.f32.mxu0 %v18847_v44  ;;  %v13176_v46 = vpack.c.bf16 %v10969_v21, %v10968_v33 }
 0xf1f   : > { %10904 = vmatmul.mubr.msk.f32.gmra.mrb[60].mxu0 %vm781_vm1, %v16553_v3 }
 0xf20   : > { %6647 = vmatprep.mubr.f32.mxu0 %v18847_v44 }
 0xf23   : > { %10905 = vmatmul.mubr.msk.f32.gmra.mrb[62].mxu0 %vm781_vm1, %v16548_v32 }
 0xf7a   : > { %v6463_v55 = vpop.f32.mrb[0].mxu0 }
 0xf7b   : > { %v6667_v62 = vadd.f32 %v16963_v41, %v6463_v55  ;;  %v6465_v38 = vpop.f32.mrb[1].mxu0  ;;  %v10975_v55 = vld [vmem:[%s18670_s4 + $0xcd0] sm:$0xff] }
 0xf7c   : > { %v6668_v47 = vadd.f32 %v16966_v6, %v6465_v38  ;;  %v13188_v60 = vpack.c.bf16 %v10975_v55, %v10974_v24 }
 0xf7d   : > { %v6731_v51 = vmax.f32 %v6667_v62, 0.0 }
 0xf7e   : > { %v6732_v63 = vmax.f32 %v6668_v47, 0.0  ;;  %v6469_v61 = vpop.f32.mrb[2].mxu0 }
 0xf7f   : > { %v6669_v45 = vadd.f32 %v16963_v41, %v6469_v61  ;;  %v6471_v14 = vpop.f32.mrb[3].mxu0 }
 0xf80   : > { %v6670_v52 = vadd.f32 %v16966_v6, %v6471_v14  ;;  %10932 = vmatprep.mubr.msk.f32.mxu1 %vm781_vm1, %v6732_v63 }
 0xf81   : > { %6981 = vmatmul.mubr.f32.vlgmr.msra.gmra.mrb[160].mxu1 %v6731_v51  ;;  %v6733_v3 = vmax.f32 %v6669_v45, 0.0 }
 0xf82   : > { %v6734_v26 = vmax.f32 %v6670_v52, 0.0  ;;  %v6475_v32 = vpop.f32.mrb[4].mxu0  ;;  %13171 = vmatpush3.bf16.msra.mxu1 %v13168_v36 }
 0xf83   : > { %v6671_v40 = vadd.f32 %v16963_v41, %v6475_v32  ;;  %v6477_v37 = vpop.f32.mrb[5].mxu0  ;;  %13173 = vmatprep.subr.bf16.mxu1 %v13172_v8 }
 0xf84   : > { %v6672_v25 = vadd.f32 %v16966_v6, %v6477_v37  ;;  %10933 = vmatprep.mubr.msk.f32.mxu1 %vm781_vm1, %v6734_v26 }
 0xf85   : > { %6986 = vmatmul.mubr.f32.gmra.mrb[162].mxu1 %v6733_v3  ;;  %v6735_v49 = vmax.f32 %v6671_v40, 0.0 }
 0xf86   : > { %v6736_v19 = vmax.f32 %v6672_v25, 0.0  ;;  %v6481_v42 = vpop.f32.mrb[6].mxu0  ;;  %13175 = vmatpush3.bf16.msra.mxu1 %v13172_v8 }
 0xf87   : > { %v6673_v20 = vadd.f32 %v16963_v41, %v6481_v42  ;;  %v6483_v4 = vpop.f32.mrb[7].mxu0  ;;  %13177 = vmatprep.subr.bf16.mxu1 %v13176_v46 }
 0xf88   : > { %v6674_v27 = vadd.f32 %v16966_v6, %v6483_v4  ;;  %10934 = vmatprep.mubr.msk.f32.mxu1 %vm781_vm1, %v6736_v19 }
 0xf89   : > { %6991 = vmatmul.mubr.f32.gmra.mrb[164].mxu1 %v6735_v49  ;;  %v6737_v28 = vmax.f32 %v6673_v20, 0.0 }
 0xf8a   : > { %v6738_v57 = vmax.f32 %v6674_v27, 0.0  ;;  %v6487_v9 = vpop.f32.mrb[8].mxu0  ;;  %13179 = vmatpush3.bf16.msra.mxu1 %v13176_v46 }
 0xf8b   : > { %v6675_v17 = vadd.f32 %v16963_v41, %v6487_v9  ;;  %v6489_v30 = vpop.f32.mrb[9].mxu0  ;;  %13181 = vmatprep.subr.bf16.mxu1 %v13180_v54 }
 0xf8c   : > { %v6676_v56 = vadd.f32 %v16966_v6, %v6489_v30  ;;  %10935 = vmatprep.mubr.msk.f32.mxu1 %vm781_vm1, %v6738_v57 }
 0xf8d   : > { %6996 = vmatmul.mubr.f32.gmra.mrb[166].mxu1 %v6737_v28  ;;  %v6739_v47 = vmax.f32 %v6675_v17, 0.0 }
 0xf8e   : > { %v6740_v62 = vmax.f32 %v6676_v56, 0.0  ;;  %v6493_v38 = vpop.f32.mrb[10].mxu0  ;;  %13183 = vmatpush3.bf16.msra.mxu1 %v13180_v54 }
 0xf8f   : > { %v6677_v35 = vadd.f32 %v16963_v41, %v6493_v38  ;;  %v6495_v23 = vpop.f32.mrb[11].mxu0  ;;  %13185 = vmatprep.subr.bf16.mxu1 %v13184_v29 }
 0xf90   : > { %v6678_v63 = vadd.f32 %v16966_v6, %v6495_v23  ;;  %10936 = vmatprep.mubr.msk.f32.mxu1 %vm781_vm1, %v6740_v62 }
 0xf91   : > { %7001 = vmatmul.mubr.f32.gmra.mrb[168].mxu1 %v6739_v47  ;;  %v6741_v16 = vmax.f32 %v6677_v35, 0.0 }
 0xf92   : > { %v6742_v61 = vmax.f32 %v6678_v63, 0.0  ;;  %v6499_v36 = vpop.f32.mrb[12].mxu0  ;;  %13187 = vmatpush3.bf16.msra.mxu1 %v13184_v29 }
 0xf93   : > { %v6679_v51 = vadd.f32 %v16963_v41, %v6499_v36  ;;  %v6501_v45 = vpop.f32.mrb[13].mxu0  ;;  %13189 = vmatprep.subr.bf16.mxu1 %v13188_v60 }
 0xf94   : > { %v6680_v14 = vadd.f32 %v16966_v6, %v6501_v45  ;;  %10937 = vmatprep.mubr.msk.f32.mxu1 %vm781_vm1, %v6742_v61 }
 0xf95   : > { %7006 = vmatmul.mubr.f32.gmra.mrb[170].mxu1 %v6741_v16  ;;  %v6743_v33 = vmax.f32 %v6679_v51, 0.0 }
 0xf96   : > { %v6744_v8 = vmax.f32 %v6680_v14, 0.0  ;;  %v6505_v52 = vpop.f32.mrb[14].mxu0  ;;  %13191 = vmatpush3.bf16.msra.mxu1 %v13188_v60 }
 0xf97   : > { %v6681_v21 = vadd.f32 %v16963_v41, %v6505_v52  ;;  %v6507_v26 = vpop.f32.mrb[15].mxu0 }
 0xf98   : > { %v6682_v32 = vadd.f32 %v16966_v6, %v6507_v26  ;;  %10938 = vmatprep.mubr.msk.f32.mxu1 %vm781_vm1, %v6744_v8 }
 0xf99   : > { %7011 = vmatmul.mubr.f32.gmra.mrb[172].mxu1 %v6743_v33  ;;  %v6745_v37 = vmax.f32 %v6681_v21, 0.0 }
 0xf9a   : > { %v6746_v3 = vmax.f32 %v6682_v32, 0.0  ;;  %v6511_v40 = vpop.f32.mrb[16].mxu0 }
 0xf9b   : > { %v6683_v46 = vadd.f32 %v16963_v41, %v6511_v40  ;;  %v6513_v25 = vpop.f32.mrb[17].mxu0 }
 0xf9c   : > { %v6684_v18 = vadd.f32 %v16966_v6, %v6513_v25  ;;  %10939 = vmatprep.mubr.msk.f32.mxu1 %vm781_vm1, %v6746_v3 }
 0xf9d   : > { %7016 = vmatmul.mubr.f32.gmra.mrb[174].mxu1 %v6745_v37  ;;  %v6747_v42 = vmax.f32 %v6683_v46, 0.0 }
 0xf9e   : > { %v6748_v50 = vmax.f32 %v6684_v18, 0.0  ;;  %v6517_v19 = vpop.f32.mrb[18].mxu0 }
 0xf9f   : > { %v6685_v49 = vadd.f32 %v16963_v41, %v6517_v19  ;;  %v6519_v20 = vpop.f32.mrb[19].mxu0 }
 0xfa0   : > { %v6686_v4 = vadd.f32 %v16966_v6, %v6519_v20  ;;  %10940 = vmatprep.mubr.msk.f32.mxu1 %vm781_vm1, %v6748_v50 }
 0xfa1   : > { %7021 = vmatmul.mubr.f32.gmra.mrb[176].mxu1 %v6747_v42  ;;  %v6749_v1 = vmax.f32 %v6685_v49, 0.0 }
 0xfa2   : > { %v6750_v54 = vmax.f32 %v6686_v4, 0.0  ;;  %v6523_v27 = vpop.f32.mrb[20].mxu0 }
 0xfa3   : > { %v6687_v58 = vadd.f32 %v16963_v41, %v6523_v27  ;;  %v6525_v57 = vpop.f32.mrb[21].mxu0 }
 0xfa4   : > { %v6688_v9 = vadd.f32 %v16966_v6, %v6525_v57  ;;  %10941 = vmatprep.mubr.msk.f32.mxu1 %vm781_vm1, %v6750_v54 }
 0xfa5   : > { %7026 = vmatmul.mubr.f32.gmra.mrb[178].mxu1 %v6749_v1  ;;  %v6751_v30 = vmax.f32 %v6687_v58, 0.0 }
 0xfa6   : > { %v6752_v28 = vmax.f32 %v6688_v9, 0.0  ;;  %v6529_v17 = vpop.f32.mrb[22].mxu0 }
 0xfa7   : > { %v6689_v29 = vadd.f32 %v16963_v41, %v6529_v17  ;;  %v6531_v56 = vpop.f32.mrb[23].mxu0 }
 0xfa8   : > { %v6690_v24 = vadd.f32 %v16966_v6, %v6531_v56  ;;  %10942 = vmatprep.mubr.msk.f32.mxu1 %vm781_vm1, %v6752_v28 }
 0xfa9   : > { %7031 = vmatmul.mubr.f32.gmra.mrb[180].mxu1 %v6751_v30  ;;  %v6753_v38 = vmax.f32 %v6689_v29, 0.0 }
 0xfaa   : > { %v6754_v55 = vmax.f32 %v6690_v24, 0.0  ;;  %v6535_v62 = vpop.f32.mrb[24].mxu0 }
 0xfab   : > { %v6691_v47 = vadd.f32 %v16963_v41, %v6535_v62  ;;  %v6537_v35 = vpop.f32.mrb[25].mxu0 }
 0xfac   : > { %v6692_v23 = vadd.f32 %v16966_v6, %v6537_v35  ;;  %10943 = vmatprep.mubr.msk.f32.mxu1 %vm781_vm1, %v6754_v55 }
 0xfad   : > { %7036 = vmatmul.mubr.f32.gmra.mrb[182].mxu1 %v6753_v38  ;;  %v6755_v61 = vmax.f32 %v6691_v47, 0.0 }
 0xfae   : > { %v6756_v60 = vmax.f32 %v6692_v23, 0.0  ;;  %v6541_v63 = vpop.f32.mrb[26].mxu0 }
 0xfaf   : > { %v6693_v36 = vadd.f32 %v16963_v41, %v6541_v63  ;;  %v6543_v16 = vpop.f32.mrb[27].mxu0 }
 0xfb0   : > { %v6694_v51 = vadd.f32 %v16966_v6, %v6543_v16  ;;  %10944 = vmatprep.mubr.msk.f32.mxu1 %vm781_vm1, %v6756_v60 }
 0xfb1   : > { %7041 = vmatmul.mubr.f32.gmra.mrb[184].mxu1 %v6755_v61  ;;  %v6757_v8 = vmax.f32 %v6693_v36, 0.0 }
 0xfb2   : > { %v6758_v45 = vmax.f32 %v6694_v51, 0.0  ;;  %v6547_v14 = vpop.f32.mrb[28].mxu0 }
 0xfb3   : > { %v6695_v52 = vadd.f32 %v16963_v41, %v6547_v14  ;;  %v6549_v33 = vpop.f32.mrb[29].mxu0 }
 0xfb4   : > { %v6696_v21 = vadd.f32 %v16966_v6, %v6549_v33  ;;  %10945 = vmatprep.mubr.msk.f32.mxu1 %vm781_vm1, %v6758_v45 }
 0xfb5   : > { %7046 = vmatmul.mubr.f32.gmra.mrb[186].mxu1 %v6757_v8  ;;  %v6759_v3 = vmax.f32 %v6695_v52, 0.0 }
 0xfb6   : > { %v6760_v26 = vmax.f32 %v6696_v21, 0.0  ;;  %v6553_v32 = vpop.f32.mrb[30].mxu0 }
 0xfb7   : > { %v6697_v40 = vadd.f32 %v16963_v41, %v6553_v32  ;;  %v6555_v37 = vpop.f32.mrb[31].mxu0  ;;  %v10977_v32 = vld [vmem:[%s18670_s4 + $0xcf0] sm:$0xff] }
 0xfb8   : > { %v6698_v46 = vadd.f32 %v16966_v6, %v6555_v37  ;;  %10946 = vmatprep.mubr.msk.f32.mxu1 %vm781_vm1, %v6760_v26  ;;  %v10976_v26 = vld [vmem:[%s18670_s4 + $0xce0] sm:$0xff] }
 0xfb9   : > { %7051 = vmatmul.mubr.f32.gmra.mrb[188].mxu1 %v6759_v3  ;;  %v6761_v50 = vmax.f32 %v6697_v40, 0.0 }
 0xfba   : > { %v6762_v25 = vmax.f32 %v6698_v46, 0.0  ;;  %v6559_v18 = vpop.f32.mrb[32].mxu0  ;;  %v13192_v46 = vpack.c.bf16 %v10977_v32, %v10976_v26 }
 0xfbb   : > { %v6699_v19 = vadd.f32 %v16963_v41, %v6559_v18  ;;  %v6561_v42 = vpop.f32.mrb[33].mxu0 }
 0xfbc   : > { %v6700_v49 = vadd.f32 %v16966_v6, %v6561_v42  ;;  %10947 = vmatprep.mubr.msk.f32.mxu1 %vm781_vm1, %v6762_v25  ;;  %13193 = vmatprep.subr.bf16.mxu1 %v13192_v46  ;;  %v10979_v42 = vld [vmem:[%s18670_s4 + $0xd10] sm:$0xff] }
 0xfbd   : > { %7056 = vmatmul.mubr.f32.gmra.mrb[190].mxu1 %v6761_v50  ;;  %v6763_v54 = vmax.f32 %v6699_v19, 0.0  ;;  %v10978_v19 = vld [vmem:[%s18670_s4 + $0xd00] sm:$0xff] }
 0xfbe   : > { %v6764_v20 = vmax.f32 %v6700_v49, 0.0  ;;  %v6565_v4 = vpop.f32.mrb[34].mxu0  ;;  %13195 = vmatpush3.bf16.msra.mxu1 %v13192_v46 }
 0xfbf   : > { %v6701_v27 = vadd.f32 %v16963_v41, %v6565_v4  ;;  %v6567_v1 = vpop.f32.mrb[35].mxu0 }
 0xfc0   : > { %v6702_v58 = vadd.f32 %v16966_v6, %v6567_v1  ;;  %10948 = vmatprep.mubr.msk.f32.mxu1 %vm781_vm1, %v6764_v20 }
 0xfc1   : > { %7061 = vmatmul.mubr.f32.gmra.mrb[192].mxu1 %v6763_v54  ;;  %v6765_v28 = vmax.f32 %v6701_v27, 0.0  ;;  %v13196_v54 = vpack.c.bf16 %v10979_v42, %v10978_v19 }
 0xfc2   : > { %v6766_v57 = vmax.f32 %v6702_v58, 0.0  ;;  %v6571_v9 = vpop.f32.mrb[36].mxu0 }
 0xfc3   : > { %v6703_v17 = vadd.f32 %v16963_v41, %v6571_v9  ;;  %v6573_v30 = vpop.f32.mrb[37].mxu0  ;;  %13197 = vmatprep.subr.bf16.mxu1 %v13196_v54 }
 0xfc4   : > { %v6704_v29 = vadd.f32 %v16966_v6, %v6573_v30  ;;  %10949 = vmatprep.mubr.msk.f32.mxu1 %vm781_vm1, %v6766_v57  ;;  %13199 = vmatpush3.bf16.msra.mxu1 %v13196_v54 }
 0xfc5   : > { %7066 = vmatmul.mubr.f32.gmra.mrb[194].mxu1 %v6765_v28  ;;  %v6767_v55 = vmax.f32 %v6703_v17, 0.0  ;;  %13232 = vmatprep.subr.bf16.mxu1 %v18828_v22 }
 0xfc6   : > { %v6768_v56 = vmax.f32 %v6704_v29, 0.0  ;;  %v6577_v24 = vpop.f32.mrb[38].mxu0 }
 0xfc7   : > { %v6705_v62 = vadd.f32 %v16963_v41, %v6577_v24  ;;  %v6579_v38 = vpop.f32.mrb[39].mxu0 }
 0xfc8   : > { %v6706_v47 = vadd.f32 %v16966_v6, %v6579_v38  ;;  %10950 = vmatprep.mubr.msk.f32.mxu1 %vm781_vm1, %v6768_v56 }
 0xfc9   : > { %7071 = vmatmul.mubr.f32.gmra.mrb[196].mxu1 %v6767_v55  ;;  %v6769_v60 = vmax.f32 %v6705_v62, 0.0 }
 0xfca   : > { %v6770_v35 = vmax.f32 %v6706_v47, 0.0  ;;  %v6583_v23 = vpop.f32.mrb[40].mxu0 }
 0xfcb   : > { %v6707_v63 = vadd.f32 %v16963_v41, %v6583_v23  ;;  %v6585_v61 = vpop.f32.mrb[41].mxu0 }
 0xfcc   : > { %v6708_v36 = vadd.f32 %v16966_v6, %v6585_v61  ;;  %10951 = vmatprep.mubr.msk.f32.mxu1 %vm781_vm1, %v6770_v35 }
 0xfcd   : > { %7076 = vmatmul.mubr.f32.gmra.mrb[198].mxu1 %v6769_v60  ;;  %v6771_v45 = vmax.f32 %v6707_v63, 0.0 }
 0xfce   : > { %v6772_v16 = vmax.f32 %v6708_v36, 0.0  ;;  %v6589_v51 = vpop.f32.mrb[42].mxu0 }
 0xfcf   : > { %v6709_v14 = vadd.f32 %v16963_v41, %v6589_v51  ;;  %v6591_v8 = vpop.f32.mrb[43].mxu0 }
 0xfd0   : > { %v6710_v52 = vadd.f32 %v16966_v6, %v6591_v8  ;;  %10952 = vmatprep.mubr.msk.f32.mxu1 %vm781_vm1, %v6772_v16 }
 0xfd1   : > { %7081 = vmatmul.mubr.f32.gmra.mrb[200].mxu1 %v6771_v45  ;;  %v6773_v3 = vmax.f32 %v6709_v14, 0.0 }
 0xfd2   : > { %v6774_v33 = vmax.f32 %v6710_v52, 0.0  ;;  %v6595_v21 = vpop.f32.mrb[44].mxu0 }
 0xfd3   : > { %v6711_v40 = vadd.f32 %v16963_v41, %v6595_v21  ;;  %v6597_v37 = vpop.f32.mrb[45].mxu0 }
 0xfd4   : > { %v6712_v25 = vadd.f32 %v16966_v6, %v6597_v37  ;;  %10953 = vmatprep.mubr.msk.f32.mxu1 %vm781_vm1, %v6774_v33 }
 0xfd5   : > { %7086 = vmatmul.mubr.f32.gmra.mrb[202].mxu1 %v6773_v3  ;;  %v6775_v49 = vmax.f32 %v6711_v40, 0.0 }
 0xfd6   : > { %v6776_v18 = vmax.f32 %v6712_v25, 0.0  ;;  %v6601_v50 = vpop.f32.mrb[46].mxu0 }
 0xfd7   : > { %v6713_v20 = vadd.f32 %v16963_v41, %v6601_v50  ;;  %v6603_v4 = vpop.f32.mrb[47].mxu0 }
 0xfd8   : > { %v6714_v27 = vadd.f32 %v16966_v6, %v6603_v4  ;;  %10954 = vmatprep.mubr.msk.f32.mxu1 %vm781_vm1, %v6776_v18 }
 0xfd9   : > { %7091 = vmatmul.mubr.f32.gmra.mrb[204].mxu1 %v6775_v49  ;;  %v6777_v57 = vmax.f32 %v6713_v20, 0.0 }
 0xfda   : > { %v6778_v1 = vmax.f32 %v6714_v27, 0.0  ;;  %v6607_v58 = vpop.f32.mrb[48].mxu0 }
 0xfdb   : > { %v6715_v9 = vadd.f32 %v16963_v41, %v6607_v58  ;;  %v6609_v28 = vpop.f32.mrb[49].mxu0 }
 0xfdc   : > { %v6716_v17 = vadd.f32 %v16966_v6, %v6609_v28  ;;  %10955 = vmatprep.mubr.msk.f32.mxu1 %vm781_vm1, %v6778_v1 }
 0xfdd   : > { %7096 = vmatmul.mubr.f32.gmra.mrb[206].mxu1 %v6777_v57  ;;  %v6779_v56 = vmax.f32 %v6715_v9, 0.0 }
 0xfde   : > { %v6780_v30 = vmax.f32 %v6716_v17, 0.0  ;;  %v6613_v29 = vpop.f32.mrb[50].mxu0 }
 0xfdf   : > { %v6717_v24 = vadd.f32 %v16963_v41, %v6613_v29  ;;  %v6615_v55 = vpop.f32.mrb[51].mxu0 }
 0xfe0   : > { %v6718_v62 = vadd.f32 %v16966_v6, %v6615_v55  ;;  %10956 = vmatprep.mubr.msk.f32.mxu1 %vm781_vm1, %v6780_v30  ;;  %v17116_v30 = vld [vmem:[%s18670_s4 + $0xc10] ss:$0 sm:$0xff] }
 0xfe1   : > { %7101 = vmatmul.mubr.f32.gmra.mrb[208].mxu1 %v6779_v56  ;;  %v6781_v35 = vmax.f32 %v6717_v24, 0.0  ;;  %v10982_v24 = vld [vmem:[%s18670_s4 + $0xd40] sm:$0xff]  ;;  %v10983_v55 = vld [vmem:[%s18670_s4 + $0xd50] sm:$0xff] }
 0xfe2   : > { %v6782_v38 = vmax.f32 %v6718_v62, 0.0  ;;  %v6619_v47 = vpop.f32.mrb[52].mxu0 }
 0xfe3   : > { %v6719_v23 = vadd.f32 %v16963_v41, %v6619_v47  ;;  %v6621_v60 = vpop.f32.mrb[53].mxu0 }
 0xfe4   : > { %v6720_v63 = vadd.f32 %v16966_v6, %v6621_v60  ;;  %10957 = vmatprep.mubr.msk.f32.mxu1 %vm781_vm1, %v6782_v38  ;;  %v10984_v38 = vld [vmem:[%s18670_s4 + $0xd60] sm:$0xff] }
 0xfe5   : > { %7106 = vmatmul.mubr.f32.gmra.mrb[210].mxu1 %v6781_v35  ;;  %v6783_v16 = vmax.f32 %v6719_v23, 0.0  ;;  %v13204_v35 = vpack.c.bf16 %v10984_v38, %v10983_v55  ;;  %v10985_v23 = vld [vmem:[%s18670_s4 + $0xd70] sm:$0xff]  ;;  %v10986_v60 = vld [vmem:[%s18670_s4 + $0xd80] sm:$0xff] }
 0xfe6   : > { %v6784_v61 = vmax.f32 %v6720_v63, 0.0  ;;  %v6625_v36 = vpop.f32.mrb[54].mxu0 }
 0xfe7   : > { %v6721_v51 = vadd.f32 %v16963_v41, %v6625_v36  ;;  %v6627_v45 = vpop.f32.mrb[55].mxu0 }
 0xfe8   : > { %v6722_v14 = vadd.f32 %v16966_v6, %v6627_v45  ;;  %10958 = vmatprep.mubr.msk.f32.mxu1 %vm781_vm1, %v6784_v61  ;;  %v10987_v45 = vld [vmem:[%s18670_s4 + $0xd90] sm:$0xff] }
 0xfe9   : > { %7111 = vmatmul.mubr.f32.gmra.mrb[212].mxu1 %v6783_v16  ;;  %v6785_v33 = vmax.f32 %v6721_v51, 0.0  ;;  %v13208_v16 = vpack.c.bf16 %v10986_v60, %v10985_v23 }
 0xfea   : > { %v6786_v8 = vmax.f32 %v6722_v14, 0.0  ;;  %v6631_v52 = vpop.f32.mrb[56].mxu0  ;;  %v10988_v14 = vld [vmem:[%s18670_s4 + $0xda0] sm:$0xff] }
 0xfeb   : > { %v6723_v21 = vadd.f32 %v16963_v41, %v6631_v52  ;;  %v6633_v26 = vpop.f32.mrb[57].mxu0 }
 0xfec   : > { %v6724_v32 = vadd.f32 %v16966_v6, %v6633_v26  ;;  %10959 = vmatprep.mubr.msk.f32.mxu1 %vm781_vm1, %v6786_v8 }
 0xfed   : > { %7116 = vmatmul.mubr.f32.gmra.mrb[214].mxu1 %v6785_v33  ;;  %v6787_v37 = vmax.f32 %v6723_v21, 0.0  ;;  %v13212_v21 = vpack.c.bf16 %v10988_v14, %v10987_v45 }
 0xfee   : > { %v6788_v3 = vmax.f32 %v6724_v32, 0.0  ;;  %v6637_v40 = vpop.f32.mrb[58].mxu0  ;;  %v10989_v32 = vld [vmem:[%s18670_s4 + $0xdb0] sm:$0xff] }
 0xfef   : > { %v6725_v46 = vadd.f32 %v16963_v41, %v6637_v40  ;;  %v6639_v25 = vpop.f32.mrb[59].mxu0 }
 0xff0   : > { %v6726_v18 = vadd.f32 %v16966_v6, %v6639_v25  ;;  %10960 = vmatprep.mubr.msk.f32.mxu1 %vm781_vm1, %v6788_v3  ;;  %v10990_v3 = vld [vmem:[%s18670_s4 + $0xdc0] sm:$0xff] }
 0xff1   : > { %7121 = vmatmul.mubr.f32.gmra.mrb[216].mxu1 %v6787_v37  ;;  %v6789_v42 = vmax.f32 %v6725_v46, 0.0  ;;  %v13216_v25 = vpack.c.bf16 %v10990_v3, %v10989_v32 }
 0xff2   : > { %v6790_v50 = vmax.f32 %v6726_v18, 0.0  ;;  %v6643_v19 = vpop.f32.mrb[60].mxu0 }
 0xff3   : > { %v6727_v49 = vadd.f32 %v16963_v41, %v6643_v19  ;;  %v6645_v20 = vpop.f32.mrb[61].mxu0  ;;  %v10992_v19 = vld [vmem:[%s18670_s4 + $0xde0] sm:$0xff] }
 0xff4   : > { %v6728_v4 = vadd.f32 %v16966_v6, %v6645_v20  ;;  %10961 = vmatprep.mubr.msk.f32.mxu1 %vm781_vm1, %v6790_v50  ;;  %v10991_v50 = vld [vmem:[%s18670_s4 + $0xdd0] sm:$0xff] }
 0xff5   : > { %7126 = vmatmul.mubr.f32.gmra.mrb[218].mxu1 %v6789_v42  ;;  %v6791_v1 = vmax.f32 %v6727_v49, 0.0 }
 0xff6   : > { %v6792_v54 = vmax.f32 %v6728_v4, 0.0  ;;  %v6649_v27 = vpop.f32.mrb[62].mxu0  ;;  %v13220_v4 = vpack.c.bf16 %v10992_v19, %v10991_v50 }
 0xff7   : > { %v6729_v58 = vadd.f32 %v16963_v41, %v6649_v27  ;;  %v6651_v57 = vpop.f32.mrb[63].mxu0  ;;  %v10993_v27 = vld [vmem:[%s18670_s4 + $0xdf0] sm:$0xff] }
 0xff8   : > { %v6730_v9 = vadd.f32 %v16966_v6, %v6651_v57  ;;  %10962 = vmatprep.mubr.msk.f32.mxu1 %vm781_vm1, %v6792_v54  ;;  %v10981_v6 = vld [vmem:[%s18670_s4 + $0xd30] sm:$0xff] }
 0xff9   : > { %7131 = vmatmul.mubr.f32.gmra.mrb[220].mxu1 %v6791_v1  ;;  %v6793_v17 = vmax.f32 %v6729_v58, 0.0  ;;  %v13200_v62 = vpack.c.bf16 %v10982_v24, %v10981_v6  ;;  %v10994_v1 = vld [vmem:[%s18670_s4 + $0xe00] sm:$0xff] }
 0xffa   : > { %v6794_v28 = vmax.f32 %v6730_v9, 0.0 }
 0xffb   : > { %13201 = vmatprep.subr.bf16.mxu0 %v13200_v62 }
 0xffc   : > { %10963 = vmatprep.mubr.msk.f32.mxu1 %vm781_vm1, %v6794_v28  ;;  %13203 = vmatpush3.bf16.msra.mxu0 %v13200_v62  ;;  %v13224_v28 = vpack.c.bf16 %v10994_v1, %v10993_v27 }
 0xffd   : > { %7136 = vmatmul.mubr.f32.gmra.mrb[222].mxu1 %v6793_v17  ;;  %13205 = vmatprep.subr.bf16.mxu0 %v13204_v35 }
0x1000   : > { %13207 = vmatpush3.bf16.msra.mxu0 %v13204_v35 }
0x1001   : > { %13209 = vmatprep.subr.bf16.mxu0 %v13208_v16 }
0x1004   : > { %13211 = vmatpush3.bf16.msra.mxu0 %v13208_v16 }
0x1005   : > { %13213 = vmatprep.subr.bf16.mxu0 %v13212_v21 }
0x1008   : > { %13215 = vmatpush3.bf16.msra.mxu0 %v13212_v21 }
0x1009   : > { %13217 = vmatprep.subr.bf16.mxu0 %v13216_v25 }
0x100c   : > { %13219 = vmatpush3.bf16.msra.mxu0 %v13216_v25 }
0x100d   : > { %13221 = vmatprep.subr.bf16.mxu0 %v13220_v4 }
0x1010   : > { %13223 = vmatpush3.bf16.msra.mxu0 %v13220_v4 }
0x1011   : > { %13225 = vmatprep.subr.bf16.mxu0 %v13224_v28 }
0x1014   : > { %13227 = vmatpush3.bf16.msra.mxu0 %v13224_v28 }
0x1054   : > { %v6982_v29 = vpop.f32.mrb[160].mxu1 }
0x1055   : > { %v6983_v56 = vadd.f32 %v17116_v30, %v6982_v29  ;;  %v6984_v41 = vpop.f32.mrb[161].mxu1 }
0x1057   : > { %v7141_v47 = vmax.f32 %v6983_v56, 0.0 }
0x1058   : > { %v6987_v63 = vpop.f32.mrb[162].mxu1 }
0x1059   : > { %v6988_v61 = vadd.f32 %v17116_v30, %v6987_v63  ;;  %v6989_v36 = vpop.f32.mrb[163].mxu1  ;;  %12299 = vmatprep.mubr.f32.mxu1 %v7141_v47 }
0x105b   : > { %v7142_v51 = vmax.f32 %v6988_v61, 0.0 }
0x105c   : > { %v6992_v8 = vpop.f32.mrb[164].mxu1 }
0x105d   : > { %v6993_v52 = vadd.f32 %v17116_v30, %v6992_v8  ;;  %v6994_v33 = vpop.f32.mrb[165].mxu1  ;;  %12300 = vmatmul.mubr.f32.vlgmr.msra.gmra.mrb[224].mxu1 %v7142_v51 }
0x105f   : > { %v7143_v26 = vmax.f32 %v6993_v52, 0.0 }
0x1060   : > { %v6997_v40 = vpop.f32.mrb[166].mxu1 }
0x1061   : > { %v6998_v37 = vadd.f32 %v17116_v30, %v6997_v40  ;;  %v6999_v46 = vpop.f32.mrb[167].mxu1  ;;  %12302 = vmatprep.mubr.f32.mxu1 %v7143_v26 }
0x1063   : > { %v7144_v18 = vmax.f32 %v6998_v37, 0.0 }
0x1064   : > { %v7002_v42 = vpop.f32.mrb[168].mxu1 }
0x1065   : > { %v7003_v49 = vadd.f32 %v17116_v30, %v7002_v42  ;;  %v7004_v20 = vpop.f32.mrb[169].mxu1  ;;  %12303 = vmatmul.mubr.f32.gmra.mrb[226].mxu1 %v7144_v18 }
0x1067   : > { %v7145_v54 = vmax.f32 %v7003_v49, 0.0 }
0x1068   : > { %v7007_v58 = vpop.f32.mrb[170].mxu1 }
0x1069   : > { %v7008_v57 = vadd.f32 %v17116_v30, %v7007_v58  ;;  %v7009_v9 = vpop.f32.mrb[171].mxu1  ;;  %12305 = vmatprep.mubr.f32.mxu1 %v7145_v54 }
0x106b   : > { %v7146_v17 = vmax.f32 %v7008_v57, 0.0 }
0x106c   : > { %v7012_v29 = vpop.f32.mrb[172].mxu1 }
0x106d   : > { %v7013_v56 = vadd.f32 %v17116_v30, %v7012_v29  ;;  %v7014_v41 = vpop.f32.mrb[173].mxu1  ;;  %12306 = vmatmul.mubr.f32.gmra.mrb[228].mxu1 %v7146_v17 }
0x106f   : > { %v7147_v6 = vmax.f32 %v7013_v56, 0.0 }
0x1070   : > { %v7017_v24 = vpop.f32.mrb[174].mxu1 }
0x1071   : > { %v7018_v55 = vadd.f32 %v17116_v30, %v7017_v24  ;;  %v7019_v62 = vpop.f32.mrb[175].mxu1  ;;  %12308 = vmatprep.mubr.f32.mxu1 %v7147_v6 }
0x1073   : > { %v7148_v38 = vmax.f32 %v7018_v55, 0.0 }
0x1074   : > { %v7022_v47 = vpop.f32.mrb[176].mxu1 }
0x1075   : > { %v7023_v35 = vadd.f32 %v17116_v30, %v7022_v47  ;;  %v7024_v23 = vpop.f32.mrb[177].mxu1  ;;  %12309 = vmatmul.mubr.f32.gmra.mrb[230].mxu1 %v7148_v38 }
0x1077   : > { %v7149_v60 = vmax.f32 %v7023_v35, 0.0 }
0x1078   : > { %v7027_v63 = vpop.f32.mrb[178].mxu1 }
0x1079   : > { %v7028_v61 = vadd.f32 %v17116_v30, %v7027_v63  ;;  %v7029_v36 = vpop.f32.mrb[179].mxu1  ;;  %12311 = vmatprep.mubr.f32.mxu1 %v7149_v60 }
0x107b   : > { %v7150_v16 = vmax.f32 %v7028_v61, 0.0 }
0x107c   : > { %v7032_v51 = vpop.f32.mrb[180].mxu1 }
0x107d   : > { %v7033_v45 = vadd.f32 %v17116_v30, %v7032_v51  ;;  %v7034_v14 = vpop.f32.mrb[181].mxu1  ;;  %12312 = vmatmul.mubr.f32.gmra.mrb[232].mxu1 %v7150_v16 }
0x107f   : > { %v7151_v8 = vmax.f32 %v7033_v45, 0.0 }
0x1080   : > { %v7037_v52 = vpop.f32.mrb[182].mxu1 }
0x1081   : > { %v7038_v33 = vadd.f32 %v17116_v30, %v7037_v52  ;;  %v7039_v21 = vpop.f32.mrb[183].mxu1  ;;  %12314 = vmatprep.mubr.f32.mxu1 %v7151_v8 }
0x1083   : > { %v7152_v26 = vmax.f32 %v7038_v33, 0.0 }
0x1084   : > { %v7042_v32 = vpop.f32.mrb[184].mxu1 }
0x1085   : > { %v7043_v3 = vadd.f32 %v17116_v30, %v7042_v32  ;;  %v7044_v40 = vpop.f32.mrb[185].mxu1  ;;  %12315 = vmatmul.mubr.f32.gmra.mrb[234].mxu1 %v7152_v26  ;;  %v10995_v32 = vld [vmem:[%s18670_s4 + $0xe10] sm:$0xff] }
0x1087   : > { %v7153_v37 = vmax.f32 %v7043_v3, 0.0  ;;  %v10996_v3 = vld [vmem:[%s18670_s4 + $0xe20] sm:$0xff] }
0x1088   : > { %v7047_v46 = vpop.f32.mrb[186].mxu1 }
0x1089   : > { %v7048_v25 = vadd.f32 %v17116_v30, %v7047_v46  ;;  %v7049_v18 = vpop.f32.mrb[187].mxu1  ;;  %12317 = vmatprep.mubr.f32.mxu1 %v7153_v37  ;;  %v13228_v46 = vpack.c.bf16 %v10996_v3, %v10995_v32 }
0x108b   : > { %v7154_v50 = vmax.f32 %v7048_v25, 0.0  ;;  %13229 = vmatprep.subr.bf16.mxu0 %v13228_v46 }
0x108c   : > { %v7052_v19 = vpop.f32.mrb[188].mxu1  ;;  %13231 = vmatpush3.bf16.msra.mxu0 %v13228_v46 }
0x108d   : > { %v7053_v42 = vadd.f32 %v17116_v30, %v7052_v19  ;;  %v7054_v49 = vpop.f32.mrb[189].mxu1  ;;  %12318 = vmatmul.mubr.f32.gmra.mrb[236].mxu1 %v7154_v50 }
0x108f   : > { %v7155_v20 = vmax.f32 %v7053_v42, 0.0 }
0x1090   : > { %v7057_v4 = vpop.f32.mrb[190].mxu1 }
0x1091   : > { %v7058_v54 = vadd.f32 %v17116_v30, %v7057_v4  ;;  %v7059_v27 = vpop.f32.mrb[191].mxu1  ;;  %12320 = vmatprep.mubr.f32.mxu1 %v7155_v20 }
0x1093   : > { %v7156_v1 = vmax.f32 %v7058_v54, 0.0 }
0x1094   : > { %v7062_v58 = vpop.f32.mrb[192].mxu1 }
0x1095   : > { %v7063_v57 = vadd.f32 %v17116_v30, %v7062_v58  ;;  %v7064_v9 = vpop.f32.mrb[193].mxu1  ;;  %12321 = vmatmul.mubr.f32.gmra.mrb[238].mxu1 %v7156_v1 }
0x1097   : > { %v7157_v28 = vmax.f32 %v7063_v57, 0.0 }
0x1098   : > { %v7067_v17 = vpop.f32.mrb[194].mxu1 }
0x1099   : > { %v7068_v29 = vadd.f32 %v17116_v30, %v7067_v17  ;;  %v7069_v56 = vpop.f32.mrb[195].mxu1  ;;  %12323 = vmatprep.mubr.f32.mxu1 %v7157_v28 }
0x109b   : > { %v7158_v41 = vmax.f32 %v7068_v29, 0.0 }
0x109c   : > { %v7072_v6 = vpop.f32.mrb[196].mxu1 }
0x109d   : > { %v7073_v24 = vadd.f32 %v17116_v30, %v7072_v6  ;;  %v7074_v55 = vpop.f32.mrb[197].mxu1  ;;  %12324 = vmatmul.mubr.f32.gmra.mrb[240].mxu1 %v7158_v41 }
0x109f   : > { %v7159_v62 = vmax.f32 %v7073_v24, 0.0 }
0x10a0   : > { %v7077_v38 = vpop.f32.mrb[198].mxu1 }
0x10a1   : > { %v7078_v47 = vadd.f32 %v17116_v30, %v7077_v38  ;;  %v7079_v35 = vpop.f32.mrb[199].mxu1  ;;  %12326 = vmatprep.mubr.f32.mxu1 %v7159_v62 }
0x10a3   : > { %v7160_v23 = vmax.f32 %v7078_v47, 0.0 }
0x10a4   : > { %v7082_v60 = vpop.f32.mrb[200].mxu1 }
0x10a5   : > { %v7083_v63 = vadd.f32 %v17116_v30, %v7082_v60  ;;  %v7084_v61 = vpop.f32.mrb[201].mxu1  ;;  %12327 = vmatmul.mubr.f32.gmra.mrb[242].mxu1 %v7160_v23 }
0x10a7   : > { %v7161_v36 = vmax.f32 %v7083_v63, 0.0 }
0x10a8   : > { %v7087_v16 = vpop.f32.mrb[202].mxu1 }
0x10a9   : > { %v7088_v51 = vadd.f32 %v17116_v30, %v7087_v16  ;;  %v7089_v45 = vpop.f32.mrb[203].mxu1  ;;  %12329 = vmatprep.mubr.f32.mxu1 %v7161_v36 }
0x10aa   : > { %v14006_v45 = vld [vmem:[%s14393_s28 + $0x8] sm:$0xff] }
0x10ab   : > { %v7162_v14 = vmax.f32 %v7088_v51, 0.0 }
0x10ac   : > { %v7092_v8 = vpop.f32.mrb[204].mxu1 }
0x10ad   : > { %v7093_v52 = vadd.f32 %v17116_v30, %v7092_v8  ;;  %v7094_v33 = vpop.f32.mrb[205].mxu1  ;;  %12330 = vmatmul.mubr.f32.gmra.mrb[244].mxu1 %v7162_v14  ;;  %v17202_v14 = vld [vmem:[%s18670_s4 + $0xd20] ss:$0 sm:$0xff] }
0x10af   : > { %v7163_v21 = vmax.f32 %v7093_v52, 0.0 }
0x10b0   : > { %v7097_v26 = vpop.f32.mrb[206].mxu1 }
0x10b1   : > { %v7098_v40 = vadd.f32 %v17116_v30, %v7097_v26  ;;  %v7099_v37 = vpop.f32.mrb[207].mxu1  ;;  %12332 = vmatprep.mubr.f32.mxu1 %v7163_v21 }
0x10b3   : > { %v7164_v25 = vmax.f32 %v7098_v40, 0.0 }
0x10b4   : > { %v7102_v18 = vpop.f32.mrb[208].mxu1 }
0x10b5   : > { %v7103_v50 = vadd.f32 %v17116_v30, %v7102_v18  ;;  %v7104_v19 = vpop.f32.mrb[209].mxu1  ;;  %12333 = vmatmul.mubr.f32.gmra.mrb[246].mxu1 %v7164_v25 }
0x10b7   : > { %v7165_v42 = vmax.f32 %v7103_v50, 0.0 }
0x10b8   : > { %v7107_v49 = vpop.f32.mrb[210].mxu1 }
0x10b9   : > { %v7108_v20 = vadd.f32 %v17116_v30, %v7107_v49  ;;  %v7109_v4 = vpop.f32.mrb[211].mxu1  ;;  %12335 = vmatprep.mubr.f32.mxu1 %v7165_v42 }
0x10bb   : > { %v7166_v54 = vmax.f32 %v7108_v20, 0.0 }
0x10bc   : > { %v7112_v27 = vpop.f32.mrb[212].mxu1 }
0x10bd   : > { %v7113_v1 = vadd.f32 %v17116_v30, %v7112_v27  ;;  %v7114_v58 = vpop.f32.mrb[213].mxu1  ;;  %12336 = vmatmul.mubr.f32.gmra.mrb[248].mxu1 %v7166_v54 }
0x10bf   : > { %v7167_v57 = vmax.f32 %v7113_v1, 0.0 }
0x10c0   : > { %v7117_v9 = vpop.f32.mrb[214].mxu1 }
0x10c1   : > { %v7118_v28 = vadd.f32 %v17116_v30, %v7117_v9  ;;  %v7119_v17 = vpop.f32.mrb[215].mxu1  ;;  %12338 = vmatprep.mubr.f32.mxu1 %v7167_v57 }
0x10c3   : > { %v7168_v29 = vmax.f32 %v7118_v28, 0.0 }
0x10c4   : > { %v7122_v56 = vpop.f32.mrb[216].mxu1 }
0x10c5   : > { %v7123_v41 = vadd.f32 %v17116_v30, %v7122_v56  ;;  %v7124_v6 = vpop.f32.mrb[217].mxu1  ;;  %12339 = vmatmul.mubr.f32.gmra.mrb[250].mxu1 %v7168_v29 }
0x10c7   : > { %v7169_v24 = vmax.f32 %v7123_v41, 0.0 }
0x10c8   : > { %v7127_v55 = vpop.f32.mrb[218].mxu1 }
0x10c9   : > { %v7128_v62 = vadd.f32 %v17116_v30, %v7127_v55  ;;  %v7129_v38 = vpop.f32.mrb[219].mxu1  ;;  %12341 = vmatprep.mubr.f32.mxu1 %v7169_v24 }
0x10cb   : > { %v7170_v47 = vmax.f32 %v7128_v62, 0.0 }
0x10cc   : > { %v7132_v35 = vpop.f32.mrb[220].mxu1 }
0x10cd   : > { %v7133_v23 = vadd.f32 %v17116_v30, %v7132_v35  ;;  %v7134_v60 = vpop.f32.mrb[221].mxu1  ;;  %12342 = vmatmul.mubr.f32.gmra.mrb[252].mxu1 %v7170_v47 }
0x10cf   : > { %v7171_v63 = vmax.f32 %v7133_v23, 0.0 }
0x10d0   : > { %v7137_v61 = vpop.f32.mrb[222].mxu1 }
0x10d1   : > { %v7138_v36 = vadd.f32 %v17116_v30, %v7137_v61  ;;  %v7139_v16 = vpop.f32.mrb[223].mxu1  ;;  %12344 = vmatprep.mubr.f32.mxu1 %v7171_v63 }
0x10d3   : > { %v7172_v51 = vmax.f32 %v7138_v36, 0.0 }
0x10d5   : > { %12345 = vmatmul.mubr.f32.gmra.mrb[254].mxu1 %v7172_v51 }
0x10d6   : > { %7785 = vmatprep.mubr.f32.mxu1 %v14006_v45 }
0x1130   : > { %v12301_v8 = vpop.f32.mrb[224].mxu1 }
0x1131   : > { %v7262_v52 = vadd.f32 %v12301_v8, %v17202_v14  ;;  %v7256_v33 = vpop.f32.mrb[225].mxu1 }
0x1132   : > { %v7257_v21 = vadd.f32 %v17202_v14, %v7256_v33 }
0x1133   : > { %v7416_v32 = vmax.f32 %v7262_v52, 0.0 }
0x1134   : > { %v7415_v26 = vmax.f32 %v7257_v21, 0.0 }
0x1136   : > { %12379 = vmatprep.mubr.f32.mxu0 %v7415_v26 }
0x1137   : > { %12380 = vmatmul.mubr.f32.vlgmr.msra.gmra.mrb[64].mxu0 %v7416_v32 }
0x1138   : > { %v12304_v30 = vpop.f32.mrb[226].mxu1 }
0x1139   : > { %v7272_v3 = vadd.f32 %v12304_v30, %v17202_v14  ;;  %v7266_v40 = vpop.f32.mrb[227].mxu1 }
0x113a   : > { %v7267_v37 = vadd.f32 %v17202_v14, %v7266_v40 }
0x113b   : > { %v7418_v25 = vmax.f32 %v7272_v3, 0.0 }
0x113c   : > { %v7417_v46 = vmax.f32 %v7267_v37, 0.0 }
0x113e   : > { %12382 = vmatprep.mubr.f32.mxu0 %v7417_v46 }
0x113f   : > { %12383 = vmatmul.mubr.f32.gmra.mrb[66].mxu0 %v7418_v25 }
0x1140   : > { %v12307_v18 = vpop.f32.mrb[228].mxu1 }
0x1141   : > { %v7282_v50 = vadd.f32 %v12307_v18, %v17202_v14  ;;  %v7276_v19 = vpop.f32.mrb[229].mxu1 }
0x1142   : > { %v7277_v42 = vadd.f32 %v17202_v14, %v7276_v19 }
0x1143   : > { %v7420_v20 = vmax.f32 %v7282_v50, 0.0 }
0x1144   : > { %v7419_v49 = vmax.f32 %v7277_v42, 0.0 }
0x1146   : > { %12385 = vmatprep.mubr.f32.mxu0 %v7419_v49 }
0x1147   : > { %12386 = vmatmul.mubr.f32.gmra.mrb[68].mxu0 %v7420_v20 }
0x1148   : > { %v12310_v4 = vpop.f32.mrb[230].mxu1 }
0x1149   : > { %v7292_v54 = vadd.f32 %v12310_v4, %v17202_v14  ;;  %v7286_v27 = vpop.f32.mrb[231].mxu1 }
0x114a   : > { %v7287_v1 = vadd.f32 %v17202_v14, %v7286_v27 }
0x114b   : > { %v7422_v57 = vmax.f32 %v7292_v54, 0.0 }
0x114c   : > { %v7421_v58 = vmax.f32 %v7287_v1, 0.0 }
0x114e   : > { %12388 = vmatprep.mubr.f32.mxu0 %v7421_v58 }
0x114f   : > { %12389 = vmatmul.mubr.f32.gmra.mrb[70].mxu0 %v7422_v57 }
0x1150   : > { %v12313_v9 = vpop.f32.mrb[232].mxu1 }
0x1151   : > { %v7302_v28 = vadd.f32 %v12313_v9, %v17202_v14  ;;  %v7296_v17 = vpop.f32.mrb[233].mxu1 }
0x1152   : > { %v7297_v29 = vadd.f32 %v17202_v14, %v7296_v17 }
0x1153   : > { %v7424_v41 = vmax.f32 %v7302_v28, 0.0 }
0x1154   : > { %v7423_v56 = vmax.f32 %v7297_v29, 0.0 }
0x1156   : > { %12391 = vmatprep.mubr.f32.mxu0 %v7423_v56 }
0x1157   : > { %12392 = vmatmul.mubr.f32.gmra.mrb[72].mxu0 %v7424_v41 }
0x1158   : > { %v12316_v6 = vpop.f32.mrb[234].mxu1 }
0x1159   : > { %v7312_v24 = vadd.f32 %v12316_v6, %v17202_v14  ;;  %v7306_v55 = vpop.f32.mrb[235].mxu1 }
0x115a   : > { %v7307_v62 = vadd.f32 %v17202_v14, %v7306_v55 }
0x115b   : > { %v7426_v47 = vmax.f32 %v7312_v24, 0.0 }
0x115c   : > { %v7425_v38 = vmax.f32 %v7307_v62, 0.0 }
0x115e   : > { %12394 = vmatprep.mubr.f32.mxu0 %v7425_v38 }
0x115f   : > { %12395 = vmatmul.mubr.f32.gmra.mrb[74].mxu0 %v7426_v47 }
0x1160   : > { %v12319_v35 = vpop.f32.mrb[236].mxu1 }
0x1161   : > { %v7322_v23 = vadd.f32 %v12319_v35, %v17202_v14  ;;  %v7316_v60 = vpop.f32.mrb[237].mxu1 }
0x1162   : > { %v7317_v63 = vadd.f32 %v17202_v14, %v7316_v60 }
0x1163   : > { %v7428_v36 = vmax.f32 %v7322_v23, 0.0 }
0x1164   : > { %v7427_v61 = vmax.f32 %v7317_v63, 0.0 }
0x1166   : > { %12397 = vmatprep.mubr.f32.mxu0 %v7427_v61 }
0x1167   : > { %12398 = vmatmul.mubr.f32.gmra.mrb[76].mxu0 %v7428_v36 }
0x1168   : > { %v12322_v16 = vpop.f32.mrb[238].mxu1 }
0x1169   : > { %v7332_v51 = vadd.f32 %v12322_v16, %v17202_v14  ;;  %v7326_v45 = vpop.f32.mrb[239].mxu1 }
0x116a   : > { %v7327_v8 = vadd.f32 %v17202_v14, %v7326_v45 }
0x116b   : > { %v7430_v33 = vmax.f32 %v7332_v51, 0.0 }
0x116c   : > { %v7429_v52 = vmax.f32 %v7327_v8, 0.0 }
0x116e   : > { %12400 = vmatprep.mubr.f32.mxu0 %v7429_v52 }
0x116f   : > { %12401 = vmatmul.mubr.f32.gmra.mrb[78].mxu0 %v7430_v33 }
0x1170   : > { %v12325_v21 = vpop.f32.mrb[240].mxu1 }
0x1171   : > { %v7342_v26 = vadd.f32 %v12325_v21, %v17202_v14  ;;  %v7336_v32 = vpop.f32.mrb[241].mxu1 }
0x1172   : > { %v7337_v30 = vadd.f32 %v17202_v14, %v7336_v32 }
0x1173   : > { %v7432_v40 = vmax.f32 %v7342_v26, 0.0 }
0x1174   : > { %v7431_v3 = vmax.f32 %v7337_v30, 0.0  ;;  %v17240_v30 = vld [vmem:[%s18670_s4 + $0xe30] ss:$0 sm:$0xff] }
0x1176   : > { %12403 = vmatprep.mubr.f32.mxu0 %v7431_v3 }
0x1177   : > { %12404 = vmatmul.mubr.f32.gmra.mrb[80].mxu0 %v7432_v40 }
0x1178   : > { %v12328_v37 = vpop.f32.mrb[242].mxu1 }
0x1179   : > { %v7352_v46 = vadd.f32 %v12328_v37, %v17202_v14  ;;  %v7346_v25 = vpop.f32.mrb[243].mxu1 }
0x117a   : > { %v7347_v18 = vadd.f32 %v17202_v14, %v7346_v25 }
0x117b   : > { %v7434_v19 = vmax.f32 %v7352_v46, 0.0 }
0x117c   : > { %v7433_v50 = vmax.f32 %v7347_v18, 0.0 }
0x117e   : > { %12406 = vmatprep.mubr.f32.mxu0 %v7433_v50 }
0x117f   : > { %12407 = vmatmul.mubr.f32.gmra.mrb[82].mxu0 %v7434_v19 }
0x1180   : > { %v12331_v42 = vpop.f32.mrb[244].mxu1 }
0x1181   : > { %v7362_v49 = vadd.f32 %v12331_v42, %v17202_v14  ;;  %v7356_v20 = vpop.f32.mrb[245].mxu1 }
0x1182   : > { %v7357_v4 = vadd.f32 %v17202_v14, %v7356_v20 }
0x1183   : > { %v7436_v27 = vmax.f32 %v7362_v49, 0.0 }
0x1184   : > { %v7435_v54 = vmax.f32 %v7357_v4, 0.0 }
0x1186   : > { %12409 = vmatprep.mubr.f32.mxu0 %v7435_v54 }
0x1187   : > { %12410 = vmatmul.mubr.f32.gmra.mrb[84].mxu0 %v7436_v27 }
0x1188   : > { %v12334_v1 = vpop.f32.mrb[246].mxu1 }
0x1189   : > { %v7372_v58 = vadd.f32 %v12334_v1, %v17202_v14  ;;  %v7366_v57 = vpop.f32.mrb[247].mxu1 }
0x118a   : > { %v7367_v9 = vadd.f32 %v17202_v14, %v7366_v57 }
0x118b   : > { %v7438_v17 = vmax.f32 %v7372_v58, 0.0 }
0x118c   : > { %v7437_v28 = vmax.f32 %v7367_v9, 0.0 }
0x118e   : > { %12412 = vmatprep.mubr.f32.mxu0 %v7437_v28 }
0x118f   : > { %12413 = vmatmul.mubr.f32.gmra.mrb[86].mxu0 %v7438_v17 }
0x1190   : > { %v12337_v29 = vpop.f32.mrb[248].mxu1 }
0x1191   : > { %v7382_v56 = vadd.f32 %v12337_v29, %v17202_v14  ;;  %v7376_v41 = vpop.f32.mrb[249].mxu1 }
0x1192   : > { %v7377_v6 = vadd.f32 %v17202_v14, %v7376_v41 }
0x1193   : > { %v7440_v55 = vmax.f32 %v7382_v56, 0.0 }
0x1194   : > { %v7439_v24 = vmax.f32 %v7377_v6, 0.0 }
0x1196   : > { %12415 = vmatprep.mubr.f32.mxu0 %v7439_v24 }
0x1197   : > { %12416 = vmatmul.mubr.f32.gmra.mrb[88].mxu0 %v7440_v55  ;;  %v18915_v55 = vld [vmem:[#allocation2_spill] sm:$0xff] }
0x1198   : > { %v12340_v62 = vpop.f32.mrb[250].mxu1 }
0x1199   : > { %v7392_v38 = vadd.f32 %v12340_v62, %v17202_v14  ;;  %v7386_v47 = vpop.f32.mrb[251].mxu1  ;;  %v11027_v62 = vld [vmem:[%s18670_s4 + $0xf28] sm:$0xff] }
0x119a   : > { %v7387_v35 = vadd.f32 %v17202_v14, %v7386_v47 }
0x119b   : > { %v7442_v60 = vmax.f32 %v7392_v38, 0.0 }
0x119c   : > { %v7441_v23 = vmax.f32 %v7387_v35, 0.0 }
0x119e   : > { %12418 = vmatprep.mubr.f32.mxu0 %v7441_v23 }
0x119f   : > { %12419 = vmatmul.mubr.f32.gmra.mrb[90].mxu0 %v7442_v60 }
0x11a0   : > { %v12343_v63 = vpop.f32.mrb[252].mxu1 }
0x11a1   : > { %v7402_v61 = vadd.f32 %v12343_v63, %v17202_v14  ;;  %v7396_v36 = vpop.f32.mrb[253].mxu1 }
0x11a2   : > { %v7397_v16 = vadd.f32 %v17202_v14, %v7396_v36 }
0x11a3   : > { %v7444_v45 = vmax.f32 %v7402_v61, 0.0  ;;  %v18917_v61 = vld [vmem:[#allocation3_spill] sm:$0xff] }
0x11a4   : > { %v7443_v51 = vmax.f32 %v7397_v16, 0.0 }
0x11a6   : > { %12421 = vmatprep.mubr.f32.mxu0 %v7443_v51  ;;  %v18919_v51 = vld [vmem:[#allocation4_spill] sm:$0xff] }
0x11a7   : > { %12422 = vmatmul.mubr.f32.gmra.mrb[92].mxu0 %v7444_v45 }
0x11a8   : > { %v12346_v8 = vpop.f32.mrb[254].mxu1 }
0x11a9   : > { %v7412_v52 = vadd.f32 %v12346_v8, %v17202_v14  ;;  %v7406_v33 = vpop.f32.mrb[255].mxu1 }
0x11aa   : > { %v7407_v21 = vadd.f32 %v17202_v14, %v7406_v33 }
0x11ab   : > { %v7446_v32 = vmax.f32 %v7412_v52, 0.0 }
0x11ac   : > { %v7445_v26 = vmax.f32 %v7407_v21, 0.0 }
0x11ae   : > { %12424 = vmatprep.mubr.f32.mxu0 %v7445_v26 }
0x11af   : > { %12425 = vmatmul.mubr.f32.gmra.mrb[94].mxu0 %v7446_v32 }
0x11b0   : > { %8139 = vmatprep.mubr.f32.mxu0 %v18847_v44 }
0x120a   : > { %v12381_v3 = vpop.f32.mrb[64].mxu0 }
0x120b   : > { %v7536_v40 = vadd.f32 %v12381_v3, %v17240_v30  ;;  %v7530_v37 = vpop.f32.mrb[65].mxu0  ;;  %v18921_v3 = vld [vmem:[#allocation5_spill] sm:$0xff] }
0x120c   : > { %v7531_v46 = vadd.f32 %v17240_v30, %v7530_v37 }
0x120d   : > { %v17247_v14 = vsel %vm3596_vm4, %v7536_v40, %v14402_v0  ;;  %v18922_v40 = vld [vmem:[#allocation30_spill] sm:$0xff] }
0x120e   : > { %v17252_v25 = vsel %vm3595_vm5, %v7531_v46, %v14405_v2  ;;  %vm18923_vm14 = vcmp.eq.s32.totalorder %v18922_v40, 1  ;;  %v18924_v46 = vld [vmem:[#allocation6_spill] sm:$0xff] }
0x120f   : > { %v13233_v18 = vpack.c.bf16 %v17247_v14, %v17252_v25 }
0x1211   : > { %13234 = vmatpush1.bf16.msra.mxu1 %v13233_v18 }
0x1212   : > { %v12384_v50 = vpop.f32.mrb[66].mxu0  ;;  %13235 = vmatprep.subr.bf16.mxu1 %v18828_v22 }
0x1213   : > { %v7546_v19 = vadd.f32 %v12384_v50, %v17240_v30  ;;  %v7540_v42 = vpop.f32.mrb[67].mxu0 }
0x1214   : > { %v7541_v49 = vadd.f32 %v17240_v30, %v7540_v42 }
0x1215   : > { %v17262_v20 = vsel %vm3598_vm6, %v7546_v19, %v14410_v5 }
0x1216   : > { %v17267_v4 = vsel %vm3597_vm7, %v7541_v49, %v14413_v7 }
0x1217   : > { %v13236_v54 = vpack.c.bf16 %v17262_v20, %v17267_v4 }
0x1219   : > { %13237 = vmatpush1.bf16.msra.mxu1 %v13236_v54 }
0x121a   : > { %v12387_v27 = vpop.f32.mrb[68].mxu0  ;;  %13238 = vmatprep.subr.bf16.mxu1 %v18828_v22 }
0x121b   : > { %v7556_v1 = vadd.f32 %v12387_v27, %v17240_v30  ;;  %v7550_v58 = vpop.f32.mrb[69].mxu0 }
0x121c   : > { %v7551_v57 = vadd.f32 %v17240_v30, %v7550_v58  ;;  %v18927_v58 = vld [vmem:[#allocation32_spill] sm:$0xff] }
0x121d   : > { %v17277_v9 = vsel %vm3600_vm8, %v7556_v1, %v14419_v10  ;;  %v18926_v1 = vld [vmem:[#allocation7_spill] sm:$0xff]  ;;  %vm18928_vm2 = vcmp.eq.s32.totalorder %v18927_v58, 1 }
0x121e   : > { %v17282_v28 = vsel %vm3599_vm9, %v7551_v57, %v14422_v12 }
0x121f   : > { %v13239_v17 = vpack.c.bf16 %v17277_v9, %v17282_v28 }
0x1221   : > { %13240 = vmatpush1.bf16.msra.mxu1 %v13239_v17  ;;  %v18929_v17 = vld [vmem:[#allocation8_spill] sm:$0xff] }
0x1222   : > { %v12390_v29 = vpop.f32.mrb[70].mxu0  ;;  %13241 = vmatprep.subr.bf16.mxu1 %v18828_v22 }
0x1223   : > { %v7566_v56 = vadd.f32 %v12390_v29, %v17240_v30  ;;  %v7560_v41 = vpop.f32.mrb[71].mxu0  ;;  %v18930_v29 = vld [vmem:[#allocation33_spill] sm:$0xff] }
0x1224   : > { %v7561_v6 = vadd.f32 %v17240_v30, %v7560_v41 }
0x1225   : > { %v17292_v24 = vsel %vm3602_vm10, %v7566_v56, %v14428_v15 }
0x1226   : > { %v17297_v38 = vsel %vm3601_vm11, %v7561_v6, %v18915_v55 }
0x1227   : > { %v13242_v47 = vpack.c.bf16 %v17292_v24, %v17297_v38 }
0x1229   : > { %13243 = vmatpush1.bf16.msra.mxu1 %v13242_v47 }
0x122a   : > { %v12393_v35 = vpop.f32.mrb[72].mxu0  ;;  %13244 = vmatprep.subr.bf16.mxu1 %v18828_v22 }
0x122b   : > { %v7576_v23 = vadd.f32 %v12393_v35, %v17240_v30  ;;  %v7570_v60 = vpop.f32.mrb[73].mxu0 }
0x122c   : > { %v7571_v63 = vadd.f32 %v17240_v30, %v7570_v60  ;;  %v18932_v60 = vld [vmem:[#allocation9_spill] sm:$0xff] }
0x122d   : > { %v17307_v16 = vsel %vm3604_vm12, %v7576_v23, %v18917_v61  ;;  %v11022_v61 = vld [vmem:[%s18670_s4 + $0xf00] sm:$0xff] }
0x122e   : > { %v17312_v8 = vsel %vm3603_vm13, %v7571_v63, %v18919_v51  ;;  %v18933_v63 = vld [vmem:[#allocation34_spill] sm:$0xff] }
0x122f   : > { %v13245_v52 = vpack.c.bf16 %v17307_v16, %v17312_v8 }
0x1231   : > { %13246 = vmatpush1.bf16.msra.mxu1 %v13245_v52 }
0x1232   : > { %v12396_v33 = vpop.f32.mrb[74].mxu0  ;;  %13247 = vmatprep.subr.bf16.mxu1 %v18828_v22 }
0x1233   : > { %v7586_v21 = vadd.f32 %v12396_v33, %v17240_v30  ;;  %v7580_v26 = vpop.f32.mrb[75].mxu0  ;;  %v18935_v33 = vld [vmem:[#allocation10_spill] sm:$0xff] }
0x1234   : > { %v7581_v32 = vadd.f32 %v17240_v30, %v7580_v26 }
0x1235   : > { %v17322_v37 = vsel %vm18923_vm14, %v7586_v21, %v18921_v3  ;;  %vm18931_vm14 = vcmp.eq.s32.totalorder %v18930_v29, 1  ;;  %v18936_v21 = vld [vmem:[#allocation35_spill] sm:$0xff] }
0x1236   : > { %v17327_v50 = vsel %vm3605_vm15, %v7581_v32, %v18924_v46 }
0x1237   : > { %v13248_v19 = vpack.c.bf16 %v17322_v37, %v17327_v50 }
0x1239   : > { %13249 = vmatpush1.bf16.msra.mxu1 %v13248_v19 }
0x123a   : > { %v12399_v42 = vpop.f32.mrb[76].mxu0  ;;  %13250 = vmatprep.subr.bf16.mxu1 %v18828_v22 }
0x123b   : > { %v7596_v49 = vadd.f32 %v12399_v42, %v17240_v30  ;;  %v7590_v54 = vpop.f32.mrb[77].mxu0 }
0x123c   : > { %v7591_v27 = vadd.f32 %v17240_v30, %v7590_v54 }
0x123d   : > { %v17337_v57 = vsel %vm18928_vm2, %v7596_v49, %v18926_v1  ;;  %vm18934_vm2 = vcmp.eq.s32.totalorder %v18933_v63, 1 }
0x123e   : > { %v17342_v56 = vsel %vm18931_vm14, %v7591_v27, %v18929_v17  ;;  %vm18937_vm14 = vcmp.eq.s32.totalorder %v18936_v21, 1  ;;  %v18938_v27 = vld [vmem:[#allocation11_spill] sm:$0xff] }
0x123f   : > { %v13251_v41 = vpack.c.bf16 %v17337_v57, %v17342_v56 }
0x1241   : > { %13252 = vmatpush1.bf16.msra.mxu1 %v13251_v41  ;;  %v18939_v41 = vld [vmem:[#allocation36_spill] sm:$0xff] }
0x1242   : > { %v12402_v6 = vpop.f32.mrb[78].mxu0  ;;  %13253 = vmatprep.subr.bf16.mxu1 %v18828_v22 }
0x1243   : > { %v7606_v47 = vadd.f32 %v12402_v6, %v17240_v30  ;;  %v7600_v35 = vpop.f32.mrb[79].mxu0 }
0x1244   : > { %v7601_v23 = vadd.f32 %v17240_v30, %v7600_v35  ;;  %v18942_v35 = vld [vmem:[#allocation37_spill] sm:$0xff] }
0x1245   : > { %v17352_v52 = vsel %vm18934_vm2, %v7606_v47, %v18932_v60  ;;  %vm18940_vm2 = vcmp.eq.s32.totalorder %v18939_v41, 1  ;;  %v18941_v47 = vld [vmem:[#allocation12_spill] sm:$0xff]  ;;  %v18944_v41 = vld [vmem:[#allocation13_spill] sm:$0xff] }
0x1246   : > { %v17357_v26 = vsel %vm18937_vm14, %v7601_v23, %v18935_v33  ;;  %vm18943_vm14 = vcmp.eq.s32.totalorder %v18942_v35, 1  ;;  %v18947_v35 = vld [vmem:[#allocation14_spill] sm:$0xff] }
0x1247   : > { %v13254_v32 = vpack.c.bf16 %v17352_v52, %v17357_v26 }
0x1249   : > { %13255 = vmatpush1.bf16.msra.mxu1 %v13254_v32 }
0x124a   : > { %v12405_v19 = vpop.f32.mrb[80].mxu0  ;;  %13256 = vmatprep.subr.bf16.mxu1 %v18828_v22 }
0x124b   : > { %v7616_v42 = vadd.f32 %v12405_v19, %v17240_v30  ;;  %v7610_v49 = vpop.f32.mrb[81].mxu0 }
0x124c   : > { %v7611_v54 = vadd.f32 %v17240_v30, %v7610_v49 }
0x124d   : > { %v17367_v6 = vsel %vm18940_vm2, %v7616_v42, %v18938_v27  ;;  %v18945_v42 = vld [vmem:[#allocation38_spill] sm:$0xff] }
0x124e   : > { %v17372_v23 = vsel %vm18943_vm14, %v7611_v54, %v18941_v47  ;;  %vm18946_vm2 = vcmp.eq.s32.totalorder %v18945_v42, 1  ;;  %v18948_v54 = vld [vmem:[#allocation39_spill] sm:$0xff] }
0x124f   : > { %v13257_v32 = vpack.c.bf16 %v17367_v6, %v17372_v23  ;;  %vm18949_vm14 = vcmp.eq.s32.totalorder %v18948_v54, 1  ;;  %v18950_v42 = vld [vmem:[#allocation15_spill] sm:$0xff]  ;;  %v18953_v54 = vld [vmem:[#allocation16_spill] sm:$0xff] }
0x1251   : > { %13258 = vmatpush1.bf16.msra.mxu1 %v13257_v32 }
0x1252   : > { %v12408_v21 = vpop.f32.mrb[82].mxu0  ;;  %13259 = vmatprep.subr.bf16.mxu1 %v18828_v22 }
0x1253   : > { %v7626_v19 = vadd.f32 %v12408_v21, %v17240_v30  ;;  %v7620_v49 = vpop.f32.mrb[83].mxu0 }
0x1254   : > { %v7621_v33 = vadd.f32 %v17240_v30, %v7620_v49 }
0x1255   : > { %v17382_v27 = vsel %vm18946_vm2, %v7626_v19, %v18944_v41  ;;  %v18951_v19 = vld [vmem:[#allocation40_spill] sm:$0xff] }
0x1256   : > { %v17387_v47 = vsel %vm18949_vm14, %v7621_v33, %v18947_v35  ;;  %vm18952_vm2 = vcmp.eq.s32.totalorder %v18951_v19, 1  ;;  %v18954_v33 = vld [vmem:[#allocation41_spill] sm:$0xff] }
0x1257   : > { %v13260_v32 = vpack.c.bf16 %v17382_v27, %v17387_v47  ;;  %vm18955_vm14 = vcmp.eq.s32.totalorder %v18954_v33, 1  ;;  %v18956_v19 = vld [vmem:[#allocation17_spill] sm:$0xff]  ;;  %v18959_v33 = vld [vmem:[#allocation18_spill] sm:$0xff] }
0x1259   : > { %13261 = vmatpush1.bf16.msra.mxu1 %v13260_v32 }
0x125a   : > { %v12411_v63 = vpop.f32.mrb[84].mxu0  ;;  %13262 = vmatprep.subr.bf16.mxu1 %v18828_v22 }
0x125b   : > { %v7636_v21 = vadd.f32 %v12411_v63, %v17240_v30  ;;  %v7630_v49 = vpop.f32.mrb[85].mxu0 }
0x125c   : > { %v7631_v60 = vadd.f32 %v17240_v30, %v7630_v49 }
0x125d   : > { %v17397_v41 = vsel %vm18952_vm2, %v7636_v21, %v18950_v42  ;;  %v18957_v21 = vld [vmem:[#allocation42_spill] sm:$0xff] }
0x125e   : > { %v17402_v35 = vsel %vm18955_vm14, %v7631_v60, %v18953_v54  ;;  %vm18958_vm2 = vcmp.eq.s32.totalorder %v18957_v21, 1  ;;  %v18960_v60 = vld [vmem:[#allocation43_spill] sm:$0xff] }
0x125f   : > { %v13263_v32 = vpack.c.bf16 %v17397_v41, %v17402_v35  ;;  %vm18961_vm14 = vcmp.eq.s32.totalorder %v18960_v60, 1  ;;  %v18962_v21 = vld [vmem:[#allocation19_spill] sm:$0xff]  ;;  %v18965_v60 = vld [vmem:[#allocation20_spill] sm:$0xff] }
0x1261   : > { %13264 = vmatpush1.bf16.msra.mxu1 %v13263_v32 }
0x1262   : > { %v12414_v29 = vpop.f32.mrb[86].mxu0  ;;  %13265 = vmatprep.subr.bf16.mxu1 %v18828_v22 }
0x1263   : > { %v7646_v63 = vadd.f32 %v12414_v29, %v17240_v30  ;;  %v7640_v49 = vpop.f32.mrb[87].mxu0 }
0x1264   : > { %v7641_v17 = vadd.f32 %v17240_v30, %v7640_v49 }
0x1265   : > { %v17412_v42 = vsel %vm18958_vm2, %v7646_v63, %v18956_v19  ;;  %v18963_v63 = vld [vmem:[#allocation44_spill] sm:$0xff] }
0x1266   : > { %v17417_v54 = vsel %vm18961_vm14, %v7641_v17, %v18959_v33  ;;  %vm18964_vm2 = vcmp.eq.s32.totalorder %v18963_v63, 1  ;;  %v18966_v17 = vld [vmem:[#allocation45_spill] sm:$0xff] }
0x1267   : > { %v13266_v32 = vpack.c.bf16 %v17412_v42, %v17417_v54  ;;  %vm18967_vm14 = vcmp.eq.s32.totalorder %v18966_v17, 1  ;;  %v18968_v63 = vld [vmem:[#allocation21_spill] sm:$0xff]  ;;  %v18971_v17 = vld [vmem:[#allocation22_spill] sm:$0xff] }
0x1269   : > { %13267 = vmatpush1.bf16.msra.mxu1 %v13266_v32 }
0x126a   : > { %v12417_v58 = vpop.f32.mrb[88].mxu0  ;;  %13268 = vmatprep.subr.bf16.mxu1 %v18828_v22 }
0x126b   : > { %v7656_v29 = vadd.f32 %v12417_v58, %v17240_v30  ;;  %v7650_v49 = vpop.f32.mrb[89].mxu0 }
0x126c   : > { %v7651_v1 = vadd.f32 %v17240_v30, %v7650_v49 }
0x126d   : > { %v17427_v19 = vsel %vm18964_vm2, %v7656_v29, %v18962_v21  ;;  %v18969_v29 = vld [vmem:[#allocation46_spill] sm:$0xff] }
0x126e   : > { %v17432_v33 = vsel %vm18967_vm14, %v7651_v1, %v18965_v60  ;;  %vm18970_vm2 = vcmp.eq.s32.totalorder %v18969_v29, 1  ;;  %v18972_v1 = vld [vmem:[#allocation47_spill] sm:$0xff] }
0x126f   : > { %v13269_v32 = vpack.c.bf16 %v17427_v19, %v17432_v33  ;;  %vm18973_vm14 = vcmp.eq.s32.totalorder %v18972_v1, 1  ;;  %v18974_v29 = vld [vmem:[#allocation23_spill] sm:$0xff]  ;;  %v18977_v1 = vld [vmem:[#allocation24_spill] sm:$0xff] }
0x1271   : > { %13270 = vmatpush1.bf16.msra.mxu1 %v13269_v32 }
0x1272   : > { %v12420_v18 = vpop.f32.mrb[90].mxu0  ;;  %13271 = vmatprep.subr.bf16.mxu1 %v18828_v22 }
0x1273   : > { %v7666_v58 = vadd.f32 %v12420_v18, %v17240_v30  ;;  %v7660_v49 = vpop.f32.mrb[91].mxu0 }
0x1274   : > { %v7661_v46 = vadd.f32 %v17240_v30, %v7660_v49 }
0x1275   : > { %v17442_v21 = vsel %vm18970_vm2, %v7666_v58, %v18968_v63  ;;  %v18975_v58 = vld [vmem:[#allocation48_spill] sm:$0xff] }
0x1276   : > { %v17447_v60 = vsel %vm18973_vm14, %v7661_v46, %v18971_v17  ;;  %vm18976_vm2 = vcmp.eq.s32.totalorder %v18975_v58, 1  ;;  %v18978_v46 = vld [vmem:[#allocation49_spill] sm:$0xff] }
0x1277   : > { %v13272_v32 = vpack.c.bf16 %v17442_v21, %v17447_v60  ;;  %vm18979_vm14 = vcmp.eq.s32.totalorder %v18978_v46, 1  ;;  %v18980_v58 = vld [vmem:[#allocation25_spill] sm:$0xff]  ;;  %v18982_v46 = vld [vmem:[#allocation26_spill] sm:$0xff] }
0x1279   : > { %13273 = vmatpush1.bf16.msra.mxu1 %v13272_v32 }
0x127a   : > { %v12423_v40 = vpop.f32.mrb[92].mxu0  ;;  %13274 = vmatprep.subr.bf16.mxu1 %v18828_v22 }
0x127b   : > { %v7676_v18 = vadd.f32 %v12423_v40, %v17240_v30  ;;  %v7670_v49 = vpop.f32.mrb[93].mxu0 }
0x127c   : > { %v7671_v3 = vadd.f32 %v17240_v30, %v7670_v49 }
0x127d   : > { %v17457_v63 = vsel %vm18976_vm2, %v7676_v18, %v18974_v29 }
0x127e   : > { %v17462_v17 = vsel %vm18979_vm14, %v7671_v3, %v18977_v1  ;;  %v11019_v3 = vld [vmem:[%s18670_s4 + $0xee8] sm:$0xff] }
0x127f   : > { %v13275_v32 = vpack.c.bf16 %v17457_v63, %v17462_v17 }
0x1281   : > { %13276 = vmatpush1.bf16.msra.mxu1 %v13275_v32 }
0x1282   : > { %v12426_v45 = vpop.f32.mrb[94].mxu0  ;;  %13277 = vmatprep.subr.bf16.mxu1 %v18828_v22 }
0x1283   : > { %v7686_v40 = vadd.f32 %v12426_v45, %v17240_v30  ;;  %v7680_v49 = vpop.f32.mrb[95].mxu0  ;;  %v11015_v45 = vld [vmem:[%s18670_s4 + $0xec8] sm:$0xff] }
0x1284   : > { %v7681_v51 = vadd.f32 %v17240_v30, %v7680_v49  ;;  %v11017_v30 = vld [vmem:[%s18670_s4 + $0xed8] sm:$0xff] }
0x1285   : > { %v17472_v29 = vsel %vm3626_vm3, %v7686_v40, %v18980_v58  ;;  %v11014_v40 = vld [vmem:[%s18670_s4 + $0xec0] sm:$0xff]  ;;  %v13280_v49 = vpack.c.bf16 %v11017_v30, %v11015_v45  ;;  %v11020_v45 = vld [vmem:[%s18670_s4 + $0xef0] sm:$0xff]  ;;  %v11023_v30 = vld [vmem:[%s18670_s4 + $0xf08] sm:$0xff] }
0x1286   : > { %v17477_v1 = vsel %vm3625_vm0, %v7681_v51, %v18982_v46  ;;  %v11016_v51 = vld [vmem:[%s18670_s4 + $0xed0] sm:$0xff]  ;;  %v11021_v46 = vld [vmem:[%s18670_s4 + $0xef8] sm:$0xff] }
0x1287   : > { %v13278_v32 = vpack.c.bf16 %v17472_v29, %v17477_v1  ;;  %v13282_v18 = vpack.c.bf16 %v11016_v51, %v11014_v40  ;;  %v13284_v58 = vpack.c.bf16 %v11021_v46, %v11019_v3  ;;  %13281 = vmatprep.subr.bf16.mxu0 %v13280_v49  ;;  %v11025_v46 = vld [vmem:[%s18670_s4 + $0xf18] sm:$0xff]  ;;  %v14007_v3 = vld [vmem:[%s14393_s28] sm:$0xff]  ;;  %v11024_v49 = vld [vmem:[%s18670_s4 + $0xf10] sm:$0xff] }
0x1288   : > { %v14008_v51 = vld [vmem:[%s14393_s28 + $0x18] sm:$0xff]  ;;  %v13288_v36 = vpack.c.bf16 %v11025_v46, %v11023_v30  ;;  %v11026_v46 = vld [vmem:[%s18670_s4 + $0xf20] sm:$0xff] }
0x1289   : > { %13279 = vmatpush1.bf16.msra.mxu1 %v13278_v32  ;;  %v11018_v32 = vld [vmem:[%s18670_s4 + $0xee0] sm:$0xff]  ;;  %13283 = vmatpush1.bf16.msra.mxu0 %v13282_v18  ;;  %v11029_v18 = vld [vmem:[%s18670_s4 + $0xf38] sm:$0xff] }
0x128a   : > { %13312 = vmatprep.subr.bf16.mxu1 %v18828_v22  ;;  %v13286_v40 = vpack.c.bf16 %v11020_v45, %v11018_v32  ;;  %13285 = vmatprep.subr.bf16.mxu0 %v13284_v58  ;;  %v14009_v58 = vld [vmem:[%s14393_s28 + $0x10] sm:$0xff]  ;;  %v13290_v32 = vpack.c.bf16 %v11024_v49, %v11022_v61  ;;  %v14010_v45 = vld [vmem:[%s14393_s28 + $0x28] sm:$0xff]  ;;  %v13292_v30 = vpack.c.bf16 %v11029_v18, %v11027_v62  ;;  %v14015_v49 = vld [vmem:[%s14393_s28 + $0x40] sm:$0xff] }
0x128b   : > { %v14013_v62 = vld [vmem:[%s14393_s28 + $0x30] sm:$0xff]  ;;  %v14016_v18 = vld [vmem:[%s14393_s28 + $0x58] sm:$0xff] }
0x128c   : > { %7786 = vmatmul.mubr.f32.vlgmr.msra.gmra.mrb[0].mxu1 %v14007_v3  ;;  %v11028_v3 = vld [vmem:[%s18670_s4 + $0xf30] sm:$0xff] }
0x128d   : > { %7790 = vmatprep.mubr.f32.mxu1 %v14008_v51  ;;  %13287 = vmatpush1.bf16.msra.mxu0 %v13286_v40  ;;  %v14011_v51 = vld [vmem:[%s14393_s28 + $0x20] sm:$0xff]  ;;  %v13294_v61 = vpack.c.bf16 %v11028_v3, %v11026_v46  ;;  %v14012_v40 = vld [vmem:[%s14393_s28 + $0x38] sm:$0xff]  ;;  %v14021_v46 = vld [vmem:[%s14393_s28 + $0x70] sm:$0xff] }
0x128e   : > { %13289 = vmatprep.subr.bf16.mxu0 %v13288_v36  ;;  %v14014_v36 = vld [vmem:[%s14393_s28 + $0x48] sm:$0xff] }
0x128f   : > { %v14022_v3 = vld [vmem:[%s14393_s28 + $0x88] sm:$0xff] }
0x1290   : > { %7791 = vmatmul.mubr.f32.gmra.mrb[2].mxu1 %v14009_v58  ;;  %v14017_v58 = vld [vmem:[%s14393_s28 + $0x50] sm:$0xff] }
0x1291   : > { %7795 = vmatprep.mubr.f32.mxu1 %v14010_v45  ;;  %13291 = vmatpush1.bf16.msra.mxu0 %v13290_v32  ;;  %v14018_v32 = vld [vmem:[%s14393_s28 + $0x68] sm:$0xff]  ;;  %v14019_v45 = vld [vmem:[%s14393_s28 + $0x60] sm:$0xff] }
0x1292   : > { %13293 = vmatprep.subr.bf16.mxu0 %v13292_v30  ;;  %v14020_v30 = vld [vmem:[%s14393_s28 + $0x78] sm:$0xff] }
0x1294   : > { %7796 = vmatmul.mubr.f32.gmra.mrb[4].mxu1 %v14011_v51  ;;  %v14023_v51 = vld [vmem:[%s14393_s28 + $0x80] sm:$0xff] }
0x1295   : > { %7800 = vmatprep.mubr.f32.mxu1 %v14012_v40  ;;  %13295 = vmatpush1.bf16.msra.mxu0 %v13294_v61  ;;  %v14024_v61 = vld [vmem:[%s14393_s28 + $0x98] sm:$0xff]  ;;  %v14025_v40 = vld [vmem:[%s14393_s28 + $0x90] sm:$0xff] }
0x1298   : > { %7801 = vmatmul.mubr.f32.gmra.mrb[6].mxu1 %v14013_v62  ;;  %v14026_v62 = vld [vmem:[%s14393_s28 + $0xa8] sm:$0xff] }
0x1299   : > { %7805 = vmatprep.mubr.f32.mxu1 %v14014_v36  ;;  %v14027_v36 = vld [vmem:[%s14393_s28 + $0xa0] sm:$0xff] }
0x129c   : > { %7806 = vmatmul.mubr.f32.gmra.mrb[8].mxu1 %v14015_v49  ;;  %v14028_v49 = vld [vmem:[%s14393_s28 + $0xb8] sm:$0xff] }
0x129d   : > { %7810 = vmatprep.mubr.f32.mxu1 %v14016_v18  ;;  %v14029_v18 = vld [vmem:[%s14393_s28 + $0xb0] sm:$0xff] }
0x12a0   : > { %7811 = vmatmul.mubr.f32.gmra.mrb[10].mxu1 %v14017_v58  ;;  %v14030_v58 = vld [vmem:[%s14393_s28 + $0xc8] sm:$0xff] }
0x12a1   : > { %7815 = vmatprep.mubr.f32.mxu1 %v14018_v32  ;;  %v14031_v32 = vld [vmem:[%s14393_s28 + $0xc0] sm:$0xff] }
0x12a4   : > { %7816 = vmatmul.mubr.f32.gmra.mrb[12].mxu1 %v14019_v45  ;;  %v14032_v45 = vld [vmem:[%s14393_s28 + $0xd8] sm:$0xff] }
0x12a5   : > { %7820 = vmatprep.mubr.f32.mxu1 %v14020_v30  ;;  %v14033_v30 = vld [vmem:[%s14393_s28 + $0xd0] sm:$0xff] }
0x12a8   : > { %7821 = vmatmul.mubr.f32.gmra.mrb[14].mxu1 %v14021_v46  ;;  %v14034_v46 = vld [vmem:[%s14393_s28 + $0xe8] sm:$0xff] }
0x12a9   : > { %7825 = vmatprep.mubr.f32.mxu1 %v14022_v3  ;;  %v14035_v3 = vld [vmem:[%s14393_s28 + $0xe0] sm:$0xff] }
0x12ac   : > { %7826 = vmatmul.mubr.f32.gmra.mrb[16].mxu1 %v14023_v51  ;;  %v14036_v51 = vld [vmem:[%s14393_s28 + $0xf8] sm:$0xff] }
0x12ad   : > { %7830 = vmatprep.mubr.f32.mxu1 %v14024_v61  ;;  %v14037_v61 = vld [vmem:[%s14393_s28 + $0xf0] sm:$0xff] }
0x12b0   : > { %7831 = vmatmul.mubr.f32.gmra.mrb[18].mxu1 %v14025_v40  ;;  %v14038_v40 = vld [vmem:[%s14393_s28 + $0x108] sm:$0xff] }
0x12b1   : > { %7835 = vmatprep.mubr.f32.mxu1 %v14026_v62  ;;  %v14039_v62 = vld [vmem:[%s14393_s28 + $0x100] sm:$0xff] }
0x12b4   : > { %7836 = vmatmul.mubr.f32.gmra.mrb[20].mxu1 %v14027_v36  ;;  %v14040_v36 = vld [vmem:[%s14393_s28 + $0x118] sm:$0xff] }
0x12b5   : > { %7840 = vmatprep.mubr.f32.mxu1 %v14028_v49  ;;  %v14041_v49 = vld [vmem:[%s14393_s28 + $0x110] sm:$0xff] }
0x12b8   : > { %7841 = vmatmul.mubr.f32.gmra.mrb[22].mxu1 %v14029_v18  ;;  %v14042_v18 = vld [vmem:[%s14393_s28 + $0x128] sm:$0xff] }
0x12b9   : > { %7845 = vmatprep.mubr.f32.mxu1 %v14030_v58  ;;  %v14043_v58 = vld [vmem:[%s14393_s28 + $0x120] sm:$0xff] }
0x12bc   : > { %7846 = vmatmul.mubr.f32.gmra.mrb[24].mxu1 %v14031_v32  ;;  %v14044_v32 = vld [vmem:[%s14393_s28 + $0x138] sm:$0xff] }
0x12bd   : > { %7850 = vmatprep.mubr.f32.mxu1 %v14032_v45  ;;  %v14045_v45 = vld [vmem:[%s14393_s28 + $0x130] sm:$0xff] }
0x12c0   : > { %7851 = vmatmul.mubr.f32.gmra.mrb[26].mxu1 %v14033_v30  ;;  %v14046_v30 = vld [vmem:[%s14393_s28 + $0x148] sm:$0xff] }
0x12c1   : > { %7855 = vmatprep.mubr.f32.mxu1 %v14034_v46  ;;  %v14047_v46 = vld [vmem:[%s14393_s28 + $0x140] sm:$0xff] }
0x12c4   : > { %7856 = vmatmul.mubr.f32.gmra.mrb[28].mxu1 %v14035_v3  ;;  %v14048_v3 = vld [vmem:[%s14393_s28 + $0x158] sm:$0xff] }
0x12c5   : > { %7860 = vmatprep.mubr.f32.mxu1 %v14036_v51  ;;  %v14049_v51 = vld [vmem:[%s14393_s28 + $0x150] sm:$0xff] }
0x12c8   : > { %7861 = vmatmul.mubr.f32.gmra.mrb[30].mxu1 %v14037_v61  ;;  %v14050_v61 = vld [vmem:[%s14393_s28 + $0x168] sm:$0xff] }
0x12c9   : > { %7865 = vmatprep.mubr.f32.mxu1 %v14038_v40  ;;  %v14051_v40 = vld [vmem:[%s14393_s28 + $0x160] sm:$0xff] }
0x12cc   : > { %7866 = vmatmul.mubr.f32.gmra.mrb[32].mxu1 %v14039_v62  ;;  %v10999_v62 = vld [vmem:[%s18670_s4 + $0xe48] sm:$0xff] }
0x12cd   : > { %7870 = vmatprep.mubr.f32.mxu1 %v14040_v36  ;;  %v11001_v36 = vld [vmem:[%s18670_s4 + $0xe58] sm:$0xff] }
0x12d0   : > { %7871 = vmatmul.mubr.f32.gmra.mrb[34].mxu1 %v14041_v49  ;;  %v14052_v49 = vld [vmem:[%s14393_s28 + $0x178] sm:$0xff] }
0x12d1   : > { %7875 = vmatprep.mubr.f32.mxu1 %v14042_v18  ;;  %v13296_v18 = vpack.c.bf16 %v11001_v36, %v10999_v62  ;;  %v14062_v62 = vld [vmem:[%s14393_s28 + $0x1c8] sm:$0xff]  ;;  %v14063_v36 = vld [vmem:[%s14393_s28 + $0x1c0] sm:$0xff] }
0x12d3   : > { %13297 = vmatprep.subr.bf16.mxu0 %v13296_v18  ;;  %v14065_v18 = vld [vmem:[%s14393_s28 + $0x1d0] sm:$0xff] }
0x12d4   : > { %7876 = vmatmul.mubr.f32.gmra.mrb[36].mxu1 %v14043_v58  ;;  %v14053_v58 = vld [vmem:[%s14393_s28 + $0x170] sm:$0xff] }
0x12d5   : > { %7880 = vmatprep.mubr.f32.mxu1 %v14044_v32  ;;  %v14054_v32 = vld [vmem:[%s14393_s28 + $0x188] sm:$0xff] }
0x12d8   : > { %7881 = vmatmul.mubr.f32.gmra.mrb[38].mxu1 %v14045_v45  ;;  %v14055_v45 = vld [vmem:[%s14393_s28 + $0x180] sm:$0xff] }
0x12d9   : > { %7885 = vmatprep.mubr.f32.mxu1 %v14046_v30  ;;  %v14056_v30 = vld [vmem:[%s14393_s28 + $0x198] sm:$0xff] }
0x12dc   : > { %7886 = vmatmul.mubr.f32.gmra.mrb[40].mxu1 %v14047_v46  ;;  %v14057_v46 = vld [vmem:[%s14393_s28 + $0x190] sm:$0xff] }
0x12dd   : > { %7890 = vmatprep.mubr.f32.mxu1 %v14048_v3  ;;  %v14058_v3 = vld [vmem:[%s14393_s28 + $0x1a8] sm:$0xff] }
0x12e0   : > { %7891 = vmatmul.mubr.f32.gmra.mrb[42].mxu1 %v14049_v51  ;;  %v14059_v51 = vld [vmem:[%s14393_s28 + $0x1a0] sm:$0xff] }
0x12e1   : > { %7895 = vmatprep.mubr.f32.mxu1 %v14050_v61  ;;  %v14060_v61 = vld [vmem:[%s14393_s28 + $0x1b8] sm:$0xff] }
0x12e4   : > { %7896 = vmatmul.mubr.f32.gmra.mrb[44].mxu1 %v14051_v40  ;;  %v14061_v40 = vld [vmem:[%s14393_s28 + $0x1b0] sm:$0xff] }
0x12e5   : > { %7900 = vmatprep.mubr.f32.mxu1 %v14052_v49  ;;  %v14064_v49 = vld [vmem:[%s14393_s28 + $0x1d8] sm:$0xff] }
0x12e8   : > { %7901 = vmatmul.mubr.f32.gmra.mrb[46].mxu1 %v14053_v58  ;;  %v14066_v58 = vld [vmem:[%s14393_s28 + $0x1e8] sm:$0xff] }
0x12e9   : > { %7905 = vmatprep.mubr.f32.mxu1 %v14054_v32  ;;  %v14067_v32 = vld [vmem:[%s14393_s28 + $0x1e0] sm:$0xff] }
0x12ec   : > { %7906 = vmatmul.mubr.f32.gmra.mrb[48].mxu1 %v14055_v45  ;;  %v14068_v45 = vld [vmem:[%s14393_s28 + $0x1f8] sm:$0xff] }
0x12ed   : > { %7910 = vmatprep.mubr.f32.mxu1 %v14056_v30  ;;  %v14069_v30 = vld [vmem:[%s14393_s28 + $0x1f0] sm:$0xff] }
0x12f0   : > { %7911 = vmatmul.mubr.f32.gmra.mrb[50].mxu1 %v14057_v46  ;;  %v10998_v46 = vld [vmem:[%s18670_s4 + $0xe40] sm:$0xff] }
0x12f1   : > { %7915 = vmatprep.mubr.f32.mxu1 %v14058_v3  ;;  %v11000_v3 = vld [vmem:[%s18670_s4 + $0xe50] sm:$0xff] }
0x12f4   : > { %7916 = vmatmul.mubr.f32.gmra.mrb[52].mxu1 %v14059_v51  ;;  %v11003_v51 = vld [vmem:[%s18670_s4 + $0xe68] sm:$0xff] }
0x12f5   : > { %7920 = vmatprep.mubr.f32.mxu1 %v14060_v61  ;;  %v11005_v61 = vld [vmem:[%s18670_s4 + $0xe78] sm:$0xff] }
0x12f8   : > { %7921 = vmatmul.mubr.f32.gmra.mrb[54].mxu1 %v14061_v40  ;;  %v13298_v40 = vpack.c.bf16 %v11000_v3, %v10998_v46  ;;  %v11006_v3 = vld [vmem:[%s18670_s4 + $0xe80] sm:$0xff] }
0x12f9   : > { %7925 = vmatprep.mubr.f32.mxu1 %v14062_v62  ;;  %v13300_v62 = vpack.c.bf16 %v11005_v61, %v11003_v51  ;;  %v11008_v51 = vld [vmem:[%s18670_s4 + $0xe90] sm:$0xff] }
0x12fc   : > { %7926 = vmatmul.mubr.f32.gmra.mrb[56].mxu1 %v14063_v36  ;;  %v11002_v36 = vld [vmem:[%s18670_s4 + $0xe60] sm:$0xff] }
0x12fd   : > { %7930 = vmatprep.mubr.f32.mxu1 %v14064_v49  ;;  %v11004_v49 = vld [vmem:[%s18670_s4 + $0xe70] sm:$0xff] }
0x1300   : > { %7931 = vmatmul.mubr.f32.gmra.mrb[58].mxu1 %v14065_v18 }
0x1301   : > { %7935 = vmatprep.mubr.f32.mxu1 %v14066_v58  ;;  %v11007_v58 = vld [vmem:[%s18670_s4 + $0xe88] sm:$0xff] }
0x1304   : > { %7936 = vmatmul.mubr.f32.gmra.mrb[60].mxu1 %v14067_v32  ;;  %v11009_v32 = vld [vmem:[%s18670_s4 + $0xe98] sm:$0xff] }
0x1305   : > { %7940 = vmatprep.mubr.f32.mxu1 %v14068_v45  ;;  %v13304_v46 = vpack.c.bf16 %v11009_v32, %v11007_v58  ;;  %v11012_v58 = vld [vmem:[%s18670_s4 + $0xeb0] sm:$0xff] }
0x1308   : > { %7941 = vmatmul.mubr.f32.gmra.mrb[62].mxu1 %v14069_v30  ;;  %v13302_v30 = vpack.c.bf16 %v11004_v49, %v11002_v36 }
0x135f   : > { %v7787_v18 = vpop.f32.mrb[0].mxu1 }
0x1360   : > { %v7789_v45 = vpop.f32.mrb[1].mxu1  ;;  %11030 = vmatmul.mubr.msk.f32.vlgmr.msra.gmra.mrb[96].mxu0 %vm781_vm1, %v7787_v18  ;;  %v11010_v18 = vld [vmem:[%s18670_s4 + $0xea0] sm:$0xff] }
0x1361   : > { %8145 = vmatprep.mubr.f32.mxu0 %v18847_v44  ;;  %13299 = vmatpush1.bf16.msra.mxu0 %v13298_v40  ;;  %v11011_v45 = vld [vmem:[%s18670_s4 + $0xea8] sm:$0xff]  ;;  %v11013_v40 = vld [vmem:[%s18670_s4 + $0xeb8] sm:$0xff] }
0x1362   : > { %13301 = vmatprep.subr.bf16.mxu0 %v13300_v62  ;;  %v13306_v62 = vpack.c.bf16 %v11008_v51, %v11006_v3  ;;  %v13308_v49 = vpack.c.bf16 %v11013_v40, %v11011_v45 }
0x1363   : > { %v7792_v61 = vpop.f32.mrb[2].mxu1 }
0x1364   : > { %v7794_v36 = vpop.f32.mrb[3].mxu1  ;;  %11031 = vmatmul.mubr.msk.f32.gmra.mrb[98].mxu0 %vm781_vm1, %v7792_v61  ;;  %v13310_v61 = vpack.c.bf16 %v11012_v58, %v11010_v18 }
0x1365   : > { %8151 = vmatprep.mubr.f32.mxu0 %v18847_v44  ;;  %13303 = vmatpush1.bf16.msra.mxu0 %v13302_v30 }
0x1366   : > { %13305 = vmatprep.subr.bf16.mxu0 %v13304_v46 }
0x1367   : > { %v7797_v32 = vpop.f32.mrb[4].mxu1 }
0x1368   : > { %v7799_v55 = vpop.f32.mrb[5].mxu1  ;;  %11032 = vmatmul.mubr.msk.f32.gmra.mrb[100].mxu0 %vm781_vm1, %v7797_v32 }
0x1369   : > { %8157 = vmatprep.mubr.f32.mxu0 %v18847_v44  ;;  %13307 = vmatpush1.bf16.msra.mxu0 %v13306_v62 }
0x136a   : > { %13309 = vmatprep.subr.bf16.mxu0 %v13308_v49 }
0x136b   : > { %v7802_v30 = vpop.f32.mrb[6].mxu1 }
0x136c   : > { %v7804_v46 = vpop.f32.mrb[7].mxu1  ;;  %11033 = vmatmul.mubr.msk.f32.gmra.mrb[102].mxu0 %vm781_vm1, %v7802_v30 }
0x136d   : > { %8163 = vmatprep.mubr.f32.mxu0 %v18847_v44  ;;  %13311 = vmatpush1.bf16.msra.mxu0 %v13310_v61 }
0x136f   : > { %v7807_v3 = vpop.f32.mrb[8].mxu1 }
0x1370   : > { %v7809_v51 = vpop.f32.mrb[9].mxu1  ;;  %11034 = vmatmul.mubr.msk.f32.gmra.mrb[104].mxu0 %vm781_vm1, %v7807_v3 }
0x1371   : > { %8169 = vmatprep.mubr.f32.mxu0 %v18847_v44 }
0x1373   : > { %v7812_v55 = vpop.f32.mrb[10].mxu1 }
0x1374   : > { %v7814_v45 = vpop.f32.mrb[11].mxu1  ;;  %11035 = vmatmul.mubr.msk.f32.gmra.mrb[106].mxu0 %vm781_vm1, %v7812_v55 }
0x1375   : > { %8175 = vmatprep.mubr.f32.mxu0 %v18847_v44 }
0x1377   : > { %v7817_v40 = vpop.f32.mrb[12].mxu1 }
0x1378   : > { %v7819_v36 = vpop.f32.mrb[13].mxu1  ;;  %11036 = vmatmul.mubr.msk.f32.gmra.mrb[108].mxu0 %vm781_vm1, %v7817_v40 }
0x1379   : > { %8181 = vmatprep.mubr.f32.mxu0 %v18847_v44 }
0x137b   : > { %v7822_v62 = vpop.f32.mrb[14].mxu1 }
0x137c   : > { %v7824_v49 = vpop.f32.mrb[15].mxu1  ;;  %11037 = vmatmul.mubr.msk.f32.gmra.mrb[110].mxu0 %vm781_vm1, %v7822_v62 }
0x137d   : > { %8187 = vmatprep.mubr.f32.mxu0 %v18847_v44 }
0x137f   : > { %v7827_v18 = vpop.f32.mrb[16].mxu1 }
0x1380   : > { %v7829_v58 = vpop.f32.mrb[17].mxu1  ;;  %11038 = vmatmul.mubr.msk.f32.gmra.mrb[112].mxu0 %vm781_vm1, %v7827_v18 }
0x1381   : > { %8193 = vmatprep.mubr.f32.mxu0 %v18847_v44 }
0x1383   : > { %v7832_v32 = vpop.f32.mrb[18].mxu1 }
0x1384   : > { %v7834_v61 = vpop.f32.mrb[19].mxu1  ;;  %11039 = vmatmul.mubr.msk.f32.gmra.mrb[114].mxu0 %vm781_vm1, %v7832_v32 }
0x1385   : > { %8199 = vmatprep.mubr.f32.mxu0 %v18847_v44 }
0x1387   : > { %v7837_v30 = vpop.f32.mrb[20].mxu1 }
0x1388   : > { %v7839_v46 = vpop.f32.mrb[21].mxu1  ;;  %11040 = vmatmul.mubr.msk.f32.gmra.mrb[116].mxu0 %vm781_vm1, %v7837_v30 }
0x1389   : > { %8205 = vmatprep.mubr.f32.mxu0 %v18847_v44 }
0x138b   : > { %v7842_v3 = vpop.f32.mrb[22].mxu1 }
0x138c   : > { %v7844_v51 = vpop.f32.mrb[23].mxu1  ;;  %11041 = vmatmul.mubr.msk.f32.gmra.mrb[118].mxu0 %vm781_vm1, %v7842_v3 }
0x138d   : > { %8211 = vmatprep.mubr.f32.mxu0 %v18847_v44 }
0x138f   : > { %v7847_v55 = vpop.f32.mrb[24].mxu1 }
0x1390   : > { %v7849_v45 = vpop.f32.mrb[25].mxu1  ;;  %11042 = vmatmul.mubr.msk.f32.gmra.mrb[120].mxu0 %vm781_vm1, %v7847_v55 }
0x1391   : > { %8217 = vmatprep.mubr.f32.mxu0 %v18847_v44 }
0x1393   : > { %v7852_v40 = vpop.f32.mrb[26].mxu1 }
0x1394   : > { %v7854_v36 = vpop.f32.mrb[27].mxu1  ;;  %11043 = vmatmul.mubr.msk.f32.gmra.mrb[122].mxu0 %vm781_vm1, %v7852_v40 }
0x1395   : > { %8223 = vmatprep.mubr.f32.mxu0 %v18847_v44 }
0x1397   : > { %v7857_v62 = vpop.f32.mrb[28].mxu1 }
0x1398   : > { %v7859_v49 = vpop.f32.mrb[29].mxu1  ;;  %11044 = vmatmul.mubr.msk.f32.gmra.mrb[124].mxu0 %vm781_vm1, %v7857_v62 }
0x1399   : > { %8229 = vmatprep.mubr.f32.mxu0 %v18847_v44 }
0x139b   : > { %v7862_v18 = vpop.f32.mrb[30].mxu1 }
0x139c   : > { %v7864_v58 = vpop.f32.mrb[31].mxu1  ;;  %11045 = vmatmul.mubr.msk.f32.gmra.mrb[126].mxu0 %vm781_vm1, %v7862_v18 }
0x139d   : > { %8235 = vmatprep.mubr.f32.mxu0 %v18847_v44 }
0x139f   : > { %v7867_v32 = vpop.f32.mrb[32].mxu1 }
0x13a0   : > { %v7869_v61 = vpop.f32.mrb[33].mxu1  ;;  %11046 = vmatmul.mubr.msk.f32.gmra.mrb[128].mxu0 %vm781_vm1, %v7867_v32 }
0x13a1   : > { %8241 = vmatprep.mubr.f32.mxu0 %v18847_v44 }
0x13a3   : > { %v7872_v30 = vpop.f32.mrb[34].mxu1 }
0x13a4   : > { %v7874_v46 = vpop.f32.mrb[35].mxu1  ;;  %11047 = vmatmul.mubr.msk.f32.gmra.mrb[130].mxu0 %vm781_vm1, %v7872_v30  ;;  %v11095_v30 = vld [vmem:[%s18670_s4 + $0xf50] sm:$0xff] }
0x13a5   : > { %8247 = vmatprep.mubr.f32.mxu0 %v18847_v44  ;;  %v11096_v46 = vld [vmem:[%s18670_s4 + $0xf60] sm:$0xff] }
0x13a7   : > { %v7877_v3 = vpop.f32.mrb[36].mxu1 }
0x13a8   : > { %v7879_v51 = vpop.f32.mrb[37].mxu1  ;;  %11048 = vmatmul.mubr.msk.f32.gmra.mrb[132].mxu0 %vm781_vm1, %v7877_v3  ;;  %v13313_v3 = vpack.c.bf16 %v11096_v46, %v11095_v30 }
0x13a9   : > { %8253 = vmatprep.mubr.f32.mxu0 %v18847_v44 }
0x13aa   : > { %13314 = vmatpush1.bf16.msra.mxu1 %v13313_v3 }
0x13ab   : > { %v7882_v55 = vpop.f32.mrb[38].mxu1  ;;  %13315 = vmatprep.subr.bf16.mxu1 %v18828_v22 }
0x13ac   : > { %v7884_v45 = vpop.f32.mrb[39].mxu1  ;;  %11049 = vmatmul.mubr.msk.f32.gmra.mrb[134].mxu0 %vm781_vm1, %v7882_v55 }
0x13ad   : > { %8259 = vmatprep.mubr.f32.mxu0 %v18847_v44 }
0x13af   : > { %v7887_v40 = vpop.f32.mrb[40].mxu1 }
0x13b0   : > { %v7889_v36 = vpop.f32.mrb[41].mxu1  ;;  %11050 = vmatmul.mubr.msk.f32.gmra.mrb[136].mxu0 %vm781_vm1, %v7887_v40 }
0x13b1   : > { %8265 = vmatprep.mubr.f32.mxu0 %v18847_v44 }
0x13b3   : > { %v7892_v62 = vpop.f32.mrb[42].mxu1 }
0x13b4   : > { %v7894_v49 = vpop.f32.mrb[43].mxu1  ;;  %11051 = vmatmul.mubr.msk.f32.gmra.mrb[138].mxu0 %vm781_vm1, %v7892_v62 }
0x13b5   : > { %8271 = vmatprep.mubr.f32.mxu0 %v18847_v44  ;;  %v11097_v49 = vld [vmem:[%s18670_s4 + $0xf70] sm:$0xff] }
0x13b7   : > { %v7897_v18 = vpop.f32.mrb[44].mxu1 }
0x13b8   : > { %v7899_v58 = vpop.f32.mrb[45].mxu1  ;;  %11052 = vmatmul.mubr.msk.f32.gmra.mrb[140].mxu0 %vm781_vm1, %v7897_v18  ;;  %v11098_v18 = vld [vmem:[%s18670_s4 + $0xf80] sm:$0xff] }
0x13b9   : > { %8277 = vmatprep.mubr.f32.mxu0 %v18847_v44  ;;  %v13316_v58 = vpack.c.bf16 %v11098_v18, %v11097_v49 }
0x13bb   : > { %v7902_v32 = vpop.f32.mrb[46].mxu1  ;;  %13317 = vmatpush1.bf16.msra.mxu1 %v13316_v58  ;;  %v11101_v58 = vld [vmem:[%s18670_s4 + $0xfb0] sm:$0xff] }
0x13bc   : > { %v7904_v61 = vpop.f32.mrb[47].mxu1  ;;  %11053 = vmatmul.mubr.msk.f32.gmra.mrb[142].mxu0 %vm781_vm1, %v7902_v32  ;;  %13318 = vmatprep.subr.bf16.mxu1 %v18828_v22 }
0x13bd   : > { %8283 = vmatprep.mubr.f32.mxu0 %v18847_v44 }
0x13bf   : > { %v7907_v51 = vpop.f32.mrb[48].mxu1 }
0x13c0   : > { %v7909_v55 = vpop.f32.mrb[49].mxu1  ;;  %11054 = vmatmul.mubr.msk.f32.gmra.mrb[144].mxu0 %vm781_vm1, %v7907_v51 }
0x13c1   : > { %8289 = vmatprep.mubr.f32.mxu0 %v18847_v44  ;;  %v11099_v55 = vld [vmem:[%s18670_s4 + $0xf90] sm:$0xff] }
0x13c3   : > { %v7912_v45 = vpop.f32.mrb[50].mxu1 }
0x13c4   : > { %v7914_v40 = vpop.f32.mrb[51].mxu1  ;;  %11055 = vmatmul.mubr.msk.f32.gmra.mrb[146].mxu0 %vm781_vm1, %v7912_v45  ;;  %v11100_v45 = vld [vmem:[%s18670_s4 + $0xfa0] sm:$0xff] }
0x13c5   : > { %8295 = vmatprep.mubr.f32.mxu0 %v18847_v44  ;;  %v13319_v40 = vpack.c.bf16 %v11100_v45, %v11099_v55  ;;  %v11106_v55 = vld [vmem:[%s18670_s4 + $0x1000] sm:$0xff] }
0x13c7   : > { %v7917_v36 = vpop.f32.mrb[52].mxu1  ;;  %13320 = vmatpush1.bf16.msra.mxu1 %v13319_v40  ;;  %v11108_v40 = vld [vmem:[%s18670_s4 + $0x1020] sm:$0xff] }
0x13c8   : > { %v7919_v62 = vpop.f32.mrb[53].mxu1  ;;  %11056 = vmatmul.mubr.msk.f32.gmra.mrb[148].mxu0 %vm781_vm1, %v7917_v36  ;;  %13321 = vmatprep.subr.bf16.mxu1 %v18828_v22 }
0x13c9   : > { %8301 = vmatprep.mubr.f32.mxu0 %v18847_v44 }
0x13cb   : > { %v7922_v32 = vpop.f32.mrb[54].mxu1 }
0x13cc   : > { %v7924_v61 = vpop.f32.mrb[55].mxu1  ;;  %11057 = vmatmul.mubr.msk.f32.gmra.mrb[150].mxu0 %vm781_vm1, %v7922_v32  ;;  %v11102_v32 = vld [vmem:[%s18670_s4 + $0xfc0] sm:$0xff] }
0x13cd   : > { %8307 = vmatprep.mubr.f32.mxu0 %v18847_v44  ;;  %v11103_v61 = vld [vmem:[%s18670_s4 + $0xfd0] sm:$0xff] }
0x13cf   : > { %v7927_v30 = vpop.f32.mrb[56].mxu1 }
0x13d0   : > { %v7929_v46 = vpop.f32.mrb[57].mxu1  ;;  %11058 = vmatmul.mubr.msk.f32.gmra.mrb[152].mxu0 %vm781_vm1, %v7927_v30  ;;  %v13322_v30 = vpack.c.bf16 %v11102_v32, %v11101_v58  ;;  %v11114_v32 = vld [vmem:[%s18670_s4 + $0x1080] sm:$0xff] }
0x13d1   : > { %8313 = vmatprep.mubr.f32.mxu0 %v18847_v44  ;;  %v11104_v46 = vld [vmem:[%s18670_s4 + $0xfe0] sm:$0xff] }
0x13d2   : > { %13323 = vmatpush1.bf16.msra.mxu1 %v13322_v30  ;;  %v11116_v30 = vld [vmem:[%s18670_s4 + $0x10a0] sm:$0xff] }
0x13d3   : > { %v7932_v3 = vpop.f32.mrb[58].mxu1  ;;  %13324 = vmatprep.subr.bf16.mxu1 %v18828_v22 }
0x13d4   : > { %v7934_v51 = vpop.f32.mrb[59].mxu1  ;;  %11059 = vmatmul.mubr.msk.f32.gmra.mrb[154].mxu0 %vm781_vm1, %v7932_v3  ;;  %v13325_v3 = vpack.c.bf16 %v11104_v46, %v11103_v61 }
0x13d5   : > { %8319 = vmatprep.mubr.f32.mxu0 %v18847_v44  ;;  %v11105_v51 = vld [vmem:[%s18670_s4 + $0xff0] sm:$0xff] }
0x13d6   : > { %13326 = vmatpush1.bf16.msra.mxu1 %v13325_v3  ;;  %v13328_v45 = vpack.c.bf16 %v11106_v55, %v11105_v51 }
0x13d7   : > { %v7937_v36 = vpop.f32.mrb[60].mxu1  ;;  %13327 = vmatprep.subr.bf16.mxu1 %v18828_v22 }
0x13d8   : > { %v7939_v62 = vpop.f32.mrb[61].mxu1  ;;  %11060 = vmatmul.mubr.msk.f32.gmra.mrb[156].mxu0 %vm781_vm1, %v7937_v36 }
0x13d9   : > { %8325 = vmatprep.mubr.f32.mxu0 %v18847_v44  ;;  %v11110_v62 = vld [vmem:[%s18670_s4 + $0x1040] sm:$0xff] }
0x13da   : > { %13329 = vmatpush1.bf16.msra.mxu1 %v13328_v45 }
0x13db   : > { %v7942_v49 = vpop.f32.mrb[62].mxu1  ;;  %13330 = vmatprep.subr.bf16.mxu1 %v18828_v22 }
0x13dc   : > { %v7944_v18 = vpop.f32.mrb[63].mxu1  ;;  %11061 = vmatmul.mubr.msk.f32.gmra.mrb[158].mxu0 %vm781_vm1, %v7942_v49 }
0x13dd   : > { %8492 = vmatprep.mubr.f32.mxu0 %v18847_v44  ;;  %v11112_v18 = vld [vmem:[%s18670_s4 + $0x1060] sm:$0xff] }
0x13e0   : > { %11062 = vmatmul.mubr.msk.f32.vlgmr.msra.gmra.mrb[96].mxu0 %vm781_vm1, %v17252_v25  ;;  %v11107_v25 = vld [vmem:[%s18670_s4 + $0x1010] sm:$0xff] }
0x13e1   : > { %8498 = vmatprep.mubr.f32.mxu0 %v18847_v44  ;;  %v13331_v36 = vpack.c.bf16 %v11108_v40, %v11107_v25  ;;  %v11158_v25 = vld [vmem:[%s18670_s4 + $0x1140] sm:$0xff]  ;;  %v11159_v40 = vld [vmem:[%s18670_s4 + $0x1150] sm:$0xff] }
0x13e3   : > { %13332 = vmatpush1.bf16.msra.mxu1 %v13331_v36 }
0x13e4   : > { %11063 = vmatmul.mubr.msk.f32.gmra.mrb[98].mxu0 %vm781_vm1, %v17247_v14  ;;  %v11109_v14 = vld [vmem:[%s18670_s4 + $0x1030] sm:$0xff]  ;;  %13333 = vmatprep.subr.bf16.mxu1 %v18828_v22 }
0x13e5   : > { %8504 = vmatprep.mubr.f32.mxu0 %v18847_v44  ;;  %v13334_v49 = vpack.c.bf16 %v11110_v62, %v11109_v14 }
0x13e7   : > { %13335 = vmatpush1.bf16.msra.mxu1 %v13334_v49 }
0x13e8   : > { %11064 = vmatmul.mubr.msk.f32.gmra.mrb[100].mxu0 %vm781_vm1, %v17267_v4  ;;  %v11111_v4 = vld [vmem:[%s18670_s4 + $0x1050] sm:$0xff]  ;;  %13336 = vmatprep.subr.bf16.mxu1 %v18828_v22 }
0x13e9   : > { %8510 = vmatprep.mubr.f32.mxu0 %v18847_v44  ;;  %v13337_v58 = vpack.c.bf16 %v11112_v18, %v11111_v4  ;;  %v13360_v18 = vpack.c.bf16 %v11159_v40, %v11158_v25 }
0x13eb   : > { %13338 = vmatpush1.bf16.msra.mxu1 %v13337_v58 }
0x13ec   : > { %11065 = vmatmul.mubr.msk.f32.gmra.mrb[102].mxu0 %vm781_vm1, %v17262_v20  ;;  %v11113_v20 = vld [vmem:[%s18670_s4 + $0x1070] sm:$0xff]  ;;  %13339 = vmatprep.subr.bf16.mxu1 %v18828_v22 }
0x13ed   : > { %8516 = vmatprep.mubr.f32.mxu0 %v18847_v44  ;;  %v13340_v61 = vpack.c.bf16 %v11114_v32, %v11113_v20  ;;  %v11160_v20 = vld [vmem:[%s18670_s4 + $0x1160] sm:$0xff]  ;;  %v11161_v32 = vld [vmem:[%s18670_s4 + $0x1170] sm:$0xff] }
0x13ef   : > { %13341 = vmatpush1.bf16.msra.mxu1 %v13340_v61 }
0x13f0   : > { %11066 = vmatmul.mubr.msk.f32.gmra.mrb[104].mxu0 %vm781_vm1, %v17282_v28  ;;  %v11115_v28 = vld [vmem:[%s18670_s4 + $0x1090] sm:$0xff]  ;;  %13342 = vmatprep.subr.bf16.mxu1 %v18828_v22 }
0x13f1   : > { %8522 = vmatprep.mubr.f32.mxu0 %v18847_v44  ;;  %v13343_v46 = vpack.c.bf16 %v11116_v30, %v11115_v28 }
0x13f3   : > { %13344 = vmatpush1.bf16.msra.mxu1 %v13343_v46 }
0x13f4   : > { %11067 = vmatmul.mubr.msk.f32.gmra.mrb[106].mxu0 %vm781_vm1, %v17277_v9  ;;  %13345 = vmatprep.subr.bf16.mxu1 %v18828_v22  ;;  %v11117_v9 = vld [vmem:[%s18670_s4 + $0x10b0] sm:$0xff] }
0x13f5   : > { %8528 = vmatprep.mubr.f32.mxu0 %v18847_v44 }
0x13f8   : > { %11068 = vmatmul.mubr.msk.f32.gmra.mrb[108].mxu0 %vm781_vm1, %v17297_v38 }
0x13f9   : > { %8534 = vmatprep.mubr.f32.mxu0 %v18847_v44 }
0x13fc   : > { %11069 = vmatmul.mubr.msk.f32.gmra.mrb[110].mxu0 %vm781_vm1, %v17292_v24  ;;  %v11118_v24 = vld [vmem:[%s18670_s4 + $0x10c0] sm:$0xff] }
0x13fd   : > { %8540 = vmatprep.mubr.f32.mxu0 %v18847_v44  ;;  %v13346_v38 = vpack.c.bf16 %v11118_v24, %v11117_v9  ;;  %v13364_v24 = vpack.c.bf16 %v11161_v32, %v11160_v20 }
0x13ff   : > { %13347 = vmatpush1.bf16.msra.mxu1 %v13346_v38 }
0x1400   : > { %11070 = vmatmul.mubr.msk.f32.gmra.mrb[112].mxu0 %vm781_vm1, %v17312_v8 }
0x1401   : > { %8546 = vmatprep.mubr.f32.mxu0 %v18847_v44 }
0x1404   : > { %11071 = vmatmul.mubr.msk.f32.gmra.mrb[114].mxu0 %vm781_vm1, %v17307_v16  ;;  %v11094_v16 = vld [vmem:[%s18670_s4 + $0xf40] ss:$8 sm:$0x3] }
0x1405   : > { %8552 = vmatprep.mubr.f32.mxu0 %v18847_v44  ;;  %v17887_v8 = vrot.slane %v11094_v16, %v14947_v31 }
0x1408   : > { %11072 = vmatmul.mubr.msk.f32.gmra.mrb[116].mxu0 %vm781_vm1, %v17327_v50 }
0x1409   : > { %8558 = vmatprep.mubr.f32.mxu0 %v18847_v44 }
0x140c   : > { %11073 = vmatmul.mubr.msk.f32.gmra.mrb[118].mxu0 %vm781_vm1, %v17322_v37  ;;  %v17890_v37 = vrot.slane %v11094_v16, %v14952_v34  ;;  %v11162_v16 = vld [vmem:[%s18670_s4 + $0x1180] sm:$0xff] }
0x140d   : > { %8564 = vmatprep.mubr.f32.mxu0 %v18847_v44 }
0x1410   : > { %11074 = vmatmul.mubr.msk.f32.gmra.mrb[120].mxu0 %vm781_vm1, %v17342_v56 }
0x1411   : > { %8570 = vmatprep.mubr.f32.mxu0 %v18847_v44 }
0x1414   : > { %11075 = vmatmul.mubr.msk.f32.gmra.mrb[122].mxu0 %vm781_vm1, %v17337_v57 }
0x1415   : > { %8576 = vmatprep.mubr.f32.mxu0 %v18847_v44 }
0x1418   : > { %11076 = vmatmul.mubr.msk.f32.gmra.mrb[124].mxu0 %vm781_vm1, %v17357_v26  ;;  %v11152_v26 = vld [vmem:[%s18670_s4 + $0x10e0] sm:$0xff] }
0x1419   : > { %8582 = vmatprep.mubr.f32.mxu0 %v18847_v44 }
0x141c   : > { %11077 = vmatmul.mubr.msk.f32.gmra.mrb[126].mxu0 %vm781_vm1, %v17352_v52 }
0x141d   : > { %8588 = vmatprep.mubr.f32.mxu0 %v18847_v44 }
0x1420   : > { %11078 = vmatmul.mubr.msk.f32.gmra.mrb[128].mxu0 %vm781_vm1, %v17372_v23  ;;  %v11155_v23 = vld [vmem:[%s18670_s4 + $0x1110] sm:$0xff] }
0x1421   : > { %8594 = vmatprep.mubr.f32.mxu0 %v18847_v44 }
0x1424   : > { %11079 = vmatmul.mubr.msk.f32.gmra.mrb[130].mxu0 %vm781_vm1, %v17367_v6 }
0x1425   : > { %8600 = vmatprep.mubr.f32.mxu0 %v18847_v44 }
0x1428   : > { %11080 = vmatmul.mubr.msk.f32.gmra.mrb[132].mxu0 %vm781_vm1, %v17387_v47 }
0x1429   : > { %8606 = vmatprep.mubr.f32.mxu0 %v18847_v44 }
0x142c   : > { %11081 = vmatmul.mubr.msk.f32.gmra.mrb[134].mxu0 %vm781_vm1, %v17382_v27  ;;  %v11153_v27 = vld [vmem:[%s18670_s4 + $0x10f0] sm:$0xff] }
0x142d   : > { %8612 = vmatprep.mubr.f32.mxu0 %v18847_v44 }
0x1430   : > { %11082 = vmatmul.mubr.msk.f32.gmra.mrb[136].mxu0 %vm781_vm1, %v17402_v35  ;;  %v13348_v35 = vpack.c.bf16 %v11153_v27, %v11152_v26 }
0x1431   : > { %8618 = vmatprep.mubr.f32.mxu0 %v18847_v44 }
0x1432   : > { %13349 = vmatprep.subr.bf16.mxu1 %v13348_v35 }
0x1434   : > { %11083 = vmatmul.mubr.msk.f32.gmra.mrb[138].mxu0 %vm781_vm1, %v17397_v41  ;;  %v11154_v41 = vld [vmem:[%s18670_s4 + $0x1100] sm:$0xff] }
0x1435   : > { %8624 = vmatprep.mubr.f32.mxu0 %v18847_v44 }
0x1438   : > { %11084 = vmatmul.mubr.msk.f32.gmra.mrb[140].mxu0 %vm781_vm1, %v17417_v54 }
0x1439   : > { %8630 = vmatprep.mubr.f32.mxu0 %v18847_v44 }
0x143c   : > { %11085 = vmatmul.mubr.msk.f32.gmra.mrb[142].mxu0 %vm781_vm1, %v17412_v42 }
0x143d   : > { %8636 = vmatprep.mubr.f32.mxu0 %v18847_v44 }
0x1440   : > { %11086 = vmatmul.mubr.msk.f32.gmra.mrb[144].mxu0 %vm781_vm1, %v17432_v33  ;;  %v13352_v33 = vpack.c.bf16 %v11155_v23, %v11154_v41 }
0x1441   : > { %8642 = vmatprep.mubr.f32.mxu0 %v18847_v44 }
0x1444   : > { %11087 = vmatmul.mubr.msk.f32.gmra.mrb[146].mxu0 %vm781_vm1, %v17427_v19 }
0x1445   : > { %8648 = vmatprep.mubr.f32.mxu0 %v18847_v44 }
0x1448   : > { %11088 = vmatmul.mubr.msk.f32.gmra.mrb[148].mxu0 %vm781_vm1, %v17447_v60  ;;  %v11156_v60 = vld [vmem:[%s18670_s4 + $0x1120] sm:$0xff] }
0x1449   : > { %8654 = vmatprep.mubr.f32.mxu0 %v18847_v44 }
0x144c   : > { %11089 = vmatmul.mubr.msk.f32.gmra.mrb[150].mxu0 %vm781_vm1, %v17442_v21 }
0x144d   : > { %8660 = vmatprep.mubr.f32.mxu0 %v18847_v44 }
0x1450   : > { %11090 = vmatmul.mubr.msk.f32.gmra.mrb[152].mxu0 %vm781_vm1, %v17462_v17 }
0x1451   : > { %8666 = vmatprep.mubr.f32.mxu0 %v18847_v44 }
0x1454   : > { %11091 = vmatmul.mubr.msk.f32.gmra.mrb[154].mxu0 %vm781_vm1, %v17457_v63  ;;  %v11157_v63 = vld [vmem:[%s18670_s4 + $0x1130] sm:$0xff] }
0x1455   : > { %8672 = vmatprep.mubr.f32.mxu0 %v18847_v44  ;;  %v13356_v55 = vpack.c.bf16 %v11157_v63, %v11156_v60 }
0x1458   : > { %11092 = vmatmul.mubr.msk.f32.gmra.mrb[156].mxu0 %vm781_vm1, %v17477_v1 }
0x1459   : > { %8678 = vmatprep.mubr.f32.mxu0 %v18847_v44 }
0x145c   : > { %11093 = vmatmul.mubr.msk.f32.gmra.mrb[158].mxu0 %vm781_vm1, %v17472_v29 }
0x14b3   : > { %v8494_v50 = vpop.f32.mrb[96].mxu0 }
0x14b4   : > { %v8698_v57 = vadd.f32 %v17887_v8, %v8494_v50  ;;  %v8496_v56 = vpop.f32.mrb[97].mxu0  ;;  %v11163_v50 = vld [vmem:[%s18670_s4 + $0x1190] sm:$0xff] }
0x14b5   : > { %v8699_v52 = vadd.f32 %v17890_v37, %v8496_v56  ;;  %v13368_v41 = vpack.c.bf16 %v11163_v50, %v11162_v16 }
0x14b6   : > { %v8762_v42 = vmax.f32 %v8698_v57, 0.0 }
0x14b7   : > { %v8763_v6 = vmax.f32 %v8699_v52, 0.0  ;;  %v8500_v47 = vpop.f32.mrb[98].mxu0 }
0x14b8   : > { %v8700_v54 = vadd.f32 %v17887_v8, %v8500_v47  ;;  %v8502_v19 = vpop.f32.mrb[99].mxu0 }
0x14b9   : > { %v8701_v21 = vadd.f32 %v17890_v37, %v8502_v19  ;;  %11120 = vmatprep.mubr.msk.f32.mxu1 %vm781_vm1, %v8763_v6 }
0x14ba   : > { %9012 = vmatmul.mubr.f32.vlgmr.msra.gmra.mrb[64].mxu1 %v8762_v42  ;;  %v8764_v1 = vmax.f32 %v8700_v54, 0.0 }
0x14bb   : > { %v8765_v17 = vmax.f32 %v8701_v21, 0.0  ;;  %v8506_v29 = vpop.f32.mrb[100].mxu0  ;;  %13351 = vmatpush3.bf16.msra.mxu1 %v13348_v35 }
0x14bc   : > { %v8702_v3 = vadd.f32 %v17887_v8, %v8506_v29  ;;  %v8508_v51 = vpop.f32.mrb[101].mxu0  ;;  %13353 = vmatprep.subr.bf16.mxu1 %v13352_v33 }
0x14bd   : > { %v8703_v45 = vadd.f32 %v17890_v37, %v8508_v51  ;;  %11121 = vmatprep.mubr.msk.f32.mxu1 %vm781_vm1, %v8765_v17 }
0x14be   : > { %9017 = vmatmul.mubr.f32.gmra.mrb[66].mxu1 %v8764_v1  ;;  %v8766_v62 = vmax.f32 %v8702_v3, 0.0 }
0x14bf   : > { %v8767_v36 = vmax.f32 %v8703_v45, 0.0  ;;  %v8512_v14 = vpop.f32.mrb[102].mxu0  ;;  %13355 = vmatpush3.bf16.msra.mxu1 %v13352_v33 }
0x14c0   : > { %v8704_v49 = vadd.f32 %v17887_v8, %v8512_v14  ;;  %v8514_v4 = vpop.f32.mrb[103].mxu0  ;;  %13357 = vmatprep.subr.bf16.mxu1 %v13356_v55 }
0x14c1   : > { %v8705_v58 = vadd.f32 %v17890_v37, %v8514_v4  ;;  %11122 = vmatprep.mubr.msk.f32.mxu1 %vm781_vm1, %v8767_v36 }
0x14c2   : > { %9022 = vmatmul.mubr.f32.gmra.mrb[68].mxu1 %v8766_v62  ;;  %v8768_v30 = vmax.f32 %v8704_v49, 0.0 }
0x14c3   : > { %v8769_v61 = vmax.f32 %v8705_v58, 0.0  ;;  %v8518_v28 = vpop.f32.mrb[104].mxu0  ;;  %13359 = vmatpush3.bf16.msra.mxu1 %v13356_v55 }
0x14c4   : > { %v8706_v46 = vadd.f32 %v17887_v8, %v8518_v28  ;;  %v8520_v9 = vpop.f32.mrb[105].mxu0  ;;  %13361 = vmatprep.subr.bf16.mxu1 %v13360_v18 }
0x14c5   : > { %v8707_v38 = vadd.f32 %v17890_v37, %v8520_v9  ;;  %11123 = vmatprep.mubr.msk.f32.mxu1 %vm781_vm1, %v8769_v61 }
0x14c6   : > { %9027 = vmatmul.mubr.f32.gmra.mrb[70].mxu1 %v8768_v30  ;;  %v8770_v52 = vmax.f32 %v8706_v46, 0.0 }
0x14c7   : > { %v8771_v57 = vmax.f32 %v8707_v38, 0.0  ;;  %v8524_v56 = vpop.f32.mrb[106].mxu0  ;;  %13363 = vmatpush3.bf16.msra.mxu1 %v13360_v18 }
0x14c8   : > { %v8708_v26 = vadd.f32 %v17887_v8, %v8524_v56  ;;  %v8526_v27 = vpop.f32.mrb[107].mxu0  ;;  %13365 = vmatprep.subr.bf16.mxu1 %v13364_v24 }
0x14c9   : > { %v8709_v6 = vadd.f32 %v17890_v37, %v8526_v27  ;;  %11124 = vmatprep.mubr.msk.f32.mxu1 %vm781_vm1, %v8771_v57 }
0x14ca   : > { %9032 = vmatmul.mubr.f32.gmra.mrb[72].mxu1 %v8770_v52  ;;  %v8772_v23 = vmax.f32 %v8708_v26, 0.0 }
0x14cb   : > { %v8773_v47 = vmax.f32 %v8709_v6, 0.0  ;;  %v8530_v35 = vpop.f32.mrb[108].mxu0  ;;  %13367 = vmatpush3.bf16.msra.mxu1 %v13364_v24 }
0x14cc   : > { %v8710_v42 = vadd.f32 %v17887_v8, %v8530_v35  ;;  %v8532_v54 = vpop.f32.mrb[109].mxu0  ;;  %13369 = vmatprep.subr.bf16.mxu1 %v13368_v41 }
0x14cd   : > { %v8711_v19 = vadd.f32 %v17890_v37, %v8532_v54  ;;  %11125 = vmatprep.mubr.msk.f32.mxu1 %vm781_vm1, %v8773_v47 }
0x14ce   : > { %9037 = vmatmul.mubr.f32.gmra.mrb[74].mxu1 %v8772_v23  ;;  %v8774_v60 = vmax.f32 %v8710_v42, 0.0 }
0x14cf   : > { %v8775_v33 = vmax.f32 %v8711_v19, 0.0  ;;  %v8536_v21 = vpop.f32.mrb[110].mxu0  ;;  %13371 = vmatpush3.bf16.msra.mxu1 %v13368_v41 }
0x14d0   : > { %v8712_v63 = vadd.f32 %v17887_v8, %v8536_v21  ;;  %v8538_v17 = vpop.f32.mrb[111].mxu0 }
0x14d1   : > { %v8713_v29 = vadd.f32 %v17890_v37, %v8538_v17  ;;  %11126 = vmatprep.mubr.msk.f32.mxu1 %vm781_vm1, %v8775_v33 }
0x14d2   : > { %9042 = vmatmul.mubr.f32.gmra.mrb[76].mxu1 %v8774_v60  ;;  %v8776_v51 = vmax.f32 %v8712_v63, 0.0 }
0x14d3   : > { %v8777_v1 = vmax.f32 %v8713_v29, 0.0  ;;  %v8542_v3 = vpop.f32.mrb[112].mxu0 }
0x14d4   : > { %v8714_v55 = vadd.f32 %v17887_v8, %v8542_v3  ;;  %v8544_v45 = vpop.f32.mrb[113].mxu0 }
0x14d5   : > { %v8715_v25 = vadd.f32 %v17890_v37, %v8544_v45  ;;  %11127 = vmatprep.mubr.msk.f32.mxu1 %vm781_vm1, %v8777_v1 }
0x14d6   : > { %9047 = vmatmul.mubr.f32.gmra.mrb[78].mxu1 %v8776_v51  ;;  %v8778_v14 = vmax.f32 %v8714_v55, 0.0 }
0x14d7   : > { %v8779_v40 = vmax.f32 %v8715_v25, 0.0  ;;  %v8548_v36 = vpop.f32.mrb[114].mxu0 }
0x14d8   : > { %v8716_v62 = vadd.f32 %v17887_v8, %v8548_v36  ;;  %v8550_v49 = vpop.f32.mrb[115].mxu0 }
0x14d9   : > { %v8717_v4 = vadd.f32 %v17890_v37, %v8550_v49  ;;  %11128 = vmatprep.mubr.msk.f32.mxu1 %vm781_vm1, %v8779_v40 }
0x14da   : > { %9052 = vmatmul.mubr.f32.gmra.mrb[80].mxu1 %v8778_v14  ;;  %v8780_v20 = vmax.f32 %v8716_v62, 0.0 }
0x14db   : > { %v8781_v18 = vmax.f32 %v8717_v4, 0.0  ;;  %v8554_v58 = vpop.f32.mrb[116].mxu0 }
0x14dc   : > { %v8718_v32 = vadd.f32 %v17887_v8, %v8554_v58  ;;  %v8556_v61 = vpop.f32.mrb[117].mxu0 }
0x14dd   : > { %v8719_v28 = vadd.f32 %v17890_v37, %v8556_v61  ;;  %11129 = vmatprep.mubr.msk.f32.mxu1 %vm781_vm1, %v8781_v18 }
0x14de   : > { %9057 = vmatmul.mubr.f32.gmra.mrb[82].mxu1 %v8780_v20  ;;  %v8782_v9 = vmax.f32 %v8718_v32, 0.0 }
0x14df   : > { %v8783_v30 = vmax.f32 %v8719_v28, 0.0  ;;  %v8560_v46 = vpop.f32.mrb[118].mxu0 }
0x14e0   : > { %v8720_v24 = vadd.f32 %v17887_v8, %v8560_v46  ;;  %v8562_v38 = vpop.f32.mrb[119].mxu0 }
0x14e1   : > { %v8721_v16 = vadd.f32 %v17890_v37, %v8562_v38  ;;  %11130 = vmatprep.mubr.msk.f32.mxu1 %vm781_vm1, %v8783_v30 }
0x14e2   : > { %9062 = vmatmul.mubr.f32.gmra.mrb[84].mxu1 %v8782_v9  ;;  %v8784_v56 = vmax.f32 %v8720_v24, 0.0 }
0x14e3   : > { %v8785_v50 = vmax.f32 %v8721_v16, 0.0  ;;  %v8566_v57 = vpop.f32.mrb[120].mxu0 }
0x14e4   : > { %v8722_v52 = vadd.f32 %v17887_v8, %v8566_v57  ;;  %v8568_v26 = vpop.f32.mrb[121].mxu0 }
0x14e5   : > { %v8723_v27 = vadd.f32 %v17890_v37, %v8568_v26  ;;  %11131 = vmatprep.mubr.msk.f32.mxu1 %vm781_vm1, %v8785_v50 }
0x14e6   : > { %9067 = vmatmul.mubr.f32.gmra.mrb[86].mxu1 %v8784_v56  ;;  %v8786_v47 = vmax.f32 %v8722_v52, 0.0 }
0x14e7   : > { %v8787_v41 = vmax.f32 %v8723_v27, 0.0  ;;  %v8572_v6 = vpop.f32.mrb[122].mxu0 }
0x14e8   : > { %v8724_v35 = vadd.f32 %v17887_v8, %v8572_v6  ;;  %v8574_v23 = vpop.f32.mrb[123].mxu0 }
0x14e9   : > { %v8725_v42 = vadd.f32 %v17890_v37, %v8574_v23  ;;  %11132 = vmatprep.mubr.msk.f32.mxu1 %vm781_vm1, %v8787_v41 }
0x14ea   : > { %9072 = vmatmul.mubr.f32.gmra.mrb[88].mxu1 %v8786_v47  ;;  %v8788_v33 = vmax.f32 %v8724_v35, 0.0 }
0x14eb   : > { %v8789_v54 = vmax.f32 %v8725_v42, 0.0  ;;  %v8578_v19 = vpop.f32.mrb[124].mxu0 }
0x14ec   : > { %v8726_v21 = vadd.f32 %v17887_v8, %v8578_v19  ;;  %v8580_v60 = vpop.f32.mrb[125].mxu0 }
0x14ed   : > { %v8727_v63 = vadd.f32 %v17890_v37, %v8580_v60  ;;  %11133 = vmatprep.mubr.msk.f32.mxu1 %vm781_vm1, %v8789_v54 }
0x14ee   : > { %9077 = vmatmul.mubr.f32.gmra.mrb[90].mxu1 %v8788_v33  ;;  %v8790_v1 = vmax.f32 %v8726_v21, 0.0 }
0x14ef   : > { %v8791_v17 = vmax.f32 %v8727_v63, 0.0  ;;  %v8584_v29 = vpop.f32.mrb[126].mxu0 }
0x14f0   : > { %v8728_v3 = vadd.f32 %v17887_v8, %v8584_v29  ;;  %v8586_v51 = vpop.f32.mrb[127].mxu0  ;;  %v11165_v29 = vld [vmem:[%s18670_s4 + $0x11b0] sm:$0xff] }
0x14f1   : > { %v8729_v55 = vadd.f32 %v17890_v37, %v8586_v51  ;;  %11134 = vmatprep.mubr.msk.f32.mxu1 %vm781_vm1, %v8791_v17  ;;  %v11164_v17 = vld [vmem:[%s18670_s4 + $0x11a0] sm:$0xff] }
0x14f2   : > { %9082 = vmatmul.mubr.f32.gmra.mrb[92].mxu1 %v8790_v1  ;;  %v8792_v40 = vmax.f32 %v8728_v3, 0.0 }
0x14f3   : > { %v8793_v45 = vmax.f32 %v8729_v55, 0.0  ;;  %v8590_v25 = vpop.f32.mrb[128].mxu0  ;;  %v13372_v55 = vpack.c.bf16 %v11165_v29, %v11164_v17 }
0x14f4   : > { %v8730_v36 = vadd.f32 %v17887_v8, %v8590_v25  ;;  %v8592_v14 = vpop.f32.mrb[129].mxu0 }
0x14f5   : > { %v8731_v62 = vadd.f32 %v17890_v37, %v8592_v14  ;;  %11135 = vmatprep.mubr.msk.f32.mxu1 %vm781_vm1, %v8793_v45  ;;  %13373 = vmatprep.subr.bf16.mxu1 %v13372_v55  ;;  %v11167_v14 = vld [vmem:[%s18670_s4 + $0x11d0] sm:$0xff] }
0x14f6   : > { %9087 = vmatmul.mubr.f32.gmra.mrb[94].mxu1 %v8792_v40  ;;  %v8794_v18 = vmax.f32 %v8730_v36, 0.0  ;;  %v11166_v36 = vld [vmem:[%s18670_s4 + $0x11c0] sm:$0xff] }
0x14f7   : > { %v8795_v49 = vmax.f32 %v8731_v62, 0.0  ;;  %v8596_v4 = vpop.f32.mrb[130].mxu0  ;;  %13375 = vmatpush3.bf16.msra.mxu1 %v13372_v55 }
0x14f8   : > { %v8732_v58 = vadd.f32 %v17887_v8, %v8596_v4  ;;  %v8598_v20 = vpop.f32.mrb[131].mxu0 }
0x14f9   : > { %v8733_v32 = vadd.f32 %v17890_v37, %v8598_v20  ;;  %11136 = vmatprep.mubr.msk.f32.mxu1 %vm781_vm1, %v8795_v49 }
0x14fa   : > { %9092 = vmatmul.mubr.f32.gmra.mrb[96].mxu1 %v8794_v18  ;;  %v8796_v30 = vmax.f32 %v8732_v58, 0.0  ;;  %v13376_v18 = vpack.c.bf16 %v11167_v14, %v11166_v36 }
0x14fb   : > { %v8797_v61 = vmax.f32 %v8733_v32, 0.0  ;;  %v8602_v28 = vpop.f32.mrb[132].mxu0 }
0x14fc   : > { %v8734_v46 = vadd.f32 %v17887_v8, %v8602_v28  ;;  %v8604_v9 = vpop.f32.mrb[133].mxu0  ;;  %13377 = vmatprep.subr.bf16.mxu1 %v13376_v18 }
0x14fd   : > { %v8735_v24 = vadd.f32 %v17890_v37, %v8604_v9  ;;  %11137 = vmatprep.mubr.msk.f32.mxu1 %vm781_vm1, %v8797_v61  ;;  %13379 = vmatpush3.bf16.msra.mxu1 %v13376_v18 }
0x14fe   : > { %9097 = vmatmul.mubr.f32.gmra.mrb[98].mxu1 %v8796_v30  ;;  %v8798_v50 = vmax.f32 %v8734_v46, 0.0 }
0x14ff   : > { %v8799_v38 = vmax.f32 %v8735_v24, 0.0  ;;  %v8608_v16 = vpop.f32.mrb[134].mxu0 }
0x1500   : > { %v8736_v57 = vadd.f32 %v17887_v8, %v8608_v16  ;;  %v8610_v56 = vpop.f32.mrb[135].mxu0 }
0x1501   : > { %v8737_v52 = vadd.f32 %v17890_v37, %v8610_v56  ;;  %11138 = vmatprep.mubr.msk.f32.mxu1 %vm781_vm1, %v8799_v38 }
0x1502   : > { %9102 = vmatmul.mubr.f32.gmra.mrb[100].mxu1 %v8798_v50  ;;  %v8800_v41 = vmax.f32 %v8736_v57, 0.0 }
0x1503   : > { %v8801_v26 = vmax.f32 %v8737_v52, 0.0  ;;  %v8614_v27 = vpop.f32.mrb[136].mxu0 }
0x1504   : > { %v8738_v6 = vadd.f32 %v17887_v8, %v8614_v27  ;;  %v8616_v47 = vpop.f32.mrb[137].mxu0 }
0x1505   : > { %v8739_v35 = vadd.f32 %v17890_v37, %v8616_v47  ;;  %11139 = vmatprep.mubr.msk.f32.mxu1 %vm781_vm1, %v8801_v26 }
0x1506   : > { %9107 = vmatmul.mubr.f32.gmra.mrb[102].mxu1 %v8800_v41  ;;  %v8802_v54 = vmax.f32 %v8738_v6, 0.0 }
0x1507   : > { %v8803_v23 = vmax.f32 %v8739_v35, 0.0  ;;  %v8620_v42 = vpop.f32.mrb[138].mxu0 }
0x1508   : > { %v8740_v19 = vadd.f32 %v17887_v8, %v8620_v42  ;;  %v8622_v33 = vpop.f32.mrb[139].mxu0 }
0x1509   : > { %v8741_v21 = vadd.f32 %v17890_v37, %v8622_v33  ;;  %11140 = vmatprep.mubr.msk.f32.mxu1 %vm781_vm1, %v8803_v23 }
0x150a   : > { %9112 = vmatmul.mubr.f32.gmra.mrb[104].mxu1 %v8802_v54  ;;  %v8804_v1 = vmax.f32 %v8740_v19, 0.0 }
0x150b   : > { %v8805_v60 = vmax.f32 %v8741_v21, 0.0  ;;  %v8626_v63 = vpop.f32.mrb[140].mxu0 }
0x150c   : > { %v8742_v3 = vadd.f32 %v17887_v8, %v8626_v63  ;;  %v8628_v51 = vpop.f32.mrb[141].mxu0 }
0x150d   : > { %v8743_v45 = vadd.f32 %v17890_v37, %v8628_v51  ;;  %11141 = vmatprep.mubr.msk.f32.mxu1 %vm781_vm1, %v8805_v60 }
0x150e   : > { %9117 = vmatmul.mubr.f32.gmra.mrb[106].mxu1 %v8804_v1  ;;  %v8806_v62 = vmax.f32 %v8742_v3, 0.0 }
0x150f   : > { %v8807_v25 = vmax.f32 %v8743_v45, 0.0  ;;  %v8632_v40 = vpop.f32.mrb[142].mxu0 }
0x1510   : > { %v8744_v49 = vadd.f32 %v17887_v8, %v8632_v40  ;;  %v8634_v4 = vpop.f32.mrb[143].mxu0 }
0x1511   : > { %v8745_v58 = vadd.f32 %v17890_v37, %v8634_v4  ;;  %11142 = vmatprep.mubr.msk.f32.mxu1 %vm781_vm1, %v8807_v25 }
0x1512   : > { %9122 = vmatmul.mubr.f32.gmra.mrb[108].mxu1 %v8806_v62  ;;  %v8808_v61 = vmax.f32 %v8744_v49, 0.0 }
0x1513   : > { %v8809_v20 = vmax.f32 %v8745_v58, 0.0  ;;  %v8638_v32 = vpop.f32.mrb[144].mxu0 }
0x1514   : > { %v8746_v28 = vadd.f32 %v17887_v8, %v8638_v32  ;;  %v8640_v30 = vpop.f32.mrb[145].mxu0 }
0x1515   : > { %v8747_v46 = vadd.f32 %v17890_v37, %v8640_v30  ;;  %11143 = vmatprep.mubr.msk.f32.mxu1 %vm781_vm1, %v8809_v20 }
0x1516   : > { %9127 = vmatmul.mubr.f32.gmra.mrb[110].mxu1 %v8808_v61  ;;  %v8810_v38 = vmax.f32 %v8746_v28, 0.0 }
0x1517   : > { %v8811_v9 = vmax.f32 %v8747_v46, 0.0  ;;  %v8644_v24 = vpop.f32.mrb[146].mxu0 }
0x1518   : > { %v8748_v16 = vadd.f32 %v17887_v8, %v8644_v24  ;;  %v8646_v50 = vpop.f32.mrb[147].mxu0 }
0x1519   : > { %v8749_v57 = vadd.f32 %v17890_v37, %v8646_v50  ;;  %11144 = vmatprep.mubr.msk.f32.mxu1 %vm781_vm1, %v8811_v9  ;;  %v18039_v9 = vld [vmem:[%s18670_s4 + $0x10d0] ss:$0 sm:$0xff] }
0x151a   : > { %9132 = vmatmul.mubr.f32.gmra.mrb[112].mxu1 %v8810_v38  ;;  %v8812_v26 = vmax.f32 %v8748_v16, 0.0  ;;  %v11170_v16 = vld [vmem:[%s18670_s4 + $0x1200] sm:$0xff]  ;;  %v11171_v50 = vld [vmem:[%s18670_s4 + $0x1210] sm:$0xff] }
0x151b   : > { %v8813_v56 = vmax.f32 %v8749_v57, 0.0  ;;  %v8650_v52 = vpop.f32.mrb[148].mxu0 }
0x151c   : > { %v8750_v27 = vadd.f32 %v17887_v8, %v8650_v52  ;;  %v8652_v41 = vpop.f32.mrb[149].mxu0 }
0x151d   : > { %v8751_v6 = vadd.f32 %v17890_v37, %v8652_v41  ;;  %11145 = vmatprep.mubr.msk.f32.mxu1 %vm781_vm1, %v8813_v56  ;;  %v11172_v56 = vld [vmem:[%s18670_s4 + $0x1220] sm:$0xff] }
0x151e   : > { %9137 = vmatmul.mubr.f32.gmra.mrb[114].mxu1 %v8812_v26  ;;  %v8814_v23 = vmax.f32 %v8750_v27, 0.0  ;;  %v13384_v26 = vpack.c.bf16 %v11172_v56, %v11171_v50  ;;  %v11173_v27 = vld [vmem:[%s18670_s4 + $0x1230] sm:$0xff]  ;;  %v11174_v41 = vld [vmem:[%s18670_s4 + $0x1240] sm:$0xff] }
0x151f   : > { %v8815_v47 = vmax.f32 %v8751_v6, 0.0  ;;  %v8656_v35 = vpop.f32.mrb[150].mxu0 }
0x1520   : > { %v8752_v42 = vadd.f32 %v17887_v8, %v8656_v35  ;;  %v8658_v54 = vpop.f32.mrb[151].mxu0 }
0x1521   : > { %v8753_v19 = vadd.f32 %v17890_v37, %v8658_v54  ;;  %11146 = vmatprep.mubr.msk.f32.mxu1 %vm781_vm1, %v8815_v47  ;;  %v11175_v54 = vld [vmem:[%s18670_s4 + $0x1250] sm:$0xff] }
0x1522   : > { %9142 = vmatmul.mubr.f32.gmra.mrb[116].mxu1 %v8814_v23  ;;  %v8816_v60 = vmax.f32 %v8752_v42, 0.0  ;;  %v13388_v23 = vpack.c.bf16 %v11174_v41, %v11173_v27 }
0x1523   : > { %v8817_v33 = vmax.f32 %v8753_v19, 0.0  ;;  %v8662_v21 = vpop.f32.mrb[152].mxu0  ;;  %v11176_v19 = vld [vmem:[%s18670_s4 + $0x1260] sm:$0xff] }
0x1524   : > { %v8754_v63 = vadd.f32 %v17887_v8, %v8662_v21  ;;  %v8664_v17 = vpop.f32.mrb[153].mxu0 }
0x1525   : > { %v8755_v29 = vadd.f32 %v17890_v37, %v8664_v17  ;;  %11147 = vmatprep.mubr.msk.f32.mxu1 %vm781_vm1, %v8817_v33 }
0x1526   : > { %9147 = vmatmul.mubr.f32.gmra.mrb[118].mxu1 %v8816_v60  ;;  %v8818_v51 = vmax.f32 %v8754_v63, 0.0  ;;  %v13392_v63 = vpack.c.bf16 %v11176_v19, %v11175_v54 }
0x1527   : > { %v8819_v1 = vmax.f32 %v8755_v29, 0.0  ;;  %v8668_v3 = vpop.f32.mrb[154].mxu0  ;;  %v11177_v29 = vld [vmem:[%s18670_s4 + $0x1270] sm:$0xff] }
0x1528   : > { %v8756_v55 = vadd.f32 %v17887_v8, %v8668_v3  ;;  %v8670_v45 = vpop.f32.mrb[155].mxu0 }
0x1529   : > { %v8757_v25 = vadd.f32 %v17890_v37, %v8670_v45  ;;  %11148 = vmatprep.mubr.msk.f32.mxu1 %vm781_vm1, %v8819_v1  ;;  %v11178_v1 = vld [vmem:[%s18670_s4 + $0x1280] sm:$0xff] }
0x152a   : > { %9152 = vmatmul.mubr.f32.gmra.mrb[120].mxu1 %v8818_v51  ;;  %v8820_v14 = vmax.f32 %v8756_v55, 0.0  ;;  %v13396_v45 = vpack.c.bf16 %v11178_v1, %v11177_v29 }
0x152b   : > { %v8821_v40 = vmax.f32 %v8757_v25, 0.0  ;;  %v8674_v36 = vpop.f32.mrb[156].mxu0 }
0x152c   : > { %v8758_v62 = vadd.f32 %v17887_v8, %v8674_v36  ;;  %v8676_v49 = vpop.f32.mrb[157].mxu0  ;;  %v11180_v36 = vld [vmem:[%s18670_s4 + $0x12a0] sm:$0xff] }
0x152d   : > { %v8759_v4 = vadd.f32 %v17890_v37, %v8676_v49  ;;  %11149 = vmatprep.mubr.msk.f32.mxu1 %vm781_vm1, %v8821_v40  ;;  %v11179_v40 = vld [vmem:[%s18670_s4 + $0x1290] sm:$0xff] }
0x152e   : > { %9157 = vmatmul.mubr.f32.gmra.mrb[122].mxu1 %v8820_v14  ;;  %v8822_v20 = vmax.f32 %v8758_v62, 0.0 }
0x152f   : > { %v8823_v18 = vmax.f32 %v8759_v4, 0.0  ;;  %v8680_v58 = vpop.f32.mrb[158].mxu0  ;;  %v13400_v4 = vpack.c.bf16 %v11180_v36, %v11179_v40 }
0x1530   : > { %v8760_v32 = vadd.f32 %v17887_v8, %v8680_v58  ;;  %v8682_v61 = vpop.f32.mrb[159].mxu0  ;;  %v11181_v58 = vld [vmem:[%s18670_s4 + $0x12b0] sm:$0xff] }
0x1531   : > { %v8761_v28 = vadd.f32 %v17890_v37, %v8682_v61  ;;  %11150 = vmatprep.mubr.msk.f32.mxu1 %vm781_vm1, %v8823_v18  ;;  %v11169_v37 = vld [vmem:[%s18670_s4 + $0x11f0] sm:$0xff] }
0x1532   : > { %9162 = vmatmul.mubr.f32.gmra.mrb[124].mxu1 %v8822_v20  ;;  %v8824_v46 = vmax.f32 %v8760_v32, 0.0  ;;  %v13380_v57 = vpack.c.bf16 %v11170_v16, %v11169_v37  ;;  %v11182_v20 = vld [vmem:[%s18670_s4 + $0x12c0] sm:$0xff] }
0x1533   : > { %v8825_v30 = vmax.f32 %v8761_v28, 0.0 }
0x1534   : > { %13381 = vmatprep.subr.bf16.mxu0 %v13380_v57 }
0x1535   : > { %11151 = vmatprep.mubr.msk.f32.mxu1 %vm781_vm1, %v8825_v30  ;;  %13383 = vmatpush3.bf16.msra.mxu0 %v13380_v57  ;;  %v13404_v30 = vpack.c.bf16 %v11182_v20, %v11181_v58 }
0x1536   : > { %9167 = vmatmul.mubr.f32.gmra.mrb[126].mxu1 %v8824_v46  ;;  %13385 = vmatprep.subr.bf16.mxu0 %v13384_v26 }
0x1539   : > { %13387 = vmatpush3.bf16.msra.mxu0 %v13384_v26 }
0x153a   : > { %13389 = vmatprep.subr.bf16.mxu0 %v13388_v23 }
0x153d   : > { %13391 = vmatpush3.bf16.msra.mxu0 %v13388_v23 }
0x153e   : > { %13393 = vmatprep.subr.bf16.mxu0 %v13392_v63 }
0x1541   : > { %13395 = vmatpush3.bf16.msra.mxu0 %v13392_v63 }
0x1542   : > { %13397 = vmatprep.subr.bf16.mxu0 %v13396_v45 }
0x1545   : > { %13399 = vmatpush3.bf16.msra.mxu0 %v13396_v45 }
0x1546   : > { %13401 = vmatprep.subr.bf16.mxu0 %v13400_v4 }
0x1549   : > { %13403 = vmatpush3.bf16.msra.mxu0 %v13400_v4 }
0x154a   : > { %13405 = vmatprep.subr.bf16.mxu0 %v13404_v30 }
0x154d   : > { %13407 = vmatpush3.bf16.msra.mxu0 %v13404_v30 }
0x158d   : > { %v9013_v24 = vpop.f32.mrb[64].mxu1 }
0x158e   : > { %v9014_v38 = vadd.f32 %v18039_v9, %v9013_v24  ;;  %v9015_v8 = vpop.f32.mrb[65].mxu1 }
0x1590   : > { %v9172_v52 = vmax.f32 %v9014_v38, 0.0 }
0x1591   : > { %v9018_v6 = vpop.f32.mrb[66].mxu1 }
0x1592   : > { %v9019_v47 = vadd.f32 %v18039_v9, %v9018_v6  ;;  %v9020_v35 = vpop.f32.mrb[67].mxu1  ;;  %12459 = vmatprep.mubr.f32.mxu1 %v9172_v52 }
0x1594   : > { %v9173_v42 = vmax.f32 %v9019_v47, 0.0 }
0x1595   : > { %v9023_v33 = vpop.f32.mrb[68].mxu1 }
0x1596   : > { %v9024_v21 = vadd.f32 %v18039_v9, %v9023_v33  ;;  %v9025_v60 = vpop.f32.mrb[69].mxu1  ;;  %12460 = vmatmul.mubr.f32.vlgmr.msra.gmra.mrb[128].mxu1 %v9173_v42 }
0x1598   : > { %v9174_v17 = vmax.f32 %v9024_v21, 0.0 }
0x1599   : > { %v9028_v3 = vpop.f32.mrb[70].mxu1 }
0x159a   : > { %v9029_v51 = vadd.f32 %v18039_v9, %v9028_v3  ;;  %v9030_v55 = vpop.f32.mrb[71].mxu1  ;;  %12462 = vmatprep.mubr.f32.mxu1 %v9174_v17 }
0x159c   : > { %v9175_v25 = vmax.f32 %v9029_v51, 0.0 }
0x159d   : > { %v9033_v14 = vpop.f32.mrb[72].mxu1 }
0x159e   : > { %v9034_v62 = vadd.f32 %v18039_v9, %v9033_v14  ;;  %v9035_v49 = vpop.f32.mrb[73].mxu1  ;;  %12463 = vmatmul.mubr.f32.gmra.mrb[130].mxu1 %v9175_v25 }
0x15a0   : > { %v9176_v18 = vmax.f32 %v9034_v62, 0.0 }
0x15a1   : > { %v9038_v32 = vpop.f32.mrb[74].mxu1 }
0x15a2   : > { %v9039_v61 = vadd.f32 %v18039_v9, %v9038_v32  ;;  %v9040_v28 = vpop.f32.mrb[75].mxu1  ;;  %12465 = vmatprep.mubr.f32.mxu1 %v9176_v18 }
0x15a4   : > { %v9177_v46 = vmax.f32 %v9039_v61, 0.0 }
0x15a5   : > { %v9043_v24 = vpop.f32.mrb[76].mxu1 }
0x15a6   : > { %v9044_v38 = vadd.f32 %v18039_v9, %v9043_v24  ;;  %v9045_v8 = vpop.f32.mrb[77].mxu1  ;;  %12466 = vmatmul.mubr.f32.gmra.mrb[132].mxu1 %v9177_v46 }
0x15a8   : > { %v9178_v37 = vmax.f32 %v9044_v38, 0.0 }
0x15a9   : > { %v9048_v16 = vpop.f32.mrb[78].mxu1 }
0x15aa   : > { %v9049_v50 = vadd.f32 %v18039_v9, %v9048_v16  ;;  %v9050_v57 = vpop.f32.mrb[79].mxu1  ;;  %12468 = vmatprep.mubr.f32.mxu1 %v9178_v37 }
0x15ac   : > { %v9179_v56 = vmax.f32 %v9049_v50, 0.0 }
0x15ad   : > { %v9053_v52 = vpop.f32.mrb[80].mxu1 }
0x15ae   : > { %v9054_v26 = vadd.f32 %v18039_v9, %v9053_v52  ;;  %v9055_v27 = vpop.f32.mrb[81].mxu1  ;;  %12469 = vmatmul.mubr.f32.gmra.mrb[134].mxu1 %v9179_v56 }
0x15b0   : > { %v9180_v41 = vmax.f32 %v9054_v26, 0.0 }
0x15b1   : > { %v9058_v6 = vpop.f32.mrb[82].mxu1 }
0x15b2   : > { %v9059_v47 = vadd.f32 %v18039_v9, %v9058_v6  ;;  %v9060_v35 = vpop.f32.mrb[83].mxu1  ;;  %12471 = vmatprep.mubr.f32.mxu1 %v9180_v41 }
0x15b4   : > { %v9181_v23 = vmax.f32 %v9059_v47, 0.0 }
0x15b5   : > { %v9063_v42 = vpop.f32.mrb[84].mxu1 }
0x15b6   : > { %v9064_v54 = vadd.f32 %v18039_v9, %v9063_v42  ;;  %v9065_v19 = vpop.f32.mrb[85].mxu1  ;;  %12472 = vmatmul.mubr.f32.gmra.mrb[136].mxu1 %v9181_v23 }
0x15b8   : > { %v9182_v33 = vmax.f32 %v9064_v54, 0.0 }
0x15b9   : > { %v9068_v21 = vpop.f32.mrb[86].mxu1 }
0x15ba   : > { %v9069_v60 = vadd.f32 %v18039_v9, %v9068_v21  ;;  %v9070_v63 = vpop.f32.mrb[87].mxu1  ;;  %12474 = vmatprep.mubr.f32.mxu1 %v9182_v33 }
0x15bc   : > { %v9183_v17 = vmax.f32 %v9069_v60, 0.0 }
0x15bd   : > { %v9073_v29 = vpop.f32.mrb[88].mxu1 }
0x15be   : > { %v9074_v1 = vadd.f32 %v18039_v9, %v9073_v29  ;;  %v9075_v3 = vpop.f32.mrb[89].mxu1  ;;  %12475 = vmatmul.mubr.f32.gmra.mrb[138].mxu1 %v9183_v17  ;;  %v11183_v29 = vld [vmem:[%s18670_s4 + $0x12d0] sm:$0xff] }
0x15c0   : > { %v9184_v51 = vmax.f32 %v9074_v1, 0.0  ;;  %v11184_v1 = vld [vmem:[%s18670_s4 + $0x12e0] sm:$0xff] }
0x15c1   : > { %v9078_v55 = vpop.f32.mrb[90].mxu1 }
0x15c2   : > { %v9079_v45 = vadd.f32 %v18039_v9, %v9078_v55  ;;  %v9080_v25 = vpop.f32.mrb[91].mxu1  ;;  %12477 = vmatprep.mubr.f32.mxu1 %v9184_v51  ;;  %v13408_v55 = vpack.c.bf16 %v11184_v1, %v11183_v29 }
0x15c4   : > { %v9185_v40 = vmax.f32 %v9079_v45, 0.0  ;;  %13409 = vmatprep.subr.bf16.mxu0 %v13408_v55 }
0x15c5   : > { %v9083_v36 = vpop.f32.mrb[92].mxu1  ;;  %13411 = vmatpush3.bf16.msra.mxu0 %v13408_v55 }
0x15c6   : > { %v9084_v14 = vadd.f32 %v18039_v9, %v9083_v36  ;;  %v9085_v62 = vpop.f32.mrb[93].mxu1  ;;  %12478 = vmatmul.mubr.f32.gmra.mrb[140].mxu1 %v9185_v40  ;;  %13492 = vmatprep.subr.bf16.mxu0 %v18828_v22 }
0x15c8   : > { %v9186_v49 = vmax.f32 %v9084_v14, 0.0 }
0x15c9   : > { %v9088_v4 = vpop.f32.mrb[94].mxu1 }
0x15ca   : > { %v9089_v18 = vadd.f32 %v18039_v9, %v9088_v4  ;;  %v9090_v58 = vpop.f32.mrb[95].mxu1  ;;  %12480 = vmatprep.mubr.f32.mxu1 %v9186_v49 }
0x15cc   : > { %v9187_v20 = vmax.f32 %v9089_v18, 0.0 }
0x15cd   : > { %v9093_v32 = vpop.f32.mrb[96].mxu1 }
0x15ce   : > { %v9094_v61 = vadd.f32 %v18039_v9, %v9093_v32  ;;  %v9095_v28 = vpop.f32.mrb[97].mxu1  ;;  %12481 = vmatmul.mubr.f32.gmra.mrb[142].mxu1 %v9187_v20 }
0x15d0   : > { %v9188_v30 = vmax.f32 %v9094_v61, 0.0 }
0x15d1   : > { %v9098_v46 = vpop.f32.mrb[98].mxu1 }
0x15d2   : > { %v9099_v24 = vadd.f32 %v18039_v9, %v9098_v46  ;;  %v9100_v38 = vpop.f32.mrb[99].mxu1  ;;  %12483 = vmatprep.mubr.f32.mxu1 %v9188_v30 }
0x15d4   : > { %v9189_v8 = vmax.f32 %v9099_v24, 0.0 }
0x15d5   : > { %v9103_v37 = vpop.f32.mrb[100].mxu1 }
0x15d6   : > { %v9104_v16 = vadd.f32 %v18039_v9, %v9103_v37  ;;  %v9105_v50 = vpop.f32.mrb[101].mxu1  ;;  %12484 = vmatmul.mubr.f32.gmra.mrb[144].mxu1 %v9189_v8 }
0x15d8   : > { %v9190_v57 = vmax.f32 %v9104_v16, 0.0 }
0x15d9   : > { %v9108_v56 = vpop.f32.mrb[102].mxu1 }
0x15da   : > { %v9109_v52 = vadd.f32 %v18039_v9, %v9108_v56  ;;  %v9110_v26 = vpop.f32.mrb[103].mxu1  ;;  %12486 = vmatprep.mubr.f32.mxu1 %v9190_v57 }
0x15dc   : > { %v9191_v27 = vmax.f32 %v9109_v52, 0.0 }
0x15dd   : > { %v9113_v41 = vpop.f32.mrb[104].mxu1 }
0x15de   : > { %v9114_v6 = vadd.f32 %v18039_v9, %v9113_v41  ;;  %v9115_v47 = vpop.f32.mrb[105].mxu1  ;;  %12487 = vmatmul.mubr.f32.gmra.mrb[146].mxu1 %v9191_v27 }
0x15e0   : > { %v9192_v35 = vmax.f32 %v9114_v6, 0.0 }
0x15e1   : > { %v9118_v23 = vpop.f32.mrb[106].mxu1 }
0x15e2   : > { %v9119_v42 = vadd.f32 %v18039_v9, %v9118_v23  ;;  %v9120_v54 = vpop.f32.mrb[107].mxu1  ;;  %12489 = vmatprep.mubr.f32.mxu1 %v9192_v35 }
0x15e3   : > { %v18125_v54 = vld [vmem:[%s18670_s4 + $0x11e0] ss:$0 sm:$0xff] }
0x15e4   : > { %v9193_v19 = vmax.f32 %v9119_v42, 0.0 }
0x15e5   : > { %v9123_v33 = vpop.f32.mrb[108].mxu1 }
0x15e6   : > { %v9124_v21 = vadd.f32 %v18039_v9, %v9123_v33  ;;  %v9125_v60 = vpop.f32.mrb[109].mxu1  ;;  %12490 = vmatmul.mubr.f32.gmra.mrb[148].mxu1 %v9193_v19 }
0x15e8   : > { %v9194_v63 = vmax.f32 %v9124_v21, 0.0 }
0x15e9   : > { %v9128_v17 = vpop.f32.mrb[110].mxu1 }
0x15ea   : > { %v9129_v3 = vadd.f32 %v18039_v9, %v9128_v17  ;;  %v9130_v51 = vpop.f32.mrb[111].mxu1  ;;  %12492 = vmatprep.mubr.f32.mxu1 %v9194_v63 }
0x15ec   : > { %v9195_v45 = vmax.f32 %v9129_v3, 0.0 }
0x15ed   : > { %v9133_v25 = vpop.f32.mrb[112].mxu1 }
0x15ee   : > { %v9134_v40 = vadd.f32 %v18039_v9, %v9133_v25  ;;  %v9135_v36 = vpop.f32.mrb[113].mxu1  ;;  %12493 = vmatmul.mubr.f32.gmra.mrb[150].mxu1 %v9195_v45 }
0x15f0   : > { %v9196_v14 = vmax.f32 %v9134_v40, 0.0 }
0x15f1   : > { %v9138_v62 = vpop.f32.mrb[114].mxu1 }
0x15f2   : > { %v9139_v49 = vadd.f32 %v18039_v9, %v9138_v62  ;;  %v9140_v4 = vpop.f32.mrb[115].mxu1  ;;  %12495 = vmatprep.mubr.f32.mxu1 %v9196_v14 }
0x15f4   : > { %v9197_v18 = vmax.f32 %v9139_v49, 0.0 }
0x15f5   : > { %v9143_v58 = vpop.f32.mrb[116].mxu1 }
0x15f6   : > { %v9144_v20 = vadd.f32 %v18039_v9, %v9143_v58  ;;  %v9145_v32 = vpop.f32.mrb[117].mxu1  ;;  %12496 = vmatmul.mubr.f32.gmra.mrb[152].mxu1 %v9197_v18 }
0x15f8   : > { %v9198_v61 = vmax.f32 %v9144_v20, 0.0 }
0x15f9   : > { %v9148_v28 = vpop.f32.mrb[118].mxu1 }
0x15fa   : > { %v9149_v30 = vadd.f32 %v18039_v9, %v9148_v28  ;;  %v9150_v46 = vpop.f32.mrb[119].mxu1  ;;  %12498 = vmatprep.mubr.f32.mxu1 %v9198_v61 }
0x15fc   : > { %v9199_v24 = vmax.f32 %v9149_v30, 0.0 }
0x15fd   : > { %v9153_v38 = vpop.f32.mrb[120].mxu1 }
0x15fe   : > { %v9154_v8 = vadd.f32 %v18039_v9, %v9153_v38  ;;  %v9155_v37 = vpop.f32.mrb[121].mxu1  ;;  %12499 = vmatmul.mubr.f32.gmra.mrb[154].mxu1 %v9199_v24 }
0x1600   : > { %v9200_v16 = vmax.f32 %v9154_v8, 0.0 }
0x1601   : > { %v9158_v50 = vpop.f32.mrb[122].mxu1 }
0x1602   : > { %v9159_v57 = vadd.f32 %v18039_v9, %v9158_v50  ;;  %v9160_v56 = vpop.f32.mrb[123].mxu1  ;;  %12501 = vmatprep.mubr.f32.mxu1 %v9200_v16 }
0x1604   : > { %v9201_v52 = vmax.f32 %v9159_v57, 0.0 }
0x1605   : > { %v9163_v26 = vpop.f32.mrb[124].mxu1 }
0x1606   : > { %v9164_v27 = vadd.f32 %v18039_v9, %v9163_v26  ;;  %v9165_v41 = vpop.f32.mrb[125].mxu1  ;;  %12502 = vmatmul.mubr.f32.gmra.mrb[156].mxu1 %v9201_v52 }
0x1608   : > { %v9202_v6 = vmax.f32 %v9164_v27, 0.0 }
0x1609   : > { %v9168_v47 = vpop.f32.mrb[126].mxu1 }
0x160a   : > { %v9169_v35 = vadd.f32 %v18039_v9, %v9168_v47  ;;  %v9170_v23 = vpop.f32.mrb[127].mxu1  ;;  %12504 = vmatprep.mubr.f32.mxu1 %v9202_v6 }
0x160c   : > { %v9203_v42 = vmax.f32 %v9169_v35, 0.0 }
0x160e   : > { %12505 = vmatmul.mubr.f32.gmra.mrb[158].mxu1 %v9203_v42 }
0x1669   : > { %v12461_v19 = vpop.f32.mrb[128].mxu1 }
0x166a   : > { %v9293_v33 = vadd.f32 %v12461_v19, %v18125_v54  ;;  %v9287_v21 = vpop.f32.mrb[129].mxu1 }
0x166b   : > { %v9288_v60 = vadd.f32 %v18125_v54, %v9287_v21 }
0x166c   : > { %v9447_v17 = vmax.f32 %v9293_v33, 0.0 }
0x166d   : > { %v9446_v63 = vmax.f32 %v9288_v60, 0.0 }
0x166f   : > { %12539 = vmatprep.mubr.f32.mxu0 %v9446_v63 }
0x1670   : > { %12540 = vmatmul.mubr.f32.vlgmr.msra.gmra.mrb[160].mxu0 %v9447_v17 }
0x1671   : > { %v12464_v9 = vpop.f32.mrb[130].mxu1 }
0x1672   : > { %v9303_v29 = vadd.f32 %v12464_v9, %v18125_v54  ;;  %v9297_v1 = vpop.f32.mrb[131].mxu1 }
0x1673   : > { %v9298_v3 = vadd.f32 %v18125_v54, %v9297_v1 }
0x1674   : > { %v9449_v55 = vmax.f32 %v9303_v29, 0.0 }
0x1675   : > { %v9448_v51 = vmax.f32 %v9298_v3, 0.0 }
0x1677   : > { %12542 = vmatprep.mubr.f32.mxu0 %v9448_v51 }
0x1678   : > { %12543 = vmatmul.mubr.f32.gmra.mrb[162].mxu0 %v9449_v55 }
0x1679   : > { %v12467_v45 = vpop.f32.mrb[132].mxu1 }
0x167a   : > { %v9313_v25 = vadd.f32 %v12467_v45, %v18125_v54  ;;  %v9307_v40 = vpop.f32.mrb[133].mxu1 }
0x167b   : > { %v9308_v36 = vadd.f32 %v18125_v54, %v9307_v40 }
0x167c   : > { %v9451_v62 = vmax.f32 %v9313_v25, 0.0 }
0x167d   : > { %v9450_v14 = vmax.f32 %v9308_v36, 0.0 }
0x167f   : > { %12545 = vmatprep.mubr.f32.mxu0 %v9450_v14 }
0x1680   : > { %12546 = vmatmul.mubr.f32.gmra.mrb[164].mxu0 %v9451_v62 }
0x1681   : > { %v12470_v49 = vpop.f32.mrb[134].mxu1 }
0x1682   : > { %v9323_v4 = vadd.f32 %v12470_v49, %v18125_v54  ;;  %v9317_v18 = vpop.f32.mrb[135].mxu1 }
0x1683   : > { %v9318_v58 = vadd.f32 %v18125_v54, %v9317_v18 }
0x1684   : > { %v9453_v32 = vmax.f32 %v9323_v4, 0.0 }
0x1685   : > { %v9452_v20 = vmax.f32 %v9318_v58, 0.0 }
0x1687   : > { %12548 = vmatprep.mubr.f32.mxu0 %v9452_v20 }
0x1688   : > { %12549 = vmatmul.mubr.f32.gmra.mrb[166].mxu0 %v9453_v32 }
0x1689   : > { %v12473_v61 = vpop.f32.mrb[136].mxu1 }
0x168a   : > { %v9333_v28 = vadd.f32 %v12473_v61, %v18125_v54  ;;  %v9327_v30 = vpop.f32.mrb[137].mxu1 }
0x168b   : > { %v9328_v46 = vadd.f32 %v18125_v54, %v9327_v30 }
0x168c   : > { %v9455_v38 = vmax.f32 %v9333_v28, 0.0 }
0x168d   : > { %v9454_v24 = vmax.f32 %v9328_v46, 0.0 }
0x168f   : > { %12551 = vmatprep.mubr.f32.mxu0 %v9454_v24 }
0x1690   : > { %12552 = vmatmul.mubr.f32.gmra.mrb[168].mxu0 %v9455_v38 }
0x1691   : > { %v12476_v8 = vpop.f32.mrb[138].mxu1 }
0x1692   : > { %v9343_v37 = vadd.f32 %v12476_v8, %v18125_v54  ;;  %v9337_v16 = vpop.f32.mrb[139].mxu1 }
0x1693   : > { %v9338_v50 = vadd.f32 %v18125_v54, %v9337_v16 }
0x1694   : > { %v9457_v56 = vmax.f32 %v9343_v37, 0.0 }
0x1695   : > { %v9456_v57 = vmax.f32 %v9338_v50, 0.0 }
0x1697   : > { %12554 = vmatprep.mubr.f32.mxu0 %v9456_v57 }
0x1698   : > { %12555 = vmatmul.mubr.f32.gmra.mrb[170].mxu0 %v9457_v56 }
0x1699   : > { %v12479_v52 = vpop.f32.mrb[140].mxu1 }
0x169a   : > { %v9353_v26 = vadd.f32 %v12479_v52, %v18125_v54  ;;  %v9347_v27 = vpop.f32.mrb[141].mxu1 }
0x169b   : > { %v9348_v41 = vadd.f32 %v18125_v54, %v9347_v27 }
0x169c   : > { %v9459_v47 = vmax.f32 %v9353_v26, 0.0 }
0x169d   : > { %v9458_v6 = vmax.f32 %v9348_v41, 0.0 }
0x169f   : > { %12557 = vmatprep.mubr.f32.mxu0 %v9458_v6 }
0x16a0   : > { %12558 = vmatmul.mubr.f32.gmra.mrb[172].mxu0 %v9459_v47 }
0x16a1   : > { %v12482_v35 = vpop.f32.mrb[142].mxu1 }
0x16a2   : > { %v9363_v23 = vadd.f32 %v12482_v35, %v18125_v54  ;;  %v9357_v42 = vpop.f32.mrb[143].mxu1 }
0x16a3   : > { %v9358_v19 = vadd.f32 %v18125_v54, %v9357_v42 }
0x16a4   : > { %v9461_v21 = vmax.f32 %v9363_v23, 0.0 }
0x16a5   : > { %v9460_v33 = vmax.f32 %v9358_v19, 0.0 }
0x16a7   : > { %12560 = vmatprep.mubr.f32.mxu0 %v9460_v33 }
0x16a8   : > { %12561 = vmatmul.mubr.f32.gmra.mrb[174].mxu0 %v9461_v21 }
0x16a9   : > { %v12485_v60 = vpop.f32.mrb[144].mxu1 }
0x16aa   : > { %v9373_v63 = vadd.f32 %v12485_v60, %v18125_v54  ;;  %v9367_v17 = vpop.f32.mrb[145].mxu1 }
0x16ab   : > { %v9368_v9 = vadd.f32 %v18125_v54, %v9367_v17 }
0x16ac   : > { %v9463_v1 = vmax.f32 %v9373_v63, 0.0 }
0x16ad   : > { %v9462_v29 = vmax.f32 %v9368_v9, 0.0  ;;  %v18162_v9 = vld [vmem:[%s18670_s4 + $0x12f0] ss:$0 sm:$0xff] }
0x16af   : > { %12563 = vmatprep.mubr.f32.mxu0 %v9462_v29 }
0x16b0   : > { %12564 = vmatmul.mubr.f32.gmra.mrb[176].mxu0 %v9463_v1  ;;  %v9753_v1 = vld [vmem:[%s18668_s2 + $0x8] sm:$0xff] }
0x16b1   : > { %v12488_v3 = vpop.f32.mrb[146].mxu1  ;;  %9820 = vmatprep.mubr.f32.mxu1 %v9753_v1  ;;  %v18998_v1 = vld [vmem:[#allocation8_spill] sm:$0xff] }
0x16b2   : > { %v9383_v51 = vadd.f32 %v12488_v3, %v18125_v54  ;;  %v9377_v55 = vpop.f32.mrb[147].mxu1 }
0x16b3   : > { %v9378_v45 = vadd.f32 %v18125_v54, %v9377_v55 }
0x16b4   : > { %v9465_v40 = vmax.f32 %v9383_v51, 0.0 }
0x16b5   : > { %v9464_v25 = vmax.f32 %v9378_v45, 0.0 }
0x16b7   : > { %12566 = vmatprep.mubr.f32.mxu0 %v9464_v25 }
0x16b8   : > { %12567 = vmatmul.mubr.f32.gmra.mrb[178].mxu0 %v9465_v40 }
0x16b9   : > { %v12491_v36 = vpop.f32.mrb[148].mxu1 }
0x16ba   : > { %v9393_v14 = vadd.f32 %v12491_v36, %v18125_v54  ;;  %v9387_v62 = vpop.f32.mrb[149].mxu1 }
0x16bb   : > { %v9388_v49 = vadd.f32 %v18125_v54, %v9387_v62 }
0x16bc   : > { %v9467_v18 = vmax.f32 %v9393_v14, 0.0 }
0x16bd   : > { %v9466_v4 = vmax.f32 %v9388_v49, 0.0 }
0x16bf   : > { %12569 = vmatprep.mubr.f32.mxu0 %v9466_v4 }
0x16c0   : > { %12570 = vmatmul.mubr.f32.gmra.mrb[180].mxu0 %v9467_v18 }
0x16c1   : > { %v12494_v58 = vpop.f32.mrb[150].mxu1 }
0x16c2   : > { %v9403_v20 = vadd.f32 %v12494_v58, %v18125_v54  ;;  %v9397_v32 = vpop.f32.mrb[151].mxu1 }
0x16c3   : > { %v9398_v61 = vadd.f32 %v18125_v54, %v9397_v32 }
0x16c4   : > { %v9469_v30 = vmax.f32 %v9403_v20, 0.0 }
0x16c5   : > { %v9468_v28 = vmax.f32 %v9398_v61, 0.0  ;;  %v19011_v61 = vld [vmem:[#allocation37_spill] sm:$0xff] }
0x16c7   : > { %12572 = vmatprep.mubr.f32.mxu0 %v9468_v28 }
0x16c8   : > { %12573 = vmatmul.mubr.f32.gmra.mrb[182].mxu0 %v9469_v30 }
0x16c9   : > { %v12497_v46 = vpop.f32.mrb[152].mxu1 }
0x16ca   : > { %v9413_v24 = vadd.f32 %v12497_v46, %v18125_v54  ;;  %v9407_v38 = vpop.f32.mrb[153].mxu1 }
0x16cb   : > { %v9408_v8 = vadd.f32 %v18125_v54, %v9407_v38  ;;  %v18986_v38 = vld [vmem:[#allocation3_spill] sm:$0xff] }
0x16cc   : > { %v9471_v16 = vmax.f32 %v9413_v24, 0.0 }
0x16cd   : > { %v9470_v37 = vmax.f32 %v9408_v8, 0.0 }
0x16cf   : > { %12575 = vmatprep.mubr.f32.mxu0 %v9470_v37  ;;  %v19014_v37 = vld [vmem:[#allocation38_spill] sm:$0xff] }
0x16d0   : > { %12576 = vmatmul.mubr.f32.gmra.mrb[184].mxu0 %v9471_v16 }
0x16d1   : > { %v12500_v50 = vpop.f32.mrb[154].mxu1 }
0x16d2   : > { %v9423_v57 = vadd.f32 %v12500_v50, %v18125_v54  ;;  %v9417_v56 = vpop.f32.mrb[155].mxu1 }
0x16d3   : > { %v9418_v52 = vadd.f32 %v18125_v54, %v9417_v56 }
0x16d4   : > { %v9473_v27 = vmax.f32 %v9423_v57, 0.0 }
0x16d5   : > { %v9472_v26 = vmax.f32 %v9418_v52, 0.0 }
0x16d7   : > { %12578 = vmatprep.mubr.f32.mxu0 %v9472_v26 }
0x16d8   : > { %12579 = vmatmul.mubr.f32.gmra.mrb[186].mxu0 %v9473_v27  ;;  %v18990_v27 = vld [vmem:[#allocation5_spill] sm:$0xff] }
0x16d9   : > { %v12503_v41 = vpop.f32.mrb[156].mxu1 }
0x16da   : > { %v9433_v6 = vadd.f32 %v12503_v41, %v18125_v54  ;;  %v9427_v47 = vpop.f32.mrb[157].mxu1  ;;  %v18991_v41 = vld [vmem:[#allocation30_spill] sm:$0xff] }
0x16db   : > { %v9428_v35 = vadd.f32 %v18125_v54, %v9427_v47  ;;  %v18993_v47 = vld [vmem:[#allocation6_spill] sm:$0xff] }
0x16dc   : > { %v9475_v42 = vmax.f32 %v9433_v6, 0.0 }
0x16dd   : > { %v9474_v23 = vmax.f32 %v9428_v35, 0.0 }
0x16df   : > { %12581 = vmatprep.mubr.f32.mxu0 %v9474_v23 }
0x16e0   : > { %12582 = vmatmul.mubr.f32.gmra.mrb[188].mxu0 %v9475_v42 }
0x16e1   : > { %v12506_v19 = vpop.f32.mrb[158].mxu1 }
0x16e2   : > { %v9443_v33 = vadd.f32 %v12506_v19, %v18125_v54  ;;  %v9437_v21 = vpop.f32.mrb[159].mxu1 }
0x16e3   : > { %v9438_v60 = vadd.f32 %v18125_v54, %v9437_v21 }
0x16e4   : > { %v9477_v17 = vmax.f32 %v9443_v33, 0.0 }
0x16e5   : > { %v9476_v63 = vmax.f32 %v9438_v60, 0.0 }
0x16e7   : > { %12584 = vmatprep.mubr.f32.mxu0 %v9476_v63  ;;  %v18995_v63 = vld [vmem:[#allocation7_spill] sm:$0xff] }
0x16e8   : > { %12585 = vmatmul.mubr.f32.gmra.mrb[190].mxu0 %v9477_v17  ;;  %v18996_v17 = vld [vmem:[#allocation32_spill] sm:$0xff] }
0x1743   : > { %v12541_v29 = vpop.f32.mrb[160].mxu0 }
0x1744   : > { %v9567_v3 = vadd.f32 %v12541_v29, %v18162_v9  ;;  %v9561_v51 = vpop.f32.mrb[161].mxu0 }
0x1745   : > { %v9562_v54 = vadd.f32 %v18162_v9, %v9561_v51 }
0x1746   : > { %v9721_v55 = vsel %vm3596_vm4, %v9567_v3, %v14402_v0  ;;  %vm18992_vm4 = vcmp.eq.s32.totalorder %v18991_v41, 1  ;;  %v18999_v3 = vld [vmem:[#allocation33_spill] sm:$0xff] }
0x1747   : > { %v9720_v45 = vsel %vm3595_vm5, %v9562_v54, %v14405_v2  ;;  %vm18997_vm5 = vcmp.eq.s32.totalorder %v18996_v17, 1 }
0x1748   : > { %v13414_v25 = vpack.c.bf16 %v9721_v55, %v9720_v45 }
0x174b   : > { %v12544_v40 = vpop.f32.mrb[162].mxu0 }
0x174c   : > { %v9577_v36 = vadd.f32 %v12544_v40, %v18162_v9  ;;  %v9571_v14 = vpop.f32.mrb[163].mxu0 }
0x174d   : > { %v9572_v62 = vadd.f32 %v18162_v9, %v9571_v14  ;;  %v19001_v14 = vld [vmem:[#allocation9_spill] sm:$0xff] }
0x174e   : > { %v18180_v49 = vsel %vm3598_vm6, %v9577_v36, %v14410_v5  ;;  %vm19000_vm6 = vcmp.eq.s32.totalorder %v18999_v3, 1 }
0x174f   : > { %v9722_v0 = vsel %vm3597_vm7, %v9572_v62, %v14413_v7  ;;  %v19002_v62 = vld [vmem:[#allocation34_spill] sm:$0xff] }
0x1750   : > { %v13418_v43 = vpack.c.bf16 %v18180_v49, %v9722_v0  ;;  %vm19003_vm7 = vcmp.eq.s32.totalorder %v19002_v62, 1  ;;  %v19004_v0 = vld [vmem:[#allocation10_spill] sm:$0xff] }
0x1751   : > { %v19028_v62 = vld [vmem:[#allocation18_spill] sm:$0xff] }
0x1753   : > { %v12547_v39 = vpop.f32.mrb[164].mxu0 }
0x1754   : > { %v9587_v2 = vadd.f32 %v12547_v39, %v18162_v9  ;;  %v9581_v4 = vpop.f32.mrb[165].mxu0  ;;  %v19005_v39 = vld [vmem:[#allocation35_spill] sm:$0xff] }
0x1755   : > { %v9582_v18 = vadd.f32 %v18162_v9, %v9581_v4 }
0x1756   : > { %v18191_v58 = vsel %vm3600_vm8, %v9587_v2, %v14419_v10  ;;  %v18984_v10 = vld [vmem:[#allocation2_spill] sm:$0xff]  ;;  %vm19006_vm8 = vcmp.eq.s32.totalorder %v19005_v39, 1 }
0x1757   : > { %v18196_v5 = vsel %vm3599_vm9, %v9582_v18, %v14422_v12 }
0x1758   : > { %v13422_v7 = vpack.c.bf16 %v18191_v58, %v18196_v5 }
0x175b   : > { %v12550_v48 = vpop.f32.mrb[166].mxu0 }
0x175c   : > { %v9597_v59 = vadd.f32 %v12550_v48, %v18162_v9  ;;  %v9591_v20 = vpop.f32.mrb[167].mxu0 }
0x175d   : > { %v9592_v32 = vadd.f32 %v18162_v9, %v9591_v20  ;;  %v19008_v20 = vld [vmem:[#allocation36_spill] sm:$0xff] }
0x175e   : > { %v18205_v11 = vsel %vm3602_vm10, %v9597_v59, %v14428_v15  ;;  %v18988_v15 = vld [vmem:[#allocation4_spill] sm:$0xff]  ;;  %v19007_v59 = vld [vmem:[#allocation11_spill] sm:$0xff]  ;;  %vm19009_vm9 = vcmp.eq.s32.totalorder %v19008_v20, 1  ;;  %vm19012_vm10 = vcmp.eq.s32.totalorder %v19011_v61, 1  ;;  %v19035_v61 = vld [vmem:[#allocation45_spill] sm:$0xff] }
0x175f   : > { %v18210_v13 = vsel %vm3601_vm11, %v9592_v32, %v18984_v10  ;;  %v19010_v10 = vld [vmem:[#allocation12_spill] sm:$0xff]  ;;  %vm19015_vm11 = vcmp.eq.s32.totalorder %v19014_v37, 1  ;;  %v19041_v37 = vld [vmem:[#allocation47_spill] sm:$0xff] }
0x1760   : > { %v13426_v12 = vpack.c.bf16 %v18205_v11, %v18210_v13  ;;  %v19032_v20 = vld [vmem:[#allocation44_spill] sm:$0xff] }
0x1763   : > { %v12553_v28 = vpop.f32.mrb[168].mxu0 }
0x1764   : > { %v9607_v30 = vadd.f32 %v12553_v28, %v18162_v9  ;;  %v9601_v46 = vpop.f32.mrb[169].mxu0 }
0x1765   : > { %v9602_v24 = vadd.f32 %v18162_v9, %v9601_v46 }
0x1766   : > { %v18219_v53 = vsel %vm3604_vm12, %v9607_v30, %v18986_v38 }
0x1767   : > { %v18224_v16 = vsel %vm3603_vm13, %v9602_v24, %v18988_v15  ;;  %v19013_v15 = vld [vmem:[#allocation13_spill] sm:$0xff] }
0x1768   : > { %v13430_v50 = vpack.c.bf16 %v18219_v53, %v18224_v16 }
0x176b   : > { %v12556_v57 = vpop.f32.mrb[170].mxu0 }
0x176c   : > { %v9617_v56 = vadd.f32 %v12556_v57, %v18162_v9  ;;  %v9611_v52 = vpop.f32.mrb[171].mxu0 }
0x176d   : > { %v9612_v26 = vadd.f32 %v18162_v9, %v9611_v52  ;;  %v19017_v52 = vld [vmem:[#allocation39_spill] sm:$0xff] }
0x176e   : > { %v18233_v6 = vsel %vm18992_vm4, %v9617_v56, %v18990_v27  ;;  %v19016_v56 = vld [vmem:[#allocation14_spill] sm:$0xff]  ;;  %vm19018_vm12 = vcmp.eq.s32.totalorder %v19017_v52, 1  ;;  %vm19033_vm4 = vcmp.eq.s32.totalorder %v19032_v20, 1  ;;  %v9923_v20 = vld [vmem:[%s18671_s5 + $0x90] sm:$0xff] }
0x176f   : > { %v18238_v23 = vsel %vm3605_vm15, %v9612_v26, %v18993_v47 }
0x1770   : > { %v13434_v42 = vpack.c.bf16 %v18233_v6, %v18238_v23 }
0x1773   : > { %v12559_v19 = vpop.f32.mrb[172].mxu0 }
0x1774   : > { %v9627_v33 = vadd.f32 %v12559_v19, %v18162_v9  ;;  %v9621_v21 = vpop.f32.mrb[173].mxu0  ;;  %v19019_v19 = vld [vmem:[#allocation15_spill] sm:$0xff] }
0x1775   : > { %v9622_v60 = vadd.f32 %v18162_v9, %v9621_v21 }
0x1776   : > { %v18247_v29 = vsel %vm18997_vm5, %v9627_v33, %v18995_v63  ;;  %v19020_v33 = vld [vmem:[#allocation40_spill] sm:$0xff]  ;;  %v19023_v63 = vld [vmem:[#allocation41_spill] sm:$0xff]  ;;  %vm19036_vm5 = vcmp.eq.s32.totalorder %v19035_v61, 1  ;;  %v9930_v61 = vld [vmem:[%s18671_s5 + $0xc8] sm:$0xff] }
0x1777   : > { %v18252_v51 = vsel %vm19000_vm6, %v9622_v60, %v18998_v1  ;;  %vm19021_vm13 = vcmp.eq.s32.totalorder %v19020_v33, 1  ;;  %v19022_v60 = vld [vmem:[#allocation16_spill] sm:$0xff]  ;;  %vm19024_vm15 = vcmp.eq.s32.totalorder %v19023_v63, 1  ;;  %v19049_v63 = vld [vmem:[#allocation25_spill] sm:$0xff] }
0x1778   : > { %v13438_v54 = vpack.c.bf16 %v18247_v29, %v18252_v51 }
0x177b   : > { %v12562_v55 = vpop.f32.mrb[174].mxu0 }
0x177c   : > { %v9637_v45 = vadd.f32 %v12562_v55, %v18162_v9  ;;  %v9631_v40 = vpop.f32.mrb[175].mxu0 }
0x177d   : > { %v9632_v36 = vadd.f32 %v18162_v9, %v9631_v40  ;;  %v19025_v40 = vld [vmem:[#allocation17_spill] sm:$0xff] }
0x177e   : > { %v18261_v49 = vsel %vm19003_vm7, %v9637_v45, %v19001_v14  ;;  %vm19042_vm7 = vcmp.eq.s32.totalorder %v19041_v37, 1 }
0x177f   : > { %v18266_v2 = vsel %vm19006_vm8, %v9632_v36, %v19004_v0  ;;  %v19026_v36 = vld [vmem:[#allocation42_spill] sm:$0xff]  ;;  %v19029_v0 = vld [vmem:[#allocation43_spill] sm:$0xff] }
0x1780   : > { %v13442_v4 = vpack.c.bf16 %v18261_v49, %v18266_v2  ;;  %vm19027_vm2 = vcmp.eq.s32.totalorder %v19026_v36, 1  ;;  %vm19030_vm14 = vcmp.eq.s32.totalorder %v19029_v0, 1  ;;  %v9754_v49 = vld [vmem:[%s18668_s2 + $0x10] sm:$0xff] }
0x1781   : > { %v9838_v0 = vld [vmem:[%s18671_s5 + $0x70] sm:$0xff] }
0x1783   : > { %v12565_v18 = vpop.f32.mrb[176].mxu0 }
0x1784   : > { %v9647_v58 = vadd.f32 %v12565_v18, %v18162_v9  ;;  %v9641_v5 = vpop.f32.mrb[177].mxu0 }
0x1785   : > { %v9642_v48 = vadd.f32 %v18162_v9, %v9641_v5 }
0x1786   : > { %v9737_v32 = vsel %vm19009_vm9, %v9647_v58, %v19007_v59  ;;  %v19031_v59 = vld [vmem:[#allocation19_spill] sm:$0xff] }
0x1787   : > { %v9736_v28 = vsel %vm19012_vm10, %v9642_v48, %v19010_v10  ;;  %v19034_v10 = vld [vmem:[#allocation20_spill] sm:$0xff] }
0x1788   : > { %v13412_v30 = vpack.c.bf16 %v9737_v32, %v9736_v28 }
0x178a   : > { %13413 = vmatprep.subr.bf16.mxu1 %v13412_v30 }
0x178b   : > { %v12568_v46 = vpop.f32.mrb[178].mxu0  ;;  %13415 = vmatpush3.bf16.msra.mxu1 %v13414_v25 }
0x178c   : > { %v9657_v24 = vadd.f32 %v12568_v46, %v18162_v9  ;;  %v9651_v38 = vpop.f32.mrb[179].mxu0 }
0x178d   : > { %v9652_v8 = vadd.f32 %v18162_v9, %v9651_v38  ;;  %v19038_v38 = vld [vmem:[#allocation46_spill] sm:$0xff] }
0x178e   : > { %v9739_v57 = vsel %vm19015_vm11, %v9657_v24, %v19013_v15  ;;  %v19037_v24 = vld [vmem:[#allocation21_spill] sm:$0xff]  ;;  %vm19039_vm6 = vcmp.eq.s32.totalorder %v19038_v38, 1  ;;  %v19040_v15 = vld [vmem:[#allocation22_spill] sm:$0xff] }
0x178f   : > { %v9738_v26 = vsel %vm19018_vm12, %v9652_v8, %v19016_v56  ;;  %v9932_v38 = vld [vmem:[%s18671_s5 + $0xd8] sm:$0xff] }
0x1790   : > { %v13416_v27 = vpack.c.bf16 %v9739_v57, %v9738_v26  ;;  %v19043_v26 = vld [vmem:[#allocation23_spill] sm:$0xff] }
0x1792   : > { %13417 = vmatprep.subr.bf16.mxu1 %v13416_v27  ;;  %v19044_v27 = vld [vmem:[#allocation48_spill] sm:$0xff] }
0x1793   : > { %v12571_v41 = vpop.f32.mrb[180].mxu0  ;;  %13419 = vmatpush3.bf16.msra.mxu1 %v13418_v43  ;;  %vm19045_vm8 = vcmp.eq.s32.totalorder %v19044_v27, 1  ;;  %v9937_v27 = vld [vmem:[%s18671_s5 + $0x100] sm:$0xff] }
0x1794   : > { %v9667_v47 = vadd.f32 %v12571_v41, %v18162_v9  ;;  %v9661_v25 = vpop.f32.mrb[181].mxu0 }
0x1795   : > { %v9662_v35 = vadd.f32 %v18162_v9, %v9661_v25  ;;  %v19047_v25 = vld [vmem:[#allocation49_spill] sm:$0xff] }
0x1796   : > { %v9741_v21 = vsel %vm19021_vm13, %v9667_v47, %v19019_v19  ;;  %v19046_v47 = vld [vmem:[#allocation24_spill] sm:$0xff]  ;;  %vm19048_vm9 = vcmp.eq.s32.totalorder %v19047_v25, 1 }
0x1797   : > { %v9740_v17 = vsel %vm19024_vm15, %v9662_v35, %v19022_v60  ;;  %v9832_v60 = vld [vmem:[%s18671_s5 + $0x10] sm:$0xff] }
0x1798   : > { %v13420_v1 = vpack.c.bf16 %v9741_v21, %v9740_v17  ;;  %v9831_v21 = vld [vmem:[%s18671_s5] sm:$0xff]  ;;  %v9948_v17 = vld [vmem:[%s18671_s5 + $0x158] sm:$0xff] }
0x179a   : > { %13421 = vmatprep.subr.bf16.mxu1 %v13420_v1 }
0x179b   : > { %v12574_v3 = vpop.f32.mrb[182].mxu0  ;;  %13423 = vmatpush3.bf16.msra.mxu1 %v13422_v7 }
0x179c   : > { %v9677_v55 = vadd.f32 %v12574_v3, %v18162_v9  ;;  %v9671_v43 = vpop.f32.mrb[183].mxu0  ;;  %v19051_v3 = vld [vmem:[#allocation26_spill] sm:$0xff] }
0x179d   : > { %v9672_v45 = vadd.f32 %v18162_v9, %v9671_v43  ;;  %v9834_v43 = vld [vmem:[%s18671_s5 + $0x30] sm:$0xff] }
0x179e   : > { %v9743_v14 = vsel %vm19027_vm2, %v9677_v55, %v19025_v40  ;;  %v13444_v55 = vpack.c.bf16 %v9832_v60, %v9831_v21  ;;  %v9755_v40 = vld [vmem:[%s18668_s2 + $0x18] sm:$0xff]  ;;  %v9943_v60 = vld [vmem:[%s18671_s5 + $0x130] sm:$0xff] }
0x179f   : > { %v9742_v39 = vsel %vm19030_vm14, %v9672_v45, %v19028_v62  ;;  %v9752_v45 = vld [vmem:[%s18668_s2] sm:$0xff]  ;;  %v9836_v62 = vld [vmem:[%s18671_s5 + $0x50] sm:$0xff] }
0x17a0   : > { %v13424_v18 = vpack.c.bf16 %v9743_v14, %v9742_v39  ;;  %v9835_v14 = vld [vmem:[%s18671_s5 + $0x40] sm:$0xff] }
0x17a1   : > { %v13452_v2 = vpack.c.bf16 %v9836_v62, %v9835_v14  ;;  %v10049_v62 = vld [vmem:[%s18671_s5 + $0x1a0] sm:$0xff] }
0x17a2   : > { %13425 = vmatprep.subr.bf16.mxu1 %v13424_v18  ;;  %v9924_v18 = vld [vmem:[%s18671_s5 + $0x98] sm:$0xff] }
0x17a3   : > { %v12577_v58 = vpop.f32.mrb[184].mxu0  ;;  %13427 = vmatpush3.bf16.msra.mxu1 %v13426_v12 }
0x17a4   : > { %v9687_v7 = vadd.f32 %v12577_v58, %v18162_v9  ;;  %v9681_v5 = vpop.f32.mrb[185].mxu0  ;;  %v9926_v58 = vld [vmem:[%s18671_s5 + $0xa8] sm:$0xff] }
0x17a5   : > { %v9682_v48 = vadd.f32 %v18162_v9, %v9681_v5 }
0x17a6   : > { %v9745_v32 = vsel %vm19033_vm4, %v9687_v7, %v19031_v59  ;;  %v13460_v7 = vpack.c.bf16 %v9926_v58, %v9924_v18  ;;  %v10053_v18 = vld [vmem:[%s18671_s5 + $0x1e0] sm:$0xff]  ;;  %v10054_v58 = vld [vmem:[%s18671_s5 + $0x1f0] sm:$0xff] }
0x17a7   : > { %v9744_v28 = vsel %vm19036_vm5, %v9682_v48, %v19034_v10  ;;  %v9928_v10 = vld [vmem:[%s18671_s5 + $0xb8] sm:$0xff] }
0x17a8   : > { %v13428_v30 = vpack.c.bf16 %v9745_v32, %v9744_v28  ;;  %v9925_v32 = vld [vmem:[%s18671_s5 + $0xa0] sm:$0xff] }
0x17aa   : > { %13429 = vmatprep.subr.bf16.mxu1 %v13428_v30 }
0x17ab   : > { %v12580_v46 = vpop.f32.mrb[186].mxu0  ;;  %13431 = vmatpush3.bf16.msra.mxu1 %v13430_v50 }
0x17ac   : > { %v9697_v11 = vadd.f32 %v12580_v46, %v18162_v9  ;;  %v9691_v13 = vpop.f32.mrb[187].mxu0  ;;  %v13462_v46 = vpack.c.bf16 %v9925_v32, %v9923_v20  ;;  %v10057_v20 = vld [vmem:[%s18671_s5 + $0x220] sm:$0xff]  ;;  %v10058_v32 = vld [vmem:[%s18671_s5 + $0x230] sm:$0xff] }
0x17ad   : > { %v9692_v12 = vadd.f32 %v18162_v9, %v9691_v13  ;;  %v13464_v13 = vpack.c.bf16 %v9930_v61, %v9928_v10  ;;  %v13505_v10 = vpack.c.bf16 %v10058_v32, %v10057_v20  ;;  %v10059_v61 = vld [vmem:[%s18671_s5 + $0x240] sm:$0xff] }
0x17ae   : > { %v9747_v8 = vsel %vm19039_vm6, %v9697_v11, %v19037_v24  ;;  %v9929_v24 = vld [vmem:[%s18671_s5 + $0xc0] sm:$0xff] }
0x17af   : > { %v9746_v57 = vsel %vm19042_vm7, %v9692_v12, %v19040_v15  ;;  %v9927_v12 = vld [vmem:[%s18671_s5 + $0xb0] sm:$0xff] }
0x17b0   : > { %v13432_v56 = vpack.c.bf16 %v9747_v8, %v9746_v57  ;;  %v9934_v8 = vld [vmem:[%s18671_s5 + $0xe8] sm:$0xff]  ;;  %v13466_v15 = vpack.c.bf16 %v9929_v24, %v9927_v12  ;;  %v9931_v57 = vld [vmem:[%s18671_s5 + $0xd0] sm:$0xff]  ;;  %v10063_v12 = vld [vmem:[%s18671_s5 + $0x280] sm:$0xff] }
0x17b1   : > { %v13468_v37 = vpack.c.bf16 %v9934_v8, %v9932_v38  ;;  %v10064_v24 = vld [vmem:[%s18671_s5 + $0x290] sm:$0xff]  ;;  %v10065_v8 = vld [vmem:[%s18671_s5 + $0x2a0] sm:$0xff] }
0x17b2   : > { %13433 = vmatprep.subr.bf16.mxu1 %v13432_v56  ;;  %v9933_v56 = vld [vmem:[%s18671_s5 + $0xe0] sm:$0xff]  ;;  %v13514_v38 = vpack.c.bf16 %v10064_v24, %v10063_v12  ;;  %v10254_v24 = vld [vmem:[%s18671_s5 + $0x470] sm:$0xff] }
0x17b3   : > { %v12583_v52 = vpop.f32.mrb[188].mxu0  ;;  %13435 = vmatpush3.bf16.msra.mxu1 %v13434_v42 }
0x17b4   : > { %v9707_v53 = vadd.f32 %v12583_v52, %v18162_v9  ;;  %v9701_v16 = vpop.f32.mrb[189].mxu0  ;;  %v9936_v52 = vld [vmem:[%s18671_s5 + $0xf8] sm:$0xff] }
0x17b5   : > { %v9702_v50 = vadd.f32 %v18162_v9, %v9701_v16  ;;  %v13470_v16 = vpack.c.bf16 %v9933_v56, %v9931_v57  ;;  %v10067_v57 = vld [vmem:[%s18671_s5 + $0x2c0] sm:$0xff]  ;;  %v10068_v56 = vld [vmem:[%s18671_s5 + $0x2d0] sm:$0xff] }
0x17b6   : > { %v9749_v41 = vsel %vm19045_vm8, %v9707_v53, %v19043_v26  ;;  %v9938_v53 = vld [vmem:[%s18671_s5 + $0x108] sm:$0xff]  ;;  %v9935_v26 = vld [vmem:[%s18671_s5 + $0xf0] sm:$0xff] }
0x17b7   : > { %v9748_v35 = vsel %vm19048_vm9, %v9702_v50, %v19046_v47  ;;  %v13472_v50 = vpack.c.bf16 %v9938_v53, %v9936_v52  ;;  %v9942_v47 = vld [vmem:[%s18671_s5 + $0x128] sm:$0xff]  ;;  %v13474_v25 = vpack.c.bf16 %v9937_v27, %v9935_v26  ;;  %v13520_v52 = vpack.c.bf16 %v10068_v56, %v10067_v57  ;;  %v9839_v53 = vld [vmem:[%s18671_s5 + $0x80] ss:$0 sm:$0xff] }
0x17b8   : > { %v13436_v19 = vpack.c.bf16 %v9749_v41, %v9748_v35  ;;  %v9940_v41 = vld [vmem:[%s18671_s5 + $0x118] sm:$0xff]  ;;  %v10073_v57 = vld [vmem:[%s18671_s5 + $0x320] ss:$0 sm:$0xff] }
0x17b9   : > { %v13476_v35 = vpack.c.bf16 %v9942_v47, %v9940_v41 }
0x17ba   : > { %13437 = vmatprep.subr.bf16.mxu1 %v13436_v19  ;;  %v9939_v19 = vld [vmem:[%s18671_s5 + $0x110] sm:$0xff] }
0x17bb   : > { %v12586_v33 = vpop.f32.mrb[190].mxu0  ;;  %13439 = vmatpush3.bf16.msra.mxu1 %v13438_v54 }
0x17bc   : > { %v9717_v6 = vadd.f32 %v12586_v33, %v18162_v9  ;;  %v9711_v23 = vpop.f32.mrb[191].mxu0  ;;  %v9941_v33 = vld [vmem:[%s18671_s5 + $0x120] sm:$0xff] }
0x17bd   : > { %v9712_v42 = vadd.f32 %v18162_v9, %v9711_v23  ;;  %v9833_v9 = vld [vmem:[%s18671_s5 + $0x20] sm:$0xff]  ;;  %v9946_v23 = vld [vmem:[%s18671_s5 + $0x148] sm:$0xff] }
0x17be   : > { %v9751_v1 = vsel %vm3626_vm3, %v9717_v6, %v19049_v63  ;;  %v13448_v36 = vpack.c.bf16 %v9834_v43, %v9833_v9  ;;  %v9944_v6 = vld [vmem:[%s18671_s5 + $0x138] sm:$0xff]  ;;  %v9945_v63 = vld [vmem:[%s18671_s5 + $0x140] sm:$0xff]  ;;  %v9954_v43 = vld [vmem:[%s18671_s5 + $0x188] sm:$0xff] }
0x17bf   : > { %v9750_v51 = vsel %vm3625_vm0, %v9712_v42, %v19051_v3  ;;  %v13478_v42 = vpack.c.bf16 %v9941_v33, %v9939_v19  ;;  %v13480_v21 = vpack.c.bf16 %v9946_v23, %v9944_v6  ;;  %v13482_v3 = vpack.c.bf16 %v9945_v63, %v9943_v60  ;;  %v9952_v9 = vld [vmem:[%s18671_s5 + $0x178] sm:$0xff]  ;;  %v10071_v33 = vld [vmem:[%s18671_s5 + $0x300] sm:$0xff]  ;;  %v10157_v23 = vld [vmem:[%s18671_s5 + $0x330] sm:$0xff] }
0x17c0   : > { %v13440_v54 = vpack.c.bf16 %v9751_v1, %v9750_v51  ;;  %v9950_v1 = vld [vmem:[%s18671_s5 + $0x168] sm:$0xff]  ;;  %v9947_v51 = vld [vmem:[%s18671_s5 + $0x150] sm:$0xff]  ;;  %v10160_v60 = vld [vmem:[%s18671_s5 + $0x360] sm:$0xff] }
0x17c1   : > { %v13484_v29 = vpack.c.bf16 %v9950_v1, %v9948_v17  ;;  %v10161_v17 = vld [vmem:[%s18671_s5 + $0x370] sm:$0xff]  ;;  %v10162_v1 = vld [vmem:[%s18671_s5 + $0x380] sm:$0xff] }
0x17c2   : > { %13441 = vmatprep.subr.bf16.mxu1 %v13440_v54  ;;  %v9949_v54 = vld [vmem:[%s18671_s5 + $0x160] sm:$0xff] }
0x17c3   : > { %13443 = vmatpush3.bf16.msra.mxu1 %v13442_v4  ;;  %v9837_v4 = vld [vmem:[%s18671_s5 + $0x60] sm:$0xff] }
0x17c4   : > { %13445 = vmatprep.subr.bf16.mxu1 %v13444_v55  ;;  %v13456_v39 = vpack.c.bf16 %v9838_v0, %v9837_v4  ;;  %v10052_v0 = vld [vmem:[%s18671_s5 + $0x1d0] sm:$0xff] }
0x17c6   : > { %9821 = vmatmul.mubr.f32.vlgmr.msra.gmra.mrb[160].mxu1 %v9752_v45  ;;  %v13488_v45 = vpack.c.bf16 %v9954_v43, %v9952_v9  ;;  %v10166_v9 = vld [vmem:[%s18671_s5 + $0x3c0] sm:$0xff] }
0x17c7   : > { %9825 = vmatprep.mubr.f32.mxu1 %v9755_v40  ;;  %13447 = vmatpush3.bf16.msra.mxu1 %v13444_v55  ;;  %v13486_v55 = vpack.c.bf16 %v9949_v54, %v9947_v51  ;;  %v9951_v40 = vld [vmem:[%s18671_s5 + $0x170] sm:$0xff]  ;;  %v10164_v51 = vld [vmem:[%s18671_s5 + $0x3a0] sm:$0xff] }
0x17c8   : > { %13449 = vmatprep.subr.bf16.mxu1 %v13448_v36 }
0x17ca   : > { %9826 = vmatmul.mubr.f32.gmra.mrb[162].mxu1 %v9754_v49  ;;  %v10050_v49 = vld [vmem:[%s18671_s5 + $0x1b0] sm:$0xff] }
0x17cb   : > { %13451 = vmatpush3.bf16.msra.mxu1 %v13448_v36  ;;  %v9953_v36 = vld [vmem:[%s18671_s5 + $0x180] sm:$0xff]  ;;  %v13493_v4 = vpack.c.bf16 %v10050_v49, %v10049_v62 }
0x17cc   : > { %13453 = vmatprep.subr.bf16.mxu1 %v13452_v2  ;;  %v13490_v14 = vpack.c.bf16 %v9953_v36, %v9951_v40  ;;  %v10168_v40 = vld [vmem:[%s18671_s5 + $0x3e0] sm:$0xff] }
0x17cd   : > { %13494 = vmatpush1.bf16.msra.mxu0 %v13493_v4 }
0x17ce   : > { %13495 = vmatprep.subr.bf16.mxu0 %v18828_v22 }
0x17cf   : > { %13455 = vmatpush3.bf16.msra.mxu1 %v13452_v2  ;;  %v10051_v2 = vld [vmem:[%s18671_s5 + $0x1c0] sm:$0xff] }
0x17d0   : > { %13457 = vmatprep.subr.bf16.mxu1 %v13456_v39 }
0x17d3   : > { %13459 = vmatpush3.bf16.msra.mxu1 %v13456_v39  ;;  %v13496_v39 = vpack.c.bf16 %v10052_v0, %v10051_v2 }
0x17d4   : > { %13461 = vmatprep.subr.bf16.mxu1 %v13460_v7  ;;  %v13499_v7 = vpack.c.bf16 %v10054_v58, %v10053_v18 }
0x17d5   : > { %13497 = vmatpush1.bf16.msra.mxu0 %v13496_v39 }
0x17d6   : > { %13498 = vmatprep.subr.bf16.mxu0 %v18828_v22 }
0x17d9   : > { %13500 = vmatpush1.bf16.msra.mxu0 %v13499_v7 }
0x17da   : > { %13501 = vmatprep.subr.bf16.mxu0 %v18828_v22 }
0x1899   : > { %v11725_v5 = vpop.f32.mrb[160].mxu1 }
0x189a   : > { %v11726_v48 = vpop.f32.mrb[161].mxu1 }
0x189b   : > { %v11727_v59 = vadd.f32 %v11726_v48, %v11725_v5  ;;  %v10055_v5 = vld [vmem:[%s18671_s5 + $0x200] sm:$0xff]  ;;  %v10056_v48 = vld [vmem:[%s18671_s5 + $0x210] sm:$0xff] }
0x189d   : > { %v11728_v28 = vpop.f32.mrb[162].mxu1  ;;  %12603 = vmatprep.mubr.msk.f32.mxu1 %vm781_vm1, %v11727_v59  ;;  %v13502_v59 = vpack.c.bf16 %v10056_v48, %v10055_v5 }
0x189e   : > { %v11729_v30 = vpop.f32.mrb[163].mxu1 }
0x189f   : > { %v11730_v11 = vadd.f32 %v11729_v30, %v11728_v28  ;;  %13503 = vmatpush1.bf16.msra.mxu0 %v13502_v59  ;;  %v10060_v28 = vld [vmem:[%s18671_s5 + $0x250] sm:$0xff] }
0x18a0   : > { %13504 = vmatprep.subr.bf16.mxu0 %v18828_v22  ;;  %v13508_v30 = vpack.c.bf16 %v10060_v28, %v10059_v61  ;;  %v10171_v61 = vld [vmem:[%s18671_s5 + $0x410] sm:$0xff]  ;;  %v10172_v28 = vld [vmem:[%s18671_s5 + $0x420] sm:$0xff] }
0x18a1   : > { %12604 = vmatmul.mubr.msk.f32.vlgmr.msra.gmra.mrb[164].mxu1 %vm781_vm1, %v11730_v11  ;;  %v10062_v11 = vld [vmem:[%s18671_s5 + $0x270] sm:$0xff] }
0x18a2   : > { %13463 = vmatpush1.bf16.msra.mxu1 %v13462_v46  ;;  %10032 = vmatprep.mubr.f32.mxu1 %v18847_v44  ;;  %v10061_v46 = vld [vmem:[%s18671_s5 + $0x260] sm:$0xff] }
0x18a3   : > { %13465 = vmatprep.subr.bf16.mxu1 %v13464_v13  ;;  %13506 = vmatpush1.bf16.msra.mxu0 %v13505_v10  ;;  %v13511_v13 = vpack.c.bf16 %v10062_v11, %v10061_v46  ;;  %v10251_v46 = vld [vmem:[%s18671_s5 + $0x440] sm:$0xff]  ;;  %v10252_v11 = vld [vmem:[%s18671_s5 + $0x450] sm:$0xff] }
0x18a4   : > { %13507 = vmatprep.subr.bf16.mxu0 %v18828_v22  ;;  %v13560_v12 = vpack.c.bf16 %v10252_v11, %v10251_v46 }
0x18a6   : > { %13467 = vmatpush1.bf16.msra.mxu1 %v13466_v15  ;;  %v10066_v15 = vld [vmem:[%s18671_s5 + $0x2b0] sm:$0xff] }
0x18a7   : > { %13469 = vmatprep.subr.bf16.mxu1 %v13468_v37  ;;  %13509 = vmatpush1.bf16.msra.mxu0 %v13508_v30  ;;  %v13517_v37 = vpack.c.bf16 %v10066_v15, %v10065_v8  ;;  %v13556_v30 = vpack.c.bf16 %v10172_v28, %v10171_v61  ;;  %v10255_v8 = vld [vmem:[%s18671_s5 + $0x480] sm:$0xff]  ;;  %v10256_v15 = vld [vmem:[%s18671_s5 + $0x490] sm:$0xff] }
0x18a8   : > { %13510 = vmatprep.subr.bf16.mxu0 %v18828_v22 }
0x18aa   : > { %13471 = vmatpush1.bf16.msra.mxu1 %v13470_v16 }
0x18ab   : > { %13473 = vmatprep.subr.bf16.mxu1 %v13472_v50  ;;  %13512 = vmatpush1.bf16.msra.mxu0 %v13511_v13  ;;  %v10253_v13 = vld [vmem:[%s18671_s5 + $0x460] sm:$0xff] }
0x18ac   : > { %13513 = vmatprep.subr.bf16.mxu0 %v18828_v22 }
0x18ae   : > { %13475 = vmatpush1.bf16.msra.mxu1 %v13474_v25  ;;  %v10069_v25 = vld [vmem:[%s18671_s5 + $0x2e0] sm:$0xff] }
0x18af   : > { %13477 = vmatprep.subr.bf16.mxu1 %v13476_v35  ;;  %13515 = vmatpush1.bf16.msra.mxu0 %v13514_v38  ;;  %v10070_v35 = vld [vmem:[%s18671_s5 + $0x2f0] sm:$0xff]  ;;  %v13564_v38 = vpack.c.bf16 %v10254_v24, %v10253_v13 }
0x18b0   : > { %13516 = vmatprep.subr.bf16.mxu0 %v18828_v22  ;;  %v13523_v19 = vpack.c.bf16 %v10070_v35, %v10069_v25  ;;  %v10258_v25 = vld [vmem:[%s18671_s5 + $0x4b0] sm:$0xff] }
0x18b2   : > { %13479 = vmatpush1.bf16.msra.mxu1 %v13478_v42  ;;  %v10158_v42 = vld [vmem:[%s18671_s5 + $0x340] sm:$0xff] }
0x18b3   : > { %13481 = vmatprep.subr.bf16.mxu1 %v13480_v21  ;;  %13518 = vmatpush1.bf16.msra.mxu0 %v13517_v37  ;;  %v13528_v21 = vpack.c.bf16 %v10158_v42, %v10157_v23  ;;  %v13568_v37 = vpack.c.bf16 %v10256_v15, %v10255_v8 }
0x18b4   : > { %13519 = vmatprep.subr.bf16.mxu0 %v18828_v22 }
0x18b6   : > { %13483 = vmatpush1.bf16.msra.mxu1 %v13482_v3  ;;  %v13536_v3 = vpack.c.bf16 %v10162_v1, %v10161_v17 }
0x18b7   : > { %13485 = vmatprep.subr.bf16.mxu1 %v13484_v29  ;;  %13521 = vmatpush1.bf16.msra.mxu0 %v13520_v52  ;;  %v10163_v29 = vld [vmem:[%s18671_s5 + $0x390] sm:$0xff] }
0x18b8   : > { %13522 = vmatprep.subr.bf16.mxu0 %v18828_v22  ;;  %v13540_v54 = vpack.c.bf16 %v10164_v51, %v10163_v29 }
0x18ba   : > { %13487 = vmatpush1.bf16.msra.mxu1 %v13486_v55  ;;  %v10165_v55 = vld [vmem:[%s18671_s5 + $0x3b0] sm:$0xff] }
0x18bb   : > { %13489 = vmatprep.subr.bf16.mxu1 %v13488_v45  ;;  %13524 = vmatpush1.bf16.msra.mxu0 %v13523_v19  ;;  %v13544_v43 = vpack.c.bf16 %v10166_v9, %v10165_v55  ;;  %v10167_v45 = vld [vmem:[%s18671_s5 + $0x3d0] sm:$0xff] }
0x18bc   : > { %13525 = vmatprep.subr.bf16.mxu0 %v18828_v22  ;;  %v10159_v22 = vld [vmem:[%s18671_s5 + $0x350] sm:$0xff]  ;;  %v13548_v36 = vpack.c.bf16 %v10168_v40, %v10167_v45 }
0x18bd   : > { %v13532_v63 = vpack.c.bf16 %v10160_v60, %v10159_v22  ;;  %v10173_v19 = vld [vmem:[%s18671_s5 + $0x430] ss:$0 sm:$0xff] }
0x18be   : > { %13491 = vmatpush1.bf16.msra.mxu1 %v13490_v14  ;;  %v11188_v14 = vld [vmem:[%s18671_s5 + $0x190] ss:$8 sm:$0x3] }
0x18bf   : > { %13529 = vmatprep.subr.bf16.mxu1 %v13528_v21  ;;  %v9961_v62 = vrot.slane %v11188_v14, %v14947_v31  ;;  %v9965_v49 = vrot.slane %v11188_v14, %v14952_v34  ;;  %v10169_v31 = vld [vmem:[%s18671_s5 + $0x3f0] sm:$0xff]  ;;  %v10170_v34 = vld [vmem:[%s18671_s5 + $0x400] sm:$0xff] }
0x18c0   : > { %v13552_v10 = vpack.c.bf16 %v10170_v34, %v10169_v31 }
0x1974   : > { %v12605_v16 = vpop.f32.mrb[164].mxu1 }
0x1975   : > { %v9912_v50 = vpop.f32.mrb[165].mxu1  ;;  %v9918_v27 = vadd.f32 %v12605_v16, %v9839_v53 }
0x1976   : > { %v9913_v26 = vadd.f32 %v9912_v50, %v9839_v53 }
0x1977   : > { %v9922_v47 = vmax.f32 %v9918_v27, 0.0 }
0x1978   : > { %v9921_v41 = vmax.f32 %v9913_v26, 0.0 }
0x197a   : > { %10033 = vmatmul.mubr.f32.vlgmr.msra.gmra.mrb[166].mxu1 %v9921_v41 }
0x197b   : > { %10038 = vmatprep.mubr.f32.mxu1 %v18847_v44  ;;  %v10072_v44 = vld [vmem:[%s18671_s5 + $0x310] sm:$0xff]  ;;  %13531 = vmatpush3.bf16.msra.mxu1 %v13528_v21  ;;  %v10259_v21 = vld [vmem:[%s18671_s5 + $0x4c0] ss:$0 sm:$0xff] }
0x197c   : > { %v13526_v6 = vpack.c.bf16 %v10072_v44, %v10071_v33  ;;  %13533 = vmatprep.subr.bf16.mxu1 %v13532_v63 }
0x197e   : > { %10039 = vmatmul.mubr.f32.gmra.mrb[168].mxu1 %v9922_v47  ;;  %13527 = vmatpush1.bf16.msra.mxu0 %v13526_v6  ;;  %v10257_v47 = vld [vmem:[%s18671_s5 + $0x4a0] sm:$0xff] }
0x197f   : > { %13535 = vmatpush3.bf16.msra.mxu1 %v13532_v63  ;;  %13561 = vmatprep.subr.bf16.mxu0 %v13560_v12  ;;  %v13572_v35 = vpack.c.bf16 %v10258_v25, %v10257_v47 }
0x1980   : > { %13537 = vmatprep.subr.bf16.mxu1 %v13536_v3 }
0x1983   : > { %13539 = vmatpush3.bf16.msra.mxu1 %v13536_v3 }
0x1984   : > { %13541 = vmatprep.subr.bf16.mxu1 %v13540_v54 }
0x1987   : > { %13543 = vmatpush3.bf16.msra.mxu1 %v13540_v54 }
0x1988   : > { %13545 = vmatprep.subr.bf16.mxu1 %v13544_v43 }
0x198b   : > { %13547 = vmatpush3.bf16.msra.mxu1 %v13544_v43 }
0x198c   : > { %13549 = vmatprep.subr.bf16.mxu1 %v13548_v36 }
0x198f   : > { %13551 = vmatpush3.bf16.msra.mxu1 %v13548_v36 }
0x1990   : > { %13553 = vmatprep.subr.bf16.mxu1 %v13552_v10 }
0x1993   : > { %13555 = vmatpush3.bf16.msra.mxu1 %v13552_v10 }
0x1994   : > { %13557 = vmatprep.subr.bf16.mxu1 %v13556_v30 }
0x1997   : > { %13559 = vmatpush3.bf16.msra.mxu1 %v13556_v30 }
0x1a4d   : > { %v10034_v2 = vpop.f32.mrb[166].mxu1 }
0x1a4e   : > { %v10035_v4 = vadd.f32 %v10034_v2, %v9961_v62  ;;  %v10036_v0 = vpop.f32.mrb[167].mxu1 }
0x1a4f   : > { %v10037_v39 = vadd.f32 %v10036_v0, %v9965_v49 }
0x1a50   : > { %v10045_v7 = vmax.f32 %v10035_v4, 0.0 }
0x1a51   : > { %v10046_v18 = vmax.f32 %v10037_v39, 0.0  ;;  %v10040_v58 = vpop.f32.mrb[168].mxu1 }
0x1a52   : > { %v10041_v5 = vadd.f32 %v10040_v58, %v9961_v62  ;;  %v10042_v48 = vpop.f32.mrb[169].mxu1 }
0x1a53   : > { %v10043_v59 = vadd.f32 %v10042_v48, %v9965_v49  ;;  %11189 = vmatprep.mubr.msk.f32.mxu0 %vm781_vm1, %v10046_v18 }
0x1a54   : > { %10145 = vmatmul.mubr.f32.vlgmr.msra.gmra.mrb[192].mxu0 %v10045_v7  ;;  %v10047_v32 = vmax.f32 %v10041_v5, 0.0 }
0x1a55   : > { %v10048_v20 = vmax.f32 %v10043_v59, 0.0  ;;  %13563 = vmatpush3.bf16.msra.mxu0 %v13560_v12 }
0x1a56   : > { %13565 = vmatprep.subr.bf16.mxu0 %v13564_v38 }
0x1a57   : > { %11190 = vmatprep.mubr.msk.f32.mxu0 %vm781_vm1, %v10048_v20 }
0x1a58   : > { %10150 = vmatmul.mubr.f32.gmra.mrb[194].mxu0 %v10047_v32 }
0x1a59   : > { %13567 = vmatpush3.bf16.msra.mxu0 %v13564_v38 }
0x1a5a   : > { %13569 = vmatprep.subr.bf16.mxu0 %v13568_v37 }
0x1a5d   : > { %13571 = vmatpush3.bf16.msra.mxu0 %v13568_v37 }
0x1a5e   : > { %13573 = vmatprep.subr.bf16.mxu0 %v13572_v35 }
0x1a61   : > { %13575 = vmatpush3.bf16.msra.mxu0 %v13572_v35 }
0x1b27   : > { %v10146_v56 = vpop.f32.mrb[192].mxu0 }
0x1b28   : > { %v10147_v52 = vadd.f32 %v10146_v56, %v10073_v57  ;;  %v10148_v53 = vpop.f32.mrb[193].mxu0 }
0x1b2a   : > { %v10155_v16 = vmax.f32 %v10147_v52, 0.0 }
0x1b2b   : > { %v10151_v50 = vpop.f32.mrb[194].mxu0 }
0x1b2c   : > { %v10152_v26 = vadd.f32 %v10151_v50, %v10073_v57  ;;  %v10153_v27 = vpop.f32.mrb[195].mxu0  ;;  %12638 = vmatprep.mubr.f32.mxu1 %v10155_v16 }
0x1b2e   : > { %v10156_v41 = vmax.f32 %v10152_v26, 0.0 }
0x1b30   : > { %12639 = vmatmul.mubr.f32.vlgmr.msra.gmra.mrb[170].mxu1 %v10156_v41 }
0x1c03   : > { %v12640_v33 = vpop.f32.mrb[170].mxu1 }
0x1c04   : > { %v10246_v44 = vadd.f32 %v12640_v33, %v10173_v19  ;;  %v10240_v6 = vpop.f32.mrb[171].mxu1 }
0x1c05   : > { %v10241_v23 = vadd.f32 %v10240_v6, %v10173_v19 }
0x1c06   : > { %v10250_v22 = vmax.f32 %v10246_v44, 0.0 }
0x1c07   : > { %v10249_v42 = vmax.f32 %v10241_v23, 0.0 }
0x1c09   : > { %12657 = vmatprep.mubr.msk.f32.mxu0 %vm781_vm1, %v10249_v42 }
0x1c0a   : > { %12658 = vmatmul.mubr.msk.f32.vlgmr.msra.gmra.mrb[196].mxu0 %vm781_vm1, %v10250_v22 }
0x1cdd   : > { %v12659_v60 = vpop.f32.mrb[196].mxu0 }
0x1cde   : > { %v10332_v63 = vpop.f32.mrb[197].mxu0  ;;  %v10338_v1 = vadd.f32 %v12659_v60, %v10259_v21 }
0x1cdf   : > { %v10333_v17 = vadd.f32 %v10332_v63, %v10259_v21 }
0x1ce0   : > { %10342 = vst [vmem:[%s278_s8 + $0x8] sm:$0xff] %v10338_v1 }
0x1ce1   : > { %10341 = vst [vmem:[%s278_s8] sm:$0xff] %v10333_v17 }
0x1ce2 PF: > { %s16_s21 = sadd.s32 1, %s14076_s21  }
0x1ce3   : > { %p13_p5 = scmp.ge.s32.totalorder %s16_s21, 6  }
0x1ce5   :  { %15 = sbr.rel (!%p13_p5) target bundleno = 1 (0x1), region = 85 }

</bundles_post_ra>
